<compile_context>
chip_gen: v5e
topology: v5e:2x2
jax: 0.10.0
libtpu: 0.0.40
codegen_flags: <defaults>
</compile_context>

<pallas_src>
import functools
import math

import jax
import jax.numpy as jnp
from jax.experimental import pallas as pl
from jax.experimental.pallas import tpu as pltpu


# ----------------------------------------------------------------------------
# small config (synthetic, deterministic) -- lane-dense hidden sizes
# ----------------------------------------------------------------------------
CFG = dict(
    num_images=2,          # == batch_size * num_images, also number of sequences
    channels=3,
    image_size=16,
    patch_size=8,          # -> 4 patches per image, +1 CLS token in vision tower
    vis_hidden=128,
    vis_heads=4,
    vis_inter=256,
    vis_layers=1,          # vision_feature_layer -> single encoder layer kept
    text_hidden=128,
    text_heads=4,
    text_inter=256,
    text_layers=2,
    vocab=128,
    image_token_index=32,
    seq_per_image=8,       # [bos, IMG x4, 3 text tokens]
)

_BF16 = jnp.bfloat16
_F32 = jnp.float32


# ----------------------------------------------------------------------------
# in-kernel math helpers (traced inside kernel bodies, stats in f32)
# ----------------------------------------------------------------------------
def _layernorm(x, g, b, eps=1e-5):
    mu = jnp.mean(x, axis=-1, keepdims=True)
    var = jnp.mean(jnp.square(x - mu), axis=-1, keepdims=True)
    return (x - mu) * jax.lax.rsqrt(var + eps) * g + b


def _rmsnorm(x, g, eps=1e-6):
    var = jnp.mean(jnp.square(x), axis=-1, keepdims=True)
    return x * jax.lax.rsqrt(var + eps) * g


def _quick_gelu(x):
    # CLIP's quick_gelu activation (f32).
    return x * jax.nn.sigmoid(1.702 * x)


def _block_diag_mask(n, seq_len, num_seqs, causal):
    """Bool [n, n] mask: attend only within the same sequence (optionally causal).

    Built from iota compares (no integer division, no HBM tensor)."""
    row = jax.lax.broadcasted_iota(jnp.int32, (n, n), 0)
    col = jax.lax.broadcasted_iota(jnp.int32, (n, n), 1)
    mask = None
    for b in range(num_seqs):                       # static unroll (tiny)
        lo = b * seq_len
        hi = lo + seq_len
        blk = (row >= lo) & (row < hi) & (col >= lo) & (col < hi)
        mask = blk if mask is None else jnp.logical_or(mask, blk)
    if causal:
        mask = jnp.logical_and(mask, row >= col)
    return mask


def _mha(x_f32, wqkv_ref, bqkv_ref, wo_ref, bo, num_heads, mask):
    """Multi-head self-attention over the flattened batch, relayout-free.

    x_f32: [N, D] f32 (already normalized).
    wqkv_ref: [3H, D, Dh] bf16 (Q-scale pre-folded), bqkv_ref: [3H, 1, Dh] f32 or None.
    wo_ref: [H, Dh, D] bf16. bo: [1, D] f32 or None. mask: bool [N, N].
    Returns [N, D] f32 after output projection (+bias)."""
    x_b = x_f32.astype(_BF16)
    out = None
    for h in range(num_heads):                      # static unroll, 2-D MXU dots
        q = jnp.dot(x_b, wqkv_ref[h], preferred_element_type=jnp.float32)
        k = jnp.dot(x_b, wqkv_ref[num_heads + h], preferred_element_type=jnp.float32)
        v = jnp.dot(x_b, wqkv_ref[2 * num_heads + h], preferred_element_type=jnp.float32)
        if bqkv_ref is not None:
            q = q + bqkv_ref[h]
            k = k + bqkv_ref[num_heads + h]
            v = v + bqkv_ref[2 * num_heads + h]
        # q . k^T in the MXU's natural lhs.rhs^T orientation (no explicit transpose)
        s = jax.lax.dot_general(q.astype(_BF16), k.astype(_BF16),
                                (((1,), (1,)), ((), ())),
                                preferred_element_type=jnp.float32)
        s = jnp.where(mask, s, -1e9)                # compare + select, no bias add
        s = s - jnp.max(s, axis=-1, keepdims=True)  # softmax stats in f32
        p = jnp.exp(s)
        p = p * pl.reciprocal(jnp.sum(p, axis=-1, keepdims=True), approx=True)
        ctx = jnp.dot(p.astype(_BF16), v.astype(_BF16),
                      preferred_element_type=jnp.float32)        # [N, Dh]
        contrib = jnp.dot(ctx.astype(_BF16), wo_ref[h],
                          preferred_element_type=jnp.float32)    # [N, D]
        out = contrib if out is None else out + contrib          # no concat
    if bo is not None:
        out = out + bo
    return out


# ----------------------------------------------------------------------------
# Pallas kernels (each = ONE invocation over the whole flattened batch)
# ----------------------------------------------------------------------------
def _vision_embed_kernel(patches_ref, pw_ref, cls_ref, pos_ref, g_ref, b_ref, o_ref,
                         *, num_images, n_patches):
    # Patch conv (stride = kernel = patch) as one matmul + CLS + pos emb + pre-LN.
    # patches_ref: [B*nP, C*P*P] bf16 ; o_ref: [B*(1+nP), Dv] bf16
    emb = jnp.dot(patches_ref[...], pw_ref[...],
                  preferred_element_type=jnp.float32)            # [B*nP, Dv] f32
    sv = 1 + n_patches
    cls_row = _layernorm(cls_ref[...] + pos_ref[0:1, :], g_ref[...], b_ref[...])
    for b in range(num_images):                                  # static unroll
        patch_rows = emb[b * n_patches:(b + 1) * n_patches] + pos_ref[1:, :]
        patch_rows = _layernorm(patch_rows, g_ref[...], b_ref[...])
        o_ref[pl.ds(b * sv, 1), :] = cls_row.astype(o_ref.dtype)
        o_ref[pl.ds(b * sv + 1, n_patches), :] = patch_rows.astype(o_ref.dtype)


def _clip_layer_kernel(h_ref, ln1g_ref, ln1b_ref, wqkv_ref, bqkv_ref, wo_ref, bo_ref,
                       ln2g_ref, ln2b_ref, fc1w_ref, fc1b_ref, fc2w_ref, fc2b_ref,
                       o_ref, *, num_heads, seq_len, num_seqs):
    # Full CLIP encoder block over the flattened image batch:
    # LN1 -> MHA(block-diag) -> +res -> LN2 -> MLP(quick_gelu) -> +res.
    h = h_ref[...].astype(jnp.float32)                           # [B*Sv, Dv]
    mask = _block_diag_mask(h.shape[0], seq_len, num_seqs, causal=False)
    r = _layernorm(h, ln1g_ref[...], ln1b_ref[...])
    attn = _mha(r, wqkv_ref, bqkv_ref, wo_ref, bo_ref[...], num_heads, mask)
    h1 = h + attn
    r2 = _layernorm(h1, ln2g_ref[...], ln2b_ref[...])
    m = jnp.dot(r2.astype(_BF16), fc1w_ref[...],
                preferred_element_type=jnp.float32) + fc1b_ref[...]
    m = _quick_gelu(m)
    m = jnp.dot(m.astype(_BF16), fc2w_ref[...],
                preferred_element_type=jnp.float32) + fc2b_ref[...]
    o_ref[...] = (h1 + m).astype(o_ref.dtype)


def _llama_layer_kernel(h_ref, rms1_ref, wqkv_ref, wo_ref, rms2_ref, wgu_ref, wd_ref,
                        *rest, num_heads, seq_len, num_seqs, apply_final_norm):
    # Full LLaMA decoder block over the flattened token batch:
    # RMS -> MHA(block-diag causal) -> +res -> RMS -> fused gate/up SiLU -> +res
    # (+ fused final RMSNorm on the last layer).
    if apply_final_norm:
        final_g_ref, o_ref = rest
    else:
        (o_ref,) = rest
    h = h_ref[...].astype(jnp.float32)                           # [B*S, D]
    mask = _block_diag_mask(h.shape[0], seq_len, num_seqs, causal=True)
    r = _rmsnorm(h, rms1_ref[...])
    attn = _mha(r, wqkv_ref, None, wo_ref, None, num_heads, mask)
    h1 = h + attn
    r2 = _rmsnorm(h1, rms2_ref[...])
    gu = jnp.dot(r2.astype(_BF16), wgu_ref[...],
                 preferred_element_type=jnp.float32)             # [N, 2*It]
    inter = wgu_ref.shape[1] // 2                                # 256 -> lane-aligned slice
    g = gu[:, :inter]
    u = gu[:, inter:]
    m = jax.nn.silu(g) * u                                       # silu in f32 (v5e)
    m = jnp.dot(m.astype(_BF16), wd_ref[...], preferred_element_type=jnp.float32)
    out = h1 + m
    if apply_final_norm:
        out = _rmsnorm(out, final_g_ref[...])
    o_ref[...] = out.astype(o_ref.dtype)


def _projector_kernel(vis_ref, w1_ref, b1_ref, w2_ref, b2_ref, o_ref,
                      *, num_images, n_patches):
    # LlavaMultiModalProjector fused with the 'default' feature-select strategy:
    # drop the CLS row of each image in-kernel, then linear_1 -> gelu -> linear_2.
    sv = 1 + n_patches
    for b in range(num_images):                                  # static unroll
        x = vis_ref[pl.ds(b * sv + 1, n_patches), :]             # skip CLS row
        t = jnp.dot(x, w1_ref[...], preferred_element_type=jnp.float32) + b1_ref[...]
        # TODO(synk): HF projector_hidden_act='gelu' is the exact erf GELU; the tanh
        # approximation is used here for guaranteed Mosaic lowering.
        t = jax.nn.gelu(t)
        y = jnp.dot(t.astype(_BF16), w2_ref[...],
                    preferred_element_type=jnp.float32) + b2_ref[...]
        o_ref[pl.ds(b * n_patches, n_patches), :] = y.astype(o_ref.dtype)


# ----------------------------------------------------------------------------
# pallas_call wrapper: whole problem resident in VMEM, single invocation
# ----------------------------------------------------------------------------
def _whole_call(kernel, out_shape, *args):
    return pl.pallas_call(
        kernel,
        out_shape=out_shape,
        in_specs=[pl.BlockSpec(memory_space=pltpu.MemorySpace.VMEM) for _ in args],
        out_specs=pl.BlockSpec(memory_space=pltpu.MemorySpace.VMEM),
    )(*args)


# ----------------------------------------------------------------------------
# model pieces
# ----------------------------------------------------------------------------
def vision_tower(p, pixel_values):
    """CLIP-style vision tower (patch conv + CLS + pos emb + pre-LN + encoder)."""
    B, C, H, W = pixel_values.shape
    P = CFG["patch_size"]
    nH, nW = H // P, W // P
    nP = nH * nW
    Dv = CFG["vis_hidden"]
    Sv = 1 + nP

    # patch extraction in JAX glue; everything else fused in kernels
    patches = pixel_values.reshape(B, C, nH, P, nW, P)
    patches = patches.transpose(0, 2, 4, 1, 3, 5).reshape(B * nP, C * P * P)
    patches = patches.astype(_BF16)

    embed_kern = functools.partial(_vision_embed_kernel, num_images=B, n_patches=nP)
    h = _whole_call(
        embed_kern, jax.ShapeDtypeStruct((B * Sv, Dv), _BF16),
        patches, p["patch_w"], p["class_emb"], p["pos_emb"],
        p["pre_ln_g"], p["pre_ln_b"])

    kern = functools.partial(_clip_layer_kernel, num_heads=CFG["vis_heads"],
                             seq_len=Sv, num_seqs=B)
    for lyr in p["layers"]:
        h = _whole_call(
            kern, jax.ShapeDtypeStruct((B * Sv, Dv), _BF16),
            h, lyr["ln1_g"], lyr["ln1_b"], lyr["wqkv"], lyr["bqkv"],
            lyr["wo"], lyr["bo"], lyr["ln2_g"], lyr["ln2_b"],
            lyr["fc1_w"], lyr["fc1_b"], lyr["fc2_w"], lyr["fc2_b"])
    return h  # [B*(1+nP), Dv]  (hidden state of vision_feature_layer, flattened)


def multi_modal_projector(p, vision_hidden_flat, num_images, n_patches):
    Dt = p["w2"].shape[1]
    kern = functools.partial(_projector_kernel, num_images=num_images,
                             n_patches=n_patches)
    return _whole_call(
        kern, jax.ShapeDtypeStruct((num_images * n_patches, Dt), _BF16),
        vision_hidden_flat, p["w1"], p["b1"], p["w2"], p["b2"])


def merge_multimodal_embeddings(input_ids, text_emb, vision_emb, image_token_index):
    # Gather + select kept as XLA glue fused with the embedding gather; a
    # standalone select kernel would just re-DMA three N x D tensors.
    mask = input_ids == image_token_index
    idx = jnp.clip(jnp.cumsum(mask.astype(jnp.int32)) - 1, 0, vision_emb.shape[0] - 1)
    vis_for_pos = jnp.take(vision_emb, idx, axis=0)
    return jnp.where(mask[:, None], vis_for_pos, text_emb)


def language_model(p, inputs_embeds, positions, num_seqs, seq_len):
    # TODO(synk): vLLM kv_caches / AttentionMetadata (paged KV cache, rotary
    # embeddings, ragged sequences) have no clean Pallas-synthetic equivalent;
    # this models prefill-only causal attention over uniform-length sequences.
    del positions
    N, D = inputs_embeds.shape
    h = inputs_embeds                                            # [B*S, D] bf16
    n_layers = len(p["layers"])
    for i, lyr in enumerate(p["layers"]):
        last = i == n_layers - 1
        kern = functools.partial(
            _llama_layer_kernel, num_heads=CFG["text_heads"],
            seq_len=seq_len, num_seqs=num_seqs, apply_final_norm=last)
        weights = [lyr["rms1"], lyr["wqkv"], lyr["wo"],
                   lyr["rms2"], lyr["wgu"], lyr["wd"]]
        if last:
            weights.append(p["final_norm"])                      # fused final RMSNorm
        out_dtype = jnp.float32 if last else _BF16
        h = _whole_call(kern, jax.ShapeDtypeStruct((N, D), out_dtype), h, *weights)
    return h                                                     # [N, D] f32


def llava_forward(params, input_ids, positions, pixel_values):
    """LlavaForConditionalGeneration.forward (pixel_values path)."""
    B = pixel_values.shape[0]
    nP = (CFG["image_size"] // CFG["patch_size"]) ** 2
    # 1) vision tower
    vision_hidden = vision_tower(params["vision"], pixel_values)   # [B*(1+nP), Dv]
    # 2+3) _select_image_features(strategy='default') fused into the projector
    vision_embeddings = multi_modal_projector(
        params["projector"], vision_hidden, B, nP)                 # [B*nP, Dt] bf16
    # 4) get_input_embeddings as a gather (not a one-hot matmul)
    inputs_embeds = jnp.take(params["lm"]["embed_w"], input_ids, axis=0)  # [N, Dt] bf16
    # 5) merge_multimodal_embeddings
    inputs_embeds = merge_multimodal_embeddings(
        input_ids, inputs_embeds, vision_embeddings, CFG["image_token_index"])
    # 6) language model backbone -> hidden_states (final RMSNorm fused in)
    return language_model(params["lm"], inputs_embeds, positions,
                          CFG["num_images"], CFG["seq_per_image"])


# ----------------------------------------------------------------------------
# deterministic parameter init (matmul weights bf16; biases / norms f32)
# Attention Q-scale (1/sqrt(Dh)) folded into Q weights/biases at build time.
# ----------------------------------------------------------------------------
def make_params(key):
    ks = iter(jax.random.split(key, 128))

    def nrm_f32(*shape, scale=0.02):
        return scale * jax.random.normal(next(ks), shape, jnp.float32)

    def nrm(*shape, scale=0.02):
        return nrm_f32(*shape, scale=scale).astype(_BF16)

    def qkv_stack(D, H, Dh, q_scale):
        w = nrm_f32(3 * H, D, Dh)
        w = w.at[:H].multiply(q_scale)          # fold attention scale into Q
        return w.astype(_BF16)

    def qkv_bias_stack(H, Dh, q_scale):
        b = nrm_f32(3 * H, 1, Dh)
        b = b.at[:H].multiply(q_scale)
        return b                                 # f32

    C, P = CFG["channels"], CFG["patch_size"]
    nP = (CFG["image_size"] // CFG["patch_size"]) ** 2
    Dv, Iv, Hv = CFG["vis_hidden"], CFG["vis_inter"], CFG["vis_heads"]
    Dt, It, Ht = CFG["text_hidden"], CFG["text_inter"], CFG["text_heads"]
    V = CFG["vocab"]
    Dhv, Dht = Dv // Hv, Dt // Ht
    sv, st = 1.0 / math.sqrt(Dhv), 1.0 / math.sqrt(Dht)

    vision = dict(
        patch_w=nrm(C * P * P, Dv),
        class_emb=nrm_f32(1, Dv),
        pos_emb=nrm_f32(1 + nP, Dv),
        pre_ln_g=jnp.ones((1, Dv), _F32),
        pre_ln_b=jnp.zeros((1, Dv), _F32),
        layers=[
            dict(
                ln1_g=jnp.ones((1, Dv), _F32),
                ln1_b=jnp.zeros((1, Dv), _F32),
                wqkv=qkv_stack(Dv, Hv, Dhv, sv),          # [3H, Dv, Dh]
                bqkv=qkv_bias_stack(Hv, Dhv, sv),         # [3H, 1, Dh]
                wo=nrm(Hv, Dhv, Dv),                      # [H, Dh, Dv]
                bo=nrm_f32(1, Dv),
                ln2_g=jnp.ones((1, Dv), _F32),
                ln2_b=jnp.zeros((1, Dv), _F32),
                fc1_w=nrm(Dv, Iv), fc1_b=nrm_f32(1, Iv),
                fc2_w=nrm(Iv, Dv), fc2_b=nrm_f32(1, Dv),
            )
            for _ in range(CFG["vis_layers"])
        ],
    )

    projector = dict(w1=nrm(Dv, Dt), b1=nrm_f32(1, Dt),
                     w2=nrm(Dt, Dt), b2=nrm_f32(1, Dt))

    lm = dict(
        embed_w=nrm(V, Dt),
        layers=[
            dict(
                rms1=jnp.ones((1, Dt), _F32),
                wqkv=qkv_stack(Dt, Ht, Dht, st),          # [3H, Dt, Dh]
                wo=nrm(Ht, Dht, Dt),                      # [H, Dh, Dt]
                rms2=jnp.ones((1, Dt), _F32),
                wgu=nrm(Dt, 2 * It),                      # fused gate/up
                wd=nrm(It, Dt),
            )
            for _ in range(CFG["text_layers"])
        ],
        final_norm=jnp.ones((1, Dt), _F32),
    )

    return dict(vision=vision, projector=projector, lm=lm)


# ----------------------------------------------------------------------------
# main
# ----------------------------------------------------------------------------
if __name__ == "__main__":
    key = jax.random.PRNGKey(0)
    pkey, xkey = jax.random.split(key)
    params = make_params(pkey)

    B = CFG["num_images"]
    H = W = CFG["image_size"]
    pixel_values = jax.random.normal(xkey, (B, CFG["channels"], H, W), jnp.float32)

    img_tok = CFG["image_token_index"]
    # per sequence: [bos, IMG x num_patches, text tokens] (flattened like vLLM)
    ids0 = jnp.array([1, img_tok, img_tok, img_tok, img_tok, 5, 6, 7], jnp.int32)
    ids1 = jnp.array([1, img_tok, img_tok, img_tok, img_tok, 9, 10, 11], jnp.int32)
    input_ids = jnp.concatenate([ids0, ids1])                         # [16]
    positions = jnp.concatenate([jnp.arange(8), jnp.arange(8)]).astype(jnp.int32)

    fwd = jax.jit(llava_forward)
    hidden_states = fwd(params, input_ids, positions, pixel_values)
    hidden_states = jax.block_until_ready(hidden_states)

    assert hidden_states.shape == (input_ids.shape[0], CFG["text_hidden"])
    assert bool(jnp.all(jnp.isfinite(hidden_states)))
    print("KERNEL_OK")
</pallas_src>

<mosaic_0001>
module attributes {stable_mosaic.version = 11 : i64} {
  func.func @_clip_layer_kernel(%arg0: memref<10x128xbf16, #tpu.memory_space<vmem>>, %arg1: memref<1x128xf32, #tpu.memory_space<vmem>>, %arg2: memref<1x128xf32, #tpu.memory_space<vmem>>, %arg3: memref<12x128x32xbf16, #tpu.memory_space<vmem>>, %arg4: memref<12x1x32xf32, #tpu.memory_space<vmem>>, %arg5: memref<4x32x128xbf16, #tpu.memory_space<vmem>>, %arg6: memref<1x128xf32, #tpu.memory_space<vmem>>, %arg7: memref<1x128xf32, #tpu.memory_space<vmem>>, %arg8: memref<1x128xf32, #tpu.memory_space<vmem>>, %arg9: memref<128x256xbf16, #tpu.memory_space<vmem>>, %arg10: memref<1x256xf32, #tpu.memory_space<vmem>>, %arg11: memref<256x128xbf16, #tpu.memory_space<vmem>>, %arg12: memref<1x128xf32, #tpu.memory_space<vmem>>, %arg13: memref<10x128xbf16, #tpu.memory_space<vmem>>) attributes {dimension_semantics = [], scalar_prefetch = 0 : i64, scratch_operands = 0 : i64, tpu.core_type = #tpu.core_type<tc>} {
    %c0 = arith.constant 0 : index
    %c0_0 = arith.constant 0 : index
    %0 = vector.load %arg0[%c0, %c0_0] : memref<10x128xbf16, #tpu.memory_space<vmem>>, vector<10x128xbf16>
    %1 = arith.extf %0 : vector<10x128xbf16> to vector<10x128xf32>
    %2 = tpu.iota {dimensions = array<i32: 0>} : vector<10x10xi32>
    %3 = tpu.iota {dimensions = array<i32: 1>} : vector<10x10xi32>
    %c0_i32 = arith.constant 0 : i32
    %4 = vector.broadcast %c0_i32 : i32 to vector<10x10xi32>
    %5 = arith.cmpi sge, %2, %4 : vector<10x10xi32>
    %c5_i32 = arith.constant 5 : i32
    %6 = vector.broadcast %c5_i32 : i32 to vector<10x10xi32>
    %7 = arith.cmpi slt, %2, %6 : vector<10x10xi32>
    %8 = arith.andi %5, %7 : vector<10x10xi1>
    %c0_i32_1 = arith.constant 0 : i32
    %9 = vector.broadcast %c0_i32_1 : i32 to vector<10x10xi32>
    %10 = arith.cmpi sge, %3, %9 : vector<10x10xi32>
    %11 = arith.andi %8, %10 : vector<10x10xi1>
    %c5_i32_2 = arith.constant 5 : i32
    %12 = vector.broadcast %c5_i32_2 : i32 to vector<10x10xi32>
    %13 = arith.cmpi slt, %3, %12 : vector<10x10xi32>
    %14 = arith.andi %11, %13 : vector<10x10xi1>
    %c5_i32_3 = arith.constant 5 : i32
    %15 = vector.broadcast %c5_i32_3 : i32 to vector<10x10xi32>
    %16 = arith.cmpi sge, %2, %15 : vector<10x10xi32>
    %c10_i32 = arith.constant 10 : i32
    %17 = vector.broadcast %c10_i32 : i32 to vector<10x10xi32>
    %18 = arith.cmpi slt, %2, %17 : vector<10x10xi32>
    %19 = arith.andi %16, %18 : vector<10x10xi1>
    %c5_i32_4 = arith.constant 5 : i32
    %20 = vector.broadcast %c5_i32_4 : i32 to vector<10x10xi32>
    %21 = arith.cmpi sge, %3, %20 : vector<10x10xi32>
    %22 = arith.andi %19, %21 : vector<10x10xi1>
    %c10_i32_5 = arith.constant 10 : i32
    %23 = vector.broadcast %c10_i32_5 : i32 to vector<10x10xi32>
    %24 = arith.cmpi slt, %3, %23 : vector<10x10xi32>
    %25 = arith.andi %22, %24 : vector<10x10xi1>
    %26 = arith.ori %14, %25 : vector<10x10xi1>
    %c0_6 = arith.constant 0 : index
    %c0_7 = arith.constant 0 : index
    %27 = vector.load %arg1[%c0_6, %c0_7] : memref<1x128xf32, #tpu.memory_space<vmem>>, vector<1x128xf32>
    %c0_8 = arith.constant 0 : index
    %c0_9 = arith.constant 0 : index
    %28 = vector.load %arg2[%c0_8, %c0_9] : memref<1x128xf32, #tpu.memory_space<vmem>>, vector<1x128xf32>
    %cst = arith.constant dense<0.000000e+00> : vector<10xf32>
    %29 = vector.multi_reduction <add>, %1, %cst [1] : vector<10x128xf32> to vector<10xf32>
    %30 = vector.shape_cast %29 : vector<10xf32> to vector<10x1xf32>
    %cst_10 = arith.constant 1.280000e+02 : f32
    %31 = vector.broadcast %cst_10 : f32 to vector<10x1xf32>
    %32 = arith.divf %30, %31 : vector<10x1xf32>
    %33 = vector.broadcast %32 : vector<10x1xf32> to vector<10x128xf32>
    %34 = arith.subf %1, %33 : vector<10x128xf32>
    %35 = arith.mulf %34, %34 : vector<10x128xf32>
    %cst_11 = arith.constant dense<0.000000e+00> : vector<10xf32>
    %36 = vector.multi_reduction <add>, %35, %cst_11 [1] : vector<10x128xf32> to vector<10xf32>
    %37 = vector.shape_cast %36 : vector<10xf32> to vector<10x1xf32>
    %cst_12 = arith.constant 1.280000e+02 : f32
    %38 = vector.broadcast %cst_12 : f32 to vector<10x1xf32>
    %39 = arith.divf %37, %38 : vector<10x1xf32>
    %40 = vector.broadcast %32 : vector<10x1xf32> to vector<10x128xf32>
    %41 = arith.subf %1, %40 : vector<10x128xf32>
    %cst_13 = arith.constant 9.99999974E-6 : f32
    %42 = vector.broadcast %cst_13 : f32 to vector<10x1xf32>
    %43 = arith.addf %39, %42 : vector<10x1xf32>
    %44 = math.rsqrt %43 : vector<10x1xf32>
    %45 = vector.broadcast %44 : vector<10x1xf32> to vector<10x128xf32>
    %46 = arith.mulf %41, %45 : vector<10x128xf32>
    %47 = vector.broadcast %27 : vector<1x128xf32> to vector<10x128xf32>
    %48 = arith.mulf %46, %47 : vector<10x128xf32>
    %49 = vector.broadcast %28 : vector<1x128xf32> to vector<10x128xf32>
    %50 = arith.addf %48, %49 : vector<10x128xf32>
    %c0_14 = arith.constant 0 : index
    %c0_15 = arith.constant 0 : index
    %51 = vector.load %arg6[%c0_14, %c0_15] : memref<1x128xf32, #tpu.memory_space<vmem>>, vector<1x128xf32>
    %52 = arith.truncf %50 : vector<10x128xf32> to vector<10x128xbf16>
    %c0_16 = arith.constant 0 : index
    %c0_17 = arith.constant 0 : index
    %c0_18 = arith.constant 0 : index
    %53 = vector.load %arg3[%c0_16, %c0_17, %c0_18] : memref<12x128x32xbf16, #tpu.memory_space<vmem>>, vector<1x128x32xbf16>
    %54 = vector.shape_cast %53 : vector<1x128x32xbf16> to vector<128x32xbf16>
    %cst_19 = arith.constant dense<0.000000e+00> : vector<10x32xf32>
    %55 = tpu.matmul %52, %54, %cst_19 {dimension_numbers = #tpu.dot_dimension_numbers<[1], [0], [0], [1], [0, 0, 1, 1], [], []>} : vector<10x128xbf16>, vector<128x32xbf16>, vector<10x32xf32> -> vector<10x32xf32>
    %c4 = arith.constant 4 : index
    %c0_20 = arith.constant 0 : index
    %c0_21 = arith.constant 0 : index
    %56 = vector.load %arg3[%c4, %c0_20, %c0_21] : memref<12x128x32xbf16, #tpu.memory_space<vmem>>, vector<1x128x32xbf16>
    %57 = vector.shape_cast %56 : vector<1x128x32xbf16> to vector<128x32xbf16>
    %cst_22 = arith.constant dense<0.000000e+00> : vector<10x32xf32>
    %58 = tpu.matmul %52, %57, %cst_22 {dimension_numbers = #tpu.dot_dimension_numbers<[1], [0], [0], [1], [0, 0, 1, 1], [], []>} : vector<10x128xbf16>, vector<128x32xbf16>, vector<10x32xf32> -> vector<10x32xf32>
    %c8 = arith.constant 8 : index
    %c0_23 = arith.constant 0 : index
    %c0_24 = arith.constant 0 : index
    %59 = vector.load %arg3[%c8, %c0_23, %c0_24] : memref<12x128x32xbf16, #tpu.memory_space<vmem>>, vector<1x128x32xbf16>
    %60 = vector.shape_cast %59 : vector<1x128x32xbf16> to vector<128x32xbf16>
    %cst_25 = arith.constant dense<0.000000e+00> : vector<10x32xf32>
    %61 = tpu.matmul %52, %60, %cst_25 {dimension_numbers = #tpu.dot_dimension_numbers<[1], [0], [0], [1], [0, 0, 1, 1], [], []>} : vector<10x128xbf16>, vector<128x32xbf16>, vector<10x32xf32> -> vector<10x32xf32>
    %c0_26 = arith.constant 0 : index
    %c0_27 = arith.constant 0 : index
    %c0_28 = arith.constant 0 : index
    %62 = vector.load %arg4[%c0_26, %c0_27, %c0_28] : memref<12x1x32xf32, #tpu.memory_space<vmem>>, vector<1x1x32xf32>
    %63 = vector.shape_cast %62 : vector<1x1x32xf32> to vector<1x32xf32>
    %64 = vector.broadcast %63 : vector<1x32xf32> to vector<10x32xf32>
    %65 = arith.addf %55, %64 : vector<10x32xf32>
    %c4_29 = arith.constant 4 : index
    %c0_30 = arith.constant 0 : index
    %c0_31 = arith.constant 0 : index
    %66 = vector.load %arg4[%c4_29, %c0_30, %c0_31] : memref<12x1x32xf32, #tpu.memory_space<vmem>>, vector<1x1x32xf32>
    %67 = vector.shape_cast %66 : vector<1x1x32xf32> to vector<1x32xf32>
    %68 = vector.broadcast %67 : vector<1x32xf32> to vector<10x32xf32>
    %69 = arith.addf %58, %68 : vector<10x32xf32>
    %c8_32 = arith.constant 8 : index
    %c0_33 = arith.constant 0 : index
    %c0_34 = arith.constant 0 : index
    %70 = vector.load %arg4[%c8_32, %c0_33, %c0_34] : memref<12x1x32xf32, #tpu.memory_space<vmem>>, vector<1x1x32xf32>
    %71 = vector.shape_cast %70 : vector<1x1x32xf32> to vector<1x32xf32>
    %72 = vector.broadcast %71 : vector<1x32xf32> to vector<10x32xf32>
    %73 = arith.addf %61, %72 : vector<10x32xf32>
    %74 = arith.truncf %65 : vector<10x32xf32> to vector<10x32xbf16>
    %75 = arith.truncf %69 : vector<10x32xf32> to vector<10x32xbf16>
    %cst_35 = arith.constant dense<0.000000e+00> : vector<10x10xf32>
    %76 = tpu.matmul %74, %75, %cst_35 {dimension_numbers = #tpu.dot_dimension_numbers<[1], [1], [0], [0], [0, 0, 1, 0], [], []>} : vector<10x32xbf16>, vector<10x32xbf16>, vector<10x10xf32> -> vector<10x10xf32>
    %cst_36 = arith.constant -1.000000e+09 : f32
    %77 = vector.broadcast %cst_36 : f32 to vector<10x10xf32>
    %78 = arith.select %26, %76, %77 : vector<10x10xi1>, vector<10x10xf32>
    %cst_37 = arith.constant dense<0xFF800000> : vector<10xf32>
    %79 = vector.multi_reduction <maximumf>, %78, %cst_37 [1] : vector<10x10xf32> to vector<10xf32>
    %80 = vector.shape_cast %79 : vector<10xf32> to vector<10x1xf32>
    %81 = vector.broadcast %80 : vector<10x1xf32> to vector<10x10xf32>
    %82 = arith.subf %78, %81 : vector<10x10xf32>
    %83 = math.exp %82 : vector<10x10xf32>
    %cst_38 = arith.constant dense<0.000000e+00> : vector<10xf32>
    %84 = vector.multi_reduction <add>, %83, %cst_38 [1] : vector<10x10xf32> to vector<10xf32>
    %85 = vector.shape_cast %84 : vector<10xf32> to vector<10x1xf32>
    %86 = tpu.reciprocal %85 {approx = true} : vector<10x1xf32> -> vector<10x1xf32>
    %87 = vector.broadcast %86 : vector<10x1xf32> to vector<10x10xf32>
    %88 = arith.mulf %83, %87 : vector<10x10xf32>
    %89 = arith.truncf %88 : vector<10x10xf32> to vector<10x10xbf16>
    %90 = arith.truncf %73 : vector<10x32xf32> to vector<10x32xbf16>
    %cst_39 = arith.constant dense<0.000000e+00> : vector<10x32xf32>
    %91 = tpu.matmul %89, %90, %cst_39 {dimension_numbers = #tpu.dot_dimension_numbers<[1], [0], [0], [1], [0, 0, 1, 1], [], []>} : vector<10x10xbf16>, vector<10x32xbf16>, vector<10x32xf32> -> vector<10x32xf32>
    %92 = arith.truncf %91 : vector<10x32xf32> to vector<10x32xbf16>
    %c0_40 = arith.constant 0 : index
    %c0_41 = arith.constant 0 : index
    %c0_42 = arith.constant 0 : index
    %93 = vector.load %arg5[%c0_40, %c0_41, %c0_42] : memref<4x32x128xbf16, #tpu.memory_space<vmem>>, vector<1x32x128xbf16>
    %94 = vector.shape_cast %93 : vector<1x32x128xbf16> to vector<32x128xbf16>
    %cst_43 = arith.constant dense<0.000000e+00> : vector<10x128xf32>
    %95 = tpu.matmul %92, %94, %cst_43 {dimension_numbers = #tpu.dot_dimension_numbers<[1], [0], [0], [1], [0, 0, 1, 1], [], []>} : vector<10x32xbf16>, vector<32x128xbf16>, vector<10x128xf32> -> vector<10x128xf32>
    %c1 = arith.constant 1 : index
    %c0_44 = arith.constant 0 : index
    %c0_45 = arith.constant 0 : index
    %96 = vector.load %arg3[%c1, %c0_44, %c0_45] : memref<12x128x32xbf16, #tpu.memory_space<vmem>>, vector<1x128x32xbf16>
    %97 = vector.shape_cast %96 : vector<1x128x32xbf16> to vector<128x32xbf16>
    %cst_46 = arith.constant dense<0.000000e+00> : vector<10x32xf32>
    %98 = tpu.matmul %52, %97, %cst_46 {dimension_numbers = #tpu.dot_dimension_numbers<[1], [0], [0], [1], [0, 0, 1, 1], [], []>} : vector<10x128xbf16>, vector<128x32xbf16>, vector<10x32xf32> -> vector<10x32xf32>
    %c5 = arith.constant 5 : index
    %c0_47 = arith.constant 0 : index
    %c0_48 = arith.constant 0 : index
    %99 = vector.load %arg3[%c5, %c0_47, %c0_48] : memref<12x128x32xbf16, #tpu.memory_space<vmem>>, vector<1x128x32xbf16>
    %100 = vector.shape_cast %99 : vector<1x128x32xbf16> to vector<128x32xbf16>
    %cst_49 = arith.constant dense<0.000000e+00> : vector<10x32xf32>
    %101 = tpu.matmul %52, %100, %cst_49 {dimension_numbers = #tpu.dot_dimension_numbers<[1], [0], [0], [1], [0, 0, 1, 1], [], []>} : vector<10x128xbf16>, vector<128x32xbf16>, vector<10x32xf32> -> vector<10x32xf32>
    %c9 = arith.constant 9 : index
    %c0_50 = arith.constant 0 : index
    %c0_51 = arith.constant 0 : index
    %102 = vector.load %arg3[%c9, %c0_50, %c0_51] : memref<12x128x32xbf16, #tpu.memory_space<vmem>>, vector<1x128x32xbf16>
    %103 = vector.shape_cast %102 : vector<1x128x32xbf16> to vector<128x32xbf16>
    %cst_52 = arith.constant dense<0.000000e+00> : vector<10x32xf32>
    %104 = tpu.matmul %52, %103, %cst_52 {dimension_numbers = #tpu.dot_dimension_numbers<[1], [0], [0], [1], [0, 0, 1, 1], [], []>} : vector<10x128xbf16>, vector<128x32xbf16>, vector<10x32xf32> -> vector<10x32xf32>
    %c1_53 = arith.constant 1 : index
    %c0_54 = arith.constant 0 : index
    %c0_55 = arith.constant 0 : index
    %105 = vector.load %arg4[%c1_53, %c0_54, %c0_55] : memref<12x1x32xf32, #tpu.memory_space<vmem>>, vector<1x1x32xf32>
    %106 = vector.shape_cast %105 : vector<1x1x32xf32> to vector<1x32xf32>
    %107 = vector.broadcast %106 : vector<1x32xf32> to vector<10x32xf32>
    %108 = arith.addf %98, %107 : vector<10x32xf32>
    %c5_56 = arith.constant 5 : index
    %c0_57 = arith.constant 0 : index
    %c0_58 = arith.constant 0 : index
    %109 = vector.load %arg4[%c5_56, %c0_57, %c0_58] : memref<12x1x32xf32, #tpu.memory_space<vmem>>, vector<1x1x32xf32>
    %110 = vector.shape_cast %109 : vector<1x1x32xf32> to vector<1x32xf32>
    %111 = vector.broadcast %110 : vector<1x32xf32> to vector<10x32xf32>
    %112 = arith.addf %101, %111 : vector<10x32xf32>
    %c9_59 = arith.constant 9 : index
    %c0_60 = arith.constant 0 : index
    %c0_61 = arith.constant 0 : index
    %113 = vector.load %arg4[%c9_59, %c0_60, %c0_61] : memref<12x1x32xf32, #tpu.memory_space<vmem>>, vector<1x1x32xf32>
    %114 = vector.shape_cast %113 : vector<1x1x32xf32> to vector<1x32xf32>
    %115 = vector.broadcast %114 : vector<1x32xf32> to vector<10x32xf32>
    %116 = arith.addf %104, %115 : vector<10x32xf32>
    %117 = arith.truncf %108 : vector<10x32xf32> to vector<10x32xbf16>
    %118 = arith.truncf %112 : vector<10x32xf32> to vector<10x32xbf16>
    %cst_62 = arith.constant dense<0.000000e+00> : vector<10x10xf32>
    %119 = tpu.matmul %117, %118, %cst_62 {dimension_numbers = #tpu.dot_dimension_numbers<[1], [1], [0], [0], [0, 0, 1, 0], [], []>} : vector<10x32xbf16>, vector<10x32xbf16>, vector<10x10xf32> -> vector<10x10xf32>
    %cst_63 = arith.constant -1.000000e+09 : f32
    %120 = vector.broadcast %cst_63 : f32 to vector<10x10xf32>
    %121 = arith.select %26, %119, %120 : vector<10x10xi1>, vector<10x10xf32>
    %cst_64 = arith.constant dense<0xFF800000> : vector<10xf32>
    %122 = vector.multi_reduction <maximumf>, %121, %cst_64 [1] : vector<10x10xf32> to vector<10xf32>
    %123 = vector.shape_cast %122 : vector<10xf32> to vector<10x1xf32>
    %124 = vector.broadcast %123 : vector<10x1xf32> to vector<10x10xf32>
    %125 = arith.subf %121, %124 : vector<10x10xf32>
    %126 = math.exp %125 : vector<10x10xf32>
    %cst_65 = arith.constant dense<0.000000e+00> : vector<10xf32>
    %127 = vector.multi_reduction <add>, %126, %cst_65 [1] : vector<10x10xf32> to vector<10xf32>
    %128 = vector.shape_cast %127 : vector<10xf32> to vector<10x1xf32>
    %129 = tpu.reciprocal %128 {approx = true} : vector<10x1xf32> -> vector<10x1xf32>
    %130 = vector.broadcast %129 : vector<10x1xf32> to vector<10x10xf32>
    %131 = arith.mulf %126, %130 : vector<10x10xf32>
    %132 = arith.truncf %131 : vector<10x10xf32> to vector<10x10xbf16>
    %133 = arith.truncf %116 : vector<10x32xf32> to vector<10x32xbf16>
    %cst_66 = arith.constant dense<0.000000e+00> : vector<10x32xf32>
    %134 = tpu.matmul %132, %133, %cst_66 {dimension_numbers = #tpu.dot_dimension_numbers<[1], [0], [0], [1], [0, 0, 1, 1], [], []>} : vector<10x10xbf16>, vector<10x32xbf16>, vector<10x32xf32> -> vector<10x32xf32>
    %135 = arith.truncf %134 : vector<10x32xf32> to vector<10x32xbf16>
    %c1_67 = arith.constant 1 : index
    %c0_68 = arith.constant 0 : index
    %c0_69 = arith.constant 0 : index
    %136 = vector.load %arg5[%c1_67, %c0_68, %c0_69] : memref<4x32x128xbf16, #tpu.memory_space<vmem>>, vector<1x32x128xbf16>
    %137 = vector.shape_cast %136 : vector<1x32x128xbf16> to vector<32x128xbf16>
    %cst_70 = arith.constant dense<0.000000e+00> : vector<10x128xf32>
    %138 = tpu.matmul %135, %137, %cst_70 {dimension_numbers = #tpu.dot_dimension_numbers<[1], [0], [0], [1], [0, 0, 1, 1], [], []>} : vector<10x32xbf16>, vector<32x128xbf16>, vector<10x128xf32> -> vector<10x128xf32>
    %139 = arith.addf %95, %138 : vector<10x128xf32>
    %c2 = arith.constant 2 : index
    %c0_71 = arith.constant 0 : index
    %c0_72 = arith.constant 0 : index
    %140 = vector.load %arg3[%c2, %c0_71, %c0_72] : memref<12x128x32xbf16, #tpu.memory_space<vmem>>, vector<1x128x32xbf16>
    %141 = vector.shape_cast %140 : vector<1x128x32xbf16> to vector<128x32xbf16>
    %cst_73 = arith.constant dense<0.000000e+00> : vector<10x32xf32>
    %142 = tpu.matmul %52, %141, %cst_73 {dimension_numbers = #tpu.dot_dimension_numbers<[1], [0], [0], [1], [0, 0, 1, 1], [], []>} : vector<10x128xbf16>, vector<128x32xbf16>, vector<10x32xf32> -> vector<10x32xf32>
    %c6 = arith.constant 6 : index
    %c0_74 = arith.constant 0 : index
    %c0_75 = arith.constant 0 : index
    %143 = vector.load %arg3[%c6, %c0_74, %c0_75] : memref<12x128x32xbf16, #tpu.memory_space<vmem>>, vector<1x128x32xbf16>
    %144 = vector.shape_cast %143 : vector<1x128x32xbf16> to vector<128x32xbf16>
    %cst_76 = arith.constant dense<0.000000e+00> : vector<10x32xf32>
    %145 = tpu.matmul %52, %144, %cst_76 {dimension_numbers = #tpu.dot_dimension_numbers<[1], [0], [0], [1], [0, 0, 1, 1], [], []>} : vector<10x128xbf16>, vector<128x32xbf16>, vector<10x32xf32> -> vector<10x32xf32>
    %c10 = arith.constant 10 : index
    %c0_77 = arith.constant 0 : index
    %c0_78 = arith.constant 0 : index
    %146 = vector.load %arg3[%c10, %c0_77, %c0_78] : memref<12x128x32xbf16, #tpu.memory_space<vmem>>, vector<1x128x32xbf16>
    %147 = vector.shape_cast %146 : vector<1x128x32xbf16> to vector<128x32xbf16>
    %cst_79 = arith.constant dense<0.000000e+00> : vector<10x32xf32>
    %148 = tpu.matmul %52, %147, %cst_79 {dimension_numbers = #tpu.dot_dimension_numbers<[1], [0], [0], [1], [0, 0, 1, 1], [], []>} : vector<10x128xbf16>, vector<128x32xbf16>, vector<10x32xf32> -> vector<10x32xf32>
    %c2_80 = arith.constant 2 : index
    %c0_81 = arith.constant 0 : index
    %c0_82 = arith.constant 0 : index
    %149 = vector.load %arg4[%c2_80, %c0_81, %c0_82] : memref<12x1x32xf32, #tpu.memory_space<vmem>>, vector<1x1x32xf32>
    %150 = vector.shape_cast %149 : vector<1x1x32xf32> to vector<1x32xf32>
    %151 = vector.broadcast %150 : vector<1x32xf32> to vector<10x32xf32>
    %152 = arith.addf %142, %151 : vector<10x32xf32>
    %c6_83 = arith.constant 6 : index
    %c0_84 = arith.constant 0 : index
    %c0_85 = arith.constant 0 : index
    %153 = vector.load %arg4[%c6_83, %c0_84, %c0_85] : memref<12x1x32xf32, #tpu.memory_space<vmem>>, vector<1x1x32xf32>
    %154 = vector.shape_cast %153 : vector<1x1x32xf32> to vector<1x32xf32>
    %155 = vector.broadcast %154 : vector<1x32xf32> to vector<10x32xf32>
    %156 = arith.addf %145, %155 : vector<10x32xf32>
    %c10_86 = arith.constant 10 : index
    %c0_87 = arith.constant 0 : index
    %c0_88 = arith.constant 0 : index
    %157 = vector.load %arg4[%c10_86, %c0_87, %c0_88] : memref<12x1x32xf32, #tpu.memory_space<vmem>>, vector<1x1x32xf32>
    %158 = vector.shape_cast %157 : vector<1x1x32xf32> to vector<1x32xf32>
    %159 = vector.broadcast %158 : vector<1x32xf32> to vector<10x32xf32>
    %160 = arith.addf %148, %159 : vector<10x32xf32>
    %161 = arith.truncf %152 : vector<10x32xf32> to vector<10x32xbf16>
    %162 = arith.truncf %156 : vector<10x32xf32> to vector<10x32xbf16>
    %cst_89 = arith.constant dense<0.000000e+00> : vector<10x10xf32>
    %163 = tpu.matmul %161, %162, %cst_89 {dimension_numbers = #tpu.dot_dimension_numbers<[1], [1], [0], [0], [0, 0, 1, 0], [], []>} : vector<10x32xbf16>, vector<10x32xbf16>, vector<10x10xf32> -> vector<10x10xf32>
    %cst_90 = arith.constant -1.000000e+09 : f32
    %164 = vector.broadcast %cst_90 : f32 to vector<10x10xf32>
    %165 = arith.select %26, %163, %164 : vector<10x10xi1>, vector<10x10xf32>
    %cst_91 = arith.constant dense<0xFF800000> : vector<10xf32>
    %166 = vector.multi_reduction <maximumf>, %165, %cst_91 [1] : vector<10x10xf32> to vector<10xf32>
    %167 = vector.shape_cast %166 : vector<10xf32> to vector<10x1xf32>
    %168 = vector.broadcast %167 : vector<10x1xf32> to vector<10x10xf32>
    %169 = arith.subf %165, %168 : vector<10x10xf32>
    %170 = math.exp %169 : vector<10x10xf32>
    %cst_92 = arith.constant dense<0.000000e+00> : vector<10xf32>
    %171 = vector.multi_reduction <add>, %170, %cst_92 [1] : vector<10x10xf32> to vector<10xf32>
    %172 = vector.shape_cast %171 : vector<10xf32> to vector<10x1xf32>
    %173 = tpu.reciprocal %172 {approx = true} : vector<10x1xf32> -> vector<10x1xf32>
    %174 = vector.broadcast %173 : vector<10x1xf32> to vector<10x10xf32>
    %175 = arith.mulf %170, %174 : vector<10x10xf32>
    %176 = arith.truncf %175 : vector<10x10xf32> to vector<10x10xbf16>
    %177 = arith.truncf %160 : vector<10x32xf32> to vector<10x32xbf16>
    %cst_93 = arith.constant dense<0.000000e+00> : vector<10x32xf32>
    %178 = tpu.matmul %176, %177, %cst_93 {dimension_numbers = #tpu.dot_dimension_numbers<[1], [0], [0], [1], [0, 0, 1, 1], [], []>} : vector<10x10xbf16>, vector<10x32xbf16>, vector<10x32xf32> -> vector<10x32xf32>
    %179 = arith.truncf %178 : vector<10x32xf32> to vector<10x32xbf16>
    %c2_94 = arith.constant 2 : index
    %c0_95 = arith.constant 0 : index
    %c0_96 = arith.constant 0 : index
    %180 = vector.load %arg5[%c2_94, %c0_95, %c0_96] : memref<4x32x128xbf16, #tpu.memory_space<vmem>>, vector<1x32x128xbf16>
    %181 = vector.shape_cast %180 : vector<1x32x128xbf16> to vector<32x128xbf16>
    %cst_97 = arith.constant dense<0.000000e+00> : vector<10x128xf32>
    %182 = tpu.matmul %179, %181, %cst_97 {dimension_numbers = #tpu.dot_dimension_numbers<[1], [0], [0], [1], [0, 0, 1, 1], [], []>} : vector<10x32xbf16>, vector<32x128xbf16>, vector<10x128xf32> -> vector<10x128xf32>
    %183 = arith.addf %139, %182 : vector<10x128xf32>
    %c3 = arith.constant 3 : index
    %c0_98 = arith.constant 0 : index
    %c0_99 = arith.constant 0 : index
    %184 = vector.load %arg3[%c3, %c0_98, %c0_99] : memref<12x128x32xbf16, #tpu.memory_space<vmem>>, vector<1x128x32xbf16>
    %185 = vector.shape_cast %184 : vector<1x128x32xbf16> to vector<128x32xbf16>
    %cst_100 = arith.constant dense<0.000000e+00> : vector<10x32xf32>
    %186 = tpu.matmul %52, %185, %cst_100 {dimension_numbers = #tpu.dot_dimension_numbers<[1], [0], [0], [1], [0, 0, 1, 1], [], []>} : vector<10x128xbf16>, vector<128x32xbf16>, vector<10x32xf32> -> vector<10x32xf32>
    %c7 = arith.constant 7 : index
    %c0_101 = arith.constant 0 : index
    %c0_102 = arith.constant 0 : index
    %187 = vector.load %arg3[%c7, %c0_101, %c0_102] : memref<12x128x32xbf16, #tpu.memory_space<vmem>>, vector<1x128x32xbf16>
    %188 = vector.shape_cast %187 : vector<1x128x32xbf16> to vector<128x32xbf16>
    %cst_103 = arith.constant dense<0.000000e+00> : vector<10x32xf32>
    %189 = tpu.matmul %52, %188, %cst_103 {dimension_numbers = #tpu.dot_dimension_numbers<[1], [0], [0], [1], [0, 0, 1, 1], [], []>} : vector<10x128xbf16>, vector<128x32xbf16>, vector<10x32xf32> -> vector<10x32xf32>
    %c11 = arith.constant 11 : index
    %c0_104 = arith.constant 0 : index
    %c0_105 = arith.constant 0 : index
    %190 = vector.load %arg3[%c11, %c0_104, %c0_105] : memref<12x128x32xbf16, #tpu.memory_space<vmem>>, vector<1x128x32xbf16>
    %191 = vector.shape_cast %190 : vector<1x128x32xbf16> to vector<128x32xbf16>
    %cst_106 = arith.constant dense<0.000000e+00> : vector<10x32xf32>
    %192 = tpu.matmul %52, %191, %cst_106 {dimension_numbers = #tpu.dot_dimension_numbers<[1], [0], [0], [1], [0, 0, 1, 1], [], []>} : vector<10x128xbf16>, vector<128x32xbf16>, vector<10x32xf32> -> vector<10x32xf32>
    %c3_107 = arith.constant 3 : index
    %c0_108 = arith.constant 0 : index
    %c0_109 = arith.constant 0 : index
    %193 = vector.load %arg4[%c3_107, %c0_108, %c0_109] : memref<12x1x32xf32, #tpu.memory_space<vmem>>, vector<1x1x32xf32>
    %194 = vector.shape_cast %193 : vector<1x1x32xf32> to vector<1x32xf32>
    %195 = vector.broadcast %194 : vector<1x32xf32> to vector<10x32xf32>
    %196 = arith.addf %186, %195 : vector<10x32xf32>
    %c7_110 = arith.constant 7 : index
    %c0_111 = arith.constant 0 : index
    %c0_112 = arith.constant 0 : index
    %197 = vector.load %arg4[%c7_110, %c0_111, %c0_112] : memref<12x1x32xf32, #tpu.memory_space<vmem>>, vector<1x1x32xf32>
    %198 = vector.shape_cast %197 : vector<1x1x32xf32> to vector<1x32xf32>
    %199 = vector.broadcast %198 : vector<1x32xf32> to vector<10x32xf32>
    %200 = arith.addf %189, %199 : vector<10x32xf32>
    %c11_113 = arith.constant 11 : index
    %c0_114 = arith.constant 0 : index
    %c0_115 = arith.constant 0 : index
    %201 = vector.load %arg4[%c11_113, %c0_114, %c0_115] : memref<12x1x32xf32, #tpu.memory_space<vmem>>, vector<1x1x32xf32>
    %202 = vector.shape_cast %201 : vector<1x1x32xf32> to vector<1x32xf32>
    %203 = vector.broadcast %202 : vector<1x32xf32> to vector<10x32xf32>
    %204 = arith.addf %192, %203 : vector<10x32xf32>
    %205 = arith.truncf %196 : vector<10x32xf32> to vector<10x32xbf16>
    %206 = arith.truncf %200 : vector<10x32xf32> to vector<10x32xbf16>
    %cst_116 = arith.constant dense<0.000000e+00> : vector<10x10xf32>
    %207 = tpu.matmul %205, %206, %cst_116 {dimension_numbers = #tpu.dot_dimension_numbers<[1], [1], [0], [0], [0, 0, 1, 0], [], []>} : vector<10x32xbf16>, vector<10x32xbf16>, vector<10x10xf32> -> vector<10x10xf32>
    %cst_117 = arith.constant -1.000000e+09 : f32
    %208 = vector.broadcast %cst_117 : f32 to vector<10x10xf32>
    %209 = arith.select %26, %207, %208 : vector<10x10xi1>, vector<10x10xf32>
    %cst_118 = arith.constant dense<0xFF800000> : vector<10xf32>
    %210 = vector.multi_reduction <maximumf>, %209, %cst_118 [1] : vector<10x10xf32> to vector<10xf32>
    %211 = vector.shape_cast %210 : vector<10xf32> to vector<10x1xf32>
    %212 = vector.broadcast %211 : vector<10x1xf32> to vector<10x10xf32>
    %213 = arith.subf %209, %212 : vector<10x10xf32>
    %214 = math.exp %213 : vector<10x10xf32>
    %cst_119 = arith.constant dense<0.000000e+00> : vector<10xf32>
    %215 = vector.multi_reduction <add>, %214, %cst_119 [1] : vector<10x10xf32> to vector<10xf32>
    %216 = vector.shape_cast %215 : vector<10xf32> to vector<10x1xf32>
    %217 = tpu.reciprocal %216 {approx = true} : vector<10x1xf32> -> vector<10x1xf32>
    %218 = vector.broadcast %217 : vector<10x1xf32> to vector<10x10xf32>
    %219 = arith.mulf %214, %218 : vector<10x10xf32>
    %220 = arith.truncf %219 : vector<10x10xf32> to vector<10x10xbf16>
    %221 = arith.truncf %204 : vector<10x32xf32> to vector<10x32xbf16>
    %cst_120 = arith.constant dense<0.000000e+00> : vector<10x32xf32>
    %222 = tpu.matmul %220, %221, %cst_120 {dimension_numbers = #tpu.dot_dimension_numbers<[1], [0], [0], [1], [0, 0, 1, 1], [], []>} : vector<10x10xbf16>, vector<10x32xbf16>, vector<10x32xf32> -> vector<10x32xf32>
    %223 = arith.truncf %222 : vector<10x32xf32> to vector<10x32xbf16>
    %c3_121 = arith.constant 3 : index
    %c0_122 = arith.constant 0 : index
    %c0_123 = arith.constant 0 : index
    %224 = vector.load %arg5[%c3_121, %c0_122, %c0_123] : memref<4x32x128xbf16, #tpu.memory_space<vmem>>, vector<1x32x128xbf16>
    %225 = vector.shape_cast %224 : vector<1x32x128xbf16> to vector<32x128xbf16>
    %cst_124 = arith.constant dense<0.000000e+00> : vector<10x128xf32>
    %226 = tpu.matmul %223, %225, %cst_124 {dimension_numbers = #tpu.dot_dimension_numbers<[1], [0], [0], [1], [0, 0, 1, 1], [], []>} : vector<10x32xbf16>, vector<32x128xbf16>, vector<10x128xf32> -> vector<10x128xf32>
    %227 = arith.addf %183, %226 : vector<10x128xf32>
    %228 = vector.broadcast %51 : vector<1x128xf32> to vector<10x128xf32>
    %229 = arith.addf %227, %228 : vector<10x128xf32>
    %230 = arith.addf %1, %229 : vector<10x128xf32>
    %c0_125 = arith.constant 0 : index
    %c0_126 = arith.constant 0 : index
    %231 = vector.load %arg7[%c0_125, %c0_126] : memref<1x128xf32, #tpu.memory_space<vmem>>, vector<1x128xf32>
    %c0_127 = arith.constant 0 : index
    %c0_128 = arith.constant 0 : index
    %232 = vector.load %arg8[%c0_127, %c0_128] : memref<1x128xf32, #tpu.memory_space<vmem>>, vector<1x128xf32>
    %cst_129 = arith.constant dense<0.000000e+00> : vector<10xf32>
    %233 = vector.multi_reduction <add>, %230, %cst_129 [1] : vector<10x128xf32> to vector<10xf32>
    %234 = vector.shape_cast %233 : vector<10xf32> to vector<10x1xf32>
    %cst_130 = arith.constant 1.280000e+02 : f32
    %235 = vector.broadcast %cst_130 : f32 to vector<10x1xf32>
    %236 = arith.divf %234, %235 : vector<10x1xf32>
    %237 = vector.broadcast %236 : vector<10x1xf32> to vector<10x128xf32>
    %238 = arith.subf %230, %237 : vector<10x128xf32>
    %239 = arith.mulf %238, %238 : vector<10x128xf32>
    %cst_131 = arith.constant dense<0.000000e+00> : vector<10xf32>
    %240 = vector.multi_reduction <add>, %239, %cst_131 [1] : vector<10x128xf32> to vector<10xf32>
    %241 = vector.shape_cast %240 : vector<10xf32> to vector<10x1xf32>
    %cst_132 = arith.constant 1.280000e+02 : f32
    %242 = vector.broadcast %cst_132 : f32 to vector<10x1xf32>
    %243 = arith.divf %241, %242 : vector<10x1xf32>
    %244 = vector.broadcast %236 : vector<10x1xf32> to vector<10x128xf32>
    %245 = arith.subf %230, %244 : vector<10x128xf32>
    %cst_133 = arith.constant 9.99999974E-6 : f32
    %246 = vector.broadcast %cst_133 : f32 to vector<10x1xf32>
    %247 = arith.addf %243, %246 : vector<10x1xf32>
    %248 = math.rsqrt %247 : vector<10x1xf32>
    %249 = vector.broadcast %248 : vector<10x1xf32> to vector<10x128xf32>
    %250 = arith.mulf %245, %249 : vector<10x128xf32>
    %251 = vector.broadcast %231 : vector<1x128xf32> to vector<10x128xf32>
    %252 = arith.mulf %250, %251 : vector<10x128xf32>
    %253 = vector.broadcast %232 : vector<1x128xf32> to vector<10x128xf32>
    %254 = arith.addf %252, %253 : vector<10x128xf32>
    %255 = arith.truncf %254 : vector<10x128xf32> to vector<10x128xbf16>
    %c0_134 = arith.constant 0 : index
    %c0_135 = arith.constant 0 : index
    %256 = vector.load %arg9[%c0_134, %c0_135] : memref<128x256xbf16, #tpu.memory_space<vmem>>, vector<128x256xbf16>
    %cst_136 = arith.constant dense<0.000000e+00> : vector<10x256xf32>
    %257 = tpu.matmul %255, %256, %cst_136 {dimension_numbers = #tpu.dot_dimension_numbers<[1], [0], [0], [1], [0, 0, 1, 1], [], []>} : vector<10x128xbf16>, vector<128x256xbf16>, vector<10x256xf32> -> vector<10x256xf32>
    %c0_137 = arith.constant 0 : index
    %c0_138 = arith.constant 0 : index
    %258 = vector.load %arg10[%c0_137, %c0_138] : memref<1x256xf32, #tpu.memory_space<vmem>>, vector<1x256xf32>
    %259 = vector.broadcast %258 : vector<1x256xf32> to vector<10x256xf32>
    %260 = arith.addf %257, %259 : vector<10x256xf32>
    %cst_139 = arith.constant 1.702000e+00 : f32
    %261 = vector.broadcast %cst_139 : f32 to vector<10x256xf32>
    %262 = arith.mulf %261, %260 : vector<10x256xf32>
    %263 = arith.negf %262 : vector<10x256xf32>
    %264 = math.exp %263 : vector<10x256xf32>
    %cst_140 = arith.constant 1.000000e+00 : f32
    %265 = vector.broadcast %cst_140 : f32 to vector<10x256xf32>
    %266 = arith.addf %265, %264 : vector<10x256xf32>
    %267 = arith.divf %265, %266 : vector<10x256xf32>
    %268 = arith.mulf %260, %267 : vector<10x256xf32>
    %269 = arith.truncf %268 : vector<10x256xf32> to vector<10x256xbf16>
    %c0_141 = arith.constant 0 : index
    %c0_142 = arith.constant 0 : index
    %270 = vector.load %arg11[%c0_141, %c0_142] : memref<256x128xbf16, #tpu.memory_space<vmem>>, vector<256x128xbf16>
    %cst_143 = arith.constant dense<0.000000e+00> : vector<10x128xf32>
    %271 = tpu.matmul %269, %270, %cst_143 {dimension_numbers = #tpu.dot_dimension_numbers<[1], [0], [0], [1], [0, 0, 1, 1], [], []>} : vector<10x256xbf16>, vector<256x128xbf16>, vector<10x128xf32> -> vector<10x128xf32>
    %c0_144 = arith.constant 0 : index
    %c0_145 = arith.constant 0 : index
    %272 = vector.load %arg12[%c0_144, %c0_145] : memref<1x128xf32, #tpu.memory_space<vmem>>, vector<1x128xf32>
    %273 = vector.broadcast %272 : vector<1x128xf32> to vector<10x128xf32>
    %274 = arith.addf %271, %273 : vector<10x128xf32>
    %275 = arith.addf %230, %274 : vector<10x128xf32>
    %276 = arith.truncf %275 : vector<10x128xf32> to vector<10x128xbf16>
    %c0_146 = arith.constant 0 : index
    %c0_147 = arith.constant 0 : index
    %277 = vector.load %arg13[%c0_146, %c0_147] : memref<10x128xbf16, #tpu.memory_space<vmem>>, vector<10x128xbf16>
    tpu.vector_store %arg13[%c0_146, %c0_147], %276 {strides = array<i32>} : memref<10x128xbf16, #tpu.memory_space<vmem>>, vector<10x128xbf16>,
    return
  }
}

module attributes {stable_mosaic.version = 11 : i64} {
  func.func @_vision_embed_kernel(%arg0: memref<8x192xbf16, #tpu.memory_space<vmem>>, %arg1: memref<192x128xbf16, #tpu.memory_space<vmem>>, %arg2: memref<1x128xf32, #tpu.memory_space<vmem>>, %arg3: memref<5x128xf32, #tpu.memory_space<vmem>>, %arg4: memref<1x128xf32, #tpu.memory_space<vmem>>, %arg5: memref<1x128xf32, #tpu.memory_space<vmem>>, %arg6: memref<10x128xbf16, #tpu.memory_space<vmem>>) attributes {dimension_semantics = [], scalar_prefetch = 0 : i64, scratch_operands = 0 : i64, tpu.core_type = #tpu.core_type<tc>} {
    %c0 = arith.constant 0 : index
    %c0_0 = arith.constant 0 : index
    %0 = vector.load %arg0[%c0, %c0_0] : memref<8x192xbf16, #tpu.memory_space<vmem>>, vector<8x192xbf16>
    %c0_1 = arith.constant 0 : index
    %c0_2 = arith.constant 0 : index
    %1 = vector.load %arg1[%c0_1, %c0_2] : memref<192x128xbf16, #tpu.memory_space<vmem>>, vector<192x128xbf16>
    %cst = arith.constant dense<0.000000e+00> : vector<8x128xf32>
    %2 = tpu.matmul %0, %1, %cst {dimension_numbers = #tpu.dot_dimension_numbers<[1], [0], [0], [1], [0, 0, 1, 1], [], []>} : vector<8x192xbf16>, vector<192x128xbf16>, vector<8x128xf32> -> vector<8x128xf32>
    %c0_3 = arith.constant 0 : index
    %c0_4 = arith.constant 0 : index
    %3 = vector.load %arg2[%c0_3, %c0_4] : memref<1x128xf32, #tpu.memory_space<vmem>>, vector<1x128xf32>
    %c0_5 = arith.constant 0 : index
    %c0_6 = arith.constant 0 : index
    %4 = vector.load %arg3[%c0_5, %c0_6] : memref<5x128xf32, #tpu.memory_space<vmem>>, vector<1x128xf32>
    %5 = arith.addf %3, %4 : vector<1x128xf32>
    %c0_7 = arith.constant 0 : index
    %c0_8 = arith.constant 0 : index
    %6 = vector.load %arg4[%c0_7, %c0_8] : memref<1x128xf32, #tpu.memory_space<vmem>>, vector<1x128xf32>
    %c0_9 = arith.constant 0 : index
    %c0_10 = arith.constant 0 : index
    %7 = vector.load %arg5[%c0_9, %c0_10] : memref<1x128xf32, #tpu.memory_space<vmem>>, vector<1x128xf32>
    %cst_11 = arith.constant dense<0.000000e+00> : vector<1xf32>
    %8 = vector.multi_reduction <add>, %5, %cst_11 [1] : vector<1x128xf32> to vector<1xf32>
    %9 = vector.shape_cast %8 : vector<1xf32> to vector<1x1xf32>
    %cst_12 = arith.constant 1.280000e+02 : f32
    %10 = vector.broadcast %cst_12 : f32 to vector<1x1xf32>
    %11 = arith.divf %9, %10 : vector<1x1xf32>
    %12 = vector.broadcast %11 : vector<1x1xf32> to vector<1x128xf32>
    %13 = arith.subf %5, %12 : vector<1x128xf32>
    %14 = arith.mulf %13, %13 : vector<1x128xf32>
    %cst_13 = arith.constant dense<0.000000e+00> : vector<1xf32>
    %15 = vector.multi_reduction <add>, %14, %cst_13 [1] : vector<1x128xf32> to vector<1xf32>
    %16 = vector.shape_cast %15 : vector<1xf32> to vector<1x1xf32>
    %cst_14 = arith.constant 1.280000e+02 : f32
    %17 = vector.broadcast %cst_14 : f32 to vector<1x1xf32>
    %18 = arith.divf %16, %17 : vector<1x1xf32>
    %19 = vector.broadcast %11 : vector<1x1xf32> to vector<1x128xf32>
    %20 = arith.subf %5, %19 : vector<1x128xf32>
    %cst_15 = arith.constant 9.99999974E-6 : f32
    %21 = vector.broadcast %cst_15 : f32 to vector<1x1xf32>
    %22 = arith.addf %18, %21 : vector<1x1xf32>
    %23 = math.rsqrt %22 : vector<1x1xf32>
    %24 = vector.broadcast %23 : vector<1x1xf32> to vector<1x128xf32>
    %25 = arith.mulf %20, %24 : vector<1x128xf32>
    %26 = arith.mulf %25, %6 : vector<1x128xf32>
    %27 = arith.addf %26, %7 : vector<1x128xf32>
    %28 = vector.extract_strided_slice %2 {offsets = [0, 0], sizes = [4, 128], strides = [1, 1]} : vector<8x128xf32> to vector<4x128xf32>
    %c1 = arith.constant 1 : index
    %c0_16 = arith.constant 0 : index
    %29 = vector.load %arg3[%c1, %c0_16] : memref<5x128xf32, #tpu.memory_space<vmem>>, vector<4x128xf32>
    %30 = arith.addf %28, %29 : vector<4x128xf32>
    %c0_17 = arith.constant 0 : index
    %c0_18 = arith.constant 0 : index
    %31 = vector.load %arg4[%c0_17, %c0_18] : memref<1x128xf32, #tpu.memory_space<vmem>>, vector<1x128xf32>
    %c0_19 = arith.constant 0 : index
    %c0_20 = arith.constant 0 : index
    %32 = vector.load %arg5[%c0_19, %c0_20] : memref<1x128xf32, #tpu.memory_space<vmem>>, vector<1x128xf32>
    %cst_21 = arith.constant dense<0.000000e+00> : vector<4xf32>
    %33 = vector.multi_reduction <add>, %30, %cst_21 [1] : vector<4x128xf32> to vector<4xf32>
    %34 = vector.shape_cast %33 : vector<4xf32> to vector<4x1xf32>
    %cst_22 = arith.constant 1.280000e+02 : f32
    %35 = vector.broadcast %cst_22 : f32 to vector<4x1xf32>
    %36 = arith.divf %34, %35 : vector<4x1xf32>
    %37 = vector.broadcast %36 : vector<4x1xf32> to vector<4x128xf32>
    %38 = arith.subf %30, %37 : vector<4x128xf32>
    %39 = arith.mulf %38, %38 : vector<4x128xf32>
    %cst_23 = arith.constant dense<0.000000e+00> : vector<4xf32>
    %40 = vector.multi_reduction <add>, %39, %cst_23 [1] : vector<4x128xf32> to vector<4xf32>
    %41 = vector.shape_cast %40 : vector<4xf32> to vector<4x1xf32>
    %cst_24 = arith.constant 1.280000e+02 : f32
    %42 = vector.broadcast %cst_24 : f32 to vector<4x1xf32>
    %43 = arith.divf %41, %42 : vector<4x1xf32>
    %44 = vector.broadcast %36 : vector<4x1xf32> to vector<4x128xf32>
    %45 = arith.subf %30, %44 : vector<4x128xf32>
    %cst_25 = arith.constant 9.99999974E-6 : f32
    %46 = vector.broadcast %cst_25 : f32 to vector<4x1xf32>
    %47 = arith.addf %43, %46 : vector<4x1xf32>
    %48 = math.rsqrt %47 : vector<4x1xf32>
    %49 = vector.broadcast %48 : vector<4x1xf32> to vector<4x128xf32>
    %50 = arith.mulf %45, %49 : vector<4x128xf32>
    %51 = vector.broadcast %31 : vector<1x128xf32> to vector<4x128xf32>
    %52 = arith.mulf %50, %51 : vector<4x128xf32>
    %53 = vector.broadcast %32 : vector<1x128xf32> to vector<4x128xf32>
    %54 = arith.addf %52, %53 : vector<4x128xf32>
    %55 = arith.truncf %27 : vector<1x128xf32> to vector<1x128xbf16>
    %c0_26 = arith.constant 0 : index
    %c0_27 = arith.constant 0 : index
    %56 = vector.load %arg6[%c0_26, %c0_27] : memref<10x128xbf16, #tpu.memory_space<vmem>>, vector<1x128xbf16>
    tpu.vector_store %arg6[%c0_26, %c0_27], %55 {strides = array<i32>} : memref<10x128xbf16, #tpu.memory_space<vmem>>, vector<1x128xbf16>,
    %57 = arith.truncf %54 : vector<4x128xf32> to vector<4x128xbf16>
    %c1_28 = arith.constant 1 : index
    %c0_29 = arith.constant 0 : index
    %58 = vector.load %arg6[%c1_28, %c0_29] : memref<10x128xbf16, #tpu.memory_space<vmem>>, vector<4x128xbf16>
    tpu.vector_store %arg6[%c1_28, %c0_29], %57 {strides = array<i32>} : memref<10x128xbf16, #tpu.memory_space<vmem>>, vector<4x128xbf16>,
    %59 = vector.extract_strided_slice %2 {offsets = [4, 0], sizes = [4, 128], strides = [1, 1]} : vector<8x128xf32> to vector<4x128xf32>
    %c1_30 = arith.constant 1 : index
    %c0_31 = arith.constant 0 : index
    %60 = vector.load %arg3[%c1_30, %c0_31] : memref<5x128xf32, #tpu.memory_space<vmem>>, vector<4x128xf32>
    %61 = arith.addf %59, %60 : vector<4x128xf32>
    %c0_32 = arith.constant 0 : index
    %c0_33 = arith.constant 0 : index
    %62 = vector.load %arg4[%c0_32, %c0_33] : memref<1x128xf32, #tpu.memory_space<vmem>>, vector<1x128xf32>
    %c0_34 = arith.constant 0 : index
    %c0_35 = arith.constant 0 : index
    %63 = vector.load %arg5[%c0_34, %c0_35] : memref<1x128xf32, #tpu.memory_space<vmem>>, vector<1x128xf32>
    %cst_36 = arith.constant dense<0.000000e+00> : vector<4xf32>
    %64 = vector.multi_reduction <add>, %61, %cst_36 [1] : vector<4x128xf32> to vector<4xf32>
    %65 = vector.shape_cast %64 : vector<4xf32> to vector<4x1xf32>
    %cst_37 = arith.constant 1.280000e+02 : f32
    %66 = vector.broadcast %cst_37 : f32 to vector<4x1xf32>
    %67 = arith.divf %65, %66 : vector<4x1xf32>
    %68 = vector.broadcast %67 : vector<4x1xf32> to vector<4x128xf32>
    %69 = arith.subf %61, %68 : vector<4x128xf32>
    %70 = arith.mulf %69, %69 : vector<4x128xf32>
    %cst_38 = arith.constant dense<0.000000e+00> : vector<4xf32>
    %71 = vector.multi_reduction <add>, %70, %cst_38 [1] : vector<4x128xf32> to vector<4xf32>
    %72 = vector.shape_cast %71 : vector<4xf32> to vector<4x1xf32>
    %cst_39 = arith.constant 1.280000e+02 : f32
    %73 = vector.broadcast %cst_39 : f32 to vector<4x1xf32>
    %74 = arith.divf %72, %73 : vector<4x1xf32>
    %75 = vector.broadcast %67 : vector<4x1xf32> to vector<4x128xf32>
    %76 = arith.subf %61, %75 : vector<4x128xf32>
    %cst_40 = arith.constant 9.99999974E-6 : f32
    %77 = vector.broadcast %cst_40 : f32 to vector<4x1xf32>
    %78 = arith.addf %74, %77 : vector<4x1xf32>
    %79 = math.rsqrt %78 : vector<4x1xf32>
    %80 = vector.broadcast %79 : vector<4x1xf32> to vector<4x128xf32>
    %81 = arith.mulf %76, %80 : vector<4x128xf32>
    %82 = vector.broadcast %62 : vector<1x128xf32> to vector<4x128xf32>
    %83 = arith.mulf %81, %82 : vector<4x128xf32>
    %84 = vector.broadcast %63 : vector<1x128xf32> to vector<4x128xf32>
    %85 = arith.addf %83, %84 : vector<4x128xf32>
    %86 = arith.truncf %27 : vector<1x128xf32> to vector<1x128xbf16>
    %c5 = arith.constant 5 : index
    %c0_41 = arith.constant 0 : index
    %87 = vector.load %arg6[%c5, %c0_41] : memref<10x128xbf16, #tpu.memory_space<vmem>>, vector<1x128xbf16>
    tpu.vector_store %arg6[%c5, %c0_41], %86 {strides = array<i32>} : memref<10x128xbf16, #tpu.memory_space<vmem>>, vector<1x128xbf16>,
    %88 = arith.truncf %85 : vector<4x128xf32> to vector<4x128xbf16>
    %c6 = arith.constant 6 : index
    %c0_42 = arith.constant 0 : index
    %89 = vector.load %arg6[%c6, %c0_42] : memref<10x128xbf16, #tpu.memory_space<vmem>>, vector<4x128xbf16>
    tpu.vector_store %arg6[%c6, %c0_42], %88 {strides = array<i32>} : memref<10x128xbf16, #tpu.memory_space<vmem>>, vector<4x128xbf16>,
    return
  }
}

module attributes {stable_mosaic.version = 11 : i64} {
  func.func @_projector_kernel(%arg0: memref<10x128xbf16, #tpu.memory_space<vmem>>, %arg1: memref<128x128xbf16, #tpu.memory_space<vmem>>, %arg2: memref<1x128xf32, #tpu.memory_space<vmem>>, %arg3: memref<128x128xbf16, #tpu.memory_space<vmem>>, %arg4: memref<1x128xf32, #tpu.memory_space<vmem>>, %arg5: memref<8x128xbf16, #tpu.memory_space<vmem>>) attributes {dimension_semantics = [], scalar_prefetch = 0 : i64, scratch_operands = 0 : i64, tpu.core_type = #tpu.core_type<tc>} {
    %c1 = arith.constant 1 : index
    %c0 = arith.constant 0 : index
    %0 = vector.load %arg0[%c1, %c0] : memref<10x128xbf16, #tpu.memory_space<vmem>>, vector<4x128xbf16>
    %c0_0 = arith.constant 0 : index
    %c0_1 = arith.constant 0 : index
    %1 = vector.load %arg1[%c0_0, %c0_1] : memref<128x128xbf16, #tpu.memory_space<vmem>>, vector<128x128xbf16>
    %cst = arith.constant dense<0.000000e+00> : vector<4x128xf32>
    %2 = tpu.matmul %0, %1, %cst {dimension_numbers = #tpu.dot_dimension_numbers<[1], [0], [0], [1], [0, 0, 1, 1], [], []>} : vector<4x128xbf16>, vector<128x128xbf16>, vector<4x128xf32> -> vector<4x128xf32>
    %c0_2 = arith.constant 0 : index
    %c0_3 = arith.constant 0 : index
    %3 = vector.load %arg2[%c0_2, %c0_3] : memref<1x128xf32, #tpu.memory_space<vmem>>, vector<1x128xf32>
    %4 = vector.broadcast %3 : vector<1x128xf32> to vector<4x128xf32>
    %5 = arith.addf %2, %4 : vector<4x128xf32>
    %6 = arith.mulf %5, %5 : vector<4x128xf32>
    %7 = arith.mulf %5, %6 : vector<4x128xf32>
    %cst_4 = arith.constant 4.471500e-02 : f32
    %8 = vector.broadcast %cst_4 : f32 to vector<4x128xf32>
    %9 = arith.mulf %8, %7 : vector<4x128xf32>
    %10 = arith.addf %5, %9 : vector<4x128xf32>
    %cst_5 = arith.constant 0.797884583 : f32
    %11 = vector.broadcast %cst_5 : f32 to vector<4x128xf32>
    %12 = arith.mulf %11, %10 : vector<4x128xf32>
    %13 = math.tanh %12 : vector<4x128xf32>
    %cst_6 = arith.constant 1.000000e+00 : f32
    %14 = vector.broadcast %cst_6 : f32 to vector<4x128xf32>
    %15 = arith.addf %14, %13 : vector<4x128xf32>
    %cst_7 = arith.constant 5.000000e-01 : f32
    %16 = vector.broadcast %cst_7 : f32 to vector<4x128xf32>
    %17 = arith.mulf %16, %15 : vector<4x128xf32>
    %18 = arith.mulf %5, %17 : vector<4x128xf32>
    %19 = arith.truncf %18 : vector<4x128xf32> to vector<4x128xbf16>
    %c0_8 = arith.constant 0 : index
    %c0_9 = arith.constant 0 : index
    %20 = vector.load %arg3[%c0_8, %c0_9] : memref<128x128xbf16, #tpu.memory_space<vmem>>, vector<128x128xbf16>
    %cst_10 = arith.constant dense<0.000000e+00> : vector<4x128xf32>
    %21 = tpu.matmul %19, %20, %cst_10 {dimension_numbers = #tpu.dot_dimension_numbers<[1], [0], [0], [1], [0, 0, 1, 1], [], []>} : vector<4x128xbf16>, vector<128x128xbf16>, vector<4x128xf32> -> vector<4x128xf32>
    %c0_11 = arith.constant 0 : index
    %c0_12 = arith.constant 0 : index
    %22 = vector.load %arg4[%c0_11, %c0_12] : memref<1x128xf32, #tpu.memory_space<vmem>>, vector<1x128xf32>
    %23 = vector.broadcast %22 : vector<1x128xf32> to vector<4x128xf32>
    %24 = arith.addf %21, %23 : vector<4x128xf32>
    %25 = arith.truncf %24 : vector<4x128xf32> to vector<4x128xbf16>
    %c0_13 = arith.constant 0 : index
    %c0_14 = arith.constant 0 : index
    %26 = vector.load %arg5[%c0_13, %c0_14] : memref<8x128xbf16, #tpu.memory_space<vmem>>, vector<4x128xbf16>
    tpu.vector_store %arg5[%c0_13, %c0_14], %25 {strides = array<i32>} : memref<8x128xbf16, #tpu.memory_space<vmem>>, vector<4x128xbf16>,
    %c6 = arith.constant 6 : index
    %c0_15 = arith.constant 0 : index
    %27 = vector.load %arg0[%c6, %c0_15] : memref<10x128xbf16, #tpu.memory_space<vmem>>, vector<4x128xbf16>
    %c0_16 = arith.constant 0 : index
    %c0_17 = arith.constant 0 : index
    %28 = vector.load %arg1[%c0_16, %c0_17] : memref<128x128xbf16, #tpu.memory_space<vmem>>, vector<128x128xbf16>
    %cst_18 = arith.constant dense<0.000000e+00> : vector<4x128xf32>
    %29 = tpu.matmul %27, %28, %cst_18 {dimension_numbers = #tpu.dot_dimension_numbers<[1], [0], [0], [1], [0, 0, 1, 1], [], []>} : vector<4x128xbf16>, vector<128x128xbf16>, vector<4x128xf32> -> vector<4x128xf32>
    %c0_19 = arith.constant 0 : index
    %c0_20 = arith.constant 0 : index
    %30 = vector.load %arg2[%c0_19, %c0_20] : memref<1x128xf32, #tpu.memory_space<vmem>>, vector<1x128xf32>
    %31 = vector.broadcast %30 : vector<1x128xf32> to vector<4x128xf32>
    %32 = arith.addf %29, %31 : vector<4x128xf32>
    %33 = arith.mulf %32, %32 : vector<4x128xf32>
    %34 = arith.mulf %32, %33 : vector<4x128xf32>
    %cst_21 = arith.constant 4.471500e-02 : f32
    %35 = vector.broadcast %cst_21 : f32 to vector<4x128xf32>
    %36 = arith.mulf %35, %34 : vector<4x128xf32>
    %37 = arith.addf %32, %36 : vector<4x128xf32>
    %cst_22 = arith.constant 0.797884583 : f32
    %38 = vector.broadcast %cst_22 : f32 to vector<4x128xf32>
    %39 = arith.mulf %38, %37 : vector<4x128xf32>
    %40 = math.tanh %39 : vector<4x128xf32>
    %cst_23 = arith.constant 1.000000e+00 : f32
    %41 = vector.broadcast %cst_23 : f32 to vector<4x128xf32>
    %42 = arith.addf %41, %40 : vector<4x128xf32>
    %cst_24 = arith.constant 5.000000e-01 : f32
    %43 = vector.broadcast %cst_24 : f32 to vector<4x128xf32>
    %44 = arith.mulf %43, %42 : vector<4x128xf32>
    %45 = arith.mulf %32, %44 : vector<4x128xf32>
    %46 = arith.truncf %45 : vector<4x128xf32> to vector<4x128xbf16>
    %c0_25 = arith.constant 0 : index
    %c0_26 = arith.constant 0 : index
    %47 = vector.load %arg3[%c0_25, %c0_26] : memref<128x128xbf16, #tpu.memory_space<vmem>>, vector<128x128xbf16>
    %cst_27 = arith.constant dense<0.000000e+00> : vector<4x128xf32>
    %48 = tpu.matmul %46, %47, %cst_27 {dimension_numbers = #tpu.dot_dimension_numbers<[1], [0], [0], [1], [0, 0, 1, 1], [], []>} : vector<4x128xbf16>, vector<128x128xbf16>, vector<4x128xf32> -> vector<4x128xf32>
    %c0_28 = arith.constant 0 : index
    %c0_29 = arith.constant 0 : index
    %49 = vector.load %arg4[%c0_28, %c0_29] : memref<1x128xf32, #tpu.memory_space<vmem>>, vector<1x128xf32>
    %50 = vector.broadcast %49 : vector<1x128xf32> to vector<4x128xf32>
    %51 = arith.addf %48, %50 : vector<4x128xf32>
    %52 = arith.truncf %51 : vector<4x128xf32> to vector<4x128xbf16>
    %c4 = arith.constant 4 : index
    %c0_30 = arith.constant 0 : index
    %53 = vector.load %arg5[%c4, %c0_30] : memref<8x128xbf16, #tpu.memory_space<vmem>>, vector<4x128xbf16>
    tpu.vector_store %arg5[%c4, %c0_30], %52 {strides = array<i32>} : memref<8x128xbf16, #tpu.memory_space<vmem>>, vector<4x128xbf16>,
    return
  }
}

module attributes {stable_mosaic.version = 11 : i64} {
  func.func @_llama_layer_kernel(%arg0: memref<16x128xbf16, #tpu.memory_space<vmem>>, %arg1: memref<1x128xf32, #tpu.memory_space<vmem>>, %arg2: memref<12x128x32xbf16, #tpu.memory_space<vmem>>, %arg3: memref<4x32x128xbf16, #tpu.memory_space<vmem>>, %arg4: memref<1x128xf32, #tpu.memory_space<vmem>>, %arg5: memref<128x512xbf16, #tpu.memory_space<vmem>>, %arg6: memref<256x128xbf16, #tpu.memory_space<vmem>>, %arg7: memref<16x128xbf16, #tpu.memory_space<vmem>>) attributes {dimension_semantics = [], scalar_prefetch = 0 : i64, scratch_operands = 0 : i64, tpu.core_type = #tpu.core_type<tc>} {
    %c0 = arith.constant 0 : index
    %c0_0 = arith.constant 0 : index
    %0 = vector.load %arg0[%c0, %c0_0] : memref<16x128xbf16, #tpu.memory_space<vmem>>, vector<16x128xbf16>
    %1 = arith.extf %0 : vector<16x128xbf16> to vector<16x128xf32>
    %2 = tpu.iota {dimensions = array<i32: 0>} : vector<16x16xi32>
    %3 = tpu.iota {dimensions = array<i32: 1>} : vector<16x16xi32>
    %c0_i32 = arith.constant 0 : i32
    %4 = vector.broadcast %c0_i32 : i32 to vector<16x16xi32>
    %5 = arith.cmpi sge, %2, %4 : vector<16x16xi32>
    %c8_i32 = arith.constant 8 : i32
    %6 = vector.broadcast %c8_i32 : i32 to vector<16x16xi32>
    %7 = arith.cmpi slt, %2, %6 : vector<16x16xi32>
    %8 = arith.andi %5, %7 : vector<16x16xi1>
    %c0_i32_1 = arith.constant 0 : i32
    %9 = vector.broadcast %c0_i32_1 : i32 to vector<16x16xi32>
    %10 = arith.cmpi sge, %3, %9 : vector<16x16xi32>
    %11 = arith.andi %8, %10 : vector<16x16xi1>
    %c8_i32_2 = arith.constant 8 : i32
    %12 = vector.broadcast %c8_i32_2 : i32 to vector<16x16xi32>
    %13 = arith.cmpi slt, %3, %12 : vector<16x16xi32>
    %14 = arith.andi %11, %13 : vector<16x16xi1>
    %c8_i32_3 = arith.constant 8 : i32
    %15 = vector.broadcast %c8_i32_3 : i32 to vector<16x16xi32>
    %16 = arith.cmpi sge, %2, %15 : vector<16x16xi32>
    %c16_i32 = arith.constant 16 : i32
    %17 = vector.broadcast %c16_i32 : i32 to vector<16x16xi32>
    %18 = arith.cmpi slt, %2, %17 : vector<16x16xi32>
    %19 = arith.andi %16, %18 : vector<16x16xi1>
    %c8_i32_4 = arith.constant 8 : i32
    %20 = vector.broadcast %c8_i32_4 : i32 to vector<16x16xi32>
    %21 = arith.cmpi sge, %3, %20 : vector<16x16xi32>
    %22 = arith.andi %19, %21 : vector<16x16xi1>
    %c16_i32_5 = arith.constant 16 : i32
    %23 = vector.broadcast %c16_i32_5 : i32 to vector<16x16xi32>
    %24 = arith.cmpi slt, %3, %23 : vector<16x16xi32>
    %25 = arith.andi %22, %24 : vector<16x16xi1>
    %26 = arith.ori %14, %25 : vector<16x16xi1>
    %27 = arith.cmpi sge, %2, %3 : vector<16x16xi32>
    %28 = arith.andi %26, %27 : vector<16x16xi1>
    %c0_6 = arith.constant 0 : index
    %c0_7 = arith.constant 0 : index
    %29 = vector.load %arg1[%c0_6, %c0_7] : memref<1x128xf32, #tpu.memory_space<vmem>>, vector<1x128xf32>
    %30 = arith.mulf %1, %1 : vector<16x128xf32>
    %cst = arith.constant dense<0.000000e+00> : vector<16xf32>
    %31 = vector.multi_reduction <add>, %30, %cst [1] : vector<16x128xf32> to vector<16xf32>
    %32 = vector.shape_cast %31 : vector<16xf32> to vector<16x1xf32>
    %cst_8 = arith.constant 1.280000e+02 : f32
    %33 = vector.broadcast %cst_8 : f32 to vector<16x1xf32>
    %34 = arith.divf %32, %33 : vector<16x1xf32>
    %cst_9 = arith.constant 9.99999997E-7 : f32
    %35 = vector.broadcast %cst_9 : f32 to vector<16x1xf32>
    %36 = arith.addf %34, %35 : vector<16x1xf32>
    %37 = math.rsqrt %36 : vector<16x1xf32>
    %38 = vector.broadcast %37 : vector<16x1xf32> to vector<16x128xf32>
    %39 = arith.mulf %1, %38 : vector<16x128xf32>
    %40 = vector.broadcast %29 : vector<1x128xf32> to vector<16x128xf32>
    %41 = arith.mulf %39, %40 : vector<16x128xf32>
    %42 = arith.truncf %41 : vector<16x128xf32> to vector<16x128xbf16>
    %c0_10 = arith.constant 0 : index
    %c0_11 = arith.constant 0 : index
    %c0_12 = arith.constant 0 : index
    %43 = vector.load %arg2[%c0_10, %c0_11, %c0_12] : memref<12x128x32xbf16, #tpu.memory_space<vmem>>, vector<1x128x32xbf16>
    %44 = vector.shape_cast %43 : vector<1x128x32xbf16> to vector<128x32xbf16>
    %cst_13 = arith.constant dense<0.000000e+00> : vector<16x32xf32>
    %45 = tpu.matmul %42, %44, %cst_13 {dimension_numbers = #tpu.dot_dimension_numbers<[1], [0], [0], [1], [0, 0, 1, 1], [], []>} : vector<16x128xbf16>, vector<128x32xbf16>, vector<16x32xf32> -> vector<16x32xf32>
    %c4 = arith.constant 4 : index
    %c0_14 = arith.constant 0 : index
    %c0_15 = arith.constant 0 : index
    %46 = vector.load %arg2[%c4, %c0_14, %c0_15] : memref<12x128x32xbf16, #tpu.memory_space<vmem>>, vector<1x128x32xbf16>
    %47 = vector.shape_cast %46 : vector<1x128x32xbf16> to vector<128x32xbf16>
    %cst_16 = arith.constant dense<0.000000e+00> : vector<16x32xf32>
    %48 = tpu.matmul %42, %47, %cst_16 {dimension_numbers = #tpu.dot_dimension_numbers<[1], [0], [0], [1], [0, 0, 1, 1], [], []>} : vector<16x128xbf16>, vector<128x32xbf16>, vector<16x32xf32> -> vector<16x32xf32>
    %c8 = arith.constant 8 : index
    %c0_17 = arith.constant 0 : index
    %c0_18 = arith.constant 0 : index
    %49 = vector.load %arg2[%c8, %c0_17, %c0_18] : memref<12x128x32xbf16, #tpu.memory_space<vmem>>, vector<1x128x32xbf16>
    %50 = vector.shape_cast %49 : vector<1x128x32xbf16> to vector<128x32xbf16>
    %cst_19 = arith.constant dense<0.000000e+00> : vector<16x32xf32>
    %51 = tpu.matmul %42, %50, %cst_19 {dimension_numbers = #tpu.dot_dimension_numbers<[1], [0], [0], [1], [0, 0, 1, 1], [], []>} : vector<16x128xbf16>, vector<128x32xbf16>, vector<16x32xf32> -> vector<16x32xf32>
    %52 = arith.truncf %45 : vector<16x32xf32> to vector<16x32xbf16>
    %53 = arith.truncf %48 : vector<16x32xf32> to vector<16x32xbf16>
    %cst_20 = arith.constant dense<0.000000e+00> : vector<16x16xf32>
    %54 = tpu.matmul %52, %53, %cst_20 {dimension_numbers = #tpu.dot_dimension_numbers<[1], [1], [0], [0], [0, 0, 1, 0], [], []>} : vector<16x32xbf16>, vector<16x32xbf16>, vector<16x16xf32> -> vector<16x16xf32>
    %cst_21 = arith.constant -1.000000e+09 : f32
    %55 = vector.broadcast %cst_21 : f32 to vector<16x16xf32>
    %56 = arith.select %28, %54, %55 : vector<16x16xi1>, vector<16x16xf32>
    %cst_22 = arith.constant dense<0xFF800000> : vector<16xf32>
    %57 = vector.multi_reduction <maximumf>, %56, %cst_22 [1] : vector<16x16xf32> to vector<16xf32>
    %58 = vector.shape_cast %57 : vector<16xf32> to vector<16x1xf32>
    %59 = vector.broadcast %58 : vector<16x1xf32> to vector<16x16xf32>
    %60 = arith.subf %56, %59 : vector<16x16xf32>
    %61 = math.exp %60 : vector<16x16xf32>
    %cst_23 = arith.constant dense<0.000000e+00> : vector<16xf32>
    %62 = vector.multi_reduction <add>, %61, %cst_23 [1] : vector<16x16xf32> to vector<16xf32>
    %63 = vector.shape_cast %62 : vector<16xf32> to vector<16x1xf32>
    %64 = tpu.reciprocal %63 {approx = true} : vector<16x1xf32> -> vector<16x1xf32>
    %65 = vector.broadcast %64 : vector<16x1xf32> to vector<16x16xf32>
    %66 = arith.mulf %61, %65 : vector<16x16xf32>
    %67 = arith.truncf %66 : vector<16x16xf32> to vector<16x16xbf16>
    %68 = arith.truncf %51 : vector<16x32xf32> to vector<16x32xbf16>
    %cst_24 = arith.constant dense<0.000000e+00> : vector<16x32xf32>
    %69 = tpu.matmul %67, %68, %cst_24 {dimension_numbers = #tpu.dot_dimension_numbers<[1], [0], [0], [1], [0, 0, 1, 1], [], []>} : vector<16x16xbf16>, vector<16x32xbf16>, vector<16x32xf32> -> vector<16x32xf32>
    %70 = arith.truncf %69 : vector<16x32xf32> to vector<16x32xbf16>
    %c0_25 = arith.constant 0 : index
    %c0_26 = arith.constant 0 : index
    %c0_27 = arith.constant 0 : index
    %71 = vector.load %arg3[%c0_25, %c0_26, %c0_27] : memref<4x32x128xbf16, #tpu.memory_space<vmem>>, vector<1x32x128xbf16>
    %72 = vector.shape_cast %71 : vector<1x32x128xbf16> to vector<32x128xbf16>
    %cst_28 = arith.constant dense<0.000000e+00> : vector<16x128xf32>
    %73 = tpu.matmul %70, %72, %cst_28 {dimension_numbers = #tpu.dot_dimension_numbers<[1], [0], [0], [1], [0, 0, 1, 1], [], []>} : vector<16x32xbf16>, vector<32x128xbf16>, vector<16x128xf32> -> vector<16x128xf32>
    %c1 = arith.constant 1 : index
    %c0_29 = arith.constant 0 : index
    %c0_30 = arith.constant 0 : index
    %74 = vector.load %arg2[%c1, %c0_29, %c0_30] : memref<12x128x32xbf16, #tpu.memory_space<vmem>>, vector<1x128x32xbf16>
    %75 = vector.shape_cast %74 : vector<1x128x32xbf16> to vector<128x32xbf16>
    %cst_31 = arith.constant dense<0.000000e+00> : vector<16x32xf32>
    %76 = tpu.matmul %42, %75, %cst_31 {dimension_numbers = #tpu.dot_dimension_numbers<[1], [0], [0], [1], [0, 0, 1, 1], [], []>} : vector<16x128xbf16>, vector<128x32xbf16>, vector<16x32xf32> -> vector<16x32xf32>
    %c5 = arith.constant 5 : index
    %c0_32 = arith.constant 0 : index
    %c0_33 = arith.constant 0 : index
    %77 = vector.load %arg2[%c5, %c0_32, %c0_33] : memref<12x128x32xbf16, #tpu.memory_space<vmem>>, vector<1x128x32xbf16>
    %78 = vector.shape_cast %77 : vector<1x128x32xbf16> to vector<128x32xbf16>
    %cst_34 = arith.constant dense<0.000000e+00> : vector<16x32xf32>
    %79 = tpu.matmul %42, %78, %cst_34 {dimension_numbers = #tpu.dot_dimension_numbers<[1], [0], [0], [1], [0, 0, 1, 1], [], []>} : vector<16x128xbf16>, vector<128x32xbf16>, vector<16x32xf32> -> vector<16x32xf32>
    %c9 = arith.constant 9 : index
    %c0_35 = arith.constant 0 : index
    %c0_36 = arith.constant 0 : index
    %80 = vector.load %arg2[%c9, %c0_35, %c0_36] : memref<12x128x32xbf16, #tpu.memory_space<vmem>>, vector<1x128x32xbf16>
    %81 = vector.shape_cast %80 : vector<1x128x32xbf16> to vector<128x32xbf16>
    %cst_37 = arith.constant dense<0.000000e+00> : vector<16x32xf32>
    %82 = tpu.matmul %42, %81, %cst_37 {dimension_numbers = #tpu.dot_dimension_numbers<[1], [0], [0], [1], [0, 0, 1, 1], [], []>} : vector<16x128xbf16>, vector<128x32xbf16>, vector<16x32xf32> -> vector<16x32xf32>
    %83 = arith.truncf %76 : vector<16x32xf32> to vector<16x32xbf16>
    %84 = arith.truncf %79 : vector<16x32xf32> to vector<16x32xbf16>
    %cst_38 = arith.constant dense<0.000000e+00> : vector<16x16xf32>
    %85 = tpu.matmul %83, %84, %cst_38 {dimension_numbers = #tpu.dot_dimension_numbers<[1], [1], [0], [0], [0, 0, 1, 0], [], []>} : vector<16x32xbf16>, vector<16x32xbf16>, vector<16x16xf32> -> vector<16x16xf32>
    %cst_39 = arith.constant -1.000000e+09 : f32
    %86 = vector.broadcast %cst_39 : f32 to vector<16x16xf32>
    %87 = arith.select %28, %85, %86 : vector<16x16xi1>, vector<16x16xf32>
    %cst_40 = arith.constant dense<0xFF800000> : vector<16xf32>
    %88 = vector.multi_reduction <maximumf>, %87, %cst_40 [1] : vector<16x16xf32> to vector<16xf32>
    %89 = vector.shape_cast %88 : vector<16xf32> to vector<16x1xf32>
    %90 = vector.broadcast %89 : vector<16x1xf32> to vector<16x16xf32>
    %91 = arith.subf %87, %90 : vector<16x16xf32>
    %92 = math.exp %91 : vector<16x16xf32>
    %cst_41 = arith.constant dense<0.000000e+00> : vector<16xf32>
    %93 = vector.multi_reduction <add>, %92, %cst_41 [1] : vector<16x16xf32> to vector<16xf32>
    %94 = vector.shape_cast %93 : vector<16xf32> to vector<16x1xf32>
    %95 = tpu.reciprocal %94 {approx = true} : vector<16x1xf32> -> vector<16x1xf32>
    %96 = vector.broadcast %95 : vector<16x1xf32> to vector<16x16xf32>
    %97 = arith.mulf %92, %96 : vector<16x16xf32>
    %98 = arith.truncf %97 : vector<16x16xf32> to vector<16x16xbf16>
    %99 = arith.truncf %82 : vector<16x32xf32> to vector<16x32xbf16>
    %cst_42 = arith.constant dense<0.000000e+00> : vector<16x32xf32>
    %100 = tpu.matmul %98, %99, %cst_42 {dimension_numbers = #tpu.dot_dimension_numbers<[1], [0], [0], [1], [0, 0, 1, 1], [], []>} : vector<16x16xbf16>, vector<16x32xbf16>, vector<16x32xf32> -> vector<16x32xf32>
    %101 = arith.truncf %100 : vector<16x32xf32> to vector<16x32xbf16>
    %c1_43 = arith.constant 1 : index
    %c0_44 = arith.constant 0 : index
    %c0_45 = arith.constant 0 : index
    %102 = vector.load %arg3[%c1_43, %c0_44, %c0_45] : memref<4x32x128xbf16, #tpu.memory_space<vmem>>, vector<1x32x128xbf16>
    %103 = vector.shape_cast %102 : vector<1x32x128xbf16> to vector<32x128xbf16>
    %cst_46 = arith.constant dense<0.000000e+00> : vector<16x128xf32>
    %104 = tpu.matmul %101, %103, %cst_46 {dimension_numbers = #tpu.dot_dimension_numbers<[1], [0], [0], [1], [0, 0, 1, 1], [], []>} : vector<16x32xbf16>, vector<32x128xbf16>, vector<16x128xf32> -> vector<16x128xf32>
    %105 = arith.addf %73, %104 : vector<16x128xf32>
    %c2 = arith.constant 2 : index
    %c0_47 = arith.constant 0 : index
    %c0_48 = arith.constant 0 : index
    %106 = vector.load %arg2[%c2, %c0_47, %c0_48] : memref<12x128x32xbf16, #tpu.memory_space<vmem>>, vector<1x128x32xbf16>
    %107 = vector.shape_cast %106 : vector<1x128x32xbf16> to vector<128x32xbf16>
    %cst_49 = arith.constant dense<0.000000e+00> : vector<16x32xf32>
    %108 = tpu.matmul %42, %107, %cst_49 {dimension_numbers = #tpu.dot_dimension_numbers<[1], [0], [0], [1], [0, 0, 1, 1], [], []>} : vector<16x128xbf16>, vector<128x32xbf16>, vector<16x32xf32> -> vector<16x32xf32>
    %c6 = arith.constant 6 : index
    %c0_50 = arith.constant 0 : index
    %c0_51 = arith.constant 0 : index
    %109 = vector.load %arg2[%c6, %c0_50, %c0_51] : memref<12x128x32xbf16, #tpu.memory_space<vmem>>, vector<1x128x32xbf16>
    %110 = vector.shape_cast %109 : vector<1x128x32xbf16> to vector<128x32xbf16>
    %cst_52 = arith.constant dense<0.000000e+00> : vector<16x32xf32>
    %111 = tpu.matmul %42, %110, %cst_52 {dimension_numbers = #tpu.dot_dimension_numbers<[1], [0], [0], [1], [0, 0, 1, 1], [], []>} : vector<16x128xbf16>, vector<128x32xbf16>, vector<16x32xf32> -> vector<16x32xf32>
    %c10 = arith.constant 10 : index
    %c0_53 = arith.constant 0 : index
    %c0_54 = arith.constant 0 : index
    %112 = vector.load %arg2[%c10, %c0_53, %c0_54] : memref<12x128x32xbf16, #tpu.memory_space<vmem>>, vector<1x128x32xbf16>
    %113 = vector.shape_cast %112 : vector<1x128x32xbf16> to vector<128x32xbf16>
    %cst_55 = arith.constant dense<0.000000e+00> : vector<16x32xf32>
    %114 = tpu.matmul %42, %113, %cst_55 {dimension_numbers = #tpu.dot_dimension_numbers<[1], [0], [0], [1], [0, 0, 1, 1], [], []>} : vector<16x128xbf16>, vector<128x32xbf16>, vector<16x32xf32> -> vector<16x32xf32>
    %115 = arith.truncf %108 : vector<16x32xf32> to vector<16x32xbf16>
    %116 = arith.truncf %111 : vector<16x32xf32> to vector<16x32xbf16>
    %cst_56 = arith.constant dense<0.000000e+00> : vector<16x16xf32>
    %117 = tpu.matmul %115, %116, %cst_56 {dimension_numbers = #tpu.dot_dimension_numbers<[1], [1], [0], [0], [0, 0, 1, 0], [], []>} : vector<16x32xbf16>, vector<16x32xbf16>, vector<16x16xf32> -> vector<16x16xf32>
    %cst_57 = arith.constant -1.000000e+09 : f32
    %118 = vector.broadcast %cst_57 : f32 to vector<16x16xf32>
    %119 = arith.select %28, %117, %118 : vector<16x16xi1>, vector<16x16xf32>
    %cst_58 = arith.constant dense<0xFF800000> : vector<16xf32>
    %120 = vector.multi_reduction <maximumf>, %119, %cst_58 [1] : vector<16x16xf32> to vector<16xf32>
    %121 = vector.shape_cast %120 : vector<16xf32> to vector<16x1xf32>
    %122 = vector.broadcast %121 : vector<16x1xf32> to vector<16x16xf32>
    %123 = arith.subf %119, %122 : vector<16x16xf32>
    %124 = math.exp %123 : vector<16x16xf32>
    %cst_59 = arith.constant dense<0.000000e+00> : vector<16xf32>
    %125 = vector.multi_reduction <add>, %124, %cst_59 [1] : vector<16x16xf32> to vector<16xf32>
    %126 = vector.shape_cast %125 : vector<16xf32> to vector<16x1xf32>
    %127 = tpu.reciprocal %126 {approx = true} : vector<16x1xf32> -> vector<16x1xf32>
    %128 = vector.broadcast %127 : vector<16x1xf32> to vector<16x16xf32>
    %129 = arith.mulf %124, %128 : vector<16x16xf32>
    %130 = arith.truncf %129 : vector<16x16xf32> to vector<16x16xbf16>
    %131 = arith.truncf %114 : vector<16x32xf32> to vector<16x32xbf16>
    %cst_60 = arith.constant dense<0.000000e+00> : vector<16x32xf32>
    %132 = tpu.matmul %130, %131, %cst_60 {dimension_numbers = #tpu.dot_dimension_numbers<[1], [0], [0], [1], [0, 0, 1, 1], [], []>} : vector<16x16xbf16>, vector<16x32xbf16>, vector<16x32xf32> -> vector<16x32xf32>
    %133 = arith.truncf %132 : vector<16x32xf32> to vector<16x32xbf16>
    %c2_61 = arith.constant 2 : index
    %c0_62 = arith.constant 0 : index
    %c0_63 = arith.constant 0 : index
    %134 = vector.load %arg3[%c2_61, %c0_62, %c0_63] : memref<4x32x128xbf16, #tpu.memory_space<vmem>>, vector<1x32x128xbf16>
    %135 = vector.shape_cast %134 : vector<1x32x128xbf16> to vector<32x128xbf16>
    %cst_64 = arith.constant dense<0.000000e+00> : vector<16x128xf32>
    %136 = tpu.matmul %133, %135, %cst_64 {dimension_numbers = #tpu.dot_dimension_numbers<[1], [0], [0], [1], [0, 0, 1, 1], [], []>} : vector<16x32xbf16>, vector<32x128xbf16>, vector<16x128xf32> -> vector<16x128xf32>
    %137 = arith.addf %105, %136 : vector<16x128xf32>
    %c3 = arith.constant 3 : index
    %c0_65 = arith.constant 0 : index
    %c0_66 = arith.constant 0 : index
    %138 = vector.load %arg2[%c3, %c0_65, %c0_66] : memref<12x128x32xbf16, #tpu.memory_space<vmem>>, vector<1x128x32xbf16>
    %139 = vector.shape_cast %138 : vector<1x128x32xbf16> to vector<128x32xbf16>
    %cst_67 = arith.constant dense<0.000000e+00> : vector<16x32xf32>
    %140 = tpu.matmul %42, %139, %cst_67 {dimension_numbers = #tpu.dot_dimension_numbers<[1], [0], [0], [1], [0, 0, 1, 1], [], []>} : vector<16x128xbf16>, vector<128x32xbf16>, vector<16x32xf32> -> vector<16x32xf32>
    %c7 = arith.constant 7 : index
    %c0_68 = arith.constant 0 : index
    %c0_69 = arith.constant 0 : index
    %141 = vector.load %arg2[%c7, %c0_68, %c0_69] : memref<12x128x32xbf16, #tpu.memory_space<vmem>>, vector<1x128x32xbf16>
    %142 = vector.shape_cast %141 : vector<1x128x32xbf16> to vector<128x32xbf16>
    %cst_70 = arith.constant dense<0.000000e+00> : vector<16x32xf32>
    %143 = tpu.matmul %42, %142, %cst_70 {dimension_numbers = #tpu.dot_dimension_numbers<[1], [0], [0], [1], [0, 0, 1, 1], [], []>} : vector<16x128xbf16>, vector<128x32xbf16>, vector<16x32xf32> -> vector<16x32xf32>
    %c11 = arith.constant 11 : index
    %c0_71 = arith.constant 0 : index
    %c0_72 = arith.constant 0 : index
    %144 = vector.load %arg2[%c11, %c0_71, %c0_72] : memref<12x128x32xbf16, #tpu.memory_space<vmem>>, vector<1x128x32xbf16>
    %145 = vector.shape_cast %144 : vector<1x128x32xbf16> to vector<128x32xbf16>
    %cst_73 = arith.constant dense<0.000000e+00> : vector<16x32xf32>
    %146 = tpu.matmul %42, %145, %cst_73 {dimension_numbers = #tpu.dot_dimension_numbers<[1], [0], [0], [1], [0, 0, 1, 1], [], []>} : vector<16x128xbf16>, vector<128x32xbf16>, vector<16x32xf32> -> vector<16x32xf32>
    %147 = arith.truncf %140 : vector<16x32xf32> to vector<16x32xbf16>
    %148 = arith.truncf %143 : vector<16x32xf32> to vector<16x32xbf16>
    %cst_74 = arith.constant dense<0.000000e+00> : vector<16x16xf32>
    %149 = tpu.matmul %147, %148, %cst_74 {dimension_numbers = #tpu.dot_dimension_numbers<[1], [1], [0], [0], [0, 0, 1, 0], [], []>} : vector<16x32xbf16>, vector<16x32xbf16>, vector<16x16xf32> -> vector<16x16xf32>
    %cst_75 = arith.constant -1.000000e+09 : f32
    %150 = vector.broadcast %cst_75 : f32 to vector<16x16xf32>
    %151 = arith.select %28, %149, %150 : vector<16x16xi1>, vector<16x16xf32>
    %cst_76 = arith.constant dense<0xFF800000> : vector<16xf32>
    %152 = vector.multi_reduction <maximumf>, %151, %cst_76 [1] : vector<16x16xf32> to vector<16xf32>
    %153 = vector.shape_cast %152 : vector<16xf32> to vector<16x1xf32>
    %154 = vector.broadcast %153 : vector<16x1xf32> to vector<16x16xf32>
    %155 = arith.subf %151, %154 : vector<16x16xf32>
    %156 = math.exp %155 : vector<16x16xf32>
    %cst_77 = arith.constant dense<0.000000e+00> : vector<16xf32>
    %157 = vector.multi_reduction <add>, %156, %cst_77 [1] : vector<16x16xf32> to vector<16xf32>
    %158 = vector.shape_cast %157 : vector<16xf32> to vector<16x1xf32>
    %159 = tpu.reciprocal %158 {approx = true} : vector<16x1xf32> -> vector<16x1xf32>
    %160 = vector.broadcast %159 : vector<16x1xf32> to vector<16x16xf32>
    %161 = arith.mulf %156, %160 : vector<16x16xf32>
    %162 = arith.truncf %161 : vector<16x16xf32> to vector<16x16xbf16>
    %163 = arith.truncf %146 : vector<16x32xf32> to vector<16x32xbf16>
    %cst_78 = arith.constant dense<0.000000e+00> : vector<16x32xf32>
    %164 = tpu.matmul %162, %163, %cst_78 {dimension_numbers = #tpu.dot_dimension_numbers<[1], [0], [0], [1], [0, 0, 1, 1], [], []>} : vector<16x16xbf16>, vector<16x32xbf16>, vector<16x32xf32> -> vector<16x32xf32>
    %165 = arith.truncf %164 : vector<16x32xf32> to vector<16x32xbf16>
    %c3_79 = arith.constant 3 : index
    %c0_80 = arith.constant 0 : index
    %c0_81 = arith.constant 0 : index
    %166 = vector.load %arg3[%c3_79, %c0_80, %c0_81] : memref<4x32x128xbf16, #tpu.memory_space<vmem>>, vector<1x32x128xbf16>
    %167 = vector.shape_cast %166 : vector<1x32x128xbf16> to vector<32x128xbf16>
    %cst_82 = arith.constant dense<0.000000e+00> : vector<16x128xf32>
    %168 = tpu.matmul %165, %167, %cst_82 {dimension_numbers = #tpu.dot_dimension_numbers<[1], [0], [0], [1], [0, 0, 1, 1], [], []>} : vector<16x32xbf16>, vector<32x128xbf16>, vector<16x128xf32> -> vector<16x128xf32>
    %169 = arith.addf %137, %168 : vector<16x128xf32>
    %170 = arith.addf %1, %169 : vector<16x128xf32>
    %c0_83 = arith.constant 0 : index
    %c0_84 = arith.constant 0 : index
    %171 = vector.load %arg4[%c0_83, %c0_84] : memref<1x128xf32, #tpu.memory_space<vmem>>, vector<1x128xf32>
    %172 = arith.mulf %170, %170 : vector<16x128xf32>
    %cst_85 = arith.constant dense<0.000000e+00> : vector<16xf32>
    %173 = vector.multi_reduction <add>, %172, %cst_85 [1] : vector<16x128xf32> to vector<16xf32>
    %174 = vector.shape_cast %173 : vector<16xf32> to vector<16x1xf32>
    %cst_86 = arith.constant 1.280000e+02 : f32
    %175 = vector.broadcast %cst_86 : f32 to vector<16x1xf32>
    %176 = arith.divf %174, %175 : vector<16x1xf32>
    %cst_87 = arith.constant 9.99999997E-7 : f32
    %177 = vector.broadcast %cst_87 : f32 to vector<16x1xf32>
    %178 = arith.addf %176, %177 : vector<16x1xf32>
    %179 = math.rsqrt %178 : vector<16x1xf32>
    %180 = vector.broadcast %179 : vector<16x1xf32> to vector<16x128xf32>
    %181 = arith.mulf %170, %180 : vector<16x128xf32>
    %182 = vector.broadcast %171 : vector<1x128xf32> to vector<16x128xf32>
    %183 = arith.mulf %181, %182 : vector<16x128xf32>
    %184 = arith.truncf %183 : vector<16x128xf32> to vector<16x128xbf16>
    %c0_88 = arith.constant 0 : index
    %c0_89 = arith.constant 0 : index
    %185 = vector.load %arg5[%c0_88, %c0_89] : memref<128x512xbf16, #tpu.memory_space<vmem>>, vector<128x512xbf16>
    %cst_90 = arith.constant dense<0.000000e+00> : vector<16x512xf32>
    %186 = tpu.matmul %184, %185, %cst_90 {dimension_numbers = #tpu.dot_dimension_numbers<[1], [0], [0], [1], [0, 0, 1, 1], [], []>} : vector<16x128xbf16>, vector<128x512xbf16>, vector<16x512xf32> -> vector<16x512xf32>
    %187 = vector.extract_strided_slice %186 {offsets = [0, 0], sizes = [16, 256], strides = [1, 1]} : vector<16x512xf32> to vector<16x256xf32>
    %188 = vector.extract_strided_slice %186 {offsets = [0, 256], sizes = [16, 256], strides = [1, 1]} : vector<16x512xf32> to vector<16x256xf32>
    %189 = arith.negf %187 : vector<16x256xf32>
    %190 = math.exp %189 : vector<16x256xf32>
    %cst_91 = arith.constant 1.000000e+00 : f32
    %191 = vector.broadcast %cst_91 : f32 to vector<16x256xf32>
    %192 = arith.addf %191, %190 : vector<16x256xf32>
    %193 = arith.divf %191, %192 : vector<16x256xf32>
    %194 = arith.mulf %187, %193 : vector<16x256xf32>
    %195 = arith.mulf %194, %188 : vector<16x256xf32>
    %196 = arith.truncf %195 : vector<16x256xf32> to vector<16x256xbf16>
    %c0_92 = arith.constant 0 : index
    %c0_93 = arith.constant 0 : index
    %197 = vector.load %arg6[%c0_92, %c0_93] : memref<256x128xbf16, #tpu.memory_space<vmem>>, vector<256x128xbf16>
    %cst_94 = arith.constant dense<0.000000e+00> : vector<16x128xf32>
    %198 = tpu.matmul %196, %197, %cst_94 {dimension_numbers = #tpu.dot_dimension_numbers<[1], [0], [0], [1], [0, 0, 1, 1], [], []>} : vector<16x256xbf16>, vector<256x128xbf16>, vector<16x128xf32> -> vector<16x128xf32>
    %199 = arith.addf %170, %198 : vector<16x128xf32>
    %200 = arith.truncf %199 : vector<16x128xf32> to vector<16x128xbf16>
    %c0_95 = arith.constant 0 : index
    %c0_96 = arith.constant 0 : index
    %201 = vector.load %arg7[%c0_95, %c0_96] : memref<16x128xbf16, #tpu.memory_space<vmem>>, vector<16x128xbf16>
    tpu.vector_store %arg7[%c0_95, %c0_96], %200 {strides = array<i32>} : memref<16x128xbf16, #tpu.memory_space<vmem>>, vector<16x128xbf16>,
    return
  }
}

module attributes {stable_mosaic.version = 11 : i64} {
  func.func @_llama_layer_kernel(%arg0: memref<16x128xbf16, #tpu.memory_space<vmem>>, %arg1: memref<1x128xf32, #tpu.memory_space<vmem>>, %arg2: memref<12x128x32xbf16, #tpu.memory_space<vmem>>, %arg3: memref<4x32x128xbf16, #tpu.memory_space<vmem>>, %arg4: memref<1x128xf32, #tpu.memory_space<vmem>>, %arg5: memref<128x512xbf16, #tpu.memory_space<vmem>>, %arg6: memref<256x128xbf16, #tpu.memory_space<vmem>>, %arg7: memref<1x128xf32, #tpu.memory_space<vmem>>, %arg8: memref<16x128xf32, #tpu.memory_space<vmem>>) attributes {dimension_semantics = [], scalar_prefetch = 0 : i64, scratch_operands = 0 : i64, tpu.core_type = #tpu.core_type<tc>} {
    %c0 = arith.constant 0 : index
    %c0_0 = arith.constant 0 : index
    %0 = vector.load %arg0[%c0, %c0_0] : memref<16x128xbf16, #tpu.memory_space<vmem>>, vector<16x128xbf16>
    %1 = arith.extf %0 : vector<16x128xbf16> to vector<16x128xf32>
    %2 = tpu.iota {dimensions = array<i32: 0>} : vector<16x16xi32>
    %3 = tpu.iota {dimensions = array<i32: 1>} : vector<16x16xi32>
    %c0_i32 = arith.constant 0 : i32
    %4 = vector.broadcast %c0_i32 : i32 to vector<16x16xi32>
    %5 = arith.cmpi sge, %2, %4 : vector<16x16xi32>
    %c8_i32 = arith.constant 8 : i32
    %6 = vector.broadcast %c8_i32 : i32 to vector<16x16xi32>
    %7 = arith.cmpi slt, %2, %6 : vector<16x16xi32>
    %8 = arith.andi %5, %7 : vector<16x16xi1>
    %c0_i32_1 = arith.constant 0 : i32
    %9 = vector.broadcast %c0_i32_1 : i32 to vector<16x16xi32>
    %10 = arith.cmpi sge, %3, %9 : vector<16x16xi32>
    %11 = arith.andi %8, %10 : vector<16x16xi1>
    %c8_i32_2 = arith.constant 8 : i32
    %12 = vector.broadcast %c8_i32_2 : i32 to vector<16x16xi32>
    %13 = arith.cmpi slt, %3, %12 : vector<16x16xi32>
    %14 = arith.andi %11, %13 : vector<16x16xi1>
    %c8_i32_3 = arith.constant 8 : i32
    %15 = vector.broadcast %c8_i32_3 : i32 to vector<16x16xi32>
    %16 = arith.cmpi sge, %2, %15 : vector<16x16xi32>
    %c16_i32 = arith.constant 16 : i32
    %17 = vector.broadcast %c16_i32 : i32 to vector<16x16xi32>
    %18 = arith.cmpi slt, %2, %17 : vector<16x16xi32>
    %19 = arith.andi %16, %18 : vector<16x16xi1>
    %c8_i32_4 = arith.constant 8 : i32
    %20 = vector.broadcast %c8_i32_4 : i32 to vector<16x16xi32>
    %21 = arith.cmpi sge, %3, %20 : vector<16x16xi32>
    %22 = arith.andi %19, %21 : vector<16x16xi1>
    %c16_i32_5 = arith.constant 16 : i32
    %23 = vector.broadcast %c16_i32_5 : i32 to vector<16x16xi32>
    %24 = arith.cmpi slt, %3, %23 : vector<16x16xi32>
    %25 = arith.andi %22, %24 : vector<16x16xi1>
    %26 = arith.ori %14, %25 : vector<16x16xi1>
    %27 = arith.cmpi sge, %2, %3 : vector<16x16xi32>
    %28 = arith.andi %26, %27 : vector<16x16xi1>
    %c0_6 = arith.constant 0 : index
    %c0_7 = arith.constant 0 : index
    %29 = vector.load %arg1[%c0_6, %c0_7] : memref<1x128xf32, #tpu.memory_space<vmem>>, vector<1x128xf32>
    %30 = arith.mulf %1, %1 : vector<16x128xf32>
    %cst = arith.constant dense<0.000000e+00> : vector<16xf32>
    %31 = vector.multi_reduction <add>, %30, %cst [1] : vector<16x128xf32> to vector<16xf32>
    %32 = vector.shape_cast %31 : vector<16xf32> to vector<16x1xf32>
    %cst_8 = arith.constant 1.280000e+02 : f32
    %33 = vector.broadcast %cst_8 : f32 to vector<16x1xf32>
    %34 = arith.divf %32, %33 : vector<16x1xf32>
    %cst_9 = arith.constant 9.99999997E-7 : f32
    %35 = vector.broadcast %cst_9 : f32 to vector<16x1xf32>
    %36 = arith.addf %34, %35 : vector<16x1xf32>
    %37 = math.rsqrt %36 : vector<16x1xf32>
    %38 = vector.broadcast %37 : vector<16x1xf32> to vector<16x128xf32>
    %39 = arith.mulf %1, %38 : vector<16x128xf32>
    %40 = vector.broadcast %29 : vector<1x128xf32> to vector<16x128xf32>
    %41 = arith.mulf %39, %40 : vector<16x128xf32>
    %42 = arith.truncf %41 : vector<16x128xf32> to vector<16x128xbf16>
    %c0_10 = arith.constant 0 : index
    %c0_11 = arith.constant 0 : index
    %c0_12 = arith.constant 0 : index
    %43 = vector.load %arg2[%c0_10, %c0_11, %c0_12] : memref<12x128x32xbf16, #tpu.memory_space<vmem>>, vector<1x128x32xbf16>
    %44 = vector.shape_cast %43 : vector<1x128x32xbf16> to vector<128x32xbf16>
    %cst_13 = arith.constant dense<0.000000e+00> : vector<16x32xf32>
    %45 = tpu.matmul %42, %44, %cst_13 {dimension_numbers = #tpu.dot_dimension_numbers<[1], [0], [0], [1], [0, 0, 1, 1], [], []>} : vector<16x128xbf16>, vector<128x32xbf16>, vector<16x32xf32> -> vector<16x32xf32>
    %c4 = arith.constant 4 : index
    %c0_14 = arith.constant 0 : index
    %c0_15 = arith.constant 0 : index
    %46 = vector.load %arg2[%c4, %c0_14, %c0_15] : memref<12x128x32xbf16, #tpu.memory_space<vmem>>, vector<1x128x32xbf16>
    %47 = vector.shape_cast %46 : vector<1x128x32xbf16> to vector<128x32xbf16>
    %cst_16 = arith.constant dense<0.000000e+00> : vector<16x32xf32>
    %48 = tpu.matmul %42, %47, %cst_16 {dimension_numbers = #tpu.dot_dimension_numbers<[1], [0], [0], [1], [0, 0, 1, 1], [], []>} : vector<16x128xbf16>, vector<128x32xbf16>, vector<16x32xf32> -> vector<16x32xf32>
    %c8 = arith.constant 8 : index
    %c0_17 = arith.constant 0 : index
    %c0_18 = arith.constant 0 : index
    %49 = vector.load %arg2[%c8, %c0_17, %c0_18] : memref<12x128x32xbf16, #tpu.memory_space<vmem>>, vector<1x128x32xbf16>
    %50 = vector.shape_cast %49 : vector<1x128x32xbf16> to vector<128x32xbf16>
    %cst_19 = arith.constant dense<0.000000e+00> : vector<16x32xf32>
    %51 = tpu.matmul %42, %50, %cst_19 {dimension_numbers = #tpu.dot_dimension_numbers<[1], [0], [0], [1], [0, 0, 1, 1], [], []>} : vector<16x128xbf16>, vector<128x32xbf16>, vector<16x32xf32> -> vector<16x32xf32>
    %52 = arith.truncf %45 : vector<16x32xf32> to vector<16x32xbf16>
    %53 = arith.truncf %48 : vector<16x32xf32> to vector<16x32xbf16>
    %cst_20 = arith.constant dense<0.000000e+00> : vector<16x16xf32>
    %54 = tpu.matmul %52, %53, %cst_20 {dimension_numbers = #tpu.dot_dimension_numbers<[1], [1], [0], [0], [0, 0, 1, 0], [], []>} : vector<16x32xbf16>, vector<16x32xbf16>, vector<16x16xf32> -> vector<16x16xf32>
    %cst_21 = arith.constant -1.000000e+09 : f32
    %55 = vector.broadcast %cst_21 : f32 to vector<16x16xf32>
    %56 = arith.select %28, %54, %55 : vector<16x16xi1>, vector<16x16xf32>
    %cst_22 = arith.constant dense<0xFF800000> : vector<16xf32>
    %57 = vector.multi_reduction <maximumf>, %56, %cst_22 [1] : vector<16x16xf32> to vector<16xf32>
    %58 = vector.shape_cast %57 : vector<16xf32> to vector<16x1xf32>
    %59 = vector.broadcast %58 : vector<16x1xf32> to vector<16x16xf32>
    %60 = arith.subf %56, %59 : vector<16x16xf32>
    %61 = math.exp %60 : vector<16x16xf32>
    %cst_23 = arith.constant dense<0.000000e+00> : vector<16xf32>
    %62 = vector.multi_reduction <add>, %61, %cst_23 [1] : vector<16x16xf32> to vector<16xf32>
    %63 = vector.shape_cast %62 : vector<16xf32> to vector<16x1xf32>
    %64 = tpu.reciprocal %63 {approx = true} : vector<16x1xf32> -> vector<16x1xf32>
    %65 = vector.broadcast %64 : vector<16x1xf32> to vector<16x16xf32>
    %66 = arith.mulf %61, %65 : vector<16x16xf32>
    %67 = arith.truncf %66 : vector<16x16xf32> to vector<16x16xbf16>
    %68 = arith.truncf %51 : vector<16x32xf32> to vector<16x32xbf16>
    %cst_24 = arith.constant dense<0.000000e+00> : vector<16x32xf32>
    %69 = tpu.matmul %67, %68, %cst_24 {dimension_numbers = #tpu.dot_dimension_numbers<[1], [0], [0], [1], [0, 0, 1, 1], [], []>} : vector<16x16xbf16>, vector<16x32xbf16>, vector<16x32xf32> -> vector<16x32xf32>
    %70 = arith.truncf %69 : vector<16x32xf32> to vector<16x32xbf16>
    %c0_25 = arith.constant 0 : index
    %c0_26 = arith.constant 0 : index
    %c0_27 = arith.constant 0 : index
    %71 = vector.load %arg3[%c0_25, %c0_26, %c0_27] : memref<4x32x128xbf16, #tpu.memory_space<vmem>>, vector<1x32x128xbf16>
    %72 = vector.shape_cast %71 : vector<1x32x128xbf16> to vector<32x128xbf16>
    %cst_28 = arith.constant dense<0.000000e+00> : vector<16x128xf32>
    %73 = tpu.matmul %70, %72, %cst_28 {dimension_numbers = #tpu.dot_dimension_numbers<[1], [0], [0], [1], [0, 0, 1, 1], [], []>} : vector<16x32xbf16>, vector<32x128xbf16>, vector<16x128xf32> -> vector<16x128xf32>
    %c1 = arith.constant 1 : index
    %c0_29 = arith.constant 0 : index
    %c0_30 = arith.constant 0 : index
    %74 = vector.load %arg2[%c1, %c0_29, %c0_30] : memref<12x128x32xbf16, #tpu.memory_space<vmem>>, vector<1x128x32xbf16>
    %75 = vector.shape_cast %74 : vector<1x128x32xbf16> to vector<128x32xbf16>
    %cst_31 = arith.constant dense<0.000000e+00> : vector<16x32xf32>
    %76 = tpu.matmul %42, %75, %cst_31 {dimension_numbers = #tpu.dot_dimension_numbers<[1], [0], [0], [1], [0, 0, 1, 1], [], []>} : vector<16x128xbf16>, vector<128x32xbf16>, vector<16x32xf32> -> vector<16x32xf32>
    %c5 = arith.constant 5 : index
    %c0_32 = arith.constant 0 : index
    %c0_33 = arith.constant 0 : index
    %77 = vector.load %arg2[%c5, %c0_32, %c0_33] : memref<12x128x32xbf16, #tpu.memory_space<vmem>>, vector<1x128x32xbf16>
    %78 = vector.shape_cast %77 : vector<1x128x32xbf16> to vector<128x32xbf16>
    %cst_34 = arith.constant dense<0.000000e+00> : vector<16x32xf32>
    %79 = tpu.matmul %42, %78, %cst_34 {dimension_numbers = #tpu.dot_dimension_numbers<[1], [0], [0], [1], [0, 0, 1, 1], [], []>} : vector<16x128xbf16>, vector<128x32xbf16>, vector<16x32xf32> -> vector<16x32xf32>
    %c9 = arith.constant 9 : index
    %c0_35 = arith.constant 0 : index
    %c0_36 = arith.constant 0 : index
    %80 = vector.load %arg2[%c9, %c0_35, %c0_36] : memref<12x128x32xbf16, #tpu.memory_space<vmem>>, vector<1x128x32xbf16>
    %81 = vector.shape_cast %80 : vector<1x128x32xbf16> to vector<128x32xbf16>
    %cst_37 = arith.constant dense<0.000000e+00> : vector<16x32xf32>
    %82 = tpu.matmul %42, %81, %cst_37 {dimension_numbers = #tpu.dot_dimension_numbers<[1], [0], [0], [1], [0, 0, 1, 1], [], []>} : vector<16x128xbf16>, vector<128x32xbf16>, vector<16x32xf32> -> vector<16x32xf32>
    %83 = arith.truncf %76 : vector<16x32xf32> to vector<16x32xbf16>
    %84 = arith.truncf %79 : vector<16x32xf32> to vector<16x32xbf16>
    %cst_38 = arith.constant dense<0.000000e+00> : vector<16x16xf32>
    %85 = tpu.matmul %83, %84, %cst_38 {dimension_numbers = #tpu.dot_dimension_numbers<[1], [1], [0], [0], [0, 0, 1, 0], [], []>} : vector<16x32xbf16>, vector<16x32xbf16>, vector<16x16xf32> -> vector<16x16xf32>
    %cst_39 = arith.constant -1.000000e+09 : f32
    %86 = vector.broadcast %cst_39 : f32 to vector<16x16xf32>
    %87 = arith.select %28, %85, %86 : vector<16x16xi1>, vector<16x16xf32>
    %cst_40 = arith.constant dense<0xFF800000> : vector<16xf32>
    %88 = vector.multi_reduction <maximumf>, %87, %cst_40 [1] : vector<16x16xf32> to vector<16xf32>
    %89 = vector.shape_cast %88 : vector<16xf32> to vector<16x1xf32>
    %90 = vector.broadcast %89 : vector<16x1xf32> to vector<16x16xf32>
    %91 = arith.subf %87, %90 : vector<16x16xf32>
    %92 = math.exp %91 : vector<16x16xf32>
    %cst_41 = arith.constant dense<0.000000e+00> : vector<16xf32>
    %93 = vector.multi_reduction <add>, %92, %cst_41 [1] : vector<16x16xf32> to vector<16xf32>
    %94 = vector.shape_cast %93 : vector<16xf32> to vector<16x1xf32>
    %95 = tpu.reciprocal %94 {approx = true} : vector<16x1xf32> -> vector<16x1xf32>
    %96 = vector.broadcast %95 : vector<16x1xf32> to vector<16x16xf32>
    %97 = arith.mulf %92, %96 : vector<16x16xf32>
    %98 = arith.truncf %97 : vector<16x16xf32> to vector<16x16xbf16>
    %99 = arith.truncf %82 : vector<16x32xf32> to vector<16x32xbf16>
    %cst_42 = arith.constant dense<0.000000e+00> : vector<16x32xf32>
    %100 = tpu.matmul %98, %99, %cst_42 {dimension_numbers = #tpu.dot_dimension_numbers<[1], [0], [0], [1], [0, 0, 1, 1], [], []>} : vector<16x16xbf16>, vector<16x32xbf16>, vector<16x32xf32> -> vector<16x32xf32>
    %101 = arith.truncf %100 : vector<16x32xf32> to vector<16x32xbf16>
    %c1_43 = arith.constant 1 : index
    %c0_44 = arith.constant 0 : index
    %c0_45 = arith.constant 0 : index
    %102 = vector.load %arg3[%c1_43, %c0_44, %c0_45] : memref<4x32x128xbf16, #tpu.memory_space<vmem>>, vector<1x32x128xbf16>
    %103 = vector.shape_cast %102 : vector<1x32x128xbf16> to vector<32x128xbf16>
    %cst_46 = arith.constant dense<0.000000e+00> : vector<16x128xf32>
    %104 = tpu.matmul %101, %103, %cst_46 {dimension_numbers = #tpu.dot_dimension_numbers<[1], [0], [0], [1], [0, 0, 1, 1], [], []>} : vector<16x32xbf16>, vector<32x128xbf16>, vector<16x128xf32> -> vector<16x128xf32>
    %105 = arith.addf %73, %104 : vector<16x128xf32>
    %c2 = arith.constant 2 : index
    %c0_47 = arith.constant 0 : index
    %c0_48 = arith.constant 0 : index
    %106 = vector.load %arg2[%c2, %c0_47, %c0_48] : memref<12x128x32xbf16, #tpu.memory_space<vmem>>, vector<1x128x32xbf16>
    %107 = vector.shape_cast %106 : vector<1x128x32xbf16> to vector<128x32xbf16>
    %cst_49 = arith.constant dense<0.000000e+00> : vector<16x32xf32>
    %108 = tpu.matmul %42, %107, %cst_49 {dimension_numbers = #tpu.dot_dimension_numbers<[1], [0], [0], [1], [0, 0, 1, 1], [], []>} : vector<16x128xbf16>, vector<128x32xbf16>, vector<16x32xf32> -> vector<16x32xf32>
    %c6 = arith.constant 6 : index
    %c0_50 = arith.constant 0 : index
    %c0_51 = arith.constant 0 : index
    %109 = vector.load %arg2[%c6, %c0_50, %c0_51] : memref<12x128x32xbf16, #tpu.memory_space<vmem>>, vector<1x128x32xbf16>
    %110 = vector.shape_cast %109 : vector<1x128x32xbf16> to vector<128x32xbf16>
    %cst_52 = arith.constant dense<0.000000e+00> : vector<16x32xf32>
    %111 = tpu.matmul %42, %110, %cst_52 {dimension_numbers = #tpu.dot_dimension_numbers<[1], [0], [0], [1], [0, 0, 1, 1], [], []>} : vector<16x128xbf16>, vector<128x32xbf16>, vector<16x32xf32> -> vector<16x32xf32>
    %c10 = arith.constant 10 : index
    %c0_53 = arith.constant 0 : index
    %c0_54 = arith.constant 0 : index
    %112 = vector.load %arg2[%c10, %c0_53, %c0_54] : memref<12x128x32xbf16, #tpu.memory_space<vmem>>, vector<1x128x32xbf16>
    %113 = vector.shape_cast %112 : vector<1x128x32xbf16> to vector<128x32xbf16>
    %cst_55 = arith.constant dense<0.000000e+00> : vector<16x32xf32>
    %114 = tpu.matmul %42, %113, %cst_55 {dimension_numbers = #tpu.dot_dimension_numbers<[1], [0], [0], [1], [0, 0, 1, 1], [], []>} : vector<16x128xbf16>, vector<128x32xbf16>, vector<16x32xf32> -> vector<16x32xf32>
    %115 = arith.truncf %108 : vector<16x32xf32> to vector<16x32xbf16>
    %116 = arith.truncf %111 : vector<16x32xf32> to vector<16x32xbf16>
    %cst_56 = arith.constant dense<0.000000e+00> : vector<16x16xf32>
    %117 = tpu.matmul %115, %116, %cst_56 {dimension_numbers = #tpu.dot_dimension_numbers<[1], [1], [0], [0], [0, 0, 1, 0], [], []>} : vector<16x32xbf16>, vector<16x32xbf16>, vector<16x16xf32> -> vector<16x16xf32>
    %cst_57 = arith.constant -1.000000e+09 : f32
    %118 = vector.broadcast %cst_57 : f32 to vector<16x16xf32>
    %119 = arith.select %28, %117, %118 : vector<16x16xi1>, vector<16x16xf32>
    %cst_58 = arith.constant dense<0xFF800000> : vector<16xf32>
    %120 = vector.multi_reduction <maximumf>, %119, %cst_58 [1] : vector<16x16xf32> to vector<16xf32>
    %121 = vector.shape_cast %120 : vector<16xf32> to vector<16x1xf32>
    %122 = vector.broadcast %121 : vector<16x1xf32> to vector<16x16xf32>
    %123 = arith.subf %119, %122 : vector<16x16xf32>
    %124 = math.exp %123 : vector<16x16xf32>
    %cst_59 = arith.constant dense<0.000000e+00> : vector<16xf32>
    %125 = vector.multi_reduction <add>, %124, %cst_59 [1] : vector<16x16xf32> to vector<16xf32>
    %126 = vector.shape_cast %125 : vector<16xf32> to vector<16x1xf32>
    %127 = tpu.reciprocal %126 {approx = true} : vector<16x1xf32> -> vector<16x1xf32>
    %128 = vector.broadcast %127 : vector<16x1xf32> to vector<16x16xf32>
    %129 = arith.mulf %124, %128 : vector<16x16xf32>
    %130 = arith.truncf %129 : vector<16x16xf32> to vector<16x16xbf16>
    %131 = arith.truncf %114 : vector<16x32xf32> to vector<16x32xbf16>
    %cst_60 = arith.constant dense<0.000000e+00> : vector<16x32xf32>
    %132 = tpu.matmul %130, %131, %cst_60 {dimension_numbers = #tpu.dot_dimension_numbers<[1], [0], [0], [1], [0, 0, 1, 1], [], []>} : vector<16x16xbf16>, vector<16x32xbf16>, vector<16x32xf32> -> vector<16x32xf32>
    %133 = arith.truncf %132 : vector<16x32xf32> to vector<16x32xbf16>
    %c2_61 = arith.constant 2 : index
    %c0_62 = arith.constant 0 : index
    %c0_63 = arith.constant 0 : index
    %134 = vector.load %arg3[%c2_61, %c0_62, %c0_63] : memref<4x32x128xbf16, #tpu.memory_space<vmem>>, vector<1x32x128xbf16>
    %135 = vector.shape_cast %134 : vector<1x32x128xbf16> to vector<32x128xbf16>
    %cst_64 = arith.constant dense<0.000000e+00> : vector<16x128xf32>
    %136 = tpu.matmul %133, %135, %cst_64 {dimension_numbers = #tpu.dot_dimension_numbers<[1], [0], [0], [1], [0, 0, 1, 1], [], []>} : vector<16x32xbf16>, vector<32x128xbf16>, vector<16x128xf32> -> vector<16x128xf32>
    %137 = arith.addf %105, %136 : vector<16x128xf32>
    %c3 = arith.constant 3 : index
    %c0_65 = arith.constant 0 : index
    %c0_66 = arith.constant 0 : index
    %138 = vector.load %arg2[%c3, %c0_65, %c0_66] : memref<12x128x32xbf16, #tpu.memory_space<vmem>>, vector<1x128x32xbf16>
    %139 = vector.shape_cast %138 : vector<1x128x32xbf16> to vector<128x32xbf16>
    %cst_67 = arith.constant dense<0.000000e+00> : vector<16x32xf32>
    %140 = tpu.matmul %42, %139, %cst_67 {dimension_numbers = #tpu.dot_dimension_numbers<[1], [0], [0], [1], [0, 0, 1, 1], [], []>} : vector<16x128xbf16>, vector<128x32xbf16>, vector<16x32xf32> -> vector<16x32xf32>
    %c7 = arith.constant 7 : index
    %c0_68 = arith.constant 0 : index
    %c0_69 = arith.constant 0 : index
    %141 = vector.load %arg2[%c7, %c0_68, %c0_69] : memref<12x128x32xbf16, #tpu.memory_space<vmem>>, vector<1x128x32xbf16>
    %142 = vector.shape_cast %141 : vector<1x128x32xbf16> to vector<128x32xbf16>
    %cst_70 = arith.constant dense<0.000000e+00> : vector<16x32xf32>
    %143 = tpu.matmul %42, %142, %cst_70 {dimension_numbers = #tpu.dot_dimension_numbers<[1], [0], [0], [1], [0, 0, 1, 1], [], []>} : vector<16x128xbf16>, vector<128x32xbf16>, vector<16x32xf32> -> vector<16x32xf32>
    %c11 = arith.constant 11 : index
    %c0_71 = arith.constant 0 : index
    %c0_72 = arith.constant 0 : index
    %144 = vector.load %arg2[%c11, %c0_71, %c0_72] : memref<12x128x32xbf16, #tpu.memory_space<vmem>>, vector<1x128x32xbf16>
    %145 = vector.shape_cast %144 : vector<1x128x32xbf16> to vector<128x32xbf16>
    %cst_73 = arith.constant dense<0.000000e+00> : vector<16x32xf32>
    %146 = tpu.matmul %42, %145, %cst_73 {dimension_numbers = #tpu.dot_dimension_numbers<[1], [0], [0], [1], [0, 0, 1, 1], [], []>} : vector<16x128xbf16>, vector<128x32xbf16>, vector<16x32xf32> -> vector<16x32xf32>
    %147 = arith.truncf %140 : vector<16x32xf32> to vector<16x32xbf16>
    %148 = arith.truncf %143 : vector<16x32xf32> to vector<16x32xbf16>
    %cst_74 = arith.constant dense<0.000000e+00> : vector<16x16xf32>
    %149 = tpu.matmul %147, %148, %cst_74 {dimension_numbers = #tpu.dot_dimension_numbers<[1], [1], [0], [0], [0, 0, 1, 0], [], []>} : vector<16x32xbf16>, vector<16x32xbf16>, vector<16x16xf32> -> vector<16x16xf32>
    %cst_75 = arith.constant -1.000000e+09 : f32
    %150 = vector.broadcast %cst_75 : f32 to vector<16x16xf32>
    %151 = arith.select %28, %149, %150 : vector<16x16xi1>, vector<16x16xf32>
    %cst_76 = arith.constant dense<0xFF800000> : vector<16xf32>
    %152 = vector.multi_reduction <maximumf>, %151, %cst_76 [1] : vector<16x16xf32> to vector<16xf32>
    %153 = vector.shape_cast %152 : vector<16xf32> to vector<16x1xf32>
    %154 = vector.broadcast %153 : vector<16x1xf32> to vector<16x16xf32>
    %155 = arith.subf %151, %154 : vector<16x16xf32>
    %156 = math.exp %155 : vector<16x16xf32>
    %cst_77 = arith.constant dense<0.000000e+00> : vector<16xf32>
    %157 = vector.multi_reduction <add>, %156, %cst_77 [1] : vector<16x16xf32> to vector<16xf32>
    %158 = vector.shape_cast %157 : vector<16xf32> to vector<16x1xf32>
    %159 = tpu.reciprocal %158 {approx = true} : vector<16x1xf32> -> vector<16x1xf32>
    %160 = vector.broadcast %159 : vector<16x1xf32> to vector<16x16xf32>
    %161 = arith.mulf %156, %160 : vector<16x16xf32>
    %162 = arith.truncf %161 : vector<16x16xf32> to vector<16x16xbf16>
    %163 = arith.truncf %146 : vector<16x32xf32> to vector<16x32xbf16>
    %cst_78 = arith.constant dense<0.000000e+00> : vector<16x32xf32>
    %164 = tpu.matmul %162, %163, %cst_78 {dimension_numbers = #tpu.dot_dimension_numbers<[1], [0], [0], [1], [0, 0, 1, 1], [], []>} : vector<16x16xbf16>, vector<16x32xbf16>, vector<16x32xf32> -> vector<16x32xf32>
    %165 = arith.truncf %164 : vector<16x32xf32> to vector<16x32xbf16>
    %c3_79 = arith.constant 3 : index
    %c0_80 = arith.constant 0 : index
    %c0_81 = arith.constant 0 : index
    %166 = vector.load %arg3[%c3_79, %c0_80, %c0_81] : memref<4x32x128xbf16, #tpu.memory_space<vmem>>, vector<1x32x128xbf16>
    %167 = vector.shape_cast %166 : vector<1x32x128xbf16> to vector<32x128xbf16>
    %cst_82 = arith.constant dense<0.000000e+00> : vector<16x128xf32>
    %168 = tpu.matmul %165, %167, %cst_82 {dimension_numbers = #tpu.dot_dimension_numbers<[1], [0], [0], [1], [0, 0, 1, 1], [], []>} : vector<16x32xbf16>, vector<32x128xbf16>, vector<16x128xf32> -> vector<16x128xf32>
    %169 = arith.addf %137, %168 : vector<16x128xf32>
    %170 = arith.addf %1, %169 : vector<16x128xf32>
    %c0_83 = arith.constant 0 : index
    %c0_84 = arith.constant 0 : index
    %171 = vector.load %arg4[%c0_83, %c0_84] : memref<1x128xf32, #tpu.memory_space<vmem>>, vector<1x128xf32>
    %172 = arith.mulf %170, %170 : vector<16x128xf32>
    %cst_85 = arith.constant dense<0.000000e+00> : vector<16xf32>
    %173 = vector.multi_reduction <add>, %172, %cst_85 [1] : vector<16x128xf32> to vector<16xf32>
    %174 = vector.shape_cast %173 : vector<16xf32> to vector<16x1xf32>
    %cst_86 = arith.constant 1.280000e+02 : f32
    %175 = vector.broadcast %cst_86 : f32 to vector<16x1xf32>
    %176 = arith.divf %174, %175 : vector<16x1xf32>
    %cst_87 = arith.constant 9.99999997E-7 : f32
    %177 = vector.broadcast %cst_87 : f32 to vector<16x1xf32>
    %178 = arith.addf %176, %177 : vector<16x1xf32>
    %179 = math.rsqrt %178 : vector<16x1xf32>
    %180 = vector.broadcast %179 : vector<16x1xf32> to vector<16x128xf32>
    %181 = arith.mulf %170, %180 : vector<16x128xf32>
    %182 = vector.broadcast %171 : vector<1x128xf32> to vector<16x128xf32>
    %183 = arith.mulf %181, %182 : vector<16x128xf32>
    %184 = arith.truncf %183 : vector<16x128xf32> to vector<16x128xbf16>
    %c0_88 = arith.constant 0 : index
    %c0_89 = arith.constant 0 : index
    %185 = vector.load %arg5[%c0_88, %c0_89] : memref<128x512xbf16, #tpu.memory_space<vmem>>, vector<128x512xbf16>
    %cst_90 = arith.constant dense<0.000000e+00> : vector<16x512xf32>
    %186 = tpu.matmul %184, %185, %cst_90 {dimension_numbers = #tpu.dot_dimension_numbers<[1], [0], [0], [1], [0, 0, 1, 1], [], []>} : vector<16x128xbf16>, vector<128x512xbf16>, vector<16x512xf32> -> vector<16x512xf32>
    %187 = vector.extract_strided_slice %186 {offsets = [0, 0], sizes = [16, 256], strides = [1, 1]} : vector<16x512xf32> to vector<16x256xf32>
    %188 = vector.extract_strided_slice %186 {offsets = [0, 256], sizes = [16, 256], strides = [1, 1]} : vector<16x512xf32> to vector<16x256xf32>
    %189 = arith.negf %187 : vector<16x256xf32>
    %190 = math.exp %189 : vector<16x256xf32>
    %cst_91 = arith.constant 1.000000e+00 : f32
    %191 = vector.broadcast %cst_91 : f32 to vector<16x256xf32>
    %192 = arith.addf %191, %190 : vector<16x256xf32>
    %193 = arith.divf %191, %192 : vector<16x256xf32>
    %194 = arith.mulf %187, %193 : vector<16x256xf32>
    %195 = arith.mulf %194, %188 : vector<16x256xf32>
    %196 = arith.truncf %195 : vector<16x256xf32> to vector<16x256xbf16>
    %c0_92 = arith.constant 0 : index
    %c0_93 = arith.constant 0 : index
    %197 = vector.load %arg6[%c0_92, %c0_93] : memref<256x128xbf16, #tpu.memory_space<vmem>>, vector<256x128xbf16>
    %cst_94 = arith.constant dense<0.000000e+00> : vector<16x128xf32>
    %198 = tpu.matmul %196, %197, %cst_94 {dimension_numbers = #tpu.dot_dimension_numbers<[1], [0], [0], [1], [0, 0, 1, 1], [], []>} : vector<16x256xbf16>, vector<256x128xbf16>, vector<16x128xf32> -> vector<16x128xf32>
    %199 = arith.addf %170, %198 : vector<16x128xf32>
    %c0_95 = arith.constant 0 : index
    %c0_96 = arith.constant 0 : index
    %200 = vector.load %arg7[%c0_95, %c0_96] : memref<1x128xf32, #tpu.memory_space<vmem>>, vector<1x128xf32>
    %201 = arith.mulf %199, %199 : vector<16x128xf32>
    %cst_97 = arith.constant dense<0.000000e+00> : vector<16xf32>
    %202 = vector.multi_reduction <add>, %201, %cst_97 [1] : vector<16x128xf32> to vector<16xf32>
    %203 = vector.shape_cast %202 : vector<16xf32> to vector<16x1xf32>
    %cst_98 = arith.constant 1.280000e+02 : f32
    %204 = vector.broadcast %cst_98 : f32 to vector<16x1xf32>
    %205 = arith.divf %203, %204 : vector<16x1xf32>
    %cst_99 = arith.constant 9.99999997E-7 : f32
    %206 = vector.broadcast %cst_99 : f32 to vector<16x1xf32>
    %207 = arith.addf %205, %206 : vector<16x1xf32>
    %208 = math.rsqrt %207 : vector<16x1xf32>
    %209 = vector.broadcast %208 : vector<16x1xf32> to vector<16x128xf32>
    %210 = arith.mulf %199, %209 : vector<16x128xf32>
    %211 = vector.broadcast %200 : vector<1x128xf32> to vector<16x128xf32>
    %212 = arith.mulf %210, %211 : vector<16x128xf32>
    %c0_100 = arith.constant 0 : index
    %c0_101 = arith.constant 0 : index
    %213 = vector.load %arg8[%c0_100, %c0_101] : memref<16x128xf32, #tpu.memory_space<vmem>>, vector<16x128xf32>
    tpu.vector_store %arg8[%c0_100, %c0_101], %212 {strides = array<i32>} : memref<16x128xf32, #tpu.memory_space<vmem>>, vector<16x128xf32>,
    return
  }
}

</mosaic_0001>

<bundles_post_ra>
// kernel: llava_forward.5
= control target key start
LH: loop header
LB: loop body
LE: loop exit
PB: predicated region body
PF: predicated region fallthrough
CT: control target
= control target key end

     0   :  { %vm162_vm0 = vcmask 1040384   ;;  %vm127_vm1 = vcmask 523264   ;;  %v384_v21 = vmov 128.0   ;;  %vm256_vm3 = vcmask 1047556   ;;  %s533_s1 = inlined_call_operand.vmem [shape: bf16[192,128], index: 1, kind: input, shape index: {}]   ;;  %s534_s2 = inlined_call_operand.vmem [shape: f32[1,128], index: 2, kind: input, shape index: {}]   ;;  %s535_s3 = inlined_call_operand.vmem [shape: f32[5,128], index: 3, kind: input, shape index: {}]   ;;  %s536_s0 = inlined_call_operand.vmem [shape: bf16[8,192], index: 0, kind: input, shape index: {}]   ;;  %s537_s4 = inlined_call_operand.vmem [shape: f32[1,128], index: 4, kind: input, shape index: {}]   ;;  %s538_s5 = inlined_call_operand.vmem [shape: f32[1,128], index: 5, kind: input, shape index: {}]   ;;  %s539_s6 = inlined_call_operand.vmem [shape: bf16[10,128], index: 6, kind: output, shape index: {}]  }
   0x1   :  { %v366_v0 = vld [vmem:[%s533_s1 + $0x38] sm:$0xff]  ;;  %v365_v2 = vld [vmem:[%s533_s1 + $0x30] sm:$0xff]  ;;  %v157_v4 = vld [vmem:[%s534_s2] sm:$0x1]  ;;  %376 = vrcp.f32 %v384_v21  ;;  %vm196_vm4 = vcmask 1043456  }
   0x2   :  { %v370_v1 = vld [vmem:[%s533_s1 + $0x58] sm:$0xff]  ;;  %131 = vmatpush.bf16.msra.mxu0 %v366_v0  ;;  %v369_v3 = vld [vmem:[%s533_s1 + $0x50] sm:$0xff]  ;;  %v158_v5 = vld [vmem:[%s535_s3] sm:$0x1]  ;;  %vm229_vm8 = vsmask.f32 256 }
   0x3   :  { %148 = vmatpush.bf16.msra.mxu1 %v370_v1  ;;  %v159_v6 = vadd.f32 %v158_v5, %v157_v4  ;;  %v364_v7 = vld [vmem:[%s533_s1 + $0x28] sm:$0xff]  ;;  %v24_v9 = vld [vmem:[%s536_s0] sm:$0xff]  ;;  %v362_v14 = vld [vmem:[%s533_s1 + $0x18] sm:$0xff] }
   0x4   :  { %v368_v8 = vld [vmem:[%s533_s1 + $0x48] sm:$0xff]  ;;  %v363_v11 = vld [vmem:[%s533_s1 + $0x20] sm:$0xff]  ;;  %v51_v12 = vunpack.c.h.b16 %v24_v9  ;;  %v361_v16 = vld [vmem:[%s533_s1 + $0x10] sm:$0xff]  ;;  %v50_v18 = vunpack.c.l.b16 %v24_v9 }
   0x5   :  { %v163_v10 = vsel %vm162_vm0, %v159_v6, 0.0  ;;  %v367_v13 = vld [vmem:[%s533_s1 + $0x40] sm:$0xff]  ;;  %v360_v17 = vld [vmem:[%s533_s1 + $0x8] sm:$0xff]  ;;  %vm230_vm9 = vmand %vm162_vm0, %vm229_vm8 }
   0x6   :  { %132 = vmatpush.bf16.msra.mxu0 %v365_v2  ;;  %164 = vadd.xlane.f32.xlu0 %v163_v10  ;;  %v53_v15 = vpack.c.b16 %v51_v12, %v51_v12  ;;  %v359_v19 = vld [vmem:[%s533_s1] sm:$0xff]  ;;  %v52_v20 = vpack.c.b16 %v50_v18, %v50_v18 }
   0x7   :  { %149 = vmatpush.bf16.msra.mxu1 %v369_v3  ;;  %v377_v22 = vpop.eup %376  ;;  %v249_v31 = vld [vmem:[%s535_s3 + $0x1] sm:$0xf]  ;;  %v160_v0 = vld [vmem:[%s537_s4] sm:$0x1] }
   0x8   :  { %v167_v23 = vmul.f32 128.0, %v377_v22  ;;  %vm171_vm2 = vweird.f32 %v377_v22  ;;  %v251_v33 = vrot.slane %v249_v31, 4  ;;  %v194_v35 = vld [vmem:[%s535_s3 + $0x1] sm:$0xf]  ;;  %v161_v3 = vld [vmem:[%s538_s5] sm:$0x1] }
   0xa   :  { %133 = vmatpush.bf16.msra.mxu0 %v364_v7  ;;  %v168_v24 = vsub.f32 1.0, %v167_v23  ;;  %v372_v23 = vld [vmem:[%s537_s4] ss:$0 sm:$0xff] }
   0xb   :  { %150 = vmatpush.bf16.msra.mxu1 %v368_v8 }
   0xc   :  { %v169_v26 = vmul.f32 %v377_v22, %v168_v24 }
   0xe   :  { %134 = vmatpush.bf16.msra.mxu0 %v363_v11  ;;  %v170_v27 = vadd.f32 %v377_v22, %v169_v26  ;;  %v373_v26 = vld [vmem:[%s538_s5] ss:$0 sm:$0xff] }
   0xf   :  { %151 = vmatpush.bf16.msra.mxu1 %v367_v13 }
  0x10   :  { %v466_v29 = vsel %vm171_vm2, %v377_v22, %v170_v27 }
  0x12   :  { %135 = vmatpush.bf16.msra.mxu0 %v362_v14  ;;  %358 = vmatmul.msk.bf16.vlgmr.msra.gmra.mxu1 %vm127_vm1, %v53_v15  ;;  %vm244_vm1 = vsmask.f32 2306 }
  0x16   :  { %136 = vmatpush.bf16.msra.mxu0 %v361_v16 }
  0x1a   :  { %137 = vmatpush.bf16.msra.mxu0 %v360_v17 }
  0x1e   :  { %138 = vmatpush.bf16.msra.mxu0 %v359_v19 }
  0x21   :  { %139 = vmatmul.bf16.vlgmr.msra.gmra.mxu0 %v52_v20 }
  0x79   :  { %v165_v30 = vpop.xlane.xlu0 %164 }
  0x7a   :  { %v173_v32 = vmul.f32 %v466_v29, %v165_v30 }
  0x7c   :  { %v174_v37 = vsub.f32 %v159_v6, %v173_v32  ;;  %v231_v6 = vld [vmem:[%s539_s6] sm:$0x1] }
  0x7e   :  { %v175_v42 = vmul.f32 %v174_v37, %v174_v37 }
  0x80   :  { %v176_v44 = vsel %vm162_vm0, %v175_v42, 0.0  ;;  %vm243_vm0 = vcmask 1042432  }
  0x81   :  { %vm245_vm2 = vmand %vm243_vm0, %vm244_vm1 }
  0x8f   :  { %v153_v25 = vpop.f32.mrf.mxu1 }
  0x97   :  { %v155_v28 = vpop.f32.mrf.mxu1 }
  0x9e   :  { %v140_v34 = vpop.f32.mrf.mxu0 }
  0x9f   :  { %v154_v36 = vadd.f32 %v153_v25, %v140_v34  ;;  %v374_v34 = vld [vmem:[%s537_s4] ss:$0 sm:$0xff] }
  0xa1   :  { %v253_v38 = vadd.f32 %v251_v33, %v154_v36  ;;  %v195_v39 = vadd.f32 %v194_v35, %v154_v36 }
  0xa3   :  { %v257_v40 = vsel %vm256_vm3, %v253_v38, 0.0  ;;  %v197_v41 = vsel %vm196_vm4, %v195_v39, 0.0 }
  0xa4   :  { %258 = vadd.xlane.f32.xlu1 %v257_v40  ;;  %198 = vadd.xlane.f32.xlu0 %v197_v41 }
  0xa6   :  { %v142_v43 = vpop.f32.mrf.mxu0 }
  0xac   :  { %177 = vadd.xlane.f32.xlu1 %v176_v44 }
 0x117   :  { %v259_v45 = vpop.xlane.xlu1 %258  ;;  %v199_v46 = vpop.xlane.xlu0 %198 }
 0x118   :  { %v200_v47 = vmul.f32 %v199_v46, %v466_v29  ;;  %v260_v48 = vmul.f32 %v259_v45, %v466_v29 }
 0x11a   :  { %v201_v49 = vsub.f32 %v195_v39, %v200_v47  ;;  %v480_v51 = vsub.f32 %v253_v38, %v260_v48 }
 0x11c   :  { %v202_v50 = vmul.f32 %v201_v49, %v201_v49  ;;  %v262_v56 = vmul.f32 %v480_v51, %v480_v51 }
 0x11e   :  { %v203_v52 = vsel %vm196_vm4, %v202_v50, 0.0  ;;  %v263_v57 = vsel %vm256_vm3, %v262_v56, 0.0  ;;  %vm292_vm3 = vcmask 1042434   ;;  %vm293_vm4 = vsmask.f32 7946 }
 0x11f   :  { %v178_v53 = vpop.xlane.xlu1 %177  ;;  %204 = vadd.xlane.f32.xlu2 %v203_v52 }
 0x120   :  { %v179_v54 = vmul.f32 %v178_v53, %v466_v29 }
 0x122   :  { %v180_v55 = vadd.f32 1e-05, %v179_v54 }
 0x124   :  { %378 = vrsqrt.f32 %v180_v55  ;;  %vm187_vm5 = vweird.f32 %v180_v55 }
 0x127   :  { %264 = vadd.xlane.f32.xlu2 %v263_v57 }
 0x12a   :  { %v379_v58 = vpop.eup %378 }
 0x12b   :  { %v182_v59 = vmul.f32 %v379_v58, %v180_v55  ;;  %vm188_vm6 = vweird.f32 %v379_v58 }
 0x12c   :  { %vm189_vm7 = vmor %vm187_vm5, %vm188_vm6 }
 0x12d   :  { %v183_v60 = vmul.f32 %v379_v58, %v182_v59  ;;  %vm294_vm5 = vmand %vm292_vm3, %vm293_vm4 }
 0x12f   :  { %v184_v61 = vmul.f32 0.5, %v183_v60 }
 0x131   :  { %v185_v62 = vsub.f32 1.5, %v184_v61 }
 0x133   :  { %v186_v63 = vmul.f32 %v379_v58, %v185_v62 }
 0x135   :  { %v190_v1 = vsel %vm189_vm7, %v379_v58, %v186_v63 }
 0x136   :  { %v191_v2 = vmul.f32 %v190_v1, %v174_v37  ;;  %v375_v37 = vld [vmem:[%s538_s5] ss:$0 sm:$0xff] }
 0x138   :  { %v192_v4 = vmul.f32 %v191_v2, %v160_v0 }
 0x13a   :  { %v193_v5 = vadd.f32 %v192_v4, %v161_v3 }
 0x13c   :  { %v227_v7 = vpack.c.bf16 %v193_v5, %v193_v5 }
 0x13e   :  { %v232_v8 = vsel %vm230_vm9, %v227_v7, %v231_v6  ;;  %v288_v48 = vshll.u32 %v227_v7, 16 }
 0x13f   :  { %233 = vst [vmem:[%s539_s6] sm:$0x1] %v232_v8 }
 0x140   :  { %v290_v50 = vrot.slane %v288_v48, 6 }
 0x146   :  { %v246_v44 = vld [vmem:[%s539_s6] sm:$0x7] }
 0x192   :  { %v205_v9 = vpop.xlane.xlu2 %204 }
 0x193   :  { %v206_v10 = vmul.f32 %v205_v9, %v466_v29 }
 0x195   :  { %v207_v11 = vadd.f32 1e-05, %v206_v10 }
 0x197   :  { %380 = vrsqrt.f32 %v207_v11  ;;  %vm214_vm11 = vweird.f32 %v207_v11 }
 0x19a   :  { %v265_v12 = vpop.xlane.xlu2 %264 }
 0x19b   :  { %v266_v13 = vmul.f32 %v265_v12, %v466_v29 }
 0x19d   :  { %v381_v14 = vpop.eup %380  ;;  %v267_v15 = vadd.f32 1e-05, %v266_v13 }
 0x19e   :  { %v209_v16 = vmul.f32 %v381_v14, %v207_v11  ;;  %vm215_vm10 = vweird.f32 %v381_v14 }
 0x19f   :  { %382 = vrsqrt.f32 %v267_v15  ;;  %vm216_vm12 = vmor %vm214_vm11, %vm215_vm10  ;;  %vm274_vm14 = vweird.f32 %v267_v15 }
 0x1a0   :  { %v210_v17 = vmul.f32 %v381_v14, %v209_v16 }
 0x1a2   :  { %v211_v18 = vmul.f32 0.5, %v210_v17 }
 0x1a4   :  { %v212_v19 = vsub.f32 1.5, %v211_v18 }
 0x1a5   :  { %v383_v20 = vpop.eup %382 }
 0x1a6   :  { %v213_v21 = vmul.f32 %v381_v14, %v212_v19  ;;  %v269_v22 = vmul.f32 %v383_v20, %v267_v15  ;;  %vm275_vm13 = vweird.f32 %v383_v20 }
 0x1a7   :  { %vm276_vm15 = vmor %vm274_vm14, %vm275_vm13 }
 0x1a8   :  { %v217_v24 = vsel %vm216_vm12, %v381_v14, %v213_v21  ;;  %v270_v25 = vmul.f32 %v383_v20, %v269_v22 }
 0x1a9   :  { %v218_v27 = vmul.f32 %v217_v24, %v201_v49 }
 0x1aa   :  { %v271_v28 = vmul.f32 0.5, %v270_v25 }
 0x1ab   :  { %v222_v29 = vmul.f32 %v372_v23, %v218_v27 }
 0x1ac   :  { %v272_v30 = vsub.f32 1.5, %v271_v28 }
 0x1ad   :  { %v226_v31 = vadd.f32 %v373_v26, %v222_v29 }
 0x1ae   :  { %v273_v32 = vmul.f32 %v383_v20, %v272_v30 }
 0x1af   :  { %v234_v33 = vpack.c.bf16 %v226_v31, %v226_v31 }
 0x1b0   :  { %v277_v35 = vsel %vm276_vm15, %v383_v20, %v273_v32 }
 0x1b1   :  { %v236_v36 = vshrl.u32 %v234_v33, 16  ;;  %v278_v38 = vmul.f32 %v277_v35, %v480_v51  ;;  %v239_v40 = vshll.u32 %v234_v33, 16 }
 0x1b3   :  { %v238_v39 = vrot.slane %v236_v36, 7  ;;  %v282_v41 = vmul.f32 %v374_v34, %v278_v38 }
 0x1b5   :  { %v241_v42 = vor.u32 %v239_v40, %v238_v39  ;;  %v286_v43 = vadd.f32 %v375_v37, %v282_v41 }
 0x1b7   :  { %v247_v45 = vsel %vm245_vm2, %v241_v42, %v246_v44  ;;  %v298_v46 = vpack.c.bf16 %v286_v43, %v286_v43 }
 0x1b8   :  { %248 = vst [vmem:[%s539_s6] sm:$0x7] %v247_v45 }
 0x1b9   :  { %v300_v47 = vrot.slane %v298_v46, 7 }
 0x1bb   :  { %v301_v49 = vrot.slane %v300_v47, 4  ;;  %304 = vst [vmem:[%s539_s6] sm:$0x8] %v300_v47 }
 0x1bd   :  { %305 = vst [vmem:[%s539_s6 + $0x4] sm:$0x1] %v301_v49 }
 0x1bf   :  { %v295_v51 = vld [vmem:[%s539_s6] sm:$0x4] }
 0x1c0   :  { %v296_v52 = vsel %vm294_vm5, %v290_v50, %v295_v51 }
 0x1c1   :  { %297 = vst [vmem:[%s539_s6] sm:$0x4] %v296_v52 }

// kernel: llava_forward.7
= control target key start
LH: loop header
LB: loop body
LE: loop exit
PB: predicated region body
PF: predicated region fallthrough
CT: control target
= control target key end

     0   :  { %s722_s1 = inlined_call_operand.vmem [shape: bf16[128,128], index: 1, kind: input, shape index: {}]   ;;  %s723_s3 = inlined_call_operand.vmem [shape: bf16[128,128], index: 3, kind: input, shape index: {}]   ;;  %s724_s2 = inlined_call_operand.vmem [shape: f32[1,128], index: 2, kind: input, shape index: {}]   ;;  %s725_s0 = inlined_call_operand.vmem [shape: bf16[10,128], index: 0, kind: input, shape index: {}]   ;;  %s726_s4 = inlined_call_operand.vmem [shape: f32[1,128], index: 4, kind: input, shape index: {}]   ;;  %s727_s5 = inlined_call_operand.vmem [shape: bf16[8,128], index: 5, kind: output, shape index: {}]  }
   0x1   :  { %v535_v0 = vld [vmem:[%s722_s1 + $0x38] sm:$0xff]  ;;  %v534_v2 = vld [vmem:[%s722_s1 + $0x30] sm:$0xff]  ;;  %v533_v4 = vld [vmem:[%s722_s1 + $0x28] sm:$0xff] }
   0x2   :  { %v552_v1 = vld [vmem:[%s722_s1 + $0x38] sm:$0xff]  ;;  %100 = vmatpush.bf16.msra.mxu0 %v535_v0  ;;  %v551_v3 = vld [vmem:[%s722_s1 + $0x30] sm:$0xff]  ;;  %v550_v5 = vld [vmem:[%s722_s1 + $0x28] sm:$0xff] }
   0x3   :  { %283 = vmatpush.bf16.msra.mxu2 %v552_v1  ;;  %v543_v6 = vld [vmem:[%s723_s3 + $0x38] sm:$0xff]  ;;  %v532_v7 = vld [vmem:[%s722_s1 + $0x20] sm:$0xff]  ;;  %v530_v14 = vld [vmem:[%s722_s1 + $0x10] sm:$0xff] }
   0x4   :  { %191 = vmatpush.bf16.msra.mxu1 %v543_v6  ;;  %v549_v8 = vld [vmem:[%s722_s1 + $0x20] sm:$0xff]  ;;  %v531_v11 = vld [vmem:[%s722_s1 + $0x18] sm:$0xff]  ;;  %v547_v15 = vld [vmem:[%s722_s1 + $0x10] sm:$0xff] }
   0x5   :  { %v20_v9 = vld [vmem:[%s725_s0] sm:$0x7]  ;;  %v548_v12 = vld [vmem:[%s722_s1 + $0x18] sm:$0xff]  ;;  %v529_v16 = vld [vmem:[%s722_s1 + $0x8] sm:$0xff] }
   0x6   :  { %101 = vmatpush.bf16.msra.mxu0 %v534_v2  ;;  %v42_v10 = vunpack.c.l.b16 %v20_v9  ;;  %v546_v18 = vld [vmem:[%s722_s1 + $0x8] sm:$0xff]  ;;  %v462_v19 = vld [vmem:[%s725_s0] sm:$0x8]  ;;  %v544_v20 = vld [vmem:[%s725_s0] sm:$0x10] }
   0x7   :  { %284 = vmatpush.bf16.msra.mxu2 %v551_v3  ;;  %v463_v23 = vor.u32 %v544_v20, %v462_v19  ;;  %v528_v24 = vld [vmem:[%s722_s1] sm:$0xff]  ;;  %v542_v28 = vld [vmem:[%s723_s3 + $0x30] sm:$0xff]  ;;  %v560_v29 = vld [vmem:[%s723_s3 + $0x38] sm:$0xff] }
   0x8   :  { %v43_v13 = vpack.c.b16 %v42_v10, %v42_v10  ;;  %v545_v25 = vld [vmem:[%s722_s1] sm:$0xff]  ;;  %192 = vmatpush.bf16.msra.mxu1 %v542_v28  ;;  %374 = vmatpush.bf16.msra.mxu3 %v560_v29  ;;  %v541_v30 = vld [vmem:[%s723_s3 + $0x28] sm:$0xff]  ;;  %v559_v31 = vld [vmem:[%s723_s3 + $0x30] sm:$0xff] }
   0x9   :  { %v233_v27 = vrot.slane %v463_v23, 3  ;;  %v540_v32 = vld [vmem:[%s723_s3 + $0x20] sm:$0xff]  ;;  %v558_v33 = vld [vmem:[%s723_s3 + $0x28] sm:$0xff]  ;;  %v539_v34 = vld [vmem:[%s723_s3 + $0x18] sm:$0xff] }
   0xa   :  { %102 = vmatpush.bf16.msra.mxu0 %v533_v4  ;;  %v47_v17 = vshll.u32 %v43_v13, 16  ;;  %v45_v21 = vshrl.u32 %v43_v13, 16  ;;  %v557_v35 = vld [vmem:[%s723_s3 + $0x20] sm:$0xff]  ;;  %v538_v36 = vld [vmem:[%s723_s3 + $0x10] sm:$0xff]  ;;  %v556_v37 = vld [vmem:[%s723_s3 + $0x18] sm:$0xff] }
   0xb   :  { %285 = vmatpush.bf16.msra.mxu2 %v550_v5  ;;  %v537_v38 = vld [vmem:[%s723_s3 + $0x8] sm:$0xff]  ;;  %v555_v39 = vld [vmem:[%s723_s3 + $0x10] sm:$0xff]  ;;  %v536_v40 = vld [vmem:[%s723_s3] sm:$0xff] }
   0xc   :  { %v49_v22 = vrot.slane %v47_v17, 1  ;;  %193 = vmatpush.bf16.msra.mxu1 %v541_v30  ;;  %375 = vmatpush.bf16.msra.mxu3 %v559_v31  ;;  %v554_v41 = vld [vmem:[%s723_s3 + $0x8] sm:$0xff]  ;;  %v553_v42 = vld [vmem:[%s723_s3] sm:$0xff] }
   0xd   :  { %v561_v43 = vld [vmem:[%s724_s2] ss:$0 sm:$0xff] }
   0xe   :  { %103 = vmatpush.bf16.msra.mxu0 %v532_v7  ;;  %v50_v26 = vor.u32 %v49_v22, %v45_v21  ;;  %v562_v47 = vld [vmem:[%s724_s2] ss:$0 sm:$0xff] }
   0xf   :  { %286 = vmatpush.bf16.msra.mxu2 %v549_v8  ;;  %v563_v7 = vld [vmem:[%s726_s4] ss:$0 sm:$0xff] }
  0x10   :  { %194 = vmatpush.bf16.msra.mxu1 %v540_v32  ;;  %376 = vmatpush.bf16.msra.mxu3 %v558_v33 }
  0x12   :  { %104 = vmatpush.bf16.msra.mxu0 %v531_v11 }
  0x13   :  { %287 = vmatpush.bf16.msra.mxu2 %v548_v12  ;;  %v564_v12 = vld [vmem:[%s726_s4] ss:$0 sm:$0xff] }
  0x14   :  { %195 = vmatpush.bf16.msra.mxu1 %v539_v34  ;;  %377 = vmatpush.bf16.msra.mxu3 %v557_v35 }
  0x16   :  { %105 = vmatpush.bf16.msra.mxu0 %v530_v14 }
  0x17   :  { %288 = vmatpush.bf16.msra.mxu2 %v547_v15 }
  0x18   :  { %196 = vmatpush.bf16.msra.mxu1 %v538_v36  ;;  %378 = vmatpush.bf16.msra.mxu3 %v556_v37 }
  0x1a   :  { %106 = vmatpush.bf16.msra.mxu0 %v529_v16 }
  0x1b   :  { %289 = vmatpush.bf16.msra.mxu2 %v546_v18 }
  0x1c   :  { %197 = vmatpush.bf16.msra.mxu1 %v537_v38  ;;  %379 = vmatpush.bf16.msra.mxu3 %v555_v39 }
  0x1e   :  { %107 = vmatpush.bf16.msra.mxu0 %v528_v24 }
  0x1f   :  { %290 = vmatpush.bf16.msra.mxu2 %v545_v25 }
  0x20   :  { %198 = vmatpush.bf16.msra.mxu1 %v536_v40  ;;  %380 = vmatpush.bf16.msra.mxu3 %v554_v41 }
  0x21   :  { %108 = vmatmul.bf16.vlgmr.msra.gmra.mxu0 %v50_v26 }
  0x22   :  { %291 = vmatmul.bf16.vlgmr.msra.gmra.mxu2 %v233_v27 }
  0x24   :  { %381 = vmatpush.bf16.msra.mxu3 %v553_v42 }
  0x9e   :  { %v109_v44 = vpop.f32.mrf.mxu0 }
  0x9f   :  { %v110_v45 = vadd.f32 %v561_v43, %v109_v44 }
  0xa1   :  { %v113_v46 = vmul.f32 %v110_v45, %v110_v45 }
  0xa3   :  { %v114_v48 = vmul.f32 %v113_v46, %v110_v45 }
  0xa5   :  { %v292_v49 = vpop.f32.mrf.mxu2  ;;  %v115_v50 = vmul.f32 0.044715, %v114_v48 }
  0xa6   :  { %v293_v51 = vadd.f32 %v562_v47, %v292_v49  ;;  %v111_v52 = vpop.f32.mrf.mxu0 }
  0xa7   :  { %v116_v54 = vadd.f32 %v115_v50, %v110_v45 }
  0xa8   :  { %v296_v53 = vmul.f32 %v293_v51, %v293_v51 }
  0xa9   :  { %v117_v56 = vmul.f32 0.7978846, %v116_v54 }
  0xaa   :  { %v297_v55 = vmul.f32 %v296_v53, %v293_v51 }
  0xab   :  { %565 = vtanh.f32 %v117_v56 }
  0xac   :  { %v298_v57 = vmul.f32 0.044715, %v297_v55 }
  0xad   :  { %v294_v58 = vpop.f32.mrf.mxu2 }
  0xae   :  { %v299_v59 = vadd.f32 %v298_v57, %v293_v51 }
  0xb0   :  { %v300_v60 = vmul.f32 0.7978846, %v299_v59 }
  0xb1   :  { %v566_v61 = vpop.eup %565 }
  0xb2   :  { %567 = vtanh.f32 %v300_v60  ;;  %v119_v62 = vadd.f32 1.0, %v566_v61 }
  0xb4   :  { %v120_v63 = vmul.f32 0.5, %v119_v62 }
  0xb6   :  { %v121_v0 = vmul.f32 %v120_v63, %v110_v45 }
  0xb8   :  { %v568_v1 = vpop.eup %567  ;;  %v122_v2 = vpack.c.bf16 %v121_v0, %v121_v0 }
  0xb9   :  { %v302_v3 = vadd.f32 1.0, %v568_v1 }
  0xba   :  { %199 = vmatmul.bf16.vlgmr.msra.gmra.mxu1 %v122_v2 }
  0xbb   :  { %v303_v4 = vmul.f32 0.5, %v302_v3 }
  0xbd   :  { %v304_v5 = vmul.f32 %v303_v4, %v293_v51 }
  0xbf   :  { %v305_v6 = vpack.c.bf16 %v304_v5, %v304_v5 }
  0xc1   :  { %382 = vmatmul.bf16.vlgmr.msra.gmra.mxu3 %v305_v6 }
 0x137   :  { %v200_v8 = vpop.f32.mrf.mxu1 }
 0x138   :  { %v201_v9 = vadd.f32 %v563_v7, %v200_v8 }
 0x13a   :  { %v204_v10 = vpack.c.bf16 %v201_v9, %v201_v9 }
 0x13c   :  { %205 = vst [vmem:[%s727_s5] sm:$0x3] %v204_v10 }
 0x13f   :  { %v202_v11 = vpop.f32.mrf.mxu1 }
 0x144   :  { %v383_v13 = vpop.f32.mrf.mxu3 }
 0x145   :  { %v384_v14 = vadd.f32 %v564_v12, %v383_v13 }
 0x147   :  { %v387_v15 = vpack.c.bf16 %v384_v14, %v384_v14 }
 0x149   :  { %v389_v16 = vrot.slane %v387_v15, 6 }
 0x14b   :  { %391 = vst [vmem:[%s727_s5] sm:$0xc] %v389_v16 }
 0x14c   :  { %v385_v17 = vpop.f32.mrf.mxu3 }

// kernel: llava_forward.6
= control target key start
LH: loop header
LB: loop body
LE: loop exit
PB: predicated region body
PF: predicated region fallthrough
CT: control target
= control target key end

     0   :  { %vm84_vm0 = vcmask 1041408   ;;  %v2989_v5 = vmov 128.0   ;;  %vm396_vm8 = vcmask 261120   ;;  %vm448_vm9 = vcmask 1044480   ;;  %s3752_s0 = inlined_call_operand.vmem [shape: bf16[10,128], index: 0, kind: input, shape index: {}]   ;;  %s3753_s1 = inlined_call_operand.vmem [shape: f32[1,128], index: 1, kind: input, shape index: {}]   ;;  %s3754_s2 = inlined_call_operand.vmem [shape: f32[1,128], index: 2, kind: input, shape index: {}]   ;;  %s3755_s3 = inlined_call_operand.vmem [shape: bf16[12,128,32], index: 3, kind: input, shape index: {}]   ;;  %s3756_s4 = inlined_call_operand.vmem [shape: f32[12,1,32], index: 4, kind: input, shape index: {}]   ;;  %s3757_s5 = inlined_call_operand.vmem [shape: bf16[4,32,128], index: 5, kind: input, shape index: {}]   ;;  %s3758_s6 = inlined_call_operand.vmem [shape: f32[1,128], index: 6, kind: input, shape index: {}]   ;;  %s3759_s7 = inlined_call_operand.vmem [shape: f32[1,128], index: 7, kind: input, shape index: {}]   ;;  %s3760_s8 = inlined_call_operand.vmem [shape: f32[1,128], index: 8, kind: input, shape index: {}]   ;;  %s3761_s9 = inlined_call_operand.vmem [shape: bf16[128,256], index: 9, kind: input, shape index: {}]   ;;  %s3762_s12 = inlined_call_operand.vmem [shape: f32[1,128], index: 12, kind: input, shape index: {}]   ;;  %s3763_s11 = inlined_call_operand.vmem [shape: bf16[256,128], index: 11, kind: input, shape index: {}]   ;;  %s3764_s10 = inlined_call_operand.vmem [shape: f32[1,256], index: 10, kind: input, shape index: {}]   ;;  %s3765_s13 = inlined_call_operand.vmem [shape: bf16[10,128], index: 13, kind: output, shape index: {}]  }
   0x1   :  { %v46_v0 = vld [vmem:[%s3752_s0 + $0x4] sm:$0x1]  ;;  %v45_v3 = vld [vmem:[%s3752_s0] sm:$0xf]  ;;  %2931 = vrcp.f32 %v2989_v5  ;;  %v2791_v8 = vld [vmem:[%s3755_s3 + $0x138] sm:$0xff] }
   0x2   :  { %v3063_v1 = vunpack.c.l.bf16 %v46_v0  ;;  %v3070_v4 = vunpack.c.l.bf16 %v45_v3  ;;  %v2783_v9 = vld [vmem:[%s3755_s3 + $0x38] sm:$0xff]  ;;  %313 = vmatpush.bf16.msra.mxu1 %v2791_v8  ;;  %v2790_v10 = vld [vmem:[%s3755_s3 + $0x130] sm:$0xff]  ;;  %v2789_v13 = vld [vmem:[%s3755_s3 + $0x128] sm:$0xff] }
   0x3   :  { %246 = vmatpush.bf16.msra.mxu0 %v2783_v9  ;;  %v2782_v11 = vld [vmem:[%s3755_s3 + $0x30] sm:$0xff]  ;;  %v2788_v16 = vld [vmem:[%s3755_s3 + $0x120] sm:$0xff]  ;;  %v2787_v18 = vld [vmem:[%s3755_s3 + $0x118] sm:$0xff] }
   0x4   :  { %v85_v2 = vsel %vm84_vm0, %v3063_v1, 0.0  ;;  %v2786_v28 = vld [vmem:[%s3755_s3 + $0x110] sm:$0xff]  ;;  %v2781_v29 = vld [vmem:[%s3755_s3 + $0x28] sm:$0xff]  ;;  %v2780_v31 = vld [vmem:[%s3755_s3 + $0x20] sm:$0xff] }
   0x5   :  { %86 = vadd.xlane.f32.xlu0 %v85_v2  ;;  %v2785_v30 = vld [vmem:[%s3755_s3 + $0x108] sm:$0xff]  ;;  %v2799_v32 = vld [vmem:[%s3755_s3 + $0x238] sm:$0xff]  ;;  %v2784_v33 = vld [vmem:[%s3755_s3 + $0x100] sm:$0xff] }
   0x6   :  { %314 = vmatpush.bf16.msra.mxu1 %v2790_v10  ;;  %380 = vmatpush.bf16.msra.mxu2 %v2799_v32  ;;  %v2779_v34 = vld [vmem:[%s3755_s3 + $0x18] sm:$0xff]  ;;  %v2798_v36 = vld [vmem:[%s3755_s3 + $0x230] sm:$0xff]  ;;  %v2797_v39 = vld [vmem:[%s3755_s3 + $0x228] sm:$0xff] }
   0x7   :  { %v2932_v6 = vpop.eup %2931  ;;  %247 = vmatpush.bf16.msra.mxu0 %v2782_v11  ;;  %v2825_v35 = vld [vmem:[%s3755_s3 + $0x278] sm:$0xff]  ;;  %v2778_v37 = vld [vmem:[%s3755_s3 + $0x10] sm:$0xff]  ;;  %v2777_v40 = vld [vmem:[%s3755_s3 + $0x8] sm:$0xff] }
   0x8   :  { %v89_v7 = vmul.f32 128.0, %v2932_v6  ;;  %vm93_vm1 = vweird.f32 %v2932_v6  ;;  %v2824_v38 = vld [vmem:[%s3755_s3 + $0x270] sm:$0xff]  ;;  %v2823_v41 = vld [vmem:[%s3755_s3 + $0x268] sm:$0xff]  ;;  %v2796_v42 = vld [vmem:[%s3755_s3 + $0x220] sm:$0xff] }
   0x9   :  { %v2776_v43 = vld [vmem:[%s3755_s3] sm:$0xff]  ;;  %v2795_v45 = vld [vmem:[%s3755_s3 + $0x218] sm:$0xff]  ;;  %v2794_v48 = vld [vmem:[%s3755_s3 + $0x210] sm:$0xff] }
   0xa   :  { %v90_v12 = vsub.f32 1.0, %v89_v7  ;;  %315 = vmatpush.bf16.msra.mxu1 %v2789_v13  ;;  %381 = vmatpush.bf16.msra.mxu2 %v2798_v36  ;;  %v2822_v44 = vld [vmem:[%s3755_s3 + $0x260] sm:$0xff]  ;;  %v2817_v46 = vld [vmem:[%s3755_s3 + $0x178] sm:$0xff]  ;;  %v2816_v49 = vld [vmem:[%s3755_s3 + $0x170] sm:$0xff] }
   0xb   :  { %248 = vmatpush.bf16.msra.mxu0 %v2781_v29  ;;  %v2821_v47 = vld [vmem:[%s3755_s3 + $0x258] sm:$0xff]  ;;  %v2820_v50 = vld [vmem:[%s3755_s3 + $0x250] sm:$0xff]  ;;  %v2793_v51 = vld [vmem:[%s3755_s3 + $0x208] sm:$0xff] }
   0xc   :  { %v91_v14 = vmul.f32 %v2932_v6, %v90_v12  ;;  %v2815_v52 = vld [vmem:[%s3755_s3 + $0x168] sm:$0xff]  ;;  %v2792_v56 = vld [vmem:[%s3755_s3 + $0x200] sm:$0xff]  ;;  %v2813_v60 = vld [vmem:[%s3755_s3 + $0x158] sm:$0xff] }
   0xd   :  { %82 = vadd.xlane.f32.xlu0 %v3070_v4  ;;  %v2819_v55 = vld [vmem:[%s3755_s3 + $0x248] sm:$0xff]  ;;  %v2814_v57 = vld [vmem:[%s3755_s3 + $0x160] sm:$0xff]  ;;  %v2812_v63 = vld [vmem:[%s3755_s3 + $0x150] sm:$0xff] }
   0xe   :  { %v92_v17 = vadd.f32 %v2932_v6, %v91_v14  ;;  %316 = vmatpush.bf16.msra.mxu1 %v2788_v16  ;;  %382 = vmatpush.bf16.msra.mxu2 %v2797_v39  ;;  %v2818_v59 = vld [vmem:[%s3755_s3 + $0x240] sm:$0xff]  ;;  %v2811_v5 = vld [vmem:[%s3755_s3 + $0x148] sm:$0xff] }
   0xf   :  { %249 = vmatpush.bf16.msra.mxu0 %v2780_v31  ;;  %v2810_v8 = vld [vmem:[%s3755_s3 + $0x140] sm:$0xff] }
  0x10   :  { %v3094_v19 = vsel %vm93_vm1, %v2932_v6, %v92_v17  ;;  %v2913_v17 = vld [vmem:[%s3753_s1] ss:$0 sm:$0xff]  ;;  %v2916_v39 = vld [vmem:[%s3756_s4 + $0x4] ss:$0 sm:$0xff] }
  0x11   :  { %v2832_v32 = vld [vmem:[%s3755_s3 + $0xa0] sm:$0xff] }
  0x12   :  { %317 = vmatpush.bf16.msra.mxu1 %v2787_v18  ;;  %383 = vmatpush.bf16.msra.mxu2 %v2796_v42  ;;  %v2828_v36 = vld [vmem:[%s3755_s3 + $0x80] sm:$0xff] }
  0x13   :  { %250 = vmatpush.bf16.msra.mxu0 %v2779_v34  ;;  %v2830_v34 = vld [vmem:[%s3755_s3 + $0x90] sm:$0xff] }
  0x16   :  { %318 = vmatpush.bf16.msra.mxu1 %v2786_v28  ;;  %384 = vmatpush.bf16.msra.mxu2 %v2795_v45 }
  0x17   :  { %251 = vmatpush.bf16.msra.mxu0 %v2778_v37 }
  0x1a   :  { %319 = vmatpush.bf16.msra.mxu1 %v2785_v30  ;;  %385 = vmatpush.bf16.msra.mxu2 %v2794_v48  ;;  %v2835_v30 = vld [vmem:[%s3755_s3 + $0xb8] sm:$0xff]  ;;  %v2915_v48 = vld [vmem:[%s3756_s4] ss:$0 sm:$0xff] }
  0x1b   :  { %252 = vmatpush.bf16.msra.mxu0 %v2777_v40 }
  0x1e   :  { %320 = vmatpush.bf16.msra.mxu1 %v2784_v33  ;;  %386 = vmatpush.bf16.msra.mxu2 %v2793_v51  ;;  %v2831_v33 = vld [vmem:[%s3755_s3 + $0x98] sm:$0xff] }
  0x1f   :  { %253 = vmatpush.bf16.msra.mxu0 %v2776_v43 }
  0x22   :  { %709 = vmatpush.bf16.msrb.mxu1 %v2825_v35  ;;  %387 = vmatpush.bf16.msra.mxu2 %v2792_v56  ;;  %v2829_v35 = vld [vmem:[%s3755_s3 + $0x88] sm:$0xff] }
  0x23   :  { %642 = vmatpush.bf16.msrb.mxu0 %v2817_v46  ;;  %v2917_v46 = vld [vmem:[%s3756_s4 + $0x8] ss:$0 sm:$0xff] }
  0x26   :  { %710 = vmatpush.bf16.msrb.mxu1 %v2824_v38 }
  0x27   :  { %643 = vmatpush.bf16.msrb.mxu0 %v2816_v49 }
  0x2a   :  { %711 = vmatpush.bf16.msrb.mxu1 %v2823_v41 }
  0x2b   :  { %644 = vmatpush.bf16.msrb.mxu0 %v2815_v52 }
  0x2e   :  { %712 = vmatpush.bf16.msrb.mxu1 %v2822_v44 }
  0x2f   :  { %645 = vmatpush.bf16.msrb.mxu0 %v2814_v57 }
  0x32   :  { %713 = vmatpush.bf16.msrb.mxu1 %v2821_v47 }
  0x33   :  { %646 = vmatpush.bf16.msrb.mxu0 %v2813_v60  ;;  %v2919_v60 = vld [vmem:[%s3756_s4 + $0x9] ss:$0 sm:$0xff] }
  0x36   :  { %714 = vmatpush.bf16.msrb.mxu1 %v2820_v50 }
  0x37   :  { %647 = vmatpush.bf16.msrb.mxu0 %v2812_v63 }
  0x3a   :  { %715 = vmatpush.bf16.msrb.mxu1 %v2819_v55 }
  0x3b   :  { %648 = vmatpush.bf16.msrb.mxu0 %v2811_v5 }
  0x3e   :  { %716 = vmatpush.bf16.msrb.mxu1 %v2818_v59  ;;  %v2918_v59 = vld [vmem:[%s3756_s4 + $0x5] ss:$0 sm:$0xff] }
  0x3f   :  { %649 = vmatpush.bf16.msrb.mxu0 %v2810_v8 }
  0x78   :  { %v87_v15 = vpop.xlane.xlu0 %86 }
  0x79   :  { %v96_v22 = vmul.f32 %v3094_v19, %v87_v15 }
  0x7b   :  { %v3104_v25 = vsub.f32 %v3063_v1, %v96_v22  ;;  %v2914_v22 = vld [vmem:[%s3754_s2] ss:$0 sm:$0xff] }
  0x7d   :  { %v100_v26 = vmul.f32 %v3104_v25, %v3104_v25 }
  0x7f   :  { %v103_v27 = vsel %vm84_vm0, %v100_v26, 0.0 }
  0x80   :  { %v83_v20 = vpop.xlane.xlu0 %82 }
  0x81   :  { %v95_v21 = vmul.f32 %v3094_v19, %v83_v20 }
  0x83   :  { %v3099_v23 = vsub.f32 %v3070_v4, %v95_v21 }
  0x85   :  { %v99_v24 = vmul.f32 %v3099_v23, %v3099_v23 }
  0x87   :  { %101 = vadd.xlane.f32.xlu1 %v99_v24 }
  0x8f   :  { %104 = vadd.xlane.f32.xlu1 %v103_v27 }
  0xfa   :  { %v102_v53 = vpop.xlane.xlu1 %101 }
  0xfb   :  { %v106_v54 = vmul.f32 %v102_v53, %v3094_v19 }
  0xfd   :  { %v108_v58 = vadd.f32 1e-05, %v106_v54 }
  0xff   :  { %2933 = vrsqrt.f32 %v108_v58  ;;  %vm116_vm3 = vweird.f32 %v108_v58 }
 0x102   :  { %v105_v61 = vpop.xlane.xlu1 %104 }
 0x103   :  { %v107_v62 = vmul.f32 %v105_v61, %v3094_v19 }
 0x105   :  { %v2934_v0 = vpop.eup %2933  ;;  %v109_v2 = vadd.f32 1e-05, %v107_v62 }
 0x106   :  { %v111_v3 = vmul.f32 %v2934_v0, %v108_v58  ;;  %vm117_vm2 = vweird.f32 %v2934_v0 }
 0x107   :  { %2935 = vrsqrt.f32 %v109_v2  ;;  %vm118_vm4 = vmor %vm116_vm3, %vm117_vm2  ;;  %vm126_vm6 = vweird.f32 %v109_v2 }
 0x108   :  { %v112_v6 = vmul.f32 %v2934_v0, %v111_v3 }
 0x10a   :  { %v113_v7 = vmul.f32 0.5, %v112_v6 }
 0x10c   :  { %v114_v9 = vsub.f32 1.5, %v113_v7 }
 0x10d   :  { %v2936_v10 = vpop.eup %2935 }
 0x10e   :  { %v115_v11 = vmul.f32 %v2934_v0, %v114_v9  ;;  %v121_v12 = vmul.f32 %v2936_v10, %v109_v2  ;;  %vm127_vm5 = vweird.f32 %v2936_v10  ;;  %v49_v9 = vlaneseq }
 0x10f   :  { %vm128_vm7 = vmor %vm126_vm6, %vm127_vm5 }
 0x110   :  { %v122_v13 = vmul.f32 %v2936_v10, %v121_v12  ;;  %v119_v14 = vsel %vm118_vm4, %v2934_v0, %v115_v11  ;;  %v53_v11 = vand.u32 127, %v49_v9  ;;  %vm419_vm4 = vcmask 80896  }
 0x111   :  { %v130_v18 = vmul.f32 %v119_v14, %v3099_v23  ;;  %v2834_v23 = vld [vmem:[%s3755_s3 + $0xb0] sm:$0xff] }
 0x112   :  { %v123_v15 = vmul.f32 0.5, %v122_v13  ;;  %vm72_vm11 = vcmp.ge.s32.totalorder %v53_v11, 5  ;;  %vm63_vm13 = vcmp.lt.s32.totalorder %v53_v11, 5  ;;  %vm75_vm15 = vcmp.lt.s32.totalorder %v53_v11, 10 }
 0x113   :  { %v135_v24 = vmul.f32 %v2913_v17, %v130_v18 }
 0x114   :  { %v124_v16 = vsub.f32 1.5, %v123_v15 }
 0x115   :  { %v140_v28 = vadd.f32 %v2914_v22, %v135_v24 }
 0x116   :  { %v125_v20 = vmul.f32 %v2936_v10, %v124_v16 }
 0x118   :  { %v129_v21 = vsel %vm128_vm7, %v2936_v10, %v125_v20  ;;  %v50_v10 = vshrl.u32 %v49_v9, 7 }
 0x119   :  { %v131_v26 = vmul.f32 %v129_v21, %v3104_v25  ;;  %v2833_v25 = vld [vmem:[%s3755_s3 + $0xa8] sm:$0xff] }
 0x11a   :  { %vm66_vm10 = vcmp.ge.s32.totalorder %v50_v10, 5  ;;  %vm56_vm12 = vcmp.lt.s32.totalorder %v50_v10, 5  ;;  %v51_v12 = vadd.s32 8, %v50_v10 }
 0x11b   :  { %v136_v27 = vmul.f32 %v2913_v17, %v131_v26  ;;  %vm73_vm14 = vmand %vm66_vm10, %vm72_vm11  ;;  %vm423_vm10 = vcmask 74752  }
 0x11c   :  { %vm64_vm1 = vmand %vm56_vm12, %vm63_vm13  ;;  %vm69_vm5 = vcmp.lt.s32.totalorder %v51_v12, 10 }
 0x11d   :  { %v141_v29 = vadd.f32 %v2914_v22, %v136_v27  ;;  %vm76_vm2 = vmand %vm73_vm14, %vm75_vm15 }
 0x11e   :  { %vm3271_vm3 = vmor %vm64_vm1, %vm76_vm2 }
 0x11f   :  { %v3221_v31 = vpack.c.bf16 %v141_v29, %v140_v28  ;;  %vm74_vm6 = vmand %vm69_vm5, %vm72_vm11 }
 0x120   :  { %vm3279_vm7 = vmand %vm74_vm6, %vm75_vm15 }
 0x121   :  { %254 = vmatmul.bf16.vlgmr.msra.gmra.mxu0 %v3221_v31  ;;  %321 = vmatmul.bf16.vlgmr.msra.gmra.mxu1 %v3221_v31 }
 0x122   :  { %388 = vmatmul.bf16.vlgmr.msra.gmra.mxu2 %v3221_v31  ;;  %959 = vmatpush.bf16.msra.mxu1 %v2835_v30 }
 0x126   :  { %960 = vmatpush.bf16.msra.mxu1 %v2834_v23 }
 0x12a   :  { %961 = vmatpush.bf16.msra.mxu1 %v2833_v25 }
 0x12e   :  { %962 = vmatpush.bf16.msra.mxu1 %v2832_v32 }
 0x131   :  { %650 = vmatmul.bf16.vlgmr.msrb.gmra.mxu0 %v3221_v31  ;;  %717 = vmatmul.bf16.vlgmr.msrb.gmra.mxu1 %v3221_v31 }
 0x132   :  { %963 = vmatpush.bf16.msra.mxu1 %v2831_v33  ;;  %v2809_v33 = vld [vmem:[%s3755_s3 + $0x78] sm:$0xff] }
 0x136   :  { %964 = vmatpush.bf16.msra.mxu1 %v2830_v34  ;;  %v2808_v34 = vld [vmem:[%s3755_s3 + $0x70] sm:$0xff] }
 0x13a   :  { %965 = vmatpush.bf16.msra.mxu1 %v2829_v35  ;;  %v2807_v35 = vld [vmem:[%s3755_s3 + $0x68] sm:$0xff] }
 0x13e   :  { %966 = vmatpush.bf16.msra.mxu1 %v2828_v36  ;;  %v2806_v36 = vld [vmem:[%s3755_s3 + $0x60] sm:$0xff] }
 0x141   :  { %967 = vmatmul.bf16.vlgmr.msra.gmra.mxu1 %v3221_v31 }
 0x19e   :  { %v255_v37 = vpop.f32.mrf.mxu0  ;;  %v322_v38 = vpop.f32.mrf.mxu1 }
 0x19f   :  { %v323_v43 = vadd.f32 %v2916_v39, %v322_v38  ;;  %v256_v55 = vadd.f32 %v2915_v48, %v255_v37  ;;  %v2805_v37 = vld [vmem:[%s3755_s3 + $0x58] sm:$0xff]  ;;  %v2804_v38 = vld [vmem:[%s3755_s3 + $0x50] sm:$0xff] }
 0x1a5   :  { %v389_v40 = vpop.f32.mrf.mxu2 }
 0x1a6   :  { %v257_v41 = vpop.f32.mrf.mxu0  ;;  %v324_v42 = vpop.f32.mrf.mxu1  ;;  %v390_v50 = vadd.f32 %v2917_v46, %v389_v40  ;;  %v2802_v40 = vld [vmem:[%s3755_s3 + $0x40] sm:$0xff] }
 0x1a7   :  { %v325_v44 = vadd.f32 %v2916_v39, %v324_v42  ;;  %v258_v51 = vadd.f32 %v2915_v48, %v257_v41  ;;  %v2803_v39 = vld [vmem:[%s3755_s3 + $0x48] sm:$0xff] }
 0x1a8   :  { %v2801_v48 = vld [vmem:[%s3757_s5 + $0x8] sm:$0xff] }
 0x1a9   :  { %v395_v45 = vpack.c.bf16 %v325_v44, %v323_v43  ;;  %v394_v57 = vpack.c.bf16 %v258_v51, %v256_v55  ;;  %847 = vmatpush.bf16.msra.mxu0 %v2801_v48  ;;  %v2845_v48 = vld [vmem:[%s3755_s3 + $0x288] sm:$0xff] }
 0x1ab   :  { %v401_v47 = vsel %vm396_vm8, %v395_v45, 0 }
 0x1ac   :  { %410 = vmatpush.bf16.xpose.msra.mxu3 %v401_v47 }
 0x1ad   :  { %v391_v49 = vpop.f32.mrf.mxu2 }
 0x1ae   :  { %v392_v52 = vadd.f32 %v2917_v46, %v391_v49  ;;  %v651_v53 = vpop.f32.mrf.mxu0  ;;  %v718_v54 = vpop.f32.mrf.mxu1  ;;  %v2800_v49 = vld [vmem:[%s3757_s5] sm:$0xff] }
 0x1af   :  { %v652_v63 = vadd.f32 %v2918_v59, %v651_v53  ;;  %v719_v0 = vadd.f32 %v2919_v60, %v718_v54  ;;  %848 = vmatpush.bf16.msra.mxu0 %v2800_v49  ;;  %v2921_v54 = vld [vmem:[%s3756_s4 + $0x1] ss:$0 sm:$0xff] }
 0x1b0   :  { %v444_v56 = vpack.c.bf16 %v392_v52, %v390_v50  ;;  %v2844_v49 = vld [vmem:[%s3755_s3 + $0x280] sm:$0xff] }
 0x1b2   :  { %v450_v58 = vsel %vm448_vm9, %v444_v56, 0 }
 0x1b3   :  { %2147 = vmatmul.msk.bf16.vlgmr.msra.gmra.mxu3 %vm396_vm8, %v394_v57 }
 0x1b4   :  { %459 = vmatpush.bf16.msrb.mxu3 %v450_v58 }
 0x1b6   :  { %v653_v61 = vpop.f32.mrf.mxu0  ;;  %v720_v62 = vpop.f32.mrf.mxu1 }
 0x1b7   :  { %v654_v2 = vadd.f32 %v2918_v59, %v653_v61  ;;  %v721_v3 = vadd.f32 %v2919_v60, %v720_v62 }
 0x1b8   :  { %575 = vmatpush.bf16.msra.mxu3 %v2809_v33  ;;  %v2827_v33 = vld [vmem:[%s3757_s5 + $0x18] sm:$0xff] }
 0x1b9   :  { %v770_v5 = vpack.c.bf16 %v721_v3, %v719_v0  ;;  %v724_v6 = vpack.c.bf16 %v654_v2, %v652_v63  ;;  %v2843_v2 = vld [vmem:[%s3755_s3 + $0x1b8] sm:$0xff]  ;;  %v2842_v3 = vld [vmem:[%s3755_s3 + $0x1b0] sm:$0xff] }
 0x1bb   :  { %v729_v7 = vsel %vm396_vm8, %v724_v6, 0  ;;  %v775_v8 = vsel %vm448_vm9, %v770_v5, 0  ;;  %v2841_v5 = vld [vmem:[%s3755_s3 + $0x1a8] sm:$0xff] }
 0x1bc   :  { %738 = vmatpush.bf16.xpose.msrb.mxu2 %v729_v7  ;;  %576 = vmatpush.bf16.msra.mxu3 %v2808_v34  ;;  %v2860_v34 = vld [vmem:[%s3755_s3 + $0xf0] sm:$0xff] }
 0x1c0   :  { %577 = vmatpush.bf16.msra.mxu3 %v2807_v35  ;;  %v2826_v35 = vld [vmem:[%s3757_s5 + $0x10] sm:$0xff] }
 0x1c4   :  { %784 = vmatpush.bf16.msra.mxu2 %v775_v8  ;;  %578 = vmatpush.bf16.msra.mxu3 %v2806_v36  ;;  %v2851_v36 = vld [vmem:[%s3755_s3 + $0x2b8] sm:$0xff] }
 0x1c8   :  { %579 = vmatpush.bf16.msra.mxu3 %v2805_v37  ;;  %v2859_v37 = vld [vmem:[%s3755_s3 + $0xe8] sm:$0xff] }
 0x1cc   :  { %580 = vmatpush.bf16.msra.mxu3 %v2804_v38  ;;  %v2850_v38 = vld [vmem:[%s3755_s3 + $0x2b0] sm:$0xff] }
 0x1d0   :  { %581 = vmatpush.bf16.msra.mxu3 %v2803_v39  ;;  %v2858_v39 = vld [vmem:[%s3755_s3 + $0xe0] sm:$0xff] }
 0x1d4   :  { %582 = vmatpush.bf16.msra.mxu3 %v2802_v40  ;;  %v2849_v40 = vld [vmem:[%s3755_s3 + $0x2a8] sm:$0xff] }
 0x236   :  { %v412_v14 = vpop.f32.mrf.mxu3 }
 0x237   :  { %v417_v15 = vsel %vm3271_vm3, %v412_v14, -1e+09 }
 0x238   :  { %v420_v16 = vsel %vm419_vm4, %v417_v15, -inf }
 0x239   :  { %421 = vmax.xlane.f32.xlu2 %v420_v16 }
 0x23e   :  { %v414_v18 = vpop.f32.mrf.mxu3 }
 0x23f   :  { %v418_v20 = vsel %vm3279_vm7, %v414_v18, -1e+09  ;;  %v2840_v18 = vld [vmem:[%s3755_s3 + $0x1a0] sm:$0xff] }
 0x240   :  { %v424_v21 = vsel %vm423_vm10, %v418_v20, -inf }
 0x241   :  { %425 = vmax.xlane.f32.xlu2 %v424_v21  ;;  %v2838_v21 = vld [vmem:[%s3755_s3 + $0x190] sm:$0xff] }
 0x2ac   :  { %v422_v22 = vpop.xlane.xlu2 %421 }
 0x2ad   :  { %v427_v24 = vsub.f32 %v417_v15, %v422_v22  ;;  %v2837_v22 = vld [vmem:[%s3755_s3 + $0x188] sm:$0xff] }
 0x2af   :  { %v429_v26 = vmul.f32 1.442695, %v427_v24  ;;  %v2836_v24 = vld [vmem:[%s3755_s3 + $0x180] sm:$0xff] }
 0x2b1   :  { %2937 = vpow2.f32 %v429_v26 }
 0x2b4   :  { %v426_v27 = vpop.xlane.xlu2 %425 }
 0x2b5   :  { %v428_v28 = vsub.f32 %v418_v20, %v426_v27  ;;  %v2839_v20 = vld [vmem:[%s3755_s3 + $0x198] sm:$0xff] }
 0x2b7   :  { %v2938_v29 = vpop.eup %2937  ;;  %v431_v30 = vmul.f32 1.442695, %v428_v28 }
 0x2b8   :  { %v433_v23 = vsel %vm419_vm4, %v2938_v29, 0.0 }
 0x2b9   :  { %2939 = vpow2.f32 %v431_v30  ;;  %434 = vadd.xlane.f32.xlu0 %v433_v23 }
 0x2bf   :  { %v2940_v25 = vpop.eup %2939 }
 0x2c0   :  { %v436_v32 = vsel %vm423_vm10, %v2940_v25, 0.0 }
 0x2c1   :  { %437 = vadd.xlane.f32.xlu1 %v436_v32 }
 0x32c   :  { %v435_v41 = vpop.xlane.xlu0 %434 }
 0x32d   :  { %2941 = vrcp.f32 %v435_v41  ;;  %v2857_v41 = vld [vmem:[%s3755_s3 + $0xd8] sm:$0xff] }
 0x333   :  { %v2942_v43 = vpop.eup %2941 }
 0x334   :  { %v438_v42 = vpop.xlane.xlu1 %437  ;;  %v441_v45 = vmul.f32 %v2942_v43, %v2938_v29  ;;  %v2856_v43 = vld [vmem:[%s3755_s3 + $0xd0] sm:$0xff] }
 0x335   :  { %2943 = vrcp.f32 %v438_v42  ;;  %v2848_v42 = vld [vmem:[%s3755_s3 + $0x2a0] sm:$0xff] }
 0x33b   :  { %v2944_v44 = vpop.eup %2943 }
 0x33c   :  { %v442_v46 = vmul.f32 %v2944_v44, %v2940_v25  ;;  %v2861_v25 = vld [vmem:[%s3755_s3 + $0xf8] sm:$0xff] }
 0x33d   :  { %v2847_v44 = vld [vmem:[%s3755_s3 + $0x298] sm:$0xff] }
 0x33e   :  { %v443_v47 = vpack.c.bf16 %v442_v46, %v441_v45  ;;  %v2855_v45 = vld [vmem:[%s3755_s3 + $0xc8] sm:$0xff]  ;;  %v2854_v46 = vld [vmem:[%s3755_s3 + $0xc0] sm:$0xff] }
 0x340   :  { %2148 = vmatmul.msk.bf16.vlgmr.msrb.gmra.mxu3 %vm419_vm4, %v443_v47  ;;  %v2846_v47 = vld [vmem:[%s3755_s3 + $0x290] sm:$0xff] }
 0x341   :  { %818 = vmatpush.bf16.msrb.mxu3 %v2827_v33 }
 0x345   :  { %819 = vmatpush.bf16.msrb.mxu3 %v2826_v35 }
 0x350   :  { %583 = vmatmul.bf16.vlgmr.msra.gmra.mxu3 %v3221_v31 }
 0x351   :  { %1093 = vmatpush.bf16.msra.mxu3 %v2851_v36 }
 0x355   :  { %1094 = vmatpush.bf16.msra.mxu3 %v2850_v38 }
 0x359   :  { %1095 = vmatpush.bf16.msra.mxu3 %v2849_v40 }
 0x35d   :  { %1096 = vmatpush.bf16.msra.mxu3 %v2848_v42 }
 0x361   :  { %1097 = vmatpush.bf16.msra.mxu3 %v2847_v44 }
 0x365   :  { %1098 = vmatpush.bf16.msra.mxu3 %v2846_v47 }
 0x369   :  { %1099 = vmatpush.bf16.msra.mxu3 %v2845_v48 }
 0x36d   :  { %1100 = vmatpush.bf16.msra.mxu3 %v2844_v49 }
 0x3c3   :  { %v461_v50 = vpop.f32.mrf.mxu3 }
 0x3cb   :  { %v463_v51 = vpop.f32.mrf.mxu3 }
 0x3cc   :  { %v466_v52 = vpack.c.bf16 %v463_v51, %v461_v50 }
 0x3ce   :  { %2319 = vmatmul.msk.bf16.vlgmr.msra.gmra.mxu0 %vm396_vm8, %v466_v52  ;;  %v2869_v52 = vld [vmem:[%s3755_s3 + $0x1f8] sm:$0xff] }
 0x3d3   :  { %v584_v53 = vpop.f32.mrf.mxu3 }
 0x3d4   :  { %v585_v56 = vadd.f32 %v2921_v54, %v584_v53 }
 0x3db   :  { %v586_v55 = vpop.f32.mrf.mxu3 }
 0x3dc   :  { %v587_v57 = vadd.f32 %v2921_v54, %v586_v55  ;;  %v2868_v54 = vld [vmem:[%s3755_s3 + $0x1f0] sm:$0xff] }
 0x3de   :  { %v723_v58 = vpack.c.bf16 %v587_v57, %v585_v56  ;;  %v2867_v56 = vld [vmem:[%s3755_s3 + $0x1e8] sm:$0xff]  ;;  %v968_v57 = vpop.f32.mrf.mxu1 }
 0x3e0   :  { %2296 = vmatmul.msk.bf16.vlgmr.msrb.gmra.mxu2 %vm396_vm8, %v723_v58  ;;  %v2866_v58 = vld [vmem:[%s3755_s3 + $0x1e0] sm:$0xff] }
 0x3e1   :  { %1026 = vmatpush.bf16.msrb.mxu2 %v2843_v2 }
 0x3e5   :  { %1027 = vmatpush.bf16.msrb.mxu2 %v2842_v3  ;;  %v2864_v3 = vld [vmem:[%s3755_s3 + $0x1d0] sm:$0xff] }
 0x3e6   :  { %v970_v2 = vpop.f32.mrf.mxu1 }
 0x3e9   :  { %1028 = vmatpush.bf16.msrb.mxu2 %v2841_v5  ;;  %v2920_v5 = vld [vmem:[%s3756_s4 + $0x2] ss:$0 sm:$0xff] }
 0x3ed   :  { %1029 = vmatpush.bf16.msrb.mxu2 %v2840_v18 }
 0x3f1   :  { %1030 = vmatpush.bf16.msrb.mxu2 %v2839_v20 }
 0x3f5   :  { %1031 = vmatpush.bf16.msrb.mxu2 %v2838_v21  ;;  %v2852_v21 = vld [vmem:[%s3757_s5 + $0x20] sm:$0xff] }
 0x3f9   :  { %1032 = vmatpush.bf16.msrb.mxu2 %v2837_v22 }
 0x3fd   :  { %1033 = vmatpush.bf16.msrb.mxu2 %v2836_v24 }
 0x463   :  { %v740_v59 = vpop.f32.mrf.mxu2 }
 0x464   :  { %v745_v60 = vsel %vm3271_vm3, %v740_v59, -1e+09  ;;  %v2922_v59 = vld [vmem:[%s3756_s4 + $0x6] ss:$0 sm:$0xff] }
 0x465   :  { %v747_v61 = vsel %vm419_vm4, %v745_v60, -inf }
 0x466   :  { %748 = vmax.xlane.f32.xlu2 %v747_v61  ;;  %v2865_v61 = vld [vmem:[%s3755_s3 + $0x1d8] sm:$0xff] }
 0x46b   :  { %v742_v62 = vpop.f32.mrf.mxu2 }
 0x46c   :  { %v746_v63 = vsel %vm3279_vm7, %v742_v62, -1e+09 }
 0x46d   :  { %v750_v0 = vsel %vm423_vm10, %v746_v63, -inf }
 0x46e   :  { %751 = vmax.xlane.f32.xlu0 %v750_v0 }
 0x4d9   :  { %v749_v6 = vpop.xlane.xlu2 %748 }
 0x4da   :  { %v753_v7 = vsub.f32 %v745_v60, %v749_v6 }
 0x4dc   :  { %v755_v8 = vmul.f32 1.442695, %v753_v7  ;;  %v971_v7 = vadd.f32 %v2920_v5, %v970_v2 }
 0x4de   :  { %2945 = vpow2.f32 %v755_v8  ;;  %v2863_v8 = vld [vmem:[%s3755_s3 + $0x1c8] sm:$0xff] }
 0x4e1   :  { %v752_v9 = vpop.xlane.xlu0 %751 }
 0x4e2   :  { %v754_v10 = vsub.f32 %v746_v63, %v752_v9  ;;  %v969_v9 = vadd.f32 %v2920_v5, %v968_v57  ;;  %v2873_v57 = vld [vmem:[%s3755_s3 + $0x2d8] sm:$0xff] }
 0x4e4   :  { %v2946_v11 = vpop.eup %2945  ;;  %v757_v12 = vmul.f32 1.442695, %v754_v10  ;;  %v1107_v10 = vpack.c.bf16 %v971_v7, %v969_v9 }
 0x4e5   :  { %v759_v14 = vsel %vm419_vm4, %v2946_v11, 0.0 }
 0x4e6   :  { %2947 = vpow2.f32 %v757_v12  ;;  %760 = vadd.xlane.f32.xlu1 %v759_v14  ;;  %v3449_v12 = vpop.f32.mrf.mxu0 }
 0x4ec   :  { %v2948_v15 = vpop.eup %2947 }
 0x4ed   :  { %v762_v16 = vsel %vm423_vm10, %v2948_v15, 0.0 }
 0x4ee   :  { %763 = vadd.xlane.f32.xlu2 %v762_v16  ;;  %v852_v16 = vpop.f32.mrf.mxu0 }
 0x559   :  { %v761_v26 = vpop.xlane.xlu1 %760 }
 0x55a   :  { %2949 = vrcp.f32 %v761_v26  ;;  %v2924_v26 = vld [vmem:[%s3756_s4 + $0xa] ss:$0 sm:$0xff] }
 0x560   :  { %v2950_v28 = vpop.eup %2949 }
 0x561   :  { %v764_v27 = vpop.xlane.xlu2 %763  ;;  %v767_v30 = vmul.f32 %v2950_v28, %v2946_v11  ;;  %v2862_v11 = vld [vmem:[%s3755_s3 + $0x1c0] sm:$0xff] }
 0x562   :  { %2951 = vrcp.f32 %v764_v27 }
 0x568   :  { %v2952_v29 = vpop.eup %2951 }
 0x569   :  { %v768_v23 = vmul.f32 %v2952_v29, %v2948_v15  ;;  %v2853_v15 = vld [vmem:[%s3757_s5 + $0x28] sm:$0xff] }
 0x56a   :  { %1202 = vmatpush.bf16.msrb.mxu1 %v2853_v15  ;;  %v2923_v15 = vld [vmem:[%s3756_s4 + $0x3] ss:$0 sm:$0xff] }
 0x56b   :  { %v769_v32 = vpack.c.bf16 %v768_v23, %v767_v30 }
 0x56d   :  { %2297 = vmatmul.msk.bf16.vlgmr.msra.gmra.mxu2 %vm419_vm4, %v769_v32 }
 0x56e   :  { %1316 = vmatpush.bf16.msra.mxu2 %v2861_v25  ;;  %1203 = vmatpush.bf16.msrb.mxu1 %v2852_v21 }
 0x572   :  { %1317 = vmatpush.bf16.msra.mxu2 %v2860_v34 }
 0x576   :  { %1318 = vmatpush.bf16.msra.mxu2 %v2859_v37  ;;  %v2925_v37 = vld [vmem:[%s3756_s4 + $0x7] ss:$0 sm:$0xff] }
 0x57a   :  { %1319 = vmatpush.bf16.msra.mxu2 %v2858_v39 }
 0x57d   :  { %1034 = vmatmul.bf16.vlgmr.msrb.gmra.mxu2 %v3221_v31 }
 0x57e   :  { %1320 = vmatpush.bf16.msra.mxu2 %v2857_v41 }
 0x582   :  { %1321 = vmatpush.bf16.msra.mxu2 %v2856_v43 }
 0x586   :  { %1322 = vmatpush.bf16.msra.mxu2 %v2855_v45 }
 0x58a   :  { %1323 = vmatpush.bf16.msra.mxu2 %v2854_v46 }
 0x58d   :  { %1324 = vmatmul.bf16.vlgmr.msra.gmra.mxu2 %v3221_v31 }
 0x5f0   :  { %v786_v50 = vpop.f32.mrf.mxu2 }
 0x5f8   :  { %v788_v51 = vpop.f32.mrf.mxu2 }
 0x5f9   :  { %v791_v53 = vpack.c.bf16 %v788_v51, %v786_v50 }
 0x5fb   :  { %2310 = vmatmul.msk.bf16.vlgmr.msrb.gmra.mxu3 %vm396_vm8, %v791_v53  ;;  %v2877_v53 = vld [vmem:[%s3755_s3 + $0x2f8] sm:$0xff] }
 0x5fc   :  { %1383 = vmatpush.bf16.msrb.mxu3 %v2869_v52 }
 0x600   :  { %v1035_v55 = vpop.f32.mrf.mxu2  ;;  %1384 = vmatpush.bf16.msrb.mxu3 %v2868_v54  ;;  %v2876_v54 = vld [vmem:[%s3755_s3 + $0x2f0] sm:$0xff] }
 0x601   :  { %v1036_v62 = vadd.f32 %v2922_v59, %v1035_v55  ;;  %v2875_v55 = vld [vmem:[%s3755_s3 + $0x2e8] sm:$0xff] }
 0x604   :  { %1385 = vmatpush.bf16.msrb.mxu3 %v2867_v56  ;;  %v2874_v56 = vld [vmem:[%s3755_s3 + $0x2e0] sm:$0xff] }
 0x608   :  { %v1037_v60 = vpop.f32.mrf.mxu2  ;;  %1386 = vmatpush.bf16.msrb.mxu3 %v2866_v58  ;;  %v2872_v58 = vld [vmem:[%s3755_s3 + $0x2d0] sm:$0xff] }
 0x609   :  { %v1038_v63 = vadd.f32 %v2922_v59, %v1037_v60  ;;  %v2871_v59 = vld [vmem:[%s3755_s3 + $0x2c8] sm:$0xff]  ;;  %v2870_v60 = vld [vmem:[%s3755_s3 + $0x2c0] sm:$0xff] }
 0x60b   :  { %v1108_v0 = vpack.c.bf16 %v1038_v63, %v1036_v62  ;;  %1101 = vmatmul.bf16.vlgmr.msra.gmra.mxu3 %v3221_v31 }
 0x60c   :  { %1387 = vmatpush.bf16.msrb.mxu3 %v2865_v61 }
 0x60d   :  { %v1113_v6 = vsel %vm396_vm8, %v1108_v0, 0 }
 0x60e   :  { %1122 = vmatpush.bf16.xpose.msrb.mxu0 %v1113_v6 }
 0x610   :  { %1388 = vmatpush.bf16.msrb.mxu3 %v2864_v3  ;;  %v1325_v7 = vpop.f32.mrf.mxu2 }
 0x611   :  { %v1326_v21 = vadd.f32 %v2923_v15, %v1325_v7 }
 0x614   :  { %1389 = vmatpush.bf16.msrb.mxu3 %v2863_v8 }
 0x615   :  { %2467 = vmatmul.msk.bf16.vlgmr.msrb.gmra.mxu0 %vm396_vm8, %v1107_v10 }
 0x618   :  { %1390 = vmatpush.bf16.msrb.mxu3 %v2862_v11  ;;  %v1327_v11 = vpop.f32.mrf.mxu2 }
 0x61b   :  { %1391 = vmatmul.bf16.vlgmr.msrb.gmra.mxu3 %v3221_v31 }
 0x67e   :  { %v3451_v14 = vpop.f32.mrf.mxu3 }
 0x686   :  { %v823_v18 = vpop.f32.mrf.mxu3 }
 0x687   :  { %v3456_v20 = vadd.f32 %v852_v16, %v823_v18  ;;  %v1328_v16 = vadd.f32 %v2923_v15, %v1327_v11  ;;  %v2926_v18 = vld [vmem:[%s3756_s4 + $0xb] ss:$0 sm:$0xff]  ;;  %v2702_v11 = vld [vmem:[%s3761_s9 + $0x70] sm:$0xf]  ;;  %v2895_v15 = vld [vmem:[%s3761_s9 + $0x74] sm:$0xf0] }
 0x68e   :  { %v1102_v22 = vpop.f32.mrf.mxu3 }
 0x68f   :  { %v1103_v30 = vadd.f32 %v2924_v26, %v1102_v22 }
 0x692   :  { %v1124_v24 = vpop.f32.mrf.mxu0 }
 0x693   :  { %v1129_v27 = vsel %vm3271_vm3, %v1124_v24, -1e+09 }
 0x694   :  { %v1131_v28 = vsel %vm419_vm4, %v1129_v27, -inf }
 0x695   :  { %1132 = vmax.xlane.f32.xlu0 %v1131_v28 }
 0x696   :  { %v1104_v29 = vpop.f32.mrf.mxu3 }
 0x697   :  { %v1105_v23 = vadd.f32 %v2924_v26, %v1104_v29  ;;  %v851_v29 = vadd.f32 %v3449_v12, %v3451_v14 }
 0x699   :  { %v1154_v25 = vpack.c.bf16 %v1105_v23, %v1103_v30 }
 0x69a   :  { %v1126_v32 = vpop.f32.mrf.mxu0 }
 0x69b   :  { %v1130_v33 = vsel %vm3279_vm7, %v1126_v32, -1e+09  ;;  %v1159_v34 = vsel %vm448_vm9, %v1154_v25, 0 }
 0x69c   :  { %1168 = vmatpush.bf16.msra.mxu0 %v1159_v34  ;;  %v1134_v35 = vsel %vm423_vm10, %v1130_v33, -inf }
 0x69d   :  { %1135 = vmax.xlane.f32.xlu1 %v1134_v35 }
 0x69e   :  { %v1392_v36 = vpop.f32.mrf.mxu3 }
 0x69f   :  { %v1393_v39 = vadd.f32 %v2925_v37, %v1392_v36 }
 0x6a0   :  { %1450 = vmatpush.bf16.msrb.mxu0 %v2877_v53 }
 0x6a4   :  { %1451 = vmatpush.bf16.msrb.mxu0 %v2876_v54 }
 0x6a6   :  { %v1394_v38 = vpop.f32.mrf.mxu3 }
 0x6a7   :  { %v1395_v40 = vadd.f32 %v2925_v37, %v1394_v38 }
 0x6a8   :  { %1452 = vmatpush.bf16.msrb.mxu0 %v2875_v55 }
 0x6a9   :  { %v1465_v41 = vpack.c.bf16 %v1395_v40, %v1393_v39 }
 0x6ab   :  { %v1470_v42 = vsel %vm396_vm8, %v1465_v41, 0 }
 0x6ac   :  { %1479 = vmatpush.bf16.xpose.msra.mxu1 %v1470_v42  ;;  %1453 = vmatpush.bf16.msrb.mxu0 %v2874_v56  ;;  %v2927_v56 = vld [vmem:[%s3758_s6] ss:$0 sm:$0xff] }
 0x6b0   :  { %1454 = vmatpush.bf16.msrb.mxu0 %v2873_v57 }
 0x6b4   :  { %1455 = vmatpush.bf16.msrb.mxu0 %v2872_v58 }
 0x6b8   :  { %1456 = vmatpush.bf16.msrb.mxu0 %v2871_v59 }
 0x6bc   :  { %1457 = vmatpush.bf16.msrb.mxu0 %v2870_v60 }
 0x708   :  { %v1133_v43 = vpop.xlane.xlu0 %1132 }
 0x709   :  { %v1137_v44 = vsub.f32 %v1129_v27, %v1133_v43 }
 0x70b   :  { %v1139_v45 = vmul.f32 1.442695, %v1137_v44 }
 0x70d   :  { %2953 = vpow2.f32 %v1139_v45 }
 0x710   :  { %v1136_v46 = vpop.xlane.xlu1 %1135 }
 0x711   :  { %v1138_v47 = vsub.f32 %v1130_v33, %v1136_v46 }
 0x713   :  { %v2954_v48 = vpop.eup %2953  ;;  %v1141_v49 = vmul.f32 1.442695, %v1138_v47 }
 0x714   :  { %v1143_v50 = vsel %vm419_vm4, %v2954_v48, 0.0 }
 0x715   :  { %2955 = vpow2.f32 %v1141_v49  ;;  %1144 = vadd.xlane.f32.xlu2 %v1143_v50 }
 0x71b   :  { %v2956_v51 = vpop.eup %2955 }
 0x71c   :  { %v1146_v52 = vsel %vm423_vm10, %v2956_v51, 0.0 }
 0x71d   :  { %1147 = vadd.xlane.f32.xlu0 %v1146_v52  ;;  %v2878_v52 = vld [vmem:[%s3757_s5 + $0x30] sm:$0xff] }
 0x788   :  { %v1145_v61 = vpop.xlane.xlu2 %1144 }
 0x789   :  { %2957 = vrcp.f32 %v1145_v61 }
 0x78f   :  { %v2958_v63 = vpop.eup %2957 }
 0x790   :  { %v1148_v62 = vpop.xlane.xlu0 %1147  ;;  %v1151_v2 = vmul.f32 %v2958_v63, %v2954_v48 }
 0x791   :  { %2959 = vrcp.f32 %v1148_v62 }
 0x797   :  { %v2960_v0 = vpop.eup %2959 }
 0x798   :  { %v1152_v3 = vmul.f32 %v2960_v0, %v2956_v51  ;;  %v2879_v51 = vld [vmem:[%s3757_s5 + $0x38] sm:$0xff] }
 0x799   :  { %1559 = vmatpush.bf16.msrb.mxu2 %v2879_v51 }
 0x79a   :  { %v1153_v5 = vpack.c.bf16 %v1152_v3, %v1151_v2 }
 0x79c   :  { %2468 = vmatmul.msk.bf16.vlgmr.msra.gmra.mxu0 %vm419_vm4, %v1153_v5 }
 0x79d   :  { %1560 = vmatpush.bf16.msrb.mxu2 %v2878_v52 }
 0x7ac   :  { %1458 = vmatmul.bf16.vlgmr.msrb.gmra.mxu0 %v3221_v31  ;;  %v1464_v31 = vpack.c.bf16 %v1328_v16, %v1326_v21  ;;  %v2894_v16 = vld [vmem:[%s3761_s9 + $0x74] sm:$0xf]  ;;  %v2704_v21 = vld [vmem:[%s3761_s9 + $0x78] sm:$0xf0] }
 0x819   :  { %v1170_v6 = vpop.f32.mrf.mxu0 }
 0x821   :  { %v1172_v8 = vpop.f32.mrf.mxu0 }
 0x822   :  { %v1175_v9 = vpack.c.bf16 %v1172_v8, %v1170_v6 }
 0x824   :  { %2481 = vmatmul.msk.bf16.vlgmr.msrb.gmra.mxu1 %vm396_vm8, %v1175_v9 }
 0x829   :  { %v1459_v10 = vpop.f32.mrf.mxu0 }
 0x82a   :  { %v1460_v24 = vadd.f32 %v2926_v18, %v1459_v10 }
 0x831   :  { %v1461_v22 = vpop.f32.mrf.mxu0 }
 0x832   :  { %v1462_v26 = vadd.f32 %v2926_v18, %v1461_v22  ;;  %v2703_v18 = vor.u32 %v2895_v15, %v2702_v11  ;;  %v2707_v22 = vor.u32 %v2894_v16, %v2704_v21 }
 0x834   :  { %v1511_v27 = vpack.c.bf16 %v1462_v26, %v1460_v24  ;;  %2629 = vmatmul.msk.bf16.vlgmr.msra.gmra.mxu1 %vm396_vm8, %v1464_v31  ;;  %1733 = vmatpush.bf16.msra.mxu3 %v2703_v18  ;;  %v2694_v31 = vld [vmem:[%s3761_s9 + $0x60] sm:$0xf]  ;;  %v2893_v24 = vld [vmem:[%s3761_s9 + $0x64] sm:$0xf0]  ;;  %v2892_v26 = vld [vmem:[%s3761_s9 + $0x64] sm:$0xf] }
 0x835   :  { %1747 = vmatpush.bf16.msra.mxu0 %v2707_v22 }
 0x836   :  { %v1516_v28 = vsel %vm448_vm9, %v1511_v27, 0  ;;  %v2695_v27 = vor.u32 %v2893_v24, %v2694_v31 }
 0x837   :  { %1525 = vmatpush.bf16.msrb.mxu1 %v1516_v28  ;;  %v2696_v28 = vld [vmem:[%s3761_s9 + $0x68] sm:$0xf0] }
 0x838   :  { %1734 = vmatpush.bf16.msra.mxu3 %v2695_v27 }
 0x8a1   :  { %v1205_v30 = vpop.f32.mrf.mxu1 }
 0x8a2   :  { %v1210_v23 = vadd.f32 %v1205_v30, %v851_v29  ;;  %v2699_v29 = vor.u32 %v2892_v26, %v2696_v28  ;;  %v2686_v30 = vld [vmem:[%s3761_s9 + $0x50] sm:$0xf] }
 0x8a4   :  { %1748 = vmatpush.bf16.msra.mxu0 %v2699_v29 }
 0x8a9   :  { %v1207_v25 = vpop.f32.mrf.mxu1 }
 0x8aa   :  { %v1211_v32 = vadd.f32 %v1207_v25, %v3456_v20  ;;  %v2890_v25 = vld [vmem:[%s3761_s9 + $0x54] sm:$0xf] }
 0x8b1   :  { %v1481_v33 = vpop.f32.mrf.mxu1 }
 0x8b2   :  { %v1486_v34 = vsel %vm3271_vm3, %v1481_v33, -1e+09  ;;  %v2688_v33 = vld [vmem:[%s3761_s9 + $0x58] sm:$0xf0] }
 0x8b3   :  { %v1488_v35 = vsel %vm419_vm4, %v1486_v34, -inf }
 0x8b4   :  { %1489 = vmax.xlane.f32.xlu1 %v1488_v35  ;;  %v2678_v35 = vld [vmem:[%s3761_s9 + $0x40] sm:$0xf] }
 0x8b9   :  { %v1483_v36 = vpop.f32.mrf.mxu1 }
 0x8ba   :  { %v1487_v37 = vsel %vm3279_vm7, %v1483_v36, -1e+09  ;;  %v2889_v36 = vld [vmem:[%s3761_s9 + $0x44] sm:$0xf0] }
 0x8bb   :  { %v1491_v38 = vsel %vm423_vm10, %v1487_v37, -inf }
 0x8bc   :  { %1492 = vmax.xlane.f32.xlu2 %v1491_v38  ;;  %v2679_v38 = vor.u32 %v2889_v36, %v2678_v35  ;;  %v2909_v35 = vld [vmem:[%s3763_s11 + $0x68] sm:$0xff]  ;;  %v2902_v36 = vld [vmem:[%s3763_s11 + $0x30] sm:$0xff] }
 0x927   :  { %v1490_v12 = vpop.xlane.xlu1 %1489 }
 0x928   :  { %v1494_v14 = vsub.f32 %v1486_v34, %v1490_v12  ;;  %v2691_v34 = vor.u32 %v2890_v25, %v2688_v33  ;;  %v2680_v12 = vld [vmem:[%s3761_s9 + $0x48] sm:$0xf0] }
 0x92a   :  { %v1496_v39 = vmul.f32 1.442695, %v1494_v14  ;;  %1749 = vmatpush.bf16.msra.mxu0 %v2691_v34  ;;  %v2903_v34 = vld [vmem:[%s3763_s11 + $0x38] sm:$0xff] }
 0x92b   :  { %1979 = vmatpush.bf16.msra.mxu1 %v2903_v34 }
 0x92c   :  { %2961 = vpow2.f32 %v1496_v39  ;;  %v2670_v39 = vld [vmem:[%s3761_s9 + $0x30] sm:$0xf] }
 0x92f   :  { %v1493_v40 = vpop.xlane.xlu2 %1492  ;;  %1980 = vmatpush.bf16.msra.mxu1 %v2902_v36 }
 0x930   :  { %v1495_v20 = vsub.f32 %v1487_v37, %v1493_v40  ;;  %v2888_v37 = vld [vmem:[%s3761_s9 + $0x44] sm:$0xf]  ;;  %v2887_v40 = vld [vmem:[%s3761_s9 + $0x34] sm:$0xf0] }
 0x931   :  { %v2683_v14 = vor.u32 %v2888_v37, %v2680_v12  ;;  %v1647_v37 = vld [vmem:[%s3764_s10] sm:$0x3]  ;;  %v2901_v12 = vld [vmem:[%s3763_s11 + $0x28] sm:$0xff] }
 0x932   :  { %v2962_v41 = vpop.eup %2961  ;;  %v1498_v42 = vmul.f32 1.442695, %v1495_v20  ;;  %v2886_v20 = vld [vmem:[%s3761_s9 + $0x34] sm:$0xf] }
 0x933   :  { %v1500_v13 = vsel %vm419_vm4, %v2962_v41, 0.0  ;;  %1750 = vmatpush.bf16.msra.mxu0 %v2683_v14  ;;  %v1650_v14 = vperm.slane %v1647_v37, 1  ;;  %1981 = vmatpush.bf16.msra.mxu1 %v2901_v12 }
 0x934   :  { %2963 = vpow2.f32 %v1498_v42  ;;  %1501 = vadd.xlane.f32.xlu0 %v1500_v13  ;;  %v2672_v42 = vld [vmem:[%s3761_s9 + $0x38] sm:$0xf0] }
 0x935   :  { %v2675_v13 = vor.u32 %v2886_v20, %v2672_v42  ;;  %v2900_v20 = vld [vmem:[%s3763_s11 + $0x20] sm:$0xff]  ;;  %v2906_v42 = vld [vmem:[%s3763_s11 + $0x50] sm:$0xff] }
 0x937   :  { %1751 = vmatpush.bf16.msra.mxu0 %v2675_v13  ;;  %1982 = vmatpush.bf16.msra.mxu1 %v2900_v20 }
 0x93a   :  { %v2964_v43 = vpop.eup %2963 }
 0x93b   :  { %v1503_v44 = vsel %vm423_vm10, %v2964_v43, 0.0 }
 0x93c   :  { %1504 = vadd.xlane.f32.xlu1 %v1503_v44  ;;  %v2885_v44 = vld [vmem:[%s3761_s9 + $0x24] sm:$0xf0] }
 0x9a7   :  { %v1502_v17 = vpop.xlane.xlu0 %1501 }
 0x9a8   :  { %2965 = vrcp.f32 %v1502_v17  ;;  %v2884_v17 = vld [vmem:[%s3761_s9 + $0x24] sm:$0xf] }
 0x9ae   :  { %v2966_v46 = vpop.eup %2965 }
 0x9af   :  { %v1505_v45 = vpop.xlane.xlu1 %1504  ;;  %v1508_v48 = vmul.f32 %v2966_v46, %v2962_v41  ;;  %v2671_v41 = vor.u32 %v2887_v40, %v2670_v39  ;;  %v2664_v46 = vld [vmem:[%s3761_s9 + $0x28] sm:$0xf0]  ;;  %v2907_v39 = vld [vmem:[%s3763_s11 + $0x58] sm:$0xff] }
 0x9b0   :  { %2967 = vrcp.f32 %v1505_v45 }
 0x9b6   :  { %v2968_v47 = vpop.eup %2967 }
 0x9b7   :  { %v1509_v49 = vmul.f32 %v2968_v47, %v2964_v43  ;;  %v2662_v43 = vld [vmem:[%s3761_s9 + $0x20] sm:$0xf]  ;;  %v2667_v47 = vor.u32 %v2884_v17, %v2664_v46  ;;  %v2905_v46 = vld [vmem:[%s3763_s11 + $0x48] sm:$0xff] }
 0x9b8   :  { %v2663_v45 = vor.u32 %v2885_v44, %v2662_v43  ;;  %v1649_v43 = vperm.slane %v1647_v37, 0  ;;  %v2899_v44 = vld [vmem:[%s3763_s11 + $0x18] sm:$0xff] }
 0x9b9   :  { %v1510_v50 = vpack.c.bf16 %v1509_v49, %v1508_v48  ;;  %1752 = vmatpush.bf16.msra.mxu0 %v2667_v47  ;;  %v2654_v48 = vld [vmem:[%s3761_s9 + $0x10] sm:$0xf]  ;;  %v2883_v49 = vld [vmem:[%s3761_s9 + $0x14] sm:$0xf0]  ;;  %1983 = vmatpush.bf16.msra.mxu1 %v2899_v44 }
 0x9ba   :  { %v2655_v52 = vor.u32 %v2883_v49, %v2654_v48  ;;  %v2898_v49 = vld [vmem:[%s3763_s11 + $0x10] sm:$0xff] }
 0x9bb   :  { %2630 = vmatmul.msk.bf16.vlgmr.msrb.gmra.mxu1 %vm419_vm4, %v1510_v50  ;;  %v2882_v50 = vld [vmem:[%s3761_s9 + $0x14] sm:$0xf] }
 0x9bd   :  { %1984 = vmatpush.bf16.msra.mxu1 %v2898_v49 }
 0xa38   :  { %v1527_v53 = vpop.f32.mrf.mxu1 }
 0xa40   :  { %v1529_v54 = vpop.f32.mrf.mxu1 }
 0xa41   :  { %v1532_v55 = vpack.c.bf16 %v1529_v54, %v1527_v53  ;;  %v2656_v53 = vld [vmem:[%s3761_s9 + $0x18] sm:$0xf0] }
 0xa43   :  { %2643 = vmatmul.msk.bf16.vlgmr.msrb.gmra.mxu2 %vm396_vm8, %v1532_v55  ;;  %v2659_v55 = vor.u32 %v2882_v50, %v2656_v53 }
 0xa45   :  { %1753 = vmatpush.bf16.msra.mxu0 %v2659_v55  ;;  %v2897_v55 = vld [vmem:[%s3763_s11 + $0x8] sm:$0xff] }
 0xa46   :  { %1985 = vmatpush.bf16.msra.mxu1 %v2897_v55 }
 0xac6   :  { %v1562_v57 = vpop.f32.mrf.mxu2 }
 0xac7   :  { %v1567_v58 = vadd.f32 %v1562_v57, %v1210_v23  ;;  %v2891_v23 = vld [vmem:[%s3761_s9 + $0x54] sm:$0xf0]  ;;  %v2881_v57 = vld [vmem:[%s3761_s9 + $0x4] sm:$0xf0] }
 0xac9   :  { %v1572_v59 = vadd.f32 %v2927_v56, %v1567_v58  ;;  %v2880_v58 = vld [vmem:[%s3761_s9 + $0x4] sm:$0xf] }
 0xacb   :  { %v3535_v60 = vadd.f32 %v1572_v59, %v3070_v4 }
 0xacd   :  { %1578 = vadd.xlane.f32.xlu0 %v3535_v60 }
 0xace   :  { %v1564_v61 = vpop.f32.mrf.mxu2 }
 0xacf   :  { %v1568_v62 = vadd.f32 %v1564_v61, %v1211_v32  ;;  %v2687_v32 = vor.u32 %v2891_v23, %v2686_v30  ;;  %v2648_v61 = vld [vmem:[%s3761_s9 + $0x8] sm:$0xf0]  ;;  %v2929_v30 = vld [vmem:[%s3760_s8] ss:$0 sm:$0xff] }
 0xad1   :  { %v1573_v63 = vadd.f32 %v2927_v56, %v1568_v62  ;;  %1735 = vmatpush.bf16.msra.mxu3 %v2687_v32  ;;  %v2646_v56 = vld [vmem:[%s3761_s9] sm:$0xf] }
 0xad2   :  { %v2647_v59 = vor.u32 %v2881_v57, %v2646_v56 }
 0xad3   :  { %v3539_v0 = vadd.f32 %v1573_v63, %v3063_v1  ;;  %v2651_v63 = vor.u32 %v2880_v58, %v2648_v61 }
 0xad5   :  { %v1580_v2 = vsel %vm84_vm0, %v3539_v0, 0.0  ;;  %1736 = vmatpush.bf16.msra.mxu3 %v2679_v38  ;;  %1754 = vmatpush.bf16.msra.mxu0 %v2651_v63  ;;  %v2908_v38 = vld [vmem:[%s3763_s11 + $0x60] sm:$0xff] }
 0xad6   :  { %1581 = vadd.xlane.f32.xlu2 %v1580_v2 }
 0xad9   :  { %1737 = vmatpush.bf16.msra.mxu3 %v2671_v41 }
 0xadd   :  { %1738 = vmatpush.bf16.msra.mxu3 %v2663_v45 }
 0xae1   :  { %1739 = vmatpush.bf16.msra.mxu3 %v2655_v52  ;;  %v2904_v52 = vld [vmem:[%s3763_s11 + $0x40] sm:$0xff] }
 0xae5   :  { %1740 = vmatpush.bf16.msra.mxu3 %v2647_v59 }
 0xb40   :  { %v1579_v3 = vpop.xlane.xlu0 %1578 }
 0xb41   :  { %v1583_v5 = vmul.f32 %v1579_v3, %v3094_v19 }
 0xb43   :  { %v3545_v6 = vsub.f32 %v3535_v60, %v1583_v5 }
 0xb45   :  { %v1587_v4 = vmul.f32 %v3545_v6, %v3545_v6 }
 0xb47   :  { %1589 = vadd.xlane.f32.xlu1 %v1587_v4 }
 0xb49   :  { %v1582_v7 = vpop.xlane.xlu2 %1581 }
 0xb4a   :  { %v1584_v8 = vmul.f32 %v1582_v7, %v3094_v19 }
 0xb4c   :  { %v3551_v1 = vsub.f32 %v3539_v0, %v1584_v8 }
 0xb4e   :  { %v1588_v9 = vmul.f32 %v3551_v1, %v3551_v1 }
 0xb50   :  { %v1591_v10 = vsel %vm84_vm0, %v1588_v9, 0.0 }
 0xb51   :  { %1592 = vadd.xlane.f32.xlu2 %v1591_v10 }
 0xbba   :  { %v1590_v51 = vpop.xlane.xlu1 %1589 }
 0xbbb   :  { %v1594_v54 = vmul.f32 %v1590_v51, %v3094_v19 }
 0xbbd   :  { %v1596_v62 = vadd.f32 1e-05, %v1594_v54 }
 0xbbf   :  { %2969 = vrsqrt.f32 %v1596_v62  ;;  %vm1604_vm8 = vweird.f32 %v1596_v62 }
 0xbc4   :  { %v1593_v2 = vpop.xlane.xlu2 %1592 }
 0xbc5   :  { %v2970_v3 = vpop.eup %2969  ;;  %v1595_v5 = vmul.f32 %v1593_v2, %v3094_v19  ;;  %v2928_v19 = vld [vmem:[%s3759_s7] ss:$0 sm:$0xff] }
 0xbc6   :  { %v1599_v4 = vmul.f32 %v2970_v3, %v1596_v62  ;;  %vm1605_vm0 = vweird.f32 %v2970_v3  ;;  %v2896_v62 = vld [vmem:[%s3763_s11] sm:$0xff] }
 0xbc7   :  { %v1597_v7 = vadd.f32 1e-05, %v1595_v5  ;;  %vm1606_vm9 = vmor %vm1604_vm8, %vm1605_vm0  ;;  %1986 = vmatpush.bf16.msra.mxu1 %v2896_v62 }
 0xbc8   :  { %v1600_v8 = vmul.f32 %v2970_v3, %v1599_v4 }
 0xbc9   :  { %2971 = vrsqrt.f32 %v1597_v7  ;;  %vm1614_vm12 = vweird.f32 %v1597_v7 }
 0xbca   :  { %v1601_v9 = vmul.f32 0.5, %v1600_v8 }
 0xbcc   :  { %v1602_v10 = vsub.f32 1.5, %v1601_v9 }
 0xbce   :  { %v1603_v15 = vmul.f32 %v2970_v3, %v1602_v10 }
 0xbcf   :  { %v2972_v11 = vpop.eup %2971 }
 0xbd0   :  { %v1609_v16 = vmul.f32 %v2972_v11, %v1597_v7  ;;  %v1607_v21 = vsel %vm1606_vm9, %v2970_v3, %v1603_v15  ;;  %vm1615_vm11 = vweird.f32 %v2972_v11 }
 0xbd1   :  { %v1618_v24 = vmul.f32 %v1607_v21, %v3545_v6  ;;  %vm1616_vm13 = vmor %vm1614_vm12, %vm1615_vm11  ;;  %v2911_v6 = vld [vmem:[%s3763_s11 + $0x78] sm:$0xff] }
 0xbd2   :  { %v1610_v18 = vmul.f32 %v2972_v11, %v1609_v16  ;;  %1993 = vmatpush.bf16.msra.mxu2 %v2911_v6 }
 0xbd3   :  { %v1623_v29 = vmul.f32 %v2928_v19, %v1618_v24 }
 0xbd4   :  { %v1611_v22 = vmul.f32 0.5, %v1610_v18 }
 0xbd5   :  { %v1628_v25 = vadd.f32 %v2929_v30, %v1623_v29 }
 0xbd6   :  { %v1612_v31 = vsub.f32 1.5, %v1611_v22 }
 0xbd8   :  { %v1613_v26 = vmul.f32 %v2972_v11, %v1612_v31 }
 0xbda   :  { %v1617_v27 = vsel %vm1616_vm13, %v2972_v11, %v1613_v26 }
 0xbdb   :  { %v1619_v28 = vmul.f32 %v1617_v27, %v3551_v1  ;;  %v2910_v1 = vld [vmem:[%s3763_s11 + $0x70] sm:$0xff] }
 0xbdc   :  { %1994 = vmatpush.bf16.msra.mxu2 %v2910_v1 }
 0xbdd   :  { %v1624_v23 = vmul.f32 %v2928_v19, %v1619_v28 }
 0xbdf   :  { %v1629_v32 = vadd.f32 %v2929_v30, %v1624_v23 }
 0xbe0   :  { %1995 = vmatpush.bf16.msra.mxu2 %v2909_v35 }
 0xbe1   :  { %v1630_v33 = vpack.c.bf16 %v1629_v32, %v1628_v25 }
 0xbe3   :  { %1741 = vmatmul.bf16.vlgmr.msra.gmra.mxu3 %v1630_v33  ;;  %1755 = vmatmul.bf16.vlgmr.msra.gmra.mxu0 %v1630_v33 }
 0xbe4   :  { %1996 = vmatpush.bf16.msra.mxu2 %v2908_v38 }
 0xbe8   :  { %1997 = vmatpush.bf16.msra.mxu2 %v2907_v39 }
 0xbec   :  { %1998 = vmatpush.bf16.msra.mxu2 %v2906_v42 }
 0xbf0   :  { %1999 = vmatpush.bf16.msra.mxu2 %v2905_v46 }
 0xbf4   :  { %2000 = vmatpush.bf16.msra.mxu2 %v2904_v52 }
 0xc60   :  { %v1756_v40 = vpop.f32.mrf.mxu0 }
 0xc61   :  { %v3692_v41 = vadd.f32 %v1756_v40, %v1650_v14 }
 0xc63   :  { %v2709_v13 = vmul.f32 -1.702, %v3692_v41 }
 0xc65   :  { %v1771_v17 = vmul.f32 1.442695, %v2709_v13 }
 0xc66   :  { %v1742_v45 = vpop.f32.mrf.mxu3 }
 0xc67   :  { %2973 = vpow2.f32 %v1771_v17  ;;  %v3704_v47 = vadd.f32 %v1742_v45, %v1649_v43 }
 0xc68   :  { %v1758_v48 = vpop.f32.mrf.mxu0 }
 0xc69   :  { %v2708_v50 = vmul.f32 -1.702, %v3704_v47  ;;  %v3710_v51 = vadd.f32 %v1758_v48, %v1650_v14 }
 0xc6b   :  { %v1769_v53 = vmul.f32 1.442695, %v2708_v50  ;;  %v2711_v54 = vmul.f32 -1.702, %v3710_v51 }
 0xc6d   :  { %v2974_v56 = vpop.eup %2973  ;;  %2975 = vpow2.f32 %v1769_v53  ;;  %v1775_v57 = vmul.f32 1.442695, %v2711_v54 }
 0xc6e   :  { %v1778_v58 = vadd.f32 1.0, %v2974_v56  ;;  %v1744_v59 = vpop.f32.mrf.mxu3 }
 0xc6f   :  { %2977 = vpow2.f32 %v1775_v57  ;;  %v3719_v61 = vadd.f32 %v1744_v59, %v1649_v43 }
 0xc70   :  { %2979 = vrcp.f32 %v1778_v58  ;;  %v1805_v31 = vand.u32 2147483647, %v1778_v58  ;;  %v1807_v27 = vand.u32 2147483648, %v1778_v58  ;;  %vm1801_vm15 = vweird.f32 %v1778_v58 }
 0xc71   :  { %v2710_v63 = vmul.f32 -1.702, %v3719_v61 }
 0xc72   :  { %vm1806_vm2 = vcmp.eq.f32.partialorder %v1805_v31, 8.507059e+37  ;;  %v1808_v1 = vor.u32 1.1754944e-38, %v1807_v27 }
 0xc73   :  { %v2976_v2 = vpop.eup %2975  ;;  %v1773_v3 = vmul.f32 1.442695, %v2710_v63 }
 0xc74   :  { %v1777_v5 = vadd.f32 1.0, %v2976_v2 }
 0xc75   :  { %v2978_v4 = vpop.eup %2977  ;;  %2981 = vpow2.f32 %v1773_v3 }
 0xc76   :  { %v2980_v7 = vpop.eup %2979  ;;  %2983 = vrcp.f32 %v1777_v5  ;;  %v1780_v9 = vadd.f32 1.0, %v2978_v4  ;;  %vm1786_vm5 = vweird.f32 %v1777_v5  ;;  %v1792_v36 = vand.u32 2147483648, %v1777_v5 }
 0xc77   :  { %v1797_v8 = vmul.f32 %v2980_v7, %v1778_v58  ;;  %vm1802_vm14 = vweird.f32 %v2980_v7  ;;  %v1790_v12 = vand.u32 2147483647, %v1777_v5 }
 0xc78   :  { %2985 = vrcp.f32 %v1780_v9  ;;  %vm3725_vm1 = vmor %vm1801_vm15, %vm1802_vm14  ;;  %v1837_v23 = vand.u32 2147483648, %v1780_v9  ;;  %v1835_v6 = vand.u32 2147483647, %v1780_v9  ;;  %vm1831_vm6 = vweird.f32 %v1780_v9 }
 0xc79   :  { %v1798_v10 = vsub.f32 1.0, %v1797_v8  ;;  %v1793_v46 = vor.u32 1.1754944e-38, %v1792_v36  ;;  %vm1791_vm9 = vcmp.eq.f32.partialorder %v1790_v12, 8.507059e+37 }
 0xc7a   :  { %v1838_v14 = vor.u32 1.1754944e-38, %v1837_v23  ;;  %vm1836_vm0 = vcmp.eq.f32.partialorder %v1835_v6, 8.507059e+37 }
 0xc7b   :  { %v2982_v11 = vpop.eup %2981  ;;  %v1799_v16 = vmul.f32 %v2980_v7, %v1798_v10 }
 0xc7c   :  { %v2984_v15 = vpop.eup %2983  ;;  %v1779_v18 = vadd.f32 1.0, %v2982_v11 }
 0xc7d   :  { %v1782_v21 = vmul.f32 %v2984_v15, %v1777_v5  ;;  %v1800_v19 = vadd.f32 %v2980_v7, %v1799_v16  ;;  %vm1787_vm4 = vweird.f32 %v2984_v15 }
 0xc7e   :  { %2987 = vrcp.f32 %v1779_v18  ;;  %v2986_v22 = vpop.eup %2985  ;;  %vm3731_vm10 = vmor %vm1786_vm5, %vm1787_vm4  ;;  %v1820_v42 = vand.u32 2147483647, %v1779_v18  ;;  %v1822_v13 = vand.u32 2147483648, %v1779_v18  ;;  %vm1816_vm11 = vweird.f32 %v1779_v18 }
 0xc7f   :  { %v1783_v24 = vsub.f32 1.0, %v1782_v21  ;;  %v1827_v26 = vmul.f32 %v2986_v22, %v1780_v9  ;;  %v1804_v32 = vsel %vm3725_vm1, %v2980_v7, %v1800_v19  ;;  %vm1832_vm3 = vweird.f32 %v2986_v22 }
 0xc80   :  { %v1809_v38 = vsel %vm1806_vm2, %v1808_v1, %v1804_v32  ;;  %vm1833_vm7 = vmor %vm1831_vm6, %vm1832_vm3  ;;  %v1823_v53 = vor.u32 1.1754944e-38, %v1822_v13  ;;  %vm1821_vm13 = vcmp.eq.f32.partialorder %v1820_v42, 8.507059e+37 }
 0xc81   :  { %v1784_v28 = vmul.f32 %v2984_v15, %v1783_v24  ;;  %v1828_v29 = vsub.f32 1.0, %v1827_v26  ;;  %v1842_v45 = vmul.f32 %v1809_v38, %v3692_v41  ;;  %v2930_v41 = vld [vmem:[%s3762_s12] ss:$0 sm:$0xff] }
 0xc83   :  { %v1829_v33 = vmul.f32 %v2986_v22, %v1828_v29  ;;  %v1785_v34 = vadd.f32 %v2984_v15, %v1784_v28 }
 0xc84   :  { %v2988_v25 = vpop.eup %2987 }
 0xc85   :  { %v1812_v35 = vmul.f32 %v2988_v25, %v1779_v18  ;;  %v1830_v37 = vadd.f32 %v2986_v22, %v1829_v33  ;;  %v1789_v43 = vsel %vm3731_vm10, %v2984_v15, %v1785_v34  ;;  %vm1817_vm8 = vweird.f32 %v2988_v25 }
 0xc86   :  { %v1794_v50 = vsel %vm1791_vm9, %v1793_v46, %v1789_v43  ;;  %vm1818_vm12 = vmor %vm1816_vm11, %vm1817_vm8 }
 0xc87   :  { %v1813_v39 = vsub.f32 1.0, %v1812_v35  ;;  %v1834_v20 = vsel %vm1833_vm7, %v2986_v22, %v1830_v37  ;;  %v1841_v56 = vmul.f32 %v1794_v50, %v3704_v47 }
 0xc88   :  { %v1839_v44 = vsel %vm1836_vm0, %v1838_v14, %v1834_v20 }
 0xc89   :  { %v1814_v17 = vmul.f32 %v2988_v25, %v1813_v39  ;;  %v1844_v48 = vmul.f32 %v1839_v44, %v3710_v51 }
 0xc8b   :  { %v1815_v49 = vadd.f32 %v2988_v25, %v1814_v17  ;;  %v1846_v52 = vpack.c.bf16 %v1844_v48, %v1842_v45 }
 0xc8d   :  { %v1819_v54 = vsel %vm1818_vm12, %v2988_v25, %v1815_v49  ;;  %2001 = vmatmul.bf16.vlgmr.msra.gmra.mxu2 %v1846_v52 }
 0xc8e   :  { %v1824_v55 = vsel %vm1821_vm13, %v1823_v53, %v1819_v54 }
 0xc8f   :  { %v1843_v57 = vmul.f32 %v1824_v55, %v3719_v61 }
 0xc91   :  { %v1845_v58 = vpack.c.bf16 %v1843_v57, %v1841_v56 }
 0xc93   :  { %1987 = vmatmul.bf16.vlgmr.msra.gmra.mxu1 %v1845_v58 }
 0xd10   :  { %v1988_v51 = vpop.f32.mrf.mxu1  ;;  %v2002_v62 = vpop.f32.mrf.mxu2 }
 0xd11   :  { %v1989_v59 = vadd.f32 %v2930_v41, %v1988_v51 }
 0xd13   :  { %v2003_v63 = vadd.f32 %v2002_v62, %v1989_v59 }
 0xd15   :  { %v2007_v2 = vadd.f32 %v2003_v63, %v3535_v60 }
 0xd17   :  { %v2009_v3 = vpack.c.bf16 %v2007_v2, %v2007_v2 }
 0xd18   :  { %v1990_v5 = vpop.f32.mrf.mxu1  ;;  %v2004_v61 = vpop.f32.mrf.mxu2 }
 0xd19   :  { %2011 = vst [vmem:[%s3765_s13] sm:$0xf] %v2009_v3  ;;  %v1991_v47 = vadd.f32 %v2930_v41, %v1990_v5 }
 0xd1b   :  { %v2005_v4 = vadd.f32 %v2004_v61, %v1991_v47 }
 0xd1d   :  { %v2008_v7 = vadd.f32 %v2005_v4, %v3539_v0 }
 0xd1f   :  { %v2010_v8 = vpack.c.bf16 %v2008_v7, %v2008_v7 }
 0xd21   :  { %2012 = vst [vmem:[%s3765_s13 + $0x4] sm:$0x1] %v2010_v8 }

// kernel: llava_forward.9
= control target key start
LH: loop header
LB: loop body
LE: loop exit
PB: predicated region body
PF: predicated region fallthrough
CT: control target
= control target key end

     0   :  { %s3886_s0 = inlined_call_operand.vmem [shape: bf16[16,128], index: 0, kind: input, shape index: {}]   ;;  %s3887_s1 = inlined_call_operand.vmem [shape: f32[1,128], index: 1, kind: input, shape index: {}]   ;;  %s3888_s2 = inlined_call_operand.vmem [shape: bf16[12,128,32], index: 2, kind: input, shape index: {}]   ;;  %s3889_s3 = inlined_call_operand.vmem [shape: bf16[4,32,128], index: 3, kind: input, shape index: {}]   ;;  %s3890_s4 = inlined_call_operand.vmem [shape: f32[1,128], index: 4, kind: input, shape index: {}]   ;;  %s3891_s5 = inlined_call_operand.vmem [shape: bf16[128,512], index: 5, kind: input, shape index: {}]   ;;  %s3892_s6 = inlined_call_operand.vmem [shape: bf16[256,128], index: 6, kind: input, shape index: {}]   ;;  %s3893_s7 = inlined_call_operand.vmem [shape: f32[1,128], index: 7, kind: input, shape index: {}]   ;;  %s3894_s8 = inlined_call_operand.hbm [shape: f32[16,128], index: 8, kind: output, shape index: {}]  }
   0x1   :  { %v3024_v0 = vld [vmem:[%s3886_s0] sm:$0xff]   ;;  %v2878_v1 = vld [vmem:[%s3888_s2 + $0x38] sm:$0xff]  ;;  %v2877_v4 = vld [vmem:[%s3888_s2 + $0x30] sm:$0xff] }
   0x2   :  { %v2886_v2 = vld [vmem:[%s3888_s2 + $0x138] sm:$0xff]  ;;  %v3180_v3 = vunpack.c.l.bf16 %v3024_v0  ;;  %180 = vmatpush.bf16.msra.mxu0 %v2878_v1  ;;  %v2885_v5 = vld [vmem:[%s3888_s2 + $0x130] sm:$0xff] }
   0x3   :  { %259 = vmatpush.bf16.msra.mxu1 %v2886_v2 }
   0x4   :  { %v71_v6 = vmul.f32 %v3180_v3, %v3180_v3 }
   0x5   :  { %13 = vsyncpa [#allocation3], 0  ;;  %v3190_v7 = vunpack.c.h.bf16 %v3024_v0  ;;  %v2876_v9 = vld [vmem:[%s3888_s2 + $0x28] sm:$0xff]  ;;  %v2875_v11 = vld [vmem:[%s3888_s2 + $0x20] sm:$0xff]  ;;  %v3122_v14 = vmov 128.0   ;;  %vm354_vm7 = vcmask 261120  }
   0x6   :  { %73 = vadd.xlane.f32.xlu0 %v71_v6  ;;  %181 = vmatpush.bf16.msra.mxu0 %v2877_v4  ;;  %v2884_v10 = vld [vmem:[%s3888_s2 + $0x128] sm:$0xff]  ;;  %v2883_v12 = vld [vmem:[%s3888_s2 + $0x120] sm:$0xff]  ;;  %v2894_v13 = vld [vmem:[%s3888_s2 + $0x238] sm:$0xff]  ;;  %3034 = vrcp.f32 %v3122_v14  ;;  %vm377_vm11 = vcmask 130048   ;;  %s3123_s27 = smov [#allocation2]   ;;  %s2047_s9 = sshll.u32 %s3894_s8, 4  ;;  %s2048_s9 = int_to_ptr.hbm [resolvable:$true] %s2047_s9 }
   0x7   :  { %260 = vmatpush.bf16.msra.mxu1 %v2885_v5  ;;  %v72_v8 = vmul.f32 %v3190_v7, %v3190_v7  ;;  %338 = vmatpush.bf16.msra.mxu2 %v2894_v13  ;;  %v2874_v15 = vld [vmem:[%s3888_s2 + $0x18] sm:$0xff]  ;;  %v2893_v17 = vld [vmem:[%s3888_s2 + $0x230] sm:$0xff]  ;;  %v2892_v21 = vld [vmem:[%s3888_s2 + $0x228] sm:$0xff]  ;;  %s2045_s28 = sshll.u32 %s3123_s27, 4  ;;  %s3125_s10 = smov 8   ;;  %s2046_s28 = int_to_ptr.vmem [resolvable:$true] %s2045_s28 }
   0x8   :  { %v2882_v16 = vld [vmem:[%s3888_s2 + $0x118] sm:$0xff]  ;;  %v2873_v19 = vld [vmem:[%s3888_s2 + $0x10] sm:$0xff]  ;;  %v2872_v23 = vld [vmem:[%s3888_s2 + $0x8] sm:$0xff] }
   0x9   :  { %v2881_v20 = vld [vmem:[%s3888_s2 + $0x110] sm:$0xff]  ;;  %v2880_v24 = vld [vmem:[%s3888_s2 + $0x108] sm:$0xff]  ;;  %v2891_v25 = vld [vmem:[%s3888_s2 + $0x220] sm:$0xff] }
   0xa   :  { %182 = vmatpush.bf16.msra.mxu0 %v2876_v9  ;;  %v2871_v27 = vld [vmem:[%s3888_s2] sm:$0xff]  ;;  %v2890_v29 = vld [vmem:[%s3888_s2 + $0x218] sm:$0xff]  ;;  %v2889_v33 = vld [vmem:[%s3888_s2 + $0x210] sm:$0xff] }
   0xb   :  { %261 = vmatpush.bf16.msra.mxu1 %v2884_v10  ;;  %339 = vmatpush.bf16.msra.mxu2 %v2893_v17  ;;  %v2879_v28 = vld [vmem:[%s3888_s2 + $0x100] sm:$0xff]  ;;  %v2912_v30 = vld [vmem:[%s3888_s2 + $0x178] sm:$0xff]  ;;  %v2911_v34 = vld [vmem:[%s3888_s2 + $0x170] sm:$0xff] }
   0xc   :  { %v3035_v18 = vpop.eup %3034  ;;  %v2920_v31 = vld [vmem:[%s3888_s2 + $0x278] sm:$0xff]  ;;  %v2919_v35 = vld [vmem:[%s3888_s2 + $0x270] sm:$0xff]  ;;  %v2888_v37 = vld [vmem:[%s3888_s2 + $0x208] sm:$0xff] }
   0xd   :  { %v78_v22 = vmul.f32 128.0, %v3035_v18  ;;  %vm82_vm0 = vweird.f32 %v3035_v18  ;;  %v2910_v38 = vld [vmem:[%s3888_s2 + $0x168] sm:$0xff]  ;;  %v2887_v42 = vld [vmem:[%s3888_s2 + $0x200] sm:$0xff]  ;;  %v2908_v47 = vld [vmem:[%s3888_s2 + $0x158] sm:$0xff] }
   0xe   :  { %75 = vadd.xlane.f32.xlu0 %v72_v8  ;;  %183 = vmatpush.bf16.msra.mxu0 %v2875_v11  ;;  %v2918_v39 = vld [vmem:[%s3888_s2 + $0x268] sm:$0xff]  ;;  %v2909_v43 = vld [vmem:[%s3888_s2 + $0x160] sm:$0xff]  ;;  %v2916_v48 = vld [vmem:[%s3888_s2 + $0x258] sm:$0xff] }
   0xf   :  { %262 = vmatpush.bf16.msra.mxu1 %v2883_v12  ;;  %340 = vmatpush.bf16.msra.mxu2 %v2892_v21  ;;  %v79_v26 = vsub.f32 1.0, %v78_v22  ;;  %v2917_v44 = vld [vmem:[%s3888_s2 + $0x260] sm:$0xff]  ;;  %v2907_v49 = vld [vmem:[%s3888_s2 + $0x150] sm:$0xff]  ;;  %v2906_v55 = vld [vmem:[%s3888_s2 + $0x148] sm:$0xff] }
  0x10   :  { %v2915_v50 = vld [vmem:[%s3888_s2 + $0x250] sm:$0xff]  ;;  %v2914_v56 = vld [vmem:[%s3888_s2 + $0x248] sm:$0xff]  ;;  %v2905_v59 = vld [vmem:[%s3888_s2 + $0x140] sm:$0xff] }
  0x11   :  { %v80_v32 = vmul.f32 %v3035_v18, %v79_v26  ;;  %v2913_v60 = vld [vmem:[%s3888_s2 + $0x240] sm:$0xff] }
  0x12   :  { %184 = vmatpush.bf16.msra.mxu0 %v2874_v15  ;;  %v3031_v9 = vld [vmem:[%s3887_s1] ss:$0 sm:$0xff] }
  0x13   :  { %263 = vmatpush.bf16.msra.mxu1 %v2882_v16  ;;  %341 = vmatpush.bf16.msra.mxu2 %v2891_v25  ;;  %v81_v36 = vadd.f32 %v3035_v18, %v80_v32 }
  0x15   :  { %v3269_v40 = vsel %vm82_vm0, %v3035_v18, %v81_v36 }
  0x16   :  { %185 = vmatpush.bf16.msra.mxu0 %v2873_v19 }
  0x17   :  { %264 = vmatpush.bf16.msra.mxu1 %v2881_v20  ;;  %342 = vmatpush.bf16.msra.mxu2 %v2890_v29 }
  0x1a   :  { %186 = vmatpush.bf16.msra.mxu0 %v2872_v23 }
  0x1b   :  { %265 = vmatpush.bf16.msra.mxu1 %v2880_v24  ;;  %343 = vmatpush.bf16.msra.mxu2 %v2889_v33  ;;  %v35_v33 = vlaneseq }
  0x1e   :  { %187 = vmatpush.bf16.msra.mxu0 %v2871_v27 }
  0x1f   :  { %266 = vmatpush.bf16.msra.mxu1 %v2879_v28  ;;  %344 = vmatpush.bf16.msra.mxu2 %v2888_v37 }
  0x22   :  { %568 = vmatpush.bf16.msrb.mxu0 %v2912_v30 }
  0x23   :  { %647 = vmatpush.bf16.msrb.mxu1 %v2920_v31  ;;  %345 = vmatpush.bf16.msra.mxu2 %v2887_v42 }
  0x26   :  { %569 = vmatpush.bf16.msrb.mxu0 %v2911_v34  ;;  %v36_v34 = vshrl.u32 %v35_v33, 7 }
  0x27   :  { %648 = vmatpush.bf16.msrb.mxu1 %v2919_v35  ;;  %v39_v35 = vand.u32 127, %v35_v33  ;;  %v2937_v33 = vld [vmem:[%s3888_s2 + $0x1b0] sm:$0xff] }
  0x28   :  { %v37_v37 = vadd.s32 8, %v36_v34 }
  0x29   :  { %vm49_vm8 = vcmp.lt.s32.totalorder %v39_v35, 8  ;;  %vm66_vm9 = vcmp.ge.s32.totalorder %v36_v34, %v39_v35  ;;  %vm58_vm12 = vcmp.ge.s32.totalorder %v39_v35, 8  ;;  %vm61_vm13 = vcmp.lt.s32.totalorder %v39_v35, 16  ;;  %v2936_v34 = vld [vmem:[%s3888_s2 + $0x1a8] sm:$0xff] }
  0x2a   :  { %570 = vmatpush.bf16.msrb.mxu0 %v2910_v38  ;;  %vm3321_vm10 = vmand %vm49_vm8, %vm66_vm9  ;;  %vm67_vm15 = vcmp.ge.s32.totalorder %v37_v37, %v39_v35 }
  0x2b   :  { %649 = vmatpush.bf16.msrb.mxu1 %v2918_v39  ;;  %vm63_vm14 = vmand %vm58_vm12, %vm61_vm13 }
  0x2c   :  { %vm3328_vm0 = vmand %vm63_vm14, %vm67_vm15 }
  0x2e   :  { %571 = vmatpush.bf16.msrb.mxu0 %v2909_v43 }
  0x2f   :  { %650 = vmatpush.bf16.msrb.mxu1 %v2917_v44 }
  0x32   :  { %572 = vmatpush.bf16.msrb.mxu0 %v2908_v47 }
  0x33   :  { %651 = vmatpush.bf16.msrb.mxu1 %v2916_v48 }
  0x36   :  { %573 = vmatpush.bf16.msrb.mxu0 %v2907_v49 }
  0x37   :  { %652 = vmatpush.bf16.msrb.mxu1 %v2915_v50 }
  0x3a   :  { %574 = vmatpush.bf16.msrb.mxu0 %v2906_v55 }
  0x3b   :  { %653 = vmatpush.bf16.msrb.mxu1 %v2914_v56  ;;  %v2904_v56 = vld [vmem:[%s3888_s2 + $0x78] sm:$0xff] }
  0x3e   :  { %575 = vmatpush.bf16.msrb.mxu0 %v2905_v59  ;;  %v2901_v59 = vld [vmem:[%s3888_s2 + $0x60] sm:$0xff] }
  0x3f   :  { %654 = vmatpush.bf16.msrb.mxu1 %v2913_v60  ;;  %v2900_v60 = vld [vmem:[%s3888_s2 + $0x58] sm:$0xff] }
  0x79   :  { %v74_v41 = vpop.xlane.xlu0 %73 }
  0x7a   :  { %v84_v45 = vmul.f32 %v3269_v40, %v74_v41 }
  0x7c   :  { %v86_v46 = vadd.f32 1e-06, %v84_v45 }
  0x7e   :  { %3036 = vrsqrt.f32 %v86_v46  ;;  %vm94_vm2 = vweird.f32 %v86_v46 }
  0x81   :  { %v76_v51 = vpop.xlane.xlu0 %75 }
  0x82   :  { %v85_v52 = vmul.f32 %v3269_v40, %v76_v51 }
  0x84   :  { %v3037_v53 = vpop.eup %3036  ;;  %v87_v54 = vadd.f32 1e-06, %v85_v52 }
  0x85   :  { %v89_v57 = vmul.f32 %v3037_v53, %v86_v46  ;;  %vm95_vm1 = vweird.f32 %v3037_v53 }
  0x86   :  { %3038 = vrsqrt.f32 %v87_v54  ;;  %vm96_vm3 = vmor %vm94_vm2, %vm95_vm1  ;;  %vm104_vm5 = vweird.f32 %v87_v54 }
  0x87   :  { %v90_v58 = vmul.f32 %v3037_v53, %v89_v57  ;;  %v2903_v57 = vld [vmem:[%s3888_s2 + $0x70] sm:$0xff] }
  0x89   :  { %v91_v61 = vmul.f32 0.5, %v90_v58  ;;  %v2902_v58 = vld [vmem:[%s3888_s2 + $0x68] sm:$0xff] }
  0x8b   :  { %v92_v62 = vsub.f32 1.5, %v91_v61  ;;  %v2899_v61 = vld [vmem:[%s3888_s2 + $0x50] sm:$0xff] }
  0x8c   :  { %v3039_v63 = vpop.eup %3038 }
  0x8d   :  { %v99_v0 = vmul.f32 %v3039_v63, %v87_v54  ;;  %v93_v1 = vmul.f32 %v3037_v53, %v92_v62  ;;  %vm105_vm4 = vweird.f32 %v3039_v63  ;;  %v2898_v62 = vld [vmem:[%s3888_s2 + $0x48] sm:$0xff] }
  0x8e   :  { %vm106_vm6 = vmor %vm104_vm5, %vm105_vm4 }
  0x8f   :  { %v100_v2 = vmul.f32 %v3039_v63, %v99_v0  ;;  %v97_v5 = vsel %vm96_vm3, %v3037_v53, %v93_v1  ;;  %v2896_v1 = vld [vmem:[%s3889_s3 + $0x8] sm:$0xff] }
  0x90   :  { %v108_v10 = vmul.f32 %v3180_v3, %v97_v5 }
  0x91   :  { %v101_v4 = vmul.f32 0.5, %v100_v2  ;;  %v2895_v2 = vld [vmem:[%s3889_s3] sm:$0xff] }
  0x92   :  { %v113_v13 = vmul.f32 %v3031_v9, %v108_v10 }
  0x93   :  { %v102_v6 = vsub.f32 1.5, %v101_v4  ;;  %v2930_v4 = vld [vmem:[%s3888_s2 + $0xb8] sm:$0xff] }
  0x95   :  { %v103_v8 = vmul.f32 %v3039_v63, %v102_v6 }
  0x97   :  { %v107_v11 = vsel %vm106_vm6, %v3039_v63, %v103_v8  ;;  %v2897_v63 = vld [vmem:[%s3888_s2 + $0x40] sm:$0xff] }
  0x98   :  { %v109_v12 = vmul.f32 %v3190_v7, %v107_v11 }
  0x9a   :  { %v114_v14 = vmul.f32 %v3031_v9, %v109_v12  ;;  %v2929_v12 = vld [vmem:[%s3888_s2 + $0xb0] sm:$0xff] }
  0x9c   :  { %v3311_v15 = vpack.c.bf16 %v114_v14, %v113_v13  ;;  %v2928_v13 = vld [vmem:[%s3888_s2 + $0xa8] sm:$0xff]  ;;  %v2927_v14 = vld [vmem:[%s3888_s2 + $0xa0] sm:$0xff] }
  0x9e   :  { %188 = vmatmul.bf16.vlgmr.msra.gmra.mxu0 %v3311_v15  ;;  %267 = vmatmul.bf16.vlgmr.msra.gmra.mxu1 %v3311_v15 }
  0x9f   :  { %346 = vmatmul.bf16.vlgmr.msra.gmra.mxu2 %v3311_v15  ;;  %782 = vmatpush.bf16.msra.mxu1 %v2896_v1  ;;  %v2954_v1 = vld [vmem:[%s3888_s2 + $0xe8] sm:$0xff] }
  0xa3   :  { %783 = vmatpush.bf16.msra.mxu1 %v2895_v2  ;;  %v2945_v2 = vld [vmem:[%s3888_s2 + $0x2b0] sm:$0xff] }
  0xae   :  { %576 = vmatmul.bf16.vlgmr.msrb.gmra.mxu0 %v3311_v15  ;;  %655 = vmatmul.bf16.vlgmr.msrb.gmra.mxu1 %v3311_v15 }
  0xaf   :  { %855 = vmatpush.bf16.msrb.mxu1 %v2930_v4  ;;  %v2953_v4 = vld [vmem:[%s3888_s2 + $0xe0] sm:$0xff] }
  0xb3   :  { %856 = vmatpush.bf16.msrb.mxu1 %v2929_v12  ;;  %v2949_v12 = vld [vmem:[%s3888_s2 + $0xc0] sm:$0xff] }
  0xb7   :  { %857 = vmatpush.bf16.msrb.mxu1 %v2928_v13  ;;  %v2941_v13 = vld [vmem:[%s3888_s2 + $0x290] sm:$0xff] }
  0xbb   :  { %858 = vmatpush.bf16.msrb.mxu1 %v2927_v14  ;;  %v2940_v14 = vld [vmem:[%s3888_s2 + $0x288] sm:$0xff] }
 0x11b   :  { %v189_v16 = vpop.f32.mrf.mxu0  ;;  %v268_v17 = vpop.f32.mrf.mxu1 }
 0x122   :  { %v347_v18 = vpop.f32.mrf.mxu2 }
 0x123   :  { %v191_v19 = vpop.f32.mrf.mxu0  ;;  %v270_v20 = vpop.f32.mrf.mxu1 }
 0x124   :  { %v353_v21 = vpack.c.bf16 %v270_v20, %v268_v17  ;;  %v352_v27 = vpack.c.bf16 %v191_v19, %v189_v16  ;;  %v2926_v16 = vld [vmem:[%s3888_s2 + $0x98] sm:$0xff]  ;;  %v2925_v17 = vld [vmem:[%s3888_s2 + $0x90] sm:$0xff]  ;;  %v2923_v19 = vld [vmem:[%s3888_s2 + $0x80] sm:$0xff] }
 0x125   :  { %859 = vmatpush.bf16.msrb.mxu1 %v2926_v16  ;;  %v2939_v16 = vld [vmem:[%s3888_s2 + $0x280] sm:$0xff] }
 0x126   :  { %v359_v22 = vsel %vm354_vm7, %v353_v21, 0 }
 0x127   :  { %368 = vmatpush.bf16.xpose.msrb.mxu2 %v359_v22 }
 0x129   :  { %860 = vmatpush.bf16.msrb.mxu1 %v2925_v17 }
 0x12a   :  { %v349_v23 = vpop.f32.mrf.mxu2 }
 0x12b   :  { %v577_v24 = vpop.f32.mrf.mxu0  ;;  %v656_v25 = vpop.f32.mrf.mxu1  ;;  %v401_v26 = vpack.c.bf16 %v349_v23, %v347_v18  ;;  %v2924_v18 = vld [vmem:[%s3888_s2 + $0x88] sm:$0xff] }
 0x12d   :  { %412 = vmatpush.bf16.msra.mxu3 %v401_v26  ;;  %861 = vmatpush.bf16.msrb.mxu1 %v2924_v18 }
 0x12e   :  { %2187 = vmatmul.msk.bf16.vlgmr.msrb.gmra.mxu2 %vm354_vm7, %v352_v27 }
 0x131   :  { %489 = vmatpush.bf16.msrb.mxu3 %v2904_v56  ;;  %862 = vmatpush.bf16.msrb.mxu1 %v2923_v19 }
 0x133   :  { %v579_v28 = vpop.f32.mrf.mxu0  ;;  %v658_v29 = vpop.f32.mrf.mxu1 }
 0x134   :  { %v662_v30 = vpack.c.bf16 %v579_v28, %v577_v24  ;;  %v708_v32 = vpack.c.bf16 %v658_v29, %v656_v25 }
 0x135   :  { %490 = vmatpush.bf16.msrb.mxu3 %v2903_v57 }
 0x136   :  { %v667_v31 = vsel %vm354_vm7, %v662_v30, 0 }
 0x137   :  { %676 = vmatpush.bf16.xpose.msra.mxu2 %v667_v31 }
 0x139   :  { %491 = vmatpush.bf16.msrb.mxu3 %v2902_v58 }
 0x13d   :  { %492 = vmatpush.bf16.msrb.mxu3 %v2901_v59  ;;  %v2956_v59 = vld [vmem:[%s3888_s2 + $0xf8] sm:$0xff] }
 0x13f   :  { %719 = vmatpush.bf16.msrb.mxu2 %v708_v32  ;;  %v2938_v32 = vld [vmem:[%s3888_s2 + $0x1b8] sm:$0xff] }
 0x141   :  { %493 = vmatpush.bf16.msrb.mxu3 %v2900_v60 }
 0x145   :  { %494 = vmatpush.bf16.msrb.mxu3 %v2899_v61  ;;  %v2922_v61 = vld [vmem:[%s3889_s3 + $0x18] sm:$0xff] }
 0x149   :  { %495 = vmatpush.bf16.msrb.mxu3 %v2898_v62  ;;  %v2955_v62 = vld [vmem:[%s3888_s2 + $0xf0] sm:$0xff] }
 0x14d   :  { %496 = vmatpush.bf16.msrb.mxu3 %v2897_v63  ;;  %v2921_v63 = vld [vmem:[%s3889_s3 + $0x10] sm:$0xff] }
 0x1b1   :  { %v370_v38 = vpop.f32.mrf.mxu2 }
 0x1b2   :  { %v375_v39 = vsel %vm3321_vm10, %v370_v38, -1e+09 }
 0x1b3   :  { %v378_v41 = vsel %vm377_vm11, %v375_v39, -inf }
 0x1b4   :  { %379 = vmax.xlane.f32.xlu1 %v378_v41 }
 0x1b9   :  { %v372_v43 = vpop.f32.mrf.mxu2 }
 0x1ba   :  { %v376_v44 = vsel %vm3328_vm0, %v372_v43, -1e+09 }
 0x1bb   :  { %v381_v45 = vsel %vm377_vm11, %v376_v44, -inf }
 0x1bc   :  { %382 = vmax.xlane.f32.xlu1 %v381_v45 }
 0x227   :  { %v380_v46 = vpop.xlane.xlu1 %379 }
 0x228   :  { %v384_v47 = vsub.f32 %v375_v39, %v380_v46 }
 0x22a   :  { %v386_v48 = vmul.f32 1.442695, %v384_v47 }
 0x22c   :  { %3040 = vpow2.f32 %v386_v48  ;;  %v2935_v48 = vld [vmem:[%s3888_s2 + $0x1a0] sm:$0xff] }
 0x22f   :  { %v383_v49 = vpop.xlane.xlu1 %382 }
 0x230   :  { %v385_v50 = vsub.f32 %v376_v44, %v383_v49  ;;  %v2934_v49 = vld [vmem:[%s3888_s2 + $0x198] sm:$0xff] }
 0x232   :  { %v3041_v51 = vpop.eup %3040  ;;  %v388_v52 = vmul.f32 1.442695, %v385_v50  ;;  %v2933_v50 = vld [vmem:[%s3888_s2 + $0x190] sm:$0xff] }
 0x233   :  { %v390_v53 = vsel %vm377_vm11, %v3041_v51, 0.0 }
 0x234   :  { %3042 = vpow2.f32 %v388_v52  ;;  %391 = vadd.xlane.f32.xlu2 %v390_v53  ;;  %v2931_v52 = vld [vmem:[%s3888_s2 + $0x180] sm:$0xff] }
 0x23a   :  { %v3043_v54 = vpop.eup %3042 }
 0x23b   :  { %v393_v55 = vsel %vm377_vm11, %v3043_v54, 0.0 }
 0x23c   :  { %394 = vadd.xlane.f32.xlu2 %v393_v55 }
 0x2a7   :  { %v392_v0 = vpop.xlane.xlu2 %391 }
 0x2a8   :  { %3044 = vrcp.f32 %v392_v0  ;;  %v2946_v0 = vld [vmem:[%s3888_s2 + $0x2b8] sm:$0xff] }
 0x2ae   :  { %v3045_v6 = vpop.eup %3044 }
 0x2af   :  { %v395_v5 = vpop.xlane.xlu2 %394  ;;  %v398_v9 = vmul.f32 %v3045_v6, %v3041_v51  ;;  %v2932_v51 = vld [vmem:[%s3888_s2 + $0x188] sm:$0xff]  ;;  %v2952_v6 = vld [vmem:[%s3888_s2 + $0xd8] sm:$0xff] }
 0x2b0   :  { %3046 = vrcp.f32 %v395_v5  ;;  %v2944_v5 = vld [vmem:[%s3888_s2 + $0x2a8] sm:$0xff] }
 0x2b6   :  { %v3047_v8 = vpop.eup %3046 }
 0x2b7   :  { %v399_v10 = vmul.f32 %v3047_v8, %v3043_v54  ;;  %v2943_v8 = vld [vmem:[%s3888_s2 + $0x2a0] sm:$0xff] }
 0x2b9   :  { %v400_v11 = vpack.c.bf16 %v399_v10, %v398_v9  ;;  %v2951_v9 = vld [vmem:[%s3888_s2 + $0xd0] sm:$0xff]  ;;  %v2942_v10 = vld [vmem:[%s3888_s2 + $0x298] sm:$0xff] }
 0x2bb   :  { %2188 = vmatmul.msk.bf16.vlgmr.msra.gmra.mxu3 %vm377_vm11, %v400_v11  ;;  %v2950_v11 = vld [vmem:[%s3888_s2 + $0xc8] sm:$0xff] }
 0x2bc   :  { %753 = vmatpush.bf16.msra.mxu3 %v2922_v61 }
 0x2c0   :  { %754 = vmatpush.bf16.msra.mxu3 %v2921_v63 }
 0x2cb   :  { %497 = vmatmul.bf16.vlgmr.msrb.gmra.mxu3 %v3311_v15 }
 0x2cc   :  { %1013 = vmatpush.bf16.msrb.mxu3 %v2946_v0 }
 0x2d0   :  { %1014 = vmatpush.bf16.msrb.mxu3 %v2945_v2 }
 0x2d4   :  { %1015 = vmatpush.bf16.msrb.mxu3 %v2944_v5  ;;  %v2971_v5 = vld [vmem:[%s3888_s2 + $0x2f0] sm:$0xff] }
 0x2d8   :  { %1016 = vmatpush.bf16.msrb.mxu3 %v2943_v8  ;;  %v2969_v8 = vld [vmem:[%s3888_s2 + $0x2e0] sm:$0xff] }
 0x2dc   :  { %1017 = vmatpush.bf16.msrb.mxu3 %v2942_v10  ;;  %v2967_v10 = vld [vmem:[%s3888_s2 + $0x2d0] sm:$0xff] }
 0x2e0   :  { %1018 = vmatpush.bf16.msrb.mxu3 %v2941_v13 }
 0x2e4   :  { %1019 = vmatpush.bf16.msrb.mxu3 %v2940_v14 }
 0x2e8   :  { %1020 = vmatpush.bf16.msrb.mxu3 %v2939_v16 }
 0x33e   :  { %v414_v20 = vpop.f32.mrf.mxu3 }
 0x346   :  { %v416_v21 = vpop.f32.mrf.mxu3 }
 0x347   :  { %v419_v22 = vpack.c.bf16 %v416_v21, %v414_v20  ;;  %v2964_v20 = vld [vmem:[%s3888_s2 + $0x1f8] sm:$0xff] }
 0x349   :  { %2356 = vmatmul.msk.bf16.vlgmr.msra.gmra.mxu1 %vm354_vm7, %v419_v22 }
 0x34e   :  { %v498_v23 = vpop.f32.mrf.mxu3 }
 0x356   :  { %v500_v24 = vpop.f32.mrf.mxu3 }
 0x357   :  { %v661_v25 = vpack.c.bf16 %v500_v24, %v498_v23  ;;  %v2963_v23 = vld [vmem:[%s3888_s2 + $0x1f0] sm:$0xff] }
 0x359   :  { %2333 = vmatmul.msk.bf16.vlgmr.msra.gmra.mxu2 %vm354_vm7, %v661_v25  ;;  %863 = vmatmul.bf16.vlgmr.msrb.gmra.mxu1 %v3311_v15  ;;  %v2962_v25 = vld [vmem:[%s3888_s2 + $0x1e8] sm:$0xff] }
 0x35a   :  { %934 = vmatpush.bf16.msra.mxu2 %v2938_v32  ;;  %v2959_v32 = vld [vmem:[%s3888_s2 + $0x1d0] sm:$0xff] }
 0x35e   :  { %935 = vmatpush.bf16.msra.mxu2 %v2937_v33 }
 0x362   :  { %936 = vmatpush.bf16.msra.mxu2 %v2936_v34  ;;  %v2958_v34 = vld [vmem:[%s3888_s2 + $0x1c8] sm:$0xff] }
 0x366   :  { %937 = vmatpush.bf16.msra.mxu2 %v2935_v48 }
 0x36a   :  { %938 = vmatpush.bf16.msra.mxu2 %v2934_v49 }
 0x36e   :  { %939 = vmatpush.bf16.msra.mxu2 %v2933_v50 }
 0x372   :  { %940 = vmatpush.bf16.msra.mxu2 %v2932_v51 }
 0x376   :  { %941 = vmatpush.bf16.msra.mxu2 %v2931_v52 }
 0x3c6   :  { %v3485_v17 = vpop.f32.mrf.mxu1 }
 0x3ce   :  { %v3490_v22 = vpop.f32.mrf.mxu1 }
 0x3dc   :  { %v678_v26 = vpop.f32.mrf.mxu2 }
 0x3dd   :  { %v683_v27 = vsel %vm3321_vm10, %v678_v26, -1e+09  ;;  %v864_v26 = vpop.f32.mrf.mxu1 }
 0x3de   :  { %v685_v28 = vsel %vm377_vm11, %v683_v27, -inf }
 0x3df   :  { %686 = vmax.xlane.f32.xlu0 %v685_v28 }
 0x3e4   :  { %v680_v29 = vpop.f32.mrf.mxu2 }
 0x3e5   :  { %v684_v30 = vsel %vm3328_vm0, %v680_v29, -1e+09  ;;  %v2960_v29 = vld [vmem:[%s3888_s2 + $0x1d8] sm:$0xff]  ;;  %v866_v33 = vpop.f32.mrf.mxu1 }
 0x3e6   :  { %v688_v31 = vsel %vm377_vm11, %v684_v30, -inf }
 0x3e7   :  { %689 = vmax.xlane.f32.xlu1 %v688_v31 }
 0x452   :  { %v687_v35 = vpop.xlane.xlu0 %686 }
 0x453   :  { %v691_v37 = vsub.f32 %v683_v27, %v687_v35  ;;  %v2961_v27 = vld [vmem:[%s3888_s2 + $0x1e0] sm:$0xff]  ;;  %v1027_v35 = vpack.c.bf16 %v866_v33, %v864_v26 }
 0x455   :  { %v693_v38 = vmul.f32 1.442695, %v691_v37  ;;  %v2957_v37 = vld [vmem:[%s3888_s2 + $0x1c0] sm:$0xff] }
 0x457   :  { %3048 = vpow2.f32 %v693_v38 }
 0x45a   :  { %v690_v39 = vpop.xlane.xlu1 %689 }
 0x45b   :  { %v692_v41 = vsub.f32 %v684_v30, %v690_v39  ;;  %v2948_v39 = vld [vmem:[%s3889_s3 + $0x28] sm:$0xff] }
 0x45c   :  { %1119 = vmatpush.bf16.msra.mxu1 %v2948_v39 }
 0x45d   :  { %v3049_v43 = vpop.eup %3048  ;;  %v695_v44 = vmul.f32 1.442695, %v692_v41 }
 0x45e   :  { %v697_v45 = vsel %vm377_vm11, %v3049_v43, 0.0 }
 0x45f   :  { %3050 = vpow2.f32 %v695_v44  ;;  %698 = vadd.xlane.f32.xlu2 %v697_v45 }
 0x465   :  { %v3051_v46 = vpop.eup %3050 }
 0x466   :  { %v700_v47 = vsel %vm377_vm11, %v3051_v46, 0.0 }
 0x467   :  { %701 = vadd.xlane.f32.xlu0 %v700_v47 }
 0x4d2   :  { %v699_v53 = vpop.xlane.xlu2 %698 }
 0x4d3   :  { %3052 = vrcp.f32 %v699_v53 }
 0x4d9   :  { %v3053_v55 = vpop.eup %3052 }
 0x4da   :  { %v702_v54 = vpop.xlane.xlu0 %701  ;;  %v705_v57 = vmul.f32 %v3053_v55, %v3049_v43  ;;  %v2947_v43 = vld [vmem:[%s3889_s3 + $0x20] sm:$0xff] }
 0x4db   :  { %3054 = vrcp.f32 %v702_v54  ;;  %1120 = vmatpush.bf16.msra.mxu1 %v2947_v43 }
 0x4e1   :  { %v3055_v56 = vpop.eup %3054 }
 0x4e2   :  { %v706_v58 = vmul.f32 %v3055_v56, %v3051_v46 }
 0x4e4   :  { %v707_v60 = vpack.c.bf16 %v706_v58, %v705_v57 }
 0x4e6   :  { %2334 = vmatmul.msk.bf16.vlgmr.msrb.gmra.mxu2 %vm377_vm11, %v707_v60 }
 0x4e7   :  { %1194 = vmatpush.bf16.msrb.mxu2 %v2956_v59 }
 0x4eb   :  { %1195 = vmatpush.bf16.msrb.mxu2 %v2955_v62 }
 0x4ef   :  { %1196 = vmatpush.bf16.msrb.mxu2 %v2954_v1 }
 0x4f3   :  { %1197 = vmatpush.bf16.msrb.mxu2 %v2953_v4  ;;  %v2972_v4 = vld [vmem:[%s3888_s2 + $0x2f8] sm:$0xff] }
 0x4f6   :  { %942 = vmatmul.bf16.vlgmr.msra.gmra.mxu2 %v3311_v15 }
 0x4f7   :  { %1198 = vmatpush.bf16.msrb.mxu2 %v2952_v6  ;;  %v2970_v6 = vld [vmem:[%s3888_s2 + $0x2e8] sm:$0xff] }
 0x4fb   :  { %1199 = vmatpush.bf16.msrb.mxu2 %v2951_v9  ;;  %v2968_v9 = vld [vmem:[%s3888_s2 + $0x2d8] sm:$0xff] }
 0x4ff   :  { %1200 = vmatpush.bf16.msrb.mxu2 %v2950_v11  ;;  %v2966_v11 = vld [vmem:[%s3888_s2 + $0x2c8] sm:$0xff] }
 0x503   :  { %1201 = vmatpush.bf16.msrb.mxu2 %v2949_v12  ;;  %v2965_v12 = vld [vmem:[%s3888_s2 + $0x2c0] sm:$0xff] }
 0x506   :  { %1202 = vmatmul.bf16.vlgmr.msrb.gmra.mxu2 %v3311_v15 }
 0x569   :  { %v721_v18 = vpop.f32.mrf.mxu2 }
 0x571   :  { %v723_v19 = vpop.f32.mrf.mxu2 }
 0x572   :  { %v726_v21 = vpack.c.bf16 %v723_v19, %v721_v18 }
 0x574   :  { %2347 = vmatmul.msk.bf16.vlgmr.msra.gmra.mxu3 %vm354_vm7, %v726_v21 }
 0x575   :  { %1273 = vmatpush.bf16.msra.mxu3 %v2964_v20 }
 0x579   :  { %v943_v24 = vpop.f32.mrf.mxu2  ;;  %1274 = vmatpush.bf16.msra.mxu3 %v2963_v23 }
 0x57d   :  { %1275 = vmatpush.bf16.msra.mxu3 %v2962_v25 }
 0x581   :  { %v945_v28 = vpop.f32.mrf.mxu2  ;;  %1276 = vmatpush.bf16.msra.mxu3 %v2961_v27 }
 0x582   :  { %v1028_v30 = vpack.c.bf16 %v945_v28, %v943_v24 }
 0x584   :  { %v1033_v31 = vsel %vm354_vm7, %v1028_v30, 0  ;;  %1021 = vmatmul.bf16.vlgmr.msrb.gmra.mxu3 %v3311_v15 }
 0x585   :  { %1042 = vmatpush.bf16.xpose.msra.mxu0 %v1033_v31  ;;  %1277 = vmatpush.bf16.msra.mxu3 %v2960_v29 }
 0x589   :  { %1278 = vmatpush.bf16.msra.mxu3 %v2959_v32  ;;  %v1203_v26 = vpop.f32.mrf.mxu2 }
 0x58c   :  { %2501 = vmatmul.msk.bf16.vlgmr.msra.gmra.mxu0 %vm354_vm7, %v1027_v35 }
 0x58d   :  { %1279 = vmatpush.bf16.msra.mxu3 %v2958_v34 }
 0x591   :  { %1280 = vmatpush.bf16.msra.mxu3 %v2957_v37  ;;  %v1205_v28 = vpop.f32.mrf.mxu2 }
 0x592   :  { %v1366_v30 = vpack.c.bf16 %v1205_v28, %v1203_v26  ;;  %v2781_v28 = vld [vmem:[%s3891_s5 + $0xc8] sm:$0xf] }
 0x594   :  { %1281 = vmatmul.bf16.vlgmr.msra.gmra.mxu3 %v3311_v15 }
 0x5f7   :  { %v3518_v38 = vpop.f32.mrf.mxu3 }
 0x5f8   :  { %v786_v32 = vadd.f32 %v3485_v17, %v3518_v38 }
 0x5ff   :  { %v3523_v41 = vpop.f32.mrf.mxu3 }
 0x607   :  { %v1022_v44 = vpop.f32.mrf.mxu3 }
 0x609   :  { %v1044_v45 = vpop.f32.mrf.mxu0 }
 0x60a   :  { %v1049_v46 = vsel %vm3321_vm10, %v1044_v45, -1e+09 }
 0x60b   :  { %v1051_v47 = vsel %vm377_vm11, %v1049_v46, -inf }
 0x60c   :  { %1052 = vmax.xlane.f32.xlu1 %v1051_v47 }
 0x60f   :  { %v1024_v48 = vpop.f32.mrf.mxu3 }
 0x610   :  { %v1074_v49 = vpack.c.bf16 %v1024_v48, %v1022_v44 }
 0x611   :  { %v1046_v50 = vpop.f32.mrf.mxu0 }
 0x612   :  { %v1050_v51 = vsel %vm3328_vm0, %v1046_v50, -1e+09  ;;  %1085 = vmatpush.bf16.msrb.mxu0 %v1074_v49 }
 0x613   :  { %v1054_v52 = vsel %vm377_vm11, %v1050_v51, -inf }
 0x614   :  { %1055 = vmax.xlane.f32.xlu2 %v1054_v52 }
 0x616   :  { %1352 = vmatpush.bf16.msra.mxu0 %v2972_v4 }
 0x617   :  { %v1282_v53 = vpop.f32.mrf.mxu3 }
 0x61a   :  { %1353 = vmatpush.bf16.msra.mxu0 %v2971_v5 }
 0x61e   :  { %1354 = vmatpush.bf16.msra.mxu0 %v2970_v6 }
 0x61f   :  { %v1284_v54 = vpop.f32.mrf.mxu3 }
 0x620   :  { %v1367_v55 = vpack.c.bf16 %v1284_v54, %v1282_v53 }
 0x622   :  { %v1372_v56 = vsel %vm354_vm7, %v1367_v55, 0  ;;  %1355 = vmatpush.bf16.msra.mxu0 %v2969_v8 }
 0x623   :  { %1381 = vmatpush.bf16.xpose.msrb.mxu1 %v1372_v56 }
 0x626   :  { %1356 = vmatpush.bf16.msra.mxu0 %v2968_v9 }
 0x62a   :  { %1357 = vmatpush.bf16.msra.mxu0 %v2967_v10  ;;  %v2789_v10 = vld [vmem:[%s3891_s5 + $0xe0] sm:$0xf] }
 0x62e   :  { %1358 = vmatpush.bf16.msra.mxu0 %v2966_v11  ;;  %v3003_v11 = vld [vmem:[%s3891_s5 + $0xe4] sm:$0xf] }
 0x632   :  { %1359 = vmatpush.bf16.msra.mxu0 %v2965_v12 }
 0x67f   :  { %v1053_v57 = vpop.xlane.xlu1 %1052 }
 0x680   :  { %v1057_v58 = vsub.f32 %v1049_v46, %v1053_v57 }
 0x682   :  { %v1059_v59 = vmul.f32 1.442695, %v1057_v58 }
 0x684   :  { %3056 = vpow2.f32 %v1059_v59  ;;  %v2974_v59 = vld [vmem:[%s3889_s3 + $0x38] sm:$0xff] }
 0x685   :  { %1458 = vmatpush.bf16.msra.mxu2 %v2974_v59  ;;  %v2987_v59 = vld [vmem:[%s3891_s5 + $0x64] sm:$0xf] }
 0x687   :  { %v1056_v60 = vpop.xlane.xlu2 %1055 }
 0x688   :  { %v1058_v61 = vsub.f32 %v1050_v51, %v1056_v60  ;;  %v2973_v60 = vld [vmem:[%s3889_s3 + $0x30] sm:$0xff] }
 0x689   :  { %1459 = vmatpush.bf16.msra.mxu2 %v2973_v60 }
 0x68a   :  { %v3057_v62 = vpop.eup %3056  ;;  %v1061_v63 = vmul.f32 1.442695, %v1058_v61 }
 0x68b   :  { %v1063_v0 = vsel %vm377_vm11, %v3057_v62, 0.0 }
 0x68c   :  { %3058 = vpow2.f32 %v1061_v63  ;;  %1064 = vadd.xlane.f32.xlu0 %v1063_v0 }
 0x692   :  { %v3059_v1 = vpop.eup %3058 }
 0x693   :  { %v1066_v2 = vsel %vm377_vm11, %v3059_v1, 0.0 }
 0x694   :  { %1067 = vadd.xlane.f32.xlu1 %v1066_v2 }
 0x6ff   :  { %v1065_v13 = vpop.xlane.xlu0 %1064 }
 0x700   :  { %3060 = vrcp.f32 %v1065_v13  ;;  %v2797_v13 = vld [vmem:[%s3891_s5 + $0xe8] sm:$0xf] }
 0x706   :  { %v3061_v16 = vpop.eup %3060 }
 0x707   :  { %v1068_v14 = vpop.xlane.xlu1 %1067  ;;  %v1071_v19 = vmul.f32 %v3061_v16, %v3057_v62 }
 0x708   :  { %3062 = vrcp.f32 %v1068_v14  ;;  %v3006_v14 = vld [vmem:[%s3891_s5 + $0xf4] sm:$0xf0] }
 0x70e   :  { %v3063_v18 = vpop.eup %3062 }
 0x70f   :  { %v1072_v20 = vmul.f32 %v3063_v18, %v3059_v1  ;;  %v2798_v18 = vor.u32 %v3006_v14, %v2797_v13  ;;  %v2986_v13 = vld [vmem:[%s3891_s5 + $0x54] sm:$0xf0] }
 0x711   :  { %v1073_v21 = vpack.c.bf16 %v1072_v20, %v1071_v19  ;;  %v3004_v19 = vld [vmem:[%s3891_s5 + $0xec] sm:$0xf]  ;;  %v2799_v20 = vld [vmem:[%s3891_s5 + $0xf8] sm:$0xf0] }
 0x713   :  { %2502 = vmatmul.msk.bf16.vlgmr.msrb.gmra.mxu0 %vm377_vm11, %v1073_v21  ;;  %v2802_v21 = vor.u32 %v3004_v19, %v2799_v20  ;;  %v2719_v19 = vld [vmem:[%s3891_s5 + $0x58] sm:$0xf0] }
 0x715   :  { %1743 = vmatpush.bf16.msrb.mxu2 %v2802_v21  ;;  %v2693_v21 = vld [vmem:[%s3891_s5 + $0x20] sm:$0xf] }
 0x723   :  { %1360 = vmatmul.bf16.vlgmr.msra.gmra.mxu0 %v3311_v15  ;;  %v788_v15 = vadd.f32 %v3490_v22, %v3523_v41 }
 0x790   :  { %v1087_v23 = vpop.f32.mrf.mxu0 }
 0x798   :  { %v1089_v24 = vpop.f32.mrf.mxu0 }
 0x799   :  { %v1092_v25 = vpack.c.bf16 %v1089_v24, %v1087_v23  ;;  %v2773_v23 = vld [vmem:[%s3891_s5 + $0xc0] sm:$0xf]  ;;  %v3001_v24 = vld [vmem:[%s3891_s5 + $0xcc] sm:$0xf0] }
 0x79a   :  { %v2774_v26 = vor.u32 %v3001_v24, %v2773_v23  ;;  %v2981_v23 = vld [vmem:[%s3891_s5 + $0x2c] sm:$0xf0]  ;;  %v2979_v24 = vld [vmem:[%s3891_s5 + $0x24] sm:$0xf] }
 0x79b   :  { %2515 = vmatmul.msk.bf16.vlgmr.msra.gmra.mxu1 %vm354_vm7, %v1092_v25  ;;  %v2999_v25 = vld [vmem:[%s3891_s5 + $0xc4] sm:$0xf] }
 0x7a0   :  { %v1361_v27 = vpop.f32.mrf.mxu0 }
 0x7a8   :  { %v1363_v29 = vpop.f32.mrf.mxu0 }
 0x7a9   :  { %v1413_v31 = vpack.c.bf16 %v1363_v29, %v1361_v27  ;;  %v2775_v27 = vld [vmem:[%s3891_s5 + $0xd0] sm:$0xf0]  ;;  %v3002_v29 = vld [vmem:[%s3891_s5 + $0xd4] sm:$0xf0] }
 0x7ab   :  { %2660 = vmatmul.msk.bf16.vlgmr.msrb.gmra.mxu1 %vm354_vm7, %v1366_v30  ;;  %v2778_v30 = vor.u32 %v2999_v25, %v2775_v27  ;;  %v2694_v25 = vor.u32 %v2981_v23, %v2693_v21  ;;  %v2701_v27 = vld [vmem:[%s3891_s5 + $0x28] sm:$0xf]  ;;  %v3010_v23 = vld [vmem:[%s3892_s6 + $0x18] sm:$0xff] }
 0x7ac   :  { %1424 = vmatpush.bf16.msra.mxu1 %v1413_v31  ;;  %v2782_v31 = vor.u32 %v3002_v29, %v2781_v28  ;;  %v2982_v28 = vld [vmem:[%s3891_s5 + $0x34] sm:$0xf0] }
 0x7b0   :  { %1729 = vmatpush.bf16.msrb.mxu1 %v2798_v18  ;;  %v2984_v18 = vld [vmem:[%s3891_s5 + $0x4c] sm:$0xf] }
 0x7b1   :  { %v2722_v20 = vor.u32 %v2984_v18, %v2719_v19  ;;  %v3011_v18 = vld [vmem:[%s3892_s6 + $0x20] sm:$0xff] }
 0x7b4   :  { %1730 = vmatpush.bf16.msrb.mxu1 %v2782_v31  ;;  %v2980_v31 = vld [vmem:[%s3891_s5 + $0x2c] sm:$0xf] }
 0x818   :  { %v1122_v33 = vpop.f32.mrf.mxu1 }
 0x819   :  { %v1127_v34 = vadd.f32 %v1122_v33, %v786_v32  ;;  %v3000_v32 = vld [vmem:[%s3891_s5 + $0xcc] sm:$0xf]  ;;  %v2783_v33 = vld [vmem:[%s3891_s5 + $0xd8] sm:$0xf0] }
 0x820   :  { %v1124_v35 = vpop.f32.mrf.mxu1 }
 0x821   :  { %v1128_v37 = vadd.f32 %v1124_v35, %v788_v15  ;;  %v2757_v15 = vld [vmem:[%s3891_s5 + $0xa0] sm:$0xf]  ;;  %v2997_v35 = vld [vmem:[%s3891_s5 + $0xac] sm:$0xf0] }
 0x828   :  { %v1383_v39 = vpop.f32.mrf.mxu1 }
 0x829   :  { %v1388_v43 = vsel %vm3321_vm10, %v1383_v39, -1e+09  ;;  %v2758_v39 = vor.u32 %v2997_v35, %v2757_v15  ;;  %v2977_v15 = vld [vmem:[%s3891_s5 + $0xc] sm:$0xf0]  ;;  %v2975_v35 = vld [vmem:[%s3891_s5 + $0x4] sm:$0xf] }
 0x82a   :  { %v1390_v44 = vsel %vm377_vm11, %v1388_v43, -inf }
 0x82b   :  { %1391 = vmax.xlane.f32.xlu2 %v1390_v44  ;;  %v2765_v44 = vld [vmem:[%s3891_s5 + $0xa8] sm:$0xf] }
 0x830   :  { %v1385_v45 = vpop.f32.mrf.mxu1 }
 0x831   :  { %v1389_v46 = vsel %vm3328_vm0, %v1385_v45, -1e+09  ;;  %v2998_v45 = vld [vmem:[%s3891_s5 + $0xb4] sm:$0xf0] }
 0x832   :  { %v1393_v17 = vsel %vm377_vm11, %v1389_v46, -inf }
 0x833   :  { %1394 = vmax.xlane.f32.xlu0 %v1393_v17  ;;  %v2766_v17 = vor.u32 %v2998_v45, %v2765_v44  ;;  %v2685_v44 = vld [vmem:[%s3891_s5 + $0x8] sm:$0xf]  ;;  %v2978_v45 = vld [vmem:[%s3891_s5 + $0x14] sm:$0xf0] }
 0x835   :  { %1731 = vmatpush.bf16.msrb.mxu1 %v2766_v17 }
 0x89e   :  { %v1392_v38 = vpop.xlane.xlu2 %1391 }
 0x89f   :  { %v1396_v47 = vsub.f32 %v1388_v43, %v1392_v38  ;;  %v2759_v43 = vld [vmem:[%s3891_s5 + $0xb0] sm:$0xf0]  ;;  %v2996_v38 = vld [vmem:[%s3891_s5 + $0xac] sm:$0xf] }
 0x8a1   :  { %v1398_v48 = vmul.f32 1.442695, %v1396_v47  ;;  %v2767_v47 = vld [vmem:[%s3891_s5 + $0xb8] sm:$0xf0] }
 0x8a3   :  { %3064 = vpow2.f32 %v1398_v48  ;;  %v2770_v48 = vor.u32 %v2996_v38, %v2767_v47  ;;  %v2686_v38 = vor.u32 %v2978_v45, %v2685_v44  ;;  %v2976_v47 = vld [vmem:[%s3891_s5 + $0xc] sm:$0xf] }
 0x8a6   :  { %v1395_v22 = vpop.xlane.xlu0 %1394 }
 0x8a7   :  { %v1397_v41 = vsub.f32 %v1389_v46, %v1395_v22  ;;  %v2741_v22 = vld [vmem:[%s3891_s5 + $0x80] sm:$0xf] }
 0x8a9   :  { %v3065_v49 = vpop.eup %3064  ;;  %v1400_v50 = vmul.f32 1.442695, %v1397_v41  ;;  %v2993_v41 = vld [vmem:[%s3891_s5 + $0x8c] sm:$0xf0] }
 0x8aa   :  { %v1402_v36 = vsel %vm377_vm11, %v3065_v49, 0.0 }
 0x8ab   :  { %3066 = vpow2.f32 %v1400_v50  ;;  %1403 = vadd.xlane.f32.xlu1 %v1402_v36  ;;  %v2742_v50 = vor.u32 %v2993_v41, %v2741_v22  ;;  %v2743_v36 = vld [vmem:[%s3891_s5 + $0x90] sm:$0xf0] }
 0x8b1   :  { %v3067_v51 = vpop.eup %3066 }
 0x8b2   :  { %v1405_v52 = vsel %vm377_vm11, %v3067_v51, 0.0 }
 0x8b3   :  { %1406 = vadd.xlane.f32.xlu2 %v1405_v52  ;;  %v2994_v52 = vld [vmem:[%s3891_s5 + $0x94] sm:$0xf0] }
 0x91e   :  { %v1404_v42 = vpop.xlane.xlu1 %1403 }
 0x91f   :  { %3068 = vrcp.f32 %v1404_v42 }
 0x925   :  { %v3069_v54 = vpop.eup %3068 }
 0x926   :  { %v1407_v53 = vpop.xlane.xlu2 %1406  ;;  %v1410_v56 = vmul.f32 %v3069_v54, %v3065_v49  ;;  %v2991_v49 = vld [vmem:[%s3891_s5 + $0x84] sm:$0xf]  ;;  %v2992_v54 = vld [vmem:[%s3891_s5 + $0x8c] sm:$0xf] }
 0x927   :  { %3070 = vrcp.f32 %v1407_v53  ;;  %v2746_v42 = vor.u32 %v2991_v49, %v2743_v36 }
 0x92d   :  { %v3071_v55 = vpop.eup %3070 }
 0x92e   :  { %v1411_v57 = vmul.f32 %v3071_v55, %v3067_v51  ;;  %v2749_v51 = vld [vmem:[%s3891_s5 + $0x88] sm:$0xf]  ;;  %v2751_v55 = vld [vmem:[%s3891_s5 + $0x98] sm:$0xf0] }
 0x92f   :  { %v2750_v53 = vor.u32 %v2994_v52, %v2749_v51 }
 0x930   :  { %v1412_v58 = vpack.c.bf16 %v1411_v57, %v1410_v56  ;;  %v2754_v56 = vor.u32 %v2992_v54, %v2751_v55  ;;  %v2725_v57 = vld [vmem:[%s3891_s5 + $0x60] sm:$0xf] }
 0x931   :  { %1732 = vmatpush.bf16.msrb.mxu1 %v2750_v53 }
 0x932   :  { %2661 = vmatmul.msk.bf16.vlgmr.msra.gmra.mxu1 %vm377_vm11, %v1412_v58  ;;  %v2989_v58 = vld [vmem:[%s3891_s5 + $0x6c] sm:$0xf0] }
 0x933   :  { %v2726_v60 = vor.u32 %v2989_v58, %v2725_v57 }
 0x9af   :  { %v1426_v61 = vpop.f32.mrf.mxu1 }
 0x9b7   :  { %v1428_v62 = vpop.f32.mrf.mxu1 }
 0x9b8   :  { %v1431_v63 = vpack.c.bf16 %v1428_v62, %v1426_v61  ;;  %v2727_v61 = vld [vmem:[%s3891_s5 + $0x70] sm:$0xf0]  ;;  %v2733_v62 = vld [vmem:[%s3891_s5 + $0x68] sm:$0xf] }
 0x9ba   :  { %2674 = vmatmul.msk.bf16.vlgmr.msra.gmra.mxu2 %vm354_vm7, %v1431_v63  ;;  %v2990_v63 = vld [vmem:[%s3891_s5 + $0x74] sm:$0xf0] }
 0xa3d   :  { %v1461_v0 = vpop.f32.mrf.mxu2 }
 0xa3e   :  { %v1466_v1 = vadd.f32 %v1461_v0, %v1127_v34  ;;  %v2786_v34 = vor.u32 %v3000_v32, %v2783_v33  ;;  %v2730_v0 = vor.u32 %v2987_v59, %v2727_v61  ;;  %v2703_v32 = vld [vmem:[%s3891_s5 + $0x38] sm:$0xf0] }
 0xa3f   :  { %v2706_v33 = vor.u32 %v2980_v31, %v2703_v32 }
 0xa40   :  { %v3586_v2 = vadd.f32 %v3180_v3, %v1466_v1  ;;  %v3005_v3 = vld [vmem:[%s3891_s5 + $0xec] sm:$0xf0]  ;;  %1744 = vmatpush.bf16.msrb.mxu2 %v2786_v34  ;;  %v2734_v1 = vor.u32 %v2990_v63, %v2733_v62  ;;  %v2677_v34 = vld [vmem:[%s3891_s5] sm:$0xf] }
 0xa41   :  { %v2790_v12 = vor.u32 %v3005_v3, %v2789_v10  ;;  %v2985_v10 = vld [vmem:[%s3891_s5 + $0x4c] sm:$0xf0]  ;;  %v2983_v3 = vld [vmem:[%s3891_s5 + $0x44] sm:$0xf] }
 0xa42   :  { %v1471_v4 = vmul.f32 %v3586_v2, %v3586_v2  ;;  %1733 = vmatpush.bf16.msrb.mxu1 %v2734_v1 }
 0xa43   :  { %1701 = vmatpush.bf16.msrb.mxu3 %v2790_v12  ;;  %v2711_v12 = vld [vmem:[%s3891_s5 + $0x50] sm:$0xf0] }
 0xa44   :  { %1473 = vadd.xlane.f32.xlu0 %v1471_v4  ;;  %1745 = vmatpush.bf16.msrb.mxu2 %v2770_v48  ;;  %v2988_v4 = vld [vmem:[%s3891_s5 + $0x6c] sm:$0xf]  ;;  %v2714_v14 = vor.u32 %v2983_v3, %v2711_v12  ;;  %v2687_v48 = vld [vmem:[%s3891_s5 + $0x18] sm:$0xf0]  ;;  %v3021_v3 = vld [vmem:[%s3892_s6 + $0x70] sm:$0xff] }
 0xa45   :  { %v1463_v5 = vpop.f32.mrf.mxu2  ;;  %v2690_v22 = vor.u32 %v2976_v47, %v2687_v48  ;;  %v3020_v12 = vld [vmem:[%s3892_s6 + $0x68] sm:$0xff] }
 0xa46   :  { %v1467_v6 = vadd.f32 %v1463_v5, %v1128_v37  ;;  %v2995_v37 = vld [vmem:[%s3891_s5 + $0xa4] sm:$0xf]  ;;  %v2735_v5 = vld [vmem:[%s3891_s5 + $0x78] sm:$0xf0] }
 0xa47   :  { %1702 = vmatpush.bf16.msrb.mxu3 %v2774_v26  ;;  %v2762_v46 = vor.u32 %v2995_v37, %v2759_v43  ;;  %v2695_v26 = vld [vmem:[%s3891_s5 + $0x30] sm:$0xf0] }
 0xa48   :  { %v3591_v8 = vadd.f32 %v3190_v7, %v1467_v6  ;;  %v2791_v7 = vld [vmem:[%s3891_s5 + $0xf0] sm:$0xf0]  ;;  %1746 = vmatpush.bf16.msrb.mxu2 %v2754_v56  ;;  %v2738_v6 = vor.u32 %v2988_v4, %v2735_v5  ;;  %v2698_v29 = vor.u32 %v2979_v24, %v2695_v26  ;;  %v3016_v24 = vld [vmem:[%s3892_s6 + $0x48] sm:$0xff] }
 0xa49   :  { %v2794_v16 = vor.u32 %v3003_v11, %v2791_v7  ;;  %v2717_v7 = vld [vmem:[%s3891_s5 + $0x48] sm:$0xf]  ;;  %v2679_v43 = vld [vmem:[%s3891_s5 + $0x10] sm:$0xf0] }
 0xa4a   :  { %v1472_v9 = vmul.f32 %v3591_v8, %v3591_v8  ;;  %v2682_v17 = vor.u32 %v2975_v35, %v2679_v43  ;;  %v3009_v26 = vld [vmem:[%s3892_s6 + $0x10] sm:$0xff] }
 0xa4b   :  { %1715 = vmatpush.bf16.msrb.mxu0 %v2794_v16  ;;  %1703 = vmatpush.bf16.msrb.mxu3 %v2758_v39  ;;  %v2718_v16 = vor.u32 %v2986_v13, %v2717_v7  ;;  %v2678_v39 = vor.u32 %v2977_v15, %v2677_v34  ;;  %v3013_v7 = vld [vmem:[%s3892_s6 + $0x30] sm:$0xff]  ;;  %v3019_v13 = vld [vmem:[%s3892_s6 + $0x60] sm:$0xff] }
 0xa4c   :  { %1475 = vadd.xlane.f32.xlu1 %v1472_v9  ;;  %v2709_v9 = vld [vmem:[%s3891_s5 + $0x40] sm:$0xf]  ;;  %1747 = vmatpush.bf16.msrb.mxu2 %v2738_v6 }
 0xa4d   :  { %v2710_v11 = vor.u32 %v2985_v10, %v2709_v9  ;;  %1734 = vmatpush.bf16.msrb.mxu1 %v2718_v16  ;;  %v3022_v10 = vld [vmem:[%s3892_s6 + $0x78] sm:$0xff]  ;;  %v3007_v15 = vld [vmem:[%s3892_s6] sm:$0xff] }
 0xa4e   :  { %v3018_v16 = vld [vmem:[%s3892_s6 + $0x58] sm:$0xff] }
 0xa4f   :  { %1716 = vmatpush.bf16.msrb.mxu0 %v2778_v30  ;;  %1704 = vmatpush.bf16.msrb.mxu3 %v2742_v50  ;;  %v2702_v30 = vor.u32 %v2982_v28, %v2701_v27 }
 0xa50   :  { %1748 = vmatpush.bf16.msrb.mxu2 %v2722_v20  ;;  %v3017_v20 = vld [vmem:[%s3892_s6 + $0x50] sm:$0xff] }
 0xa51   :  { %1735 = vmatpush.bf16.msrb.mxu1 %v2702_v30 }
 0xa53   :  { %1717 = vmatpush.bf16.msrb.mxu0 %v2762_v46  ;;  %1705 = vmatpush.bf16.msrb.mxu3 %v2726_v60 }
 0xa54   :  { %1749 = vmatpush.bf16.msrb.mxu2 %v2706_v33  ;;  %v3008_v33 = vld [vmem:[%s3892_s6 + $0x8] sm:$0xff] }
 0xa55   :  { %1736 = vmatpush.bf16.msrb.mxu1 %v2686_v38 }
 0xa57   :  { %1718 = vmatpush.bf16.msrb.mxu0 %v2746_v42  ;;  %1706 = vmatpush.bf16.msrb.mxu3 %v2710_v11  ;;  %v3014_v11 = vld [vmem:[%s3892_s6 + $0x38] sm:$0xff] }
 0xa58   :  { %1750 = vmatpush.bf16.msrb.mxu2 %v2690_v22 }
 0xa5b   :  { %1719 = vmatpush.bf16.msrb.mxu0 %v2730_v0  ;;  %1707 = vmatpush.bf16.msrb.mxu3 %v2694_v25  ;;  %v3032_v0 = vld [vmem:[%s3890_s4] ss:$0 sm:$0xff] }
 0xa5f   :  { %1720 = vmatpush.bf16.msrb.mxu0 %v2714_v14  ;;  %1708 = vmatpush.bf16.msrb.mxu3 %v2678_v39  ;;  %v3012_v14 = vld [vmem:[%s3892_s6 + $0x28] sm:$0xff] }
 0xa63   :  { %1721 = vmatpush.bf16.msrb.mxu0 %v2698_v29  ;;  %1971 = vmatpush.bf16.msra.mxu3 %v3014_v11  ;;  %v3015_v29 = vld [vmem:[%s3892_s6 + $0x40] sm:$0xff] }
 0xa67   :  { %1722 = vmatpush.bf16.msrb.mxu0 %v2682_v17  ;;  %1972 = vmatpush.bf16.msra.mxu3 %v3013_v7 }
 0xa6b   :  { %1985 = vmatpush.bf16.msra.mxu0 %v3022_v10  ;;  %1973 = vmatpush.bf16.msra.mxu3 %v3012_v14 }
 0xa6f   :  { %1986 = vmatpush.bf16.msra.mxu0 %v3021_v3  ;;  %1974 = vmatpush.bf16.msra.mxu3 %v3011_v18 }
 0xa73   :  { %1987 = vmatpush.bf16.msra.mxu0 %v3020_v12  ;;  %1975 = vmatpush.bf16.msra.mxu3 %v3010_v23 }
 0xa77   :  { %1988 = vmatpush.bf16.msra.mxu0 %v3019_v13  ;;  %1976 = vmatpush.bf16.msra.mxu3 %v3009_v26 }
 0xa7b   :  { %1989 = vmatpush.bf16.msra.mxu0 %v3018_v16  ;;  %1977 = vmatpush.bf16.msra.mxu3 %v3008_v33 }
 0xa7f   :  { %1990 = vmatpush.bf16.msra.mxu0 %v3017_v20  ;;  %1978 = vmatpush.bf16.msra.mxu3 %v3007_v15 }
 0xa83   :  { %1991 = vmatpush.bf16.msra.mxu0 %v3016_v24 }
 0xa87   :  { %1992 = vmatpush.bf16.msra.mxu0 %v3015_v29 }
 0xab7   :  { %v1474_v37 = vpop.xlane.xlu0 %1473 }
 0xab8   :  { %v1477_v46 = vmul.f32 %v1474_v37, %v3269_v40 }
 0xaba   :  { %v1479_v41 = vadd.f32 1e-06, %v1477_v46 }
 0xabc   :  { %3072 = vrsqrt.f32 %v1479_v41  ;;  %vm1487_vm2 = vweird.f32 %v1479_v41 }
 0xabf   :  { %v1476_v49 = vpop.xlane.xlu1 %1475 }
 0xac0   :  { %v1478_v50 = vmul.f32 %v1476_v49, %v3269_v40 }
 0xac2   :  { %v3073_v36 = vpop.eup %3072  ;;  %v1480_v51 = vadd.f32 1e-06, %v1478_v50 }
 0xac3   :  { %v1482_v52 = vmul.f32 %v3073_v36, %v1479_v41  ;;  %vm1488_vm1 = vweird.f32 %v3073_v36 }
 0xac4   :  { %3074 = vrsqrt.f32 %v1480_v51  ;;  %vm1489_vm3 = vmor %vm1487_vm2, %vm1488_vm1  ;;  %vm1497_vm5 = vweird.f32 %v1480_v51 }
 0xac5   :  { %v1483_v42 = vmul.f32 %v3073_v36, %v1482_v52 }
 0xac7   :  { %v1484_v53 = vmul.f32 0.5, %v1483_v42 }
 0xac9   :  { %v1485_v54 = vsub.f32 1.5, %v1484_v53 }
 0xaca   :  { %v3075_v55 = vpop.eup %3074 }
 0xacb   :  { %v1492_v56 = vmul.f32 %v3075_v55, %v1480_v51  ;;  %v1486_v57 = vmul.f32 %v3073_v36, %v1485_v54  ;;  %vm1498_vm4 = vweird.f32 %v3075_v55 }
 0xacc   :  { %vm1499_vm6 = vmor %vm1497_vm5, %vm1498_vm4 }
 0xacd   :  { %v1493_v58 = vmul.f32 %v3075_v55, %v1492_v56  ;;  %v1490_v60 = vsel %vm1489_vm3, %v3073_v36, %v1486_v57 }
 0xace   :  { %v1501_v63 = vmul.f32 %v1490_v60, %v3586_v2 }
 0xacf   :  { %v1494_v59 = vmul.f32 0.5, %v1493_v58 }
 0xad0   :  { %v1506_v5 = vmul.f32 %v3032_v0, %v1501_v63 }
 0xad1   :  { %v1495_v61 = vsub.f32 1.5, %v1494_v59 }
 0xad3   :  { %v1496_v62 = vmul.f32 %v3075_v55, %v1495_v61 }
 0xad5   :  { %v1500_v1 = vsel %vm1499_vm6, %v3075_v55, %v1496_v62 }
 0xad6   :  { %v1502_v4 = vmul.f32 %v1500_v1, %v3591_v8 }
 0xad8   :  { %v1507_v6 = vmul.f32 %v3032_v0, %v1502_v4 }
 0xada   :  { %v1508_v9 = vpack.c.bf16 %v1507_v6, %v1506_v5 }
 0xadc   :  { %1709 = vmatmul.bf16.vlgmr.msrb.gmra.mxu3 %v1508_v9  ;;  %1723 = vmatmul.bf16.vlgmr.msrb.gmra.mxu0 %v1508_v9 }
 0xadd   :  { %1737 = vmatmul.bf16.vlgmr.msrb.gmra.mxu1 %v1508_v9  ;;  %1751 = vmatmul.bf16.vlgmr.msrb.gmra.mxu2 %v1508_v9 }
 0xb59   :  { %v3821_v19 = vpop.f32.mrf.mxu0 }
 0xb5a   :  { %v2804_v21 = vmul.f32 -1.442695, %v3821_v19  ;;  %v1738_v6 = vpop.f32.mrf.mxu1 }
 0xb5c   :  { %3076 = vpow2.f32 %v2804_v21 }
 0xb5f   :  { %v3833_v25 = vpop.f32.mrf.mxu3 }
 0xb60   :  { %v2803_v27 = vmul.f32 -1.442695, %v3833_v25  ;;  %v1752_v55 = vpop.f32.mrf.mxu2 }
 0xb61   :  { %v3839_v28 = vpop.f32.mrf.mxu0 }
 0xb62   :  { %v3077_v30 = vpop.eup %3076  ;;  %3078 = vpow2.f32 %v2803_v27  ;;  %v2806_v31 = vmul.f32 -1.442695, %v3839_v28 }
 0xb63   :  { %v1770_v32 = vadd.f32 1.0, %v3077_v30 }
 0xb64   :  { %3080 = vpow2.f32 %v2806_v31 }
 0xb65   :  { %3082 = vrcp.f32 %v1770_v32  ;;  %v1799_v50 = vand.u32 2147483648, %v1770_v32  ;;  %vm1793_vm8 = vweird.f32 %v1770_v32  ;;  %v1797_v52 = vand.u32 2147483647, %v1770_v32 }
 0xb67   :  { %v3848_v34 = vpop.f32.mrf.mxu3  ;;  %v1800_v57 = vor.u32 1.1754944e-38, %v1799_v50  ;;  %vm1798_vm11 = vcmp.eq.f32.partialorder %v1797_v52, 8.507059e+37 }
 0xb68   :  { %v3079_v35 = vpop.eup %3078  ;;  %v2805_v37 = vmul.f32 -1.442695, %v3848_v34  ;;  %v1754_v29 = vpop.f32.mrf.mxu2 }
 0xb69   :  { %v1769_v39 = vadd.f32 1.0, %v3079_v35 }
 0xb6a   :  { %v3081_v43 = vpop.eup %3080  ;;  %3084 = vpow2.f32 %v2805_v37 }
 0xb6b   :  { %v3083_v44 = vpop.eup %3082  ;;  %3086 = vrcp.f32 %v1769_v39  ;;  %v1772_v46 = vadd.f32 1.0, %v3081_v43  ;;  %v1782_v58 = vand.u32 2147483647, %v1769_v39  ;;  %v1784_v61 = vand.u32 2147483648, %v1769_v39 }
 0xb6c   :  { %v1789_v45 = vmul.f32 %v3083_v44, %v1770_v32  ;;  %vm1794_vm7 = vweird.f32 %v3083_v44  ;;  %vm1778_vm13 = vweird.f32 %v1769_v39 }
 0xb6d   :  { %3088 = vrcp.f32 %v1772_v46  ;;  %vm3854_vm9 = vmor %vm1793_vm8, %vm1794_vm7  ;;  %v1829_v62 = vand.u32 2147483648, %v1772_v46  ;;  %v1827_v1 = vand.u32 2147483647, %v1772_v46  ;;  %vm3864_vm15 = vcmp.eq.f32.partialorder %v1782_v58, 8.507059e+37 }
 0xb6e   :  { %v1790_v17 = vsub.f32 1.0, %v1789_v45  ;;  %vm1823_vm0 = vweird.f32 %v1772_v46  ;;  %v1785_v12 = vor.u32 1.1754944e-38, %v1784_v61 }
 0xb6f   :  { %v1830_v7 = vor.u32 1.1754944e-38, %v1829_v62  ;;  %vm1828_vm2 = vcmp.eq.f32.partialorder %v1827_v1, 8.507059e+37 }
 0xb70   :  { %v3085_v38 = vpop.eup %3084  ;;  %v1791_v47 = vmul.f32 %v3083_v44, %v1790_v17 }
 0xb71   :  { %v3087_v48 = vpop.eup %3086  ;;  %v1771_v22 = vadd.f32 1.0, %v3085_v38 }
 0xb72   :  { %v1774_v41 = vmul.f32 %v3087_v48, %v1769_v39  ;;  %v1792_v49 = vadd.f32 %v3083_v44, %v1791_v47  ;;  %vm1779_vm10 = vweird.f32 %v3087_v48  ;;  %v1740_v39 = vpop.f32.mrf.mxu1 }
 0xb73   :  { %3090 = vrcp.f32 %v1771_v22  ;;  %v3089_v36 = vpop.eup %3088  ;;  %vm3860_vm14 = vmor %vm1778_vm13, %vm1779_vm10  ;;  %v1814_v18 = vand.u32 2147483648, %v1771_v22  ;;  %v1812_v23 = vand.u32 2147483647, %v1771_v22  ;;  %vm1808_vm4 = vweird.f32 %v1771_v22 }
 0xb74   :  { %v1775_v51 = vsub.f32 1.0, %v1774_v41  ;;  %v1819_v42 = vmul.f32 %v3089_v36, %v1772_v46  ;;  %v1796_v56 = vsel %vm3854_vm9, %v3083_v44, %v1792_v49  ;;  %vm1824_vm12 = vweird.f32 %v3089_v36 }
 0xb75   :  { %v1801_v4 = vsel %vm1798_vm11, %v1800_v57, %v1796_v56  ;;  %vm1825_vm1 = vmor %vm1823_vm0, %vm1824_vm12  ;;  %v1815_v31 = vor.u32 1.1754944e-38, %v1814_v18  ;;  %vm1813_vm6 = vcmp.eq.f32.partialorder %v1812_v23, 8.507059e+37 }
 0xb76   :  { %v1776_v54 = vmul.f32 %v3087_v48, %v1775_v51  ;;  %v1820_v59 = vsub.f32 1.0, %v1819_v42  ;;  %v1834_v14 = vmul.f32 %v1801_v4, %v3821_v19 }
 0xb78   :  { %v1777_v60 = vadd.f32 %v3087_v48, %v1776_v54  ;;  %v1821_v0 = vmul.f32 %v3089_v36, %v1820_v59  ;;  %v1838_v30 = vmul.f32 %v1834_v14, %v1752_v55  ;;  %v3033_v59 = vld [vmem:[%s3893_s7] ss:$0 sm:$0xff]  ;;  %s3124_s7 = smov 128  }
 0xb79   :  { %v3091_v63 = vpop.eup %3090 }
 0xb7a   :  { %v1804_v5 = vmul.f32 %v3091_v63, %v1771_v22  ;;  %v1822_v3 = vadd.f32 %v3089_v36, %v1821_v0  ;;  %v1781_v11 = vsel %vm3860_vm14, %v3087_v48, %v1777_v60  ;;  %vm1809_vm3 = vweird.f32 %v3091_v63 }
 0xb7b   :  { %v1786_v24 = vsel %vm3864_vm15, %v1785_v12, %v1781_v11  ;;  %vm1810_vm5 = vmor %vm1808_vm4, %vm1809_vm3 }
 0xb7c   :  { %v1805_v13 = vsub.f32 1.0, %v1804_v5  ;;  %v1826_v16 = vsel %vm1825_vm1, %v3089_v36, %v1822_v3  ;;  %v1833_v19 = vmul.f32 %v1786_v24, %v3833_v25 }
 0xb7d   :  { %v1831_v20 = vsel %vm1828_vm2, %v1830_v7, %v1826_v16 }
 0xb7e   :  { %v1806_v21 = vmul.f32 %v3091_v63, %v1805_v13  ;;  %v1836_v26 = vmul.f32 %v1831_v20, %v3839_v28  ;;  %v1837_v43 = vmul.f32 %v1833_v19, %v1738_v6 }
 0xb80   :  { %v1807_v27 = vadd.f32 %v3091_v63, %v1806_v21  ;;  %v1840_v32 = vmul.f32 %v1836_v26, %v1754_v29 }
 0xb82   :  { %v1811_v33 = vsel %vm1810_vm5, %v3091_v63, %v1807_v27  ;;  %v1842_v35 = vpack.c.bf16 %v1840_v32, %v1838_v30 }
 0xb83   :  { %v1816_v15 = vsel %vm1813_vm6, %v1815_v31, %v1811_v33 }
 0xb84   :  { %v1835_v37 = vmul.f32 %v1816_v15, %v3848_v34  ;;  %1993 = vmatmul.bf16.vlgmr.msra.gmra.mxu0 %v1842_v35 }
 0xb86   :  { %v1839_v44 = vmul.f32 %v1835_v37, %v1740_v39 }
 0xb88   :  { %v1841_v28 = vpack.c.bf16 %v1839_v44, %v1837_v43 }
 0xb8a   :  { %1979 = vmatmul.bf16.vlgmr.msra.gmra.mxu3 %v1841_v28 }
 0xc01   :  { %v1994_v45 = vpop.f32.mrf.mxu0 }
 0xc09   :  { %v1996_v25 = vpop.f32.mrf.mxu0 }
 0xc0d   :  { %v1980_v46 = vpop.f32.mrf.mxu3 }
 0xc0e   :  { %v1995_v17 = vadd.f32 %v1994_v45, %v1980_v46 }
 0xc10   :  { %v1999_v38 = vadd.f32 %v1995_v17, %v3586_v2 }
 0xc12   :  { %v2002_v47 = vmul.f32 %v1999_v38, %v1999_v38 }
 0xc14   :  { %2004 = vadd.xlane.f32.xlu2 %v2002_v47 }
 0xc15   :  { %v1982_v48 = vpop.f32.mrf.mxu3 }
 0xc16   :  { %v1997_v22 = vadd.f32 %v1996_v25, %v1982_v48 }
 0xc18   :  { %v2000_v41 = vadd.f32 %v1997_v22, %v3591_v8 }
 0xc1a   :  { %v2003_v49 = vmul.f32 %v2000_v41, %v2000_v41 }
 0xc1c   :  { %2006 = vadd.xlane.f32.xlu0 %v2003_v49 }
 0xc87   :  { %v2005_v34 = vpop.xlane.xlu2 %2004 }
 0xc88   :  { %v2008_v50 = vmul.f32 %v2005_v34, %v3269_v40 }
 0xc8a   :  { %v2010_v36 = vadd.f32 1e-06, %v2008_v50 }
 0xc8c   :  { %3092 = vrsqrt.f32 %v2010_v36  ;;  %vm2018_vm8 = vweird.f32 %v2010_v36 }
 0xc8f   :  { %v2007_v51 = vpop.xlane.xlu0 %2006 }
 0xc90   :  { %v2009_v52 = vmul.f32 %v2007_v51, %v3269_v40 }
 0xc92   :  { %v3093_v42 = vpop.eup %3092  ;;  %v2011_v53 = vadd.f32 1e-06, %v2009_v52 }
 0xc93   :  { %v2013_v2 = vmul.f32 %v3093_v42, %v2010_v36  ;;  %vm2019_vm7 = vweird.f32 %v3093_v42 }
 0xc94   :  { %3094 = vrsqrt.f32 %v2011_v53  ;;  %vm2020_vm9 = vmor %vm2018_vm8, %vm2019_vm7  ;;  %vm2028_vm11 = vweird.f32 %v2011_v53 }
 0xc95   :  { %v2014_v54 = vmul.f32 %v3093_v42, %v2013_v2 }
 0xc97   :  { %v2015_v55 = vmul.f32 0.5, %v2014_v54 }
 0xc99   :  { %v2016_v56 = vsub.f32 1.5, %v2015_v55 }
 0xc9a   :  { %v3095_v57 = vpop.eup %3094 }
 0xc9b   :  { %v2017_v8 = vmul.f32 %v3093_v42, %v2016_v56  ;;  %v2023_v58 = vmul.f32 %v3095_v57, %v2011_v53  ;;  %vm2029_vm10 = vweird.f32 %v3095_v57 }
 0xc9c   :  { %vm2030_vm12 = vmor %vm2028_vm11, %vm2029_vm10 }
 0xc9d   :  { %v2021_v60 = vsel %vm2020_vm9, %v3093_v42, %v2017_v8  ;;  %v2024_v61 = vmul.f32 %v3095_v57, %v2023_v58 }
 0xc9e   :  { %v2032_v40 = vmul.f32 %v2021_v60, %v1999_v38 }
 0xc9f   :  { %v2025_v62 = vmul.f32 0.5, %v2024_v61 }
 0xca0   :  { %v2037_v63 = vmul.f32 %v3033_v59, %v2032_v40 }
 0xca1   :  { %v2026_v0 = vsub.f32 1.5, %v2025_v62 }
 0xca2   :  { %2039 = vst [vmem:[#allocation2] sm:$0xff] %v2037_v63 }
 0xca3   :  { %v2027_v1 = vmul.f32 %v3095_v57, %v2026_v0 }
 0xca5   :  { %v2031_v4 = vsel %vm2030_vm12, %v3095_v57, %v2027_v1 }
 0xca6   :  { %v2033_v5 = vmul.f32 %v2031_v4, %v2000_v41 }
 0xca8   :  { %v2038_v6 = vmul.f32 %v3033_v59, %v2033_v5 }
 0xcaa   :  { %2040 = vst [vmem:[#allocation2 + $0x8] sm:$0xff] %v2038_v6 }
 0xcab   :  { %2053 = dma.vmem_to_hbm [thread:$0]  %s2046_s28, 256, %s2048_s9, [#allocation3], %s3124_s7, %s3124_s7, %s3125_s10  }
 0xcac   :  { %3120 = dma.done.wait [#allocation3], 256  }
 0xcad   :  { %3121 = vsyncadd [#allocation3], 4294967040 }
 0xcae   :  { %2058 = vsyncpa [#allocation3], 1 }

// kernel: llava_forward.8
= control target key start
LH: loop header
LB: loop body
LE: loop exit
PB: predicated region body
PF: predicated region fallthrough
CT: control target
= control target key end

     0   :  { %v3039_v14 = vmov 128.0   ;;  %vm350_vm7 = vcmask 261120   ;;  %vm373_vm11 = vcmask 130048   ;;  %s3790_s0 = inlined_call_operand.vmem [shape: bf16[16,128], index: 0, kind: input, shape index: {}]   ;;  %s3791_s2 = inlined_call_operand.vmem [shape: bf16[12,128,32], index: 2, kind: input, shape index: {}]   ;;  %s3792_s1 = inlined_call_operand.vmem [shape: f32[1,128], index: 1, kind: input, shape index: {}]   ;;  %s3793_s3 = inlined_call_operand.vmem [shape: bf16[4,32,128], index: 3, kind: input, shape index: {}]   ;;  %s3794_s4 = inlined_call_operand.vmem [shape: f32[1,128], index: 4, kind: input, shape index: {}]   ;;  %s3795_s5 = inlined_call_operand.vmem [shape: bf16[128,512], index: 5, kind: input, shape index: {}]   ;;  %s3796_s6 = inlined_call_operand.vmem [shape: bf16[256,128], index: 6, kind: input, shape index: {}]   ;;  %s3797_s7 = inlined_call_operand.vmem [shape: bf16[16,128], index: 7, kind: output, shape index: {}]  }
   0x1   :  { %v2970_v0 = vld [vmem:[%s3790_s0] sm:$0xff]   ;;  %v2824_v1 = vld [vmem:[%s3791_s2 + $0x38] sm:$0xff]  ;;  %v2823_v4 = vld [vmem:[%s3791_s2 + $0x30] sm:$0xff]  ;;  %2981 = vrcp.f32 %v3039_v14 }
   0x2   :  { %v2832_v2 = vld [vmem:[%s3791_s2 + $0x138] sm:$0xff]  ;;  %v3089_v3 = vunpack.c.l.bf16 %v2970_v0  ;;  %176 = vmatpush.bf16.msra.mxu0 %v2824_v1  ;;  %v2831_v5 = vld [vmem:[%s3791_s2 + $0x130] sm:$0xff]  ;;  %v3099_v7 = vunpack.c.h.bf16 %v2970_v0  ;;  %v2822_v9 = vld [vmem:[%s3791_s2 + $0x28] sm:$0xff] }
   0x3   :  { %255 = vmatpush.bf16.msra.mxu1 %v2832_v2  ;;  %v2830_v10 = vld [vmem:[%s3791_s2 + $0x128] sm:$0xff]  ;;  %v2821_v11 = vld [vmem:[%s3791_s2 + $0x20] sm:$0xff]  ;;  %v2840_v13 = vld [vmem:[%s3791_s2 + $0x238] sm:$0xff] }
   0x4   :  { %v67_v6 = vmul.f32 %v3089_v3, %v3089_v3  ;;  %v68_v8 = vmul.f32 %v3099_v7, %v3099_v7  ;;  %v2829_v12 = vld [vmem:[%s3791_s2 + $0x120] sm:$0xff]  ;;  %334 = vmatpush.bf16.msra.mxu2 %v2840_v13  ;;  %v2820_v15 = vld [vmem:[%s3791_s2 + $0x18] sm:$0xff]  ;;  %v2839_v17 = vld [vmem:[%s3791_s2 + $0x230] sm:$0xff] }
   0x5   :  { %v2828_v16 = vld [vmem:[%s3791_s2 + $0x118] sm:$0xff]  ;;  %v2819_v19 = vld [vmem:[%s3791_s2 + $0x10] sm:$0xff]  ;;  %v2838_v21 = vld [vmem:[%s3791_s2 + $0x228] sm:$0xff] }
   0x6   :  { %69 = vadd.xlane.f32.xlu0 %v67_v6  ;;  %177 = vmatpush.bf16.msra.mxu0 %v2823_v4  ;;  %v2827_v20 = vld [vmem:[%s3791_s2 + $0x110] sm:$0xff]  ;;  %v2818_v23 = vld [vmem:[%s3791_s2 + $0x8] sm:$0xff]  ;;  %v2837_v25 = vld [vmem:[%s3791_s2 + $0x220] sm:$0xff] }
   0x7   :  { %256 = vmatpush.bf16.msra.mxu1 %v2831_v5  ;;  %v2982_v18 = vpop.eup %2981  ;;  %v2826_v24 = vld [vmem:[%s3791_s2 + $0x108] sm:$0xff]  ;;  %v2817_v27 = vld [vmem:[%s3791_s2] sm:$0xff]  ;;  %v2836_v29 = vld [vmem:[%s3791_s2 + $0x218] sm:$0xff] }
   0x8   :  { %335 = vmatpush.bf16.msra.mxu2 %v2839_v17  ;;  %v74_v22 = vmul.f32 128.0, %v2982_v18  ;;  %v2825_v28 = vld [vmem:[%s3791_s2 + $0x100] sm:$0xff]  ;;  %v2858_v30 = vld [vmem:[%s3791_s2 + $0x178] sm:$0xff]  ;;  %v2835_v33 = vld [vmem:[%s3791_s2 + $0x210] sm:$0xff]  ;;  %vm78_vm0 = vweird.f32 %v2982_v18 }
   0x9   :  { %v2866_v31 = vld [vmem:[%s3791_s2 + $0x278] sm:$0xff]  ;;  %v2857_v34 = vld [vmem:[%s3791_s2 + $0x170] sm:$0xff]  ;;  %v2834_v37 = vld [vmem:[%s3791_s2 + $0x208] sm:$0xff] }
   0xa   :  { %178 = vmatpush.bf16.msra.mxu0 %v2822_v9  ;;  %v75_v26 = vsub.f32 1.0, %v74_v22  ;;  %v2865_v35 = vld [vmem:[%s3791_s2 + $0x270] sm:$0xff]  ;;  %v2856_v38 = vld [vmem:[%s3791_s2 + $0x168] sm:$0xff]  ;;  %v2833_v42 = vld [vmem:[%s3791_s2 + $0x200] sm:$0xff] }
   0xb   :  { %257 = vmatpush.bf16.msra.mxu1 %v2830_v10  ;;  %v2864_v39 = vld [vmem:[%s3791_s2 + $0x268] sm:$0xff]  ;;  %v2855_v43 = vld [vmem:[%s3791_s2 + $0x160] sm:$0xff]  ;;  %v2854_v47 = vld [vmem:[%s3791_s2 + $0x158] sm:$0xff] }
   0xc   :  { %336 = vmatpush.bf16.msra.mxu2 %v2838_v21  ;;  %v76_v32 = vmul.f32 %v2982_v18, %v75_v26  ;;  %v2863_v44 = vld [vmem:[%s3791_s2 + $0x260] sm:$0xff]  ;;  %v2862_v48 = vld [vmem:[%s3791_s2 + $0x258] sm:$0xff]  ;;  %v2853_v49 = vld [vmem:[%s3791_s2 + $0x150] sm:$0xff] }
   0xd   :  { %v2861_v50 = vld [vmem:[%s3791_s2 + $0x250] sm:$0xff]  ;;  %v2852_v55 = vld [vmem:[%s3791_s2 + $0x148] sm:$0xff]  ;;  %v2851_v59 = vld [vmem:[%s3791_s2 + $0x140] sm:$0xff] }
   0xe   :  { %71 = vadd.xlane.f32.xlu0 %v68_v8  ;;  %179 = vmatpush.bf16.msra.mxu0 %v2821_v11  ;;  %v77_v36 = vadd.f32 %v2982_v18, %v76_v32  ;;  %v2860_v56 = vld [vmem:[%s3791_s2 + $0x248] sm:$0xff]  ;;  %v2859_v60 = vld [vmem:[%s3791_s2 + $0x240] sm:$0xff] }
   0xf   :  { %258 = vmatpush.bf16.msra.mxu1 %v2829_v12  ;;  %v2979_v9 = vld [vmem:[%s3792_s1] ss:$0 sm:$0xff] }
  0x10   :  { %337 = vmatpush.bf16.msra.mxu2 %v2837_v25  ;;  %v3178_v40 = vsel %vm78_vm0, %v2982_v18, %v77_v36 }
  0x12   :  { %180 = vmatpush.bf16.msra.mxu0 %v2820_v15 }
  0x13   :  { %259 = vmatpush.bf16.msra.mxu1 %v2828_v16 }
  0x14   :  { %338 = vmatpush.bf16.msra.mxu2 %v2836_v29 }
  0x16   :  { %181 = vmatpush.bf16.msra.mxu0 %v2819_v19 }
  0x17   :  { %260 = vmatpush.bf16.msra.mxu1 %v2827_v20 }
  0x18   :  { %339 = vmatpush.bf16.msra.mxu2 %v2835_v33  ;;  %v31_v33 = vlaneseq }
  0x1a   :  { %182 = vmatpush.bf16.msra.mxu0 %v2818_v23 }
  0x1b   :  { %261 = vmatpush.bf16.msra.mxu1 %v2826_v24 }
  0x1c   :  { %340 = vmatpush.bf16.msra.mxu2 %v2834_v37 }
  0x1e   :  { %183 = vmatpush.bf16.msra.mxu0 %v2817_v27 }
  0x1f   :  { %262 = vmatpush.bf16.msra.mxu1 %v2825_v28 }
  0x20   :  { %341 = vmatpush.bf16.msra.mxu2 %v2833_v42 }
  0x22   :  { %564 = vmatpush.bf16.msrb.mxu0 %v2858_v30 }
  0x23   :  { %643 = vmatpush.bf16.msrb.mxu1 %v2866_v31 }
  0x26   :  { %565 = vmatpush.bf16.msrb.mxu0 %v2857_v34  ;;  %v32_v34 = vshrl.u32 %v31_v33, 7 }
  0x27   :  { %644 = vmatpush.bf16.msrb.mxu1 %v2865_v35  ;;  %v35_v35 = vand.u32 127, %v31_v33  ;;  %v2883_v33 = vld [vmem:[%s3791_s2 + $0x1b0] sm:$0xff] }
  0x28   :  { %v33_v37 = vadd.s32 8, %v32_v34 }
  0x29   :  { %vm45_vm8 = vcmp.lt.s32.totalorder %v35_v35, 8  ;;  %vm62_vm9 = vcmp.ge.s32.totalorder %v32_v34, %v35_v35  ;;  %vm54_vm12 = vcmp.ge.s32.totalorder %v35_v35, 8  ;;  %vm57_vm13 = vcmp.lt.s32.totalorder %v35_v35, 16  ;;  %v2882_v34 = vld [vmem:[%s3791_s2 + $0x1a8] sm:$0xff] }
  0x2a   :  { %566 = vmatpush.bf16.msrb.mxu0 %v2856_v38  ;;  %vm3230_vm10 = vmand %vm45_vm8, %vm62_vm9  ;;  %vm63_vm15 = vcmp.ge.s32.totalorder %v33_v37, %v35_v35 }
  0x2b   :  { %645 = vmatpush.bf16.msrb.mxu1 %v2864_v39  ;;  %vm59_vm14 = vmand %vm54_vm12, %vm57_vm13 }
  0x2c   :  { %vm3237_vm0 = vmand %vm59_vm14, %vm63_vm15 }
  0x2e   :  { %567 = vmatpush.bf16.msrb.mxu0 %v2855_v43 }
  0x2f   :  { %646 = vmatpush.bf16.msrb.mxu1 %v2863_v44 }
  0x32   :  { %568 = vmatpush.bf16.msrb.mxu0 %v2854_v47 }
  0x33   :  { %647 = vmatpush.bf16.msrb.mxu1 %v2862_v48 }
  0x36   :  { %569 = vmatpush.bf16.msrb.mxu0 %v2853_v49 }
  0x37   :  { %648 = vmatpush.bf16.msrb.mxu1 %v2861_v50 }
  0x3a   :  { %570 = vmatpush.bf16.msrb.mxu0 %v2852_v55 }
  0x3b   :  { %649 = vmatpush.bf16.msrb.mxu1 %v2860_v56  ;;  %v2850_v56 = vld [vmem:[%s3791_s2 + $0x78] sm:$0xff] }
  0x3e   :  { %571 = vmatpush.bf16.msrb.mxu0 %v2851_v59  ;;  %v2847_v59 = vld [vmem:[%s3791_s2 + $0x60] sm:$0xff] }
  0x3f   :  { %650 = vmatpush.bf16.msrb.mxu1 %v2859_v60  ;;  %v2846_v60 = vld [vmem:[%s3791_s2 + $0x58] sm:$0xff] }
  0x79   :  { %v70_v41 = vpop.xlane.xlu0 %69 }
  0x7a   :  { %v80_v45 = vmul.f32 %v3178_v40, %v70_v41 }
  0x7c   :  { %v82_v46 = vadd.f32 1e-06, %v80_v45 }
  0x7e   :  { %2983 = vrsqrt.f32 %v82_v46  ;;  %vm90_vm2 = vweird.f32 %v82_v46 }
  0x81   :  { %v72_v51 = vpop.xlane.xlu0 %71 }
  0x82   :  { %v81_v52 = vmul.f32 %v3178_v40, %v72_v51 }
  0x84   :  { %v2984_v53 = vpop.eup %2983  ;;  %v83_v54 = vadd.f32 1e-06, %v81_v52 }
  0x85   :  { %v85_v57 = vmul.f32 %v2984_v53, %v82_v46  ;;  %vm91_vm1 = vweird.f32 %v2984_v53 }
  0x86   :  { %2985 = vrsqrt.f32 %v83_v54  ;;  %vm92_vm3 = vmor %vm90_vm2, %vm91_vm1  ;;  %vm100_vm5 = vweird.f32 %v83_v54 }
  0x87   :  { %v86_v58 = vmul.f32 %v2984_v53, %v85_v57  ;;  %v2849_v57 = vld [vmem:[%s3791_s2 + $0x70] sm:$0xff] }
  0x89   :  { %v87_v61 = vmul.f32 0.5, %v86_v58  ;;  %v2848_v58 = vld [vmem:[%s3791_s2 + $0x68] sm:$0xff] }
  0x8b   :  { %v88_v62 = vsub.f32 1.5, %v87_v61  ;;  %v2845_v61 = vld [vmem:[%s3791_s2 + $0x50] sm:$0xff] }
  0x8c   :  { %v2986_v63 = vpop.eup %2985 }
  0x8d   :  { %v95_v0 = vmul.f32 %v2986_v63, %v83_v54  ;;  %v89_v1 = vmul.f32 %v2984_v53, %v88_v62  ;;  %vm101_vm4 = vweird.f32 %v2986_v63  ;;  %v2844_v62 = vld [vmem:[%s3791_s2 + $0x48] sm:$0xff] }
  0x8e   :  { %vm102_vm6 = vmor %vm100_vm5, %vm101_vm4 }
  0x8f   :  { %v96_v2 = vmul.f32 %v2986_v63, %v95_v0  ;;  %v93_v5 = vsel %vm92_vm3, %v2984_v53, %v89_v1  ;;  %v2842_v1 = vld [vmem:[%s3793_s3 + $0x8] sm:$0xff] }
  0x90   :  { %v104_v10 = vmul.f32 %v3089_v3, %v93_v5 }
  0x91   :  { %v97_v4 = vmul.f32 0.5, %v96_v2  ;;  %v2841_v2 = vld [vmem:[%s3793_s3] sm:$0xff] }
  0x92   :  { %v109_v13 = vmul.f32 %v2979_v9, %v104_v10 }
  0x93   :  { %v98_v6 = vsub.f32 1.5, %v97_v4  ;;  %v2876_v4 = vld [vmem:[%s3791_s2 + $0xb8] sm:$0xff] }
  0x95   :  { %v99_v8 = vmul.f32 %v2986_v63, %v98_v6 }
  0x97   :  { %v103_v11 = vsel %vm102_vm6, %v2986_v63, %v99_v8  ;;  %v2843_v63 = vld [vmem:[%s3791_s2 + $0x40] sm:$0xff] }
  0x98   :  { %v105_v12 = vmul.f32 %v3099_v7, %v103_v11 }
  0x9a   :  { %v110_v14 = vmul.f32 %v2979_v9, %v105_v12  ;;  %v2875_v12 = vld [vmem:[%s3791_s2 + $0xb0] sm:$0xff] }
  0x9c   :  { %v3220_v15 = vpack.c.bf16 %v110_v14, %v109_v13  ;;  %v2874_v13 = vld [vmem:[%s3791_s2 + $0xa8] sm:$0xff]  ;;  %v2873_v14 = vld [vmem:[%s3791_s2 + $0xa0] sm:$0xff] }
  0x9e   :  { %184 = vmatmul.bf16.vlgmr.msra.gmra.mxu0 %v3220_v15  ;;  %263 = vmatmul.bf16.vlgmr.msra.gmra.mxu1 %v3220_v15 }
  0x9f   :  { %342 = vmatmul.bf16.vlgmr.msra.gmra.mxu2 %v3220_v15  ;;  %778 = vmatpush.bf16.msra.mxu1 %v2842_v1  ;;  %v2900_v1 = vld [vmem:[%s3791_s2 + $0xe8] sm:$0xff] }
  0xa3   :  { %779 = vmatpush.bf16.msra.mxu1 %v2841_v2  ;;  %v2891_v2 = vld [vmem:[%s3791_s2 + $0x2b0] sm:$0xff] }
  0xae   :  { %572 = vmatmul.bf16.vlgmr.msrb.gmra.mxu0 %v3220_v15  ;;  %651 = vmatmul.bf16.vlgmr.msrb.gmra.mxu1 %v3220_v15 }
  0xaf   :  { %851 = vmatpush.bf16.msrb.mxu1 %v2876_v4  ;;  %v2899_v4 = vld [vmem:[%s3791_s2 + $0xe0] sm:$0xff] }
  0xb3   :  { %852 = vmatpush.bf16.msrb.mxu1 %v2875_v12  ;;  %v2895_v12 = vld [vmem:[%s3791_s2 + $0xc0] sm:$0xff] }
  0xb7   :  { %853 = vmatpush.bf16.msrb.mxu1 %v2874_v13  ;;  %v2887_v13 = vld [vmem:[%s3791_s2 + $0x290] sm:$0xff] }
  0xbb   :  { %854 = vmatpush.bf16.msrb.mxu1 %v2873_v14  ;;  %v2886_v14 = vld [vmem:[%s3791_s2 + $0x288] sm:$0xff] }
 0x11b   :  { %v185_v16 = vpop.f32.mrf.mxu0  ;;  %v264_v17 = vpop.f32.mrf.mxu1 }
 0x122   :  { %v343_v18 = vpop.f32.mrf.mxu2 }
 0x123   :  { %v187_v19 = vpop.f32.mrf.mxu0  ;;  %v266_v20 = vpop.f32.mrf.mxu1 }
 0x124   :  { %v349_v21 = vpack.c.bf16 %v266_v20, %v264_v17  ;;  %v348_v27 = vpack.c.bf16 %v187_v19, %v185_v16  ;;  %v2872_v16 = vld [vmem:[%s3791_s2 + $0x98] sm:$0xff]  ;;  %v2871_v17 = vld [vmem:[%s3791_s2 + $0x90] sm:$0xff]  ;;  %v2869_v19 = vld [vmem:[%s3791_s2 + $0x80] sm:$0xff] }
 0x125   :  { %855 = vmatpush.bf16.msrb.mxu1 %v2872_v16  ;;  %v2885_v16 = vld [vmem:[%s3791_s2 + $0x280] sm:$0xff] }
 0x126   :  { %v355_v22 = vsel %vm350_vm7, %v349_v21, 0 }
 0x127   :  { %364 = vmatpush.bf16.xpose.msrb.mxu2 %v355_v22 }
 0x129   :  { %856 = vmatpush.bf16.msrb.mxu1 %v2871_v17 }
 0x12a   :  { %v345_v23 = vpop.f32.mrf.mxu2 }
 0x12b   :  { %v573_v24 = vpop.f32.mrf.mxu0  ;;  %v652_v25 = vpop.f32.mrf.mxu1  ;;  %v397_v26 = vpack.c.bf16 %v345_v23, %v343_v18  ;;  %v2870_v18 = vld [vmem:[%s3791_s2 + $0x88] sm:$0xff] }
 0x12d   :  { %408 = vmatpush.bf16.msra.mxu3 %v397_v26  ;;  %857 = vmatpush.bf16.msrb.mxu1 %v2870_v18 }
 0x12e   :  { %2133 = vmatmul.msk.bf16.vlgmr.msrb.gmra.mxu2 %vm350_vm7, %v348_v27 }
 0x131   :  { %485 = vmatpush.bf16.msrb.mxu3 %v2850_v56  ;;  %858 = vmatpush.bf16.msrb.mxu1 %v2869_v19 }
 0x133   :  { %v575_v28 = vpop.f32.mrf.mxu0  ;;  %v654_v29 = vpop.f32.mrf.mxu1 }
 0x134   :  { %v658_v30 = vpack.c.bf16 %v575_v28, %v573_v24  ;;  %v704_v32 = vpack.c.bf16 %v654_v29, %v652_v25 }
 0x135   :  { %486 = vmatpush.bf16.msrb.mxu3 %v2849_v57 }
 0x136   :  { %v663_v31 = vsel %vm350_vm7, %v658_v30, 0 }
 0x137   :  { %672 = vmatpush.bf16.xpose.msra.mxu2 %v663_v31 }
 0x139   :  { %487 = vmatpush.bf16.msrb.mxu3 %v2848_v58 }
 0x13d   :  { %488 = vmatpush.bf16.msrb.mxu3 %v2847_v59  ;;  %v2902_v59 = vld [vmem:[%s3791_s2 + $0xf8] sm:$0xff] }
 0x13f   :  { %715 = vmatpush.bf16.msrb.mxu2 %v704_v32  ;;  %v2884_v32 = vld [vmem:[%s3791_s2 + $0x1b8] sm:$0xff] }
 0x141   :  { %489 = vmatpush.bf16.msrb.mxu3 %v2846_v60 }
 0x145   :  { %490 = vmatpush.bf16.msrb.mxu3 %v2845_v61  ;;  %v2868_v61 = vld [vmem:[%s3793_s3 + $0x18] sm:$0xff] }
 0x149   :  { %491 = vmatpush.bf16.msrb.mxu3 %v2844_v62  ;;  %v2901_v62 = vld [vmem:[%s3791_s2 + $0xf0] sm:$0xff] }
 0x14d   :  { %492 = vmatpush.bf16.msrb.mxu3 %v2843_v63  ;;  %v2867_v63 = vld [vmem:[%s3793_s3 + $0x10] sm:$0xff] }
 0x1b1   :  { %v366_v38 = vpop.f32.mrf.mxu2 }
 0x1b2   :  { %v371_v39 = vsel %vm3230_vm10, %v366_v38, -1e+09 }
 0x1b3   :  { %v374_v41 = vsel %vm373_vm11, %v371_v39, -inf }
 0x1b4   :  { %375 = vmax.xlane.f32.xlu1 %v374_v41 }
 0x1b9   :  { %v368_v43 = vpop.f32.mrf.mxu2 }
 0x1ba   :  { %v372_v44 = vsel %vm3237_vm0, %v368_v43, -1e+09 }
 0x1bb   :  { %v377_v45 = vsel %vm373_vm11, %v372_v44, -inf }
 0x1bc   :  { %378 = vmax.xlane.f32.xlu1 %v377_v45 }
 0x227   :  { %v376_v46 = vpop.xlane.xlu1 %375 }
 0x228   :  { %v380_v47 = vsub.f32 %v371_v39, %v376_v46 }
 0x22a   :  { %v382_v48 = vmul.f32 1.442695, %v380_v47 }
 0x22c   :  { %2987 = vpow2.f32 %v382_v48  ;;  %v2881_v48 = vld [vmem:[%s3791_s2 + $0x1a0] sm:$0xff] }
 0x22f   :  { %v379_v49 = vpop.xlane.xlu1 %378 }
 0x230   :  { %v381_v50 = vsub.f32 %v372_v44, %v379_v49  ;;  %v2880_v49 = vld [vmem:[%s3791_s2 + $0x198] sm:$0xff] }
 0x232   :  { %v2988_v51 = vpop.eup %2987  ;;  %v384_v52 = vmul.f32 1.442695, %v381_v50  ;;  %v2879_v50 = vld [vmem:[%s3791_s2 + $0x190] sm:$0xff] }
 0x233   :  { %v386_v53 = vsel %vm373_vm11, %v2988_v51, 0.0 }
 0x234   :  { %2989 = vpow2.f32 %v384_v52  ;;  %387 = vadd.xlane.f32.xlu2 %v386_v53  ;;  %v2877_v52 = vld [vmem:[%s3791_s2 + $0x180] sm:$0xff] }
 0x23a   :  { %v2990_v54 = vpop.eup %2989 }
 0x23b   :  { %v389_v55 = vsel %vm373_vm11, %v2990_v54, 0.0 }
 0x23c   :  { %390 = vadd.xlane.f32.xlu2 %v389_v55 }
 0x2a7   :  { %v388_v0 = vpop.xlane.xlu2 %387 }
 0x2a8   :  { %2991 = vrcp.f32 %v388_v0  ;;  %v2892_v0 = vld [vmem:[%s3791_s2 + $0x2b8] sm:$0xff] }
 0x2ae   :  { %v2992_v6 = vpop.eup %2991 }
 0x2af   :  { %v391_v5 = vpop.xlane.xlu2 %390  ;;  %v394_v9 = vmul.f32 %v2992_v6, %v2988_v51  ;;  %v2878_v51 = vld [vmem:[%s3791_s2 + $0x188] sm:$0xff]  ;;  %v2898_v6 = vld [vmem:[%s3791_s2 + $0xd8] sm:$0xff] }
 0x2b0   :  { %2993 = vrcp.f32 %v391_v5  ;;  %v2890_v5 = vld [vmem:[%s3791_s2 + $0x2a8] sm:$0xff] }
 0x2b6   :  { %v2994_v8 = vpop.eup %2993 }
 0x2b7   :  { %v395_v10 = vmul.f32 %v2994_v8, %v2990_v54  ;;  %v2889_v8 = vld [vmem:[%s3791_s2 + $0x2a0] sm:$0xff] }
 0x2b9   :  { %v396_v11 = vpack.c.bf16 %v395_v10, %v394_v9  ;;  %v2897_v9 = vld [vmem:[%s3791_s2 + $0xd0] sm:$0xff]  ;;  %v2888_v10 = vld [vmem:[%s3791_s2 + $0x298] sm:$0xff] }
 0x2bb   :  { %2134 = vmatmul.msk.bf16.vlgmr.msra.gmra.mxu3 %vm373_vm11, %v396_v11  ;;  %v2896_v11 = vld [vmem:[%s3791_s2 + $0xc8] sm:$0xff] }
 0x2bc   :  { %749 = vmatpush.bf16.msra.mxu3 %v2868_v61 }
 0x2c0   :  { %750 = vmatpush.bf16.msra.mxu3 %v2867_v63 }
 0x2cb   :  { %493 = vmatmul.bf16.vlgmr.msrb.gmra.mxu3 %v3220_v15 }
 0x2cc   :  { %1009 = vmatpush.bf16.msrb.mxu3 %v2892_v0 }
 0x2d0   :  { %1010 = vmatpush.bf16.msrb.mxu3 %v2891_v2 }
 0x2d4   :  { %1011 = vmatpush.bf16.msrb.mxu3 %v2890_v5  ;;  %v2917_v5 = vld [vmem:[%s3791_s2 + $0x2f0] sm:$0xff] }
 0x2d8   :  { %1012 = vmatpush.bf16.msrb.mxu3 %v2889_v8  ;;  %v2915_v8 = vld [vmem:[%s3791_s2 + $0x2e0] sm:$0xff] }
 0x2dc   :  { %1013 = vmatpush.bf16.msrb.mxu3 %v2888_v10  ;;  %v2913_v10 = vld [vmem:[%s3791_s2 + $0x2d0] sm:$0xff] }
 0x2e0   :  { %1014 = vmatpush.bf16.msrb.mxu3 %v2887_v13 }
 0x2e4   :  { %1015 = vmatpush.bf16.msrb.mxu3 %v2886_v14 }
 0x2e8   :  { %1016 = vmatpush.bf16.msrb.mxu3 %v2885_v16 }
 0x33e   :  { %v410_v20 = vpop.f32.mrf.mxu3 }
 0x346   :  { %v412_v21 = vpop.f32.mrf.mxu3 }
 0x347   :  { %v415_v22 = vpack.c.bf16 %v412_v21, %v410_v20  ;;  %v2910_v20 = vld [vmem:[%s3791_s2 + $0x1f8] sm:$0xff] }
 0x349   :  { %2302 = vmatmul.msk.bf16.vlgmr.msra.gmra.mxu1 %vm350_vm7, %v415_v22 }
 0x34e   :  { %v494_v23 = vpop.f32.mrf.mxu3 }
 0x356   :  { %v496_v24 = vpop.f32.mrf.mxu3 }
 0x357   :  { %v657_v25 = vpack.c.bf16 %v496_v24, %v494_v23  ;;  %v2909_v23 = vld [vmem:[%s3791_s2 + $0x1f0] sm:$0xff] }
 0x359   :  { %2279 = vmatmul.msk.bf16.vlgmr.msra.gmra.mxu2 %vm350_vm7, %v657_v25  ;;  %859 = vmatmul.bf16.vlgmr.msrb.gmra.mxu1 %v3220_v15  ;;  %v2908_v25 = vld [vmem:[%s3791_s2 + $0x1e8] sm:$0xff] }
 0x35a   :  { %930 = vmatpush.bf16.msra.mxu2 %v2884_v32  ;;  %v2905_v32 = vld [vmem:[%s3791_s2 + $0x1d0] sm:$0xff] }
 0x35e   :  { %931 = vmatpush.bf16.msra.mxu2 %v2883_v33 }
 0x362   :  { %932 = vmatpush.bf16.msra.mxu2 %v2882_v34  ;;  %v2904_v34 = vld [vmem:[%s3791_s2 + $0x1c8] sm:$0xff] }
 0x366   :  { %933 = vmatpush.bf16.msra.mxu2 %v2881_v48 }
 0x36a   :  { %934 = vmatpush.bf16.msra.mxu2 %v2880_v49 }
 0x36e   :  { %935 = vmatpush.bf16.msra.mxu2 %v2879_v50 }
 0x372   :  { %936 = vmatpush.bf16.msra.mxu2 %v2878_v51 }
 0x376   :  { %937 = vmatpush.bf16.msra.mxu2 %v2877_v52 }
 0x3c6   :  { %v3394_v17 = vpop.f32.mrf.mxu1 }
 0x3ce   :  { %v3399_v22 = vpop.f32.mrf.mxu1 }
 0x3dc   :  { %v674_v26 = vpop.f32.mrf.mxu2 }
 0x3dd   :  { %v679_v27 = vsel %vm3230_vm10, %v674_v26, -1e+09  ;;  %v860_v26 = vpop.f32.mrf.mxu1 }
 0x3de   :  { %v681_v28 = vsel %vm373_vm11, %v679_v27, -inf }
 0x3df   :  { %682 = vmax.xlane.f32.xlu0 %v681_v28 }
 0x3e4   :  { %v676_v29 = vpop.f32.mrf.mxu2 }
 0x3e5   :  { %v680_v30 = vsel %vm3237_vm0, %v676_v29, -1e+09  ;;  %v2906_v29 = vld [vmem:[%s3791_s2 + $0x1d8] sm:$0xff]  ;;  %v862_v33 = vpop.f32.mrf.mxu1 }
 0x3e6   :  { %v684_v31 = vsel %vm373_vm11, %v680_v30, -inf }
 0x3e7   :  { %685 = vmax.xlane.f32.xlu1 %v684_v31 }
 0x452   :  { %v683_v35 = vpop.xlane.xlu0 %682 }
 0x453   :  { %v687_v37 = vsub.f32 %v679_v27, %v683_v35  ;;  %v2907_v27 = vld [vmem:[%s3791_s2 + $0x1e0] sm:$0xff]  ;;  %v1023_v35 = vpack.c.bf16 %v862_v33, %v860_v26 }
 0x455   :  { %v689_v38 = vmul.f32 1.442695, %v687_v37  ;;  %v2903_v37 = vld [vmem:[%s3791_s2 + $0x1c0] sm:$0xff] }
 0x457   :  { %2995 = vpow2.f32 %v689_v38 }
 0x45a   :  { %v686_v39 = vpop.xlane.xlu1 %685 }
 0x45b   :  { %v688_v41 = vsub.f32 %v680_v30, %v686_v39  ;;  %v2894_v39 = vld [vmem:[%s3793_s3 + $0x28] sm:$0xff] }
 0x45c   :  { %1115 = vmatpush.bf16.msra.mxu1 %v2894_v39 }
 0x45d   :  { %v2996_v43 = vpop.eup %2995  ;;  %v691_v44 = vmul.f32 1.442695, %v688_v41 }
 0x45e   :  { %v693_v45 = vsel %vm373_vm11, %v2996_v43, 0.0 }
 0x45f   :  { %2997 = vpow2.f32 %v691_v44  ;;  %694 = vadd.xlane.f32.xlu2 %v693_v45 }
 0x465   :  { %v2998_v46 = vpop.eup %2997 }
 0x466   :  { %v696_v47 = vsel %vm373_vm11, %v2998_v46, 0.0 }
 0x467   :  { %697 = vadd.xlane.f32.xlu0 %v696_v47 }
 0x4d2   :  { %v695_v53 = vpop.xlane.xlu2 %694 }
 0x4d3   :  { %2999 = vrcp.f32 %v695_v53 }
 0x4d9   :  { %v3000_v55 = vpop.eup %2999 }
 0x4da   :  { %v698_v54 = vpop.xlane.xlu0 %697  ;;  %v701_v57 = vmul.f32 %v3000_v55, %v2996_v43  ;;  %v2893_v43 = vld [vmem:[%s3793_s3 + $0x20] sm:$0xff] }
 0x4db   :  { %3001 = vrcp.f32 %v698_v54  ;;  %1116 = vmatpush.bf16.msra.mxu1 %v2893_v43 }
 0x4e1   :  { %v3002_v56 = vpop.eup %3001 }
 0x4e2   :  { %v702_v58 = vmul.f32 %v3002_v56, %v2998_v46 }
 0x4e4   :  { %v703_v60 = vpack.c.bf16 %v702_v58, %v701_v57 }
 0x4e6   :  { %2280 = vmatmul.msk.bf16.vlgmr.msrb.gmra.mxu2 %vm373_vm11, %v703_v60 }
 0x4e7   :  { %1190 = vmatpush.bf16.msrb.mxu2 %v2902_v59 }
 0x4eb   :  { %1191 = vmatpush.bf16.msrb.mxu2 %v2901_v62 }
 0x4ef   :  { %1192 = vmatpush.bf16.msrb.mxu2 %v2900_v1 }
 0x4f3   :  { %1193 = vmatpush.bf16.msrb.mxu2 %v2899_v4  ;;  %v2918_v4 = vld [vmem:[%s3791_s2 + $0x2f8] sm:$0xff] }
 0x4f6   :  { %938 = vmatmul.bf16.vlgmr.msra.gmra.mxu2 %v3220_v15 }
 0x4f7   :  { %1194 = vmatpush.bf16.msrb.mxu2 %v2898_v6  ;;  %v2916_v6 = vld [vmem:[%s3791_s2 + $0x2e8] sm:$0xff] }
 0x4fb   :  { %1195 = vmatpush.bf16.msrb.mxu2 %v2897_v9  ;;  %v2914_v9 = vld [vmem:[%s3791_s2 + $0x2d8] sm:$0xff] }
 0x4ff   :  { %1196 = vmatpush.bf16.msrb.mxu2 %v2896_v11  ;;  %v2912_v11 = vld [vmem:[%s3791_s2 + $0x2c8] sm:$0xff] }
 0x503   :  { %1197 = vmatpush.bf16.msrb.mxu2 %v2895_v12  ;;  %v2911_v12 = vld [vmem:[%s3791_s2 + $0x2c0] sm:$0xff] }
 0x506   :  { %1198 = vmatmul.bf16.vlgmr.msrb.gmra.mxu2 %v3220_v15 }
 0x569   :  { %v717_v18 = vpop.f32.mrf.mxu2 }
 0x571   :  { %v719_v19 = vpop.f32.mrf.mxu2 }
 0x572   :  { %v722_v21 = vpack.c.bf16 %v719_v19, %v717_v18 }
 0x574   :  { %2293 = vmatmul.msk.bf16.vlgmr.msra.gmra.mxu3 %vm350_vm7, %v722_v21 }
 0x575   :  { %1269 = vmatpush.bf16.msra.mxu3 %v2910_v20 }
 0x579   :  { %v939_v24 = vpop.f32.mrf.mxu2  ;;  %1270 = vmatpush.bf16.msra.mxu3 %v2909_v23 }
 0x57d   :  { %1271 = vmatpush.bf16.msra.mxu3 %v2908_v25 }
 0x581   :  { %v941_v28 = vpop.f32.mrf.mxu2  ;;  %1272 = vmatpush.bf16.msra.mxu3 %v2907_v27 }
 0x582   :  { %v1024_v30 = vpack.c.bf16 %v941_v28, %v939_v24 }
 0x584   :  { %v1029_v31 = vsel %vm350_vm7, %v1024_v30, 0  ;;  %1017 = vmatmul.bf16.vlgmr.msrb.gmra.mxu3 %v3220_v15 }
 0x585   :  { %1038 = vmatpush.bf16.xpose.msra.mxu0 %v1029_v31  ;;  %1273 = vmatpush.bf16.msra.mxu3 %v2906_v29 }
 0x589   :  { %1274 = vmatpush.bf16.msra.mxu3 %v2905_v32  ;;  %v1199_v26 = vpop.f32.mrf.mxu2 }
 0x58c   :  { %2447 = vmatmul.msk.bf16.vlgmr.msra.gmra.mxu0 %vm350_vm7, %v1023_v35 }
 0x58d   :  { %1275 = vmatpush.bf16.msra.mxu3 %v2904_v34 }
 0x591   :  { %1276 = vmatpush.bf16.msra.mxu3 %v2903_v37  ;;  %v1201_v28 = vpop.f32.mrf.mxu2 }
 0x592   :  { %v1362_v30 = vpack.c.bf16 %v1201_v28, %v1199_v26  ;;  %v2727_v28 = vld [vmem:[%s3795_s5 + $0xc8] sm:$0xf] }
 0x594   :  { %1277 = vmatmul.bf16.vlgmr.msra.gmra.mxu3 %v3220_v15 }
 0x5f7   :  { %v3427_v38 = vpop.f32.mrf.mxu3 }
 0x5f8   :  { %v782_v32 = vadd.f32 %v3394_v17, %v3427_v38 }
 0x5ff   :  { %v3432_v41 = vpop.f32.mrf.mxu3 }
 0x607   :  { %v1018_v44 = vpop.f32.mrf.mxu3 }
 0x609   :  { %v1040_v45 = vpop.f32.mrf.mxu0 }
 0x60a   :  { %v1045_v46 = vsel %vm3230_vm10, %v1040_v45, -1e+09 }
 0x60b   :  { %v1047_v47 = vsel %vm373_vm11, %v1045_v46, -inf }
 0x60c   :  { %1048 = vmax.xlane.f32.xlu1 %v1047_v47 }
 0x60f   :  { %v1020_v48 = vpop.f32.mrf.mxu3 }
 0x610   :  { %v1070_v49 = vpack.c.bf16 %v1020_v48, %v1018_v44 }
 0x611   :  { %v1042_v50 = vpop.f32.mrf.mxu0 }
 0x612   :  { %v1046_v51 = vsel %vm3237_vm0, %v1042_v50, -1e+09  ;;  %1081 = vmatpush.bf16.msrb.mxu0 %v1070_v49 }
 0x613   :  { %v1050_v52 = vsel %vm373_vm11, %v1046_v51, -inf }
 0x614   :  { %1051 = vmax.xlane.f32.xlu2 %v1050_v52 }
 0x616   :  { %1348 = vmatpush.bf16.msra.mxu0 %v2918_v4 }
 0x617   :  { %v1278_v53 = vpop.f32.mrf.mxu3 }
 0x61a   :  { %1349 = vmatpush.bf16.msra.mxu0 %v2917_v5 }
 0x61e   :  { %1350 = vmatpush.bf16.msra.mxu0 %v2916_v6 }
 0x61f   :  { %v1280_v54 = vpop.f32.mrf.mxu3 }
 0x620   :  { %v1363_v55 = vpack.c.bf16 %v1280_v54, %v1278_v53 }
 0x622   :  { %v1368_v56 = vsel %vm350_vm7, %v1363_v55, 0  ;;  %1351 = vmatpush.bf16.msra.mxu0 %v2915_v8 }
 0x623   :  { %1377 = vmatpush.bf16.xpose.msrb.mxu1 %v1368_v56 }
 0x626   :  { %1352 = vmatpush.bf16.msra.mxu0 %v2914_v9 }
 0x62a   :  { %1353 = vmatpush.bf16.msra.mxu0 %v2913_v10  ;;  %v2735_v10 = vld [vmem:[%s3795_s5 + $0xe0] sm:$0xf] }
 0x62e   :  { %1354 = vmatpush.bf16.msra.mxu0 %v2912_v11  ;;  %v2949_v11 = vld [vmem:[%s3795_s5 + $0xe4] sm:$0xf] }
 0x632   :  { %1355 = vmatpush.bf16.msra.mxu0 %v2911_v12 }
 0x67f   :  { %v1049_v57 = vpop.xlane.xlu1 %1048 }
 0x680   :  { %v1053_v58 = vsub.f32 %v1045_v46, %v1049_v57 }
 0x682   :  { %v1055_v59 = vmul.f32 1.442695, %v1053_v58 }
 0x684   :  { %3003 = vpow2.f32 %v1055_v59  ;;  %v2920_v59 = vld [vmem:[%s3793_s3 + $0x38] sm:$0xff] }
 0x685   :  { %1454 = vmatpush.bf16.msra.mxu2 %v2920_v59  ;;  %v2933_v59 = vld [vmem:[%s3795_s5 + $0x64] sm:$0xf] }
 0x687   :  { %v1052_v60 = vpop.xlane.xlu2 %1051 }
 0x688   :  { %v1054_v61 = vsub.f32 %v1046_v51, %v1052_v60  ;;  %v2919_v60 = vld [vmem:[%s3793_s3 + $0x30] sm:$0xff] }
 0x689   :  { %1455 = vmatpush.bf16.msra.mxu2 %v2919_v60 }
 0x68a   :  { %v3004_v62 = vpop.eup %3003  ;;  %v1057_v63 = vmul.f32 1.442695, %v1054_v61 }
 0x68b   :  { %v1059_v0 = vsel %vm373_vm11, %v3004_v62, 0.0 }
 0x68c   :  { %3005 = vpow2.f32 %v1057_v63  ;;  %1060 = vadd.xlane.f32.xlu0 %v1059_v0 }
 0x692   :  { %v3006_v1 = vpop.eup %3005 }
 0x693   :  { %v1062_v2 = vsel %vm373_vm11, %v3006_v1, 0.0 }
 0x694   :  { %1063 = vadd.xlane.f32.xlu1 %v1062_v2 }
 0x6ff   :  { %v1061_v13 = vpop.xlane.xlu0 %1060 }
 0x700   :  { %3007 = vrcp.f32 %v1061_v13  ;;  %v2743_v13 = vld [vmem:[%s3795_s5 + $0xe8] sm:$0xf] }
 0x706   :  { %v3008_v16 = vpop.eup %3007 }
 0x707   :  { %v1064_v14 = vpop.xlane.xlu1 %1063  ;;  %v1067_v19 = vmul.f32 %v3008_v16, %v3004_v62 }
 0x708   :  { %3009 = vrcp.f32 %v1064_v14  ;;  %v2952_v14 = vld [vmem:[%s3795_s5 + $0xf4] sm:$0xf0] }
 0x70e   :  { %v3010_v18 = vpop.eup %3009 }
 0x70f   :  { %v1068_v20 = vmul.f32 %v3010_v18, %v3006_v1  ;;  %v2744_v18 = vor.u32 %v2952_v14, %v2743_v13  ;;  %v2932_v13 = vld [vmem:[%s3795_s5 + $0x54] sm:$0xf0] }
 0x711   :  { %v1069_v21 = vpack.c.bf16 %v1068_v20, %v1067_v19  ;;  %v2950_v19 = vld [vmem:[%s3795_s5 + $0xec] sm:$0xf]  ;;  %v2745_v20 = vld [vmem:[%s3795_s5 + $0xf8] sm:$0xf0] }
 0x713   :  { %2448 = vmatmul.msk.bf16.vlgmr.msrb.gmra.mxu0 %vm373_vm11, %v1069_v21  ;;  %v2748_v21 = vor.u32 %v2950_v19, %v2745_v20  ;;  %v2665_v19 = vld [vmem:[%s3795_s5 + $0x58] sm:$0xf0] }
 0x715   :  { %1739 = vmatpush.bf16.msrb.mxu2 %v2748_v21  ;;  %v2639_v21 = vld [vmem:[%s3795_s5 + $0x20] sm:$0xf] }
 0x723   :  { %1356 = vmatmul.bf16.vlgmr.msra.gmra.mxu0 %v3220_v15  ;;  %v784_v15 = vadd.f32 %v3399_v22, %v3432_v41 }
 0x790   :  { %v1083_v23 = vpop.f32.mrf.mxu0 }
 0x798   :  { %v1085_v24 = vpop.f32.mrf.mxu0 }
 0x799   :  { %v1088_v25 = vpack.c.bf16 %v1085_v24, %v1083_v23  ;;  %v2719_v23 = vld [vmem:[%s3795_s5 + $0xc0] sm:$0xf]  ;;  %v2947_v24 = vld [vmem:[%s3795_s5 + $0xcc] sm:$0xf0] }
 0x79a   :  { %v2720_v26 = vor.u32 %v2947_v24, %v2719_v23  ;;  %v2927_v23 = vld [vmem:[%s3795_s5 + $0x2c] sm:$0xf0]  ;;  %v2925_v24 = vld [vmem:[%s3795_s5 + $0x24] sm:$0xf] }
 0x79b   :  { %2461 = vmatmul.msk.bf16.vlgmr.msra.gmra.mxu1 %vm350_vm7, %v1088_v25  ;;  %v2945_v25 = vld [vmem:[%s3795_s5 + $0xc4] sm:$0xf] }
 0x7a0   :  { %v1357_v27 = vpop.f32.mrf.mxu0 }
 0x7a8   :  { %v1359_v29 = vpop.f32.mrf.mxu0 }
 0x7a9   :  { %v1409_v31 = vpack.c.bf16 %v1359_v29, %v1357_v27  ;;  %v2721_v27 = vld [vmem:[%s3795_s5 + $0xd0] sm:$0xf0]  ;;  %v2948_v29 = vld [vmem:[%s3795_s5 + $0xd4] sm:$0xf0] }
 0x7ab   :  { %2606 = vmatmul.msk.bf16.vlgmr.msrb.gmra.mxu1 %vm350_vm7, %v1362_v30  ;;  %v2724_v30 = vor.u32 %v2945_v25, %v2721_v27  ;;  %v2640_v25 = vor.u32 %v2927_v23, %v2639_v21  ;;  %v2647_v27 = vld [vmem:[%s3795_s5 + $0x28] sm:$0xf]  ;;  %v2956_v21 = vld [vmem:[%s3796_s6 + $0x18] sm:$0xff] }
 0x7ac   :  { %1420 = vmatpush.bf16.msra.mxu1 %v1409_v31  ;;  %v2728_v31 = vor.u32 %v2948_v29, %v2727_v28  ;;  %v2928_v28 = vld [vmem:[%s3795_s5 + $0x34] sm:$0xf0]  ;;  %v2962_v23 = vld [vmem:[%s3796_s6 + $0x48] sm:$0xff] }
 0x7b0   :  { %1725 = vmatpush.bf16.msrb.mxu1 %v2744_v18  ;;  %v2930_v18 = vld [vmem:[%s3795_s5 + $0x4c] sm:$0xf] }
 0x7b1   :  { %v2668_v20 = vor.u32 %v2930_v18, %v2665_v19  ;;  %v2963_v19 = vld [vmem:[%s3796_s6 + $0x50] sm:$0xff] }
 0x7b4   :  { %1726 = vmatpush.bf16.msrb.mxu1 %v2728_v31  ;;  %v2926_v31 = vld [vmem:[%s3795_s5 + $0x2c] sm:$0xf] }
 0x818   :  { %v1118_v33 = vpop.f32.mrf.mxu1 }
 0x819   :  { %v1123_v34 = vadd.f32 %v1118_v33, %v782_v32  ;;  %v2946_v32 = vld [vmem:[%s3795_s5 + $0xcc] sm:$0xf]  ;;  %v2729_v33 = vld [vmem:[%s3795_s5 + $0xd8] sm:$0xf0] }
 0x820   :  { %v1120_v35 = vpop.f32.mrf.mxu1 }
 0x821   :  { %v1124_v37 = vadd.f32 %v1120_v35, %v784_v15  ;;  %v2703_v15 = vld [vmem:[%s3795_s5 + $0xa0] sm:$0xf]  ;;  %v2943_v35 = vld [vmem:[%s3795_s5 + $0xac] sm:$0xf0] }
 0x828   :  { %v1379_v39 = vpop.f32.mrf.mxu1 }
 0x829   :  { %v1384_v43 = vsel %vm3230_vm10, %v1379_v39, -1e+09  ;;  %v2704_v39 = vor.u32 %v2943_v35, %v2703_v15  ;;  %v2923_v15 = vld [vmem:[%s3795_s5 + $0xc] sm:$0xf0]  ;;  %v2921_v35 = vld [vmem:[%s3795_s5 + $0x4] sm:$0xf] }
 0x82a   :  { %v1386_v44 = vsel %vm373_vm11, %v1384_v43, -inf }
 0x82b   :  { %1387 = vmax.xlane.f32.xlu2 %v1386_v44  ;;  %v2711_v44 = vld [vmem:[%s3795_s5 + $0xa8] sm:$0xf] }
 0x830   :  { %v1381_v45 = vpop.f32.mrf.mxu1 }
 0x831   :  { %v1385_v46 = vsel %vm3237_vm0, %v1381_v45, -1e+09  ;;  %v2944_v45 = vld [vmem:[%s3795_s5 + $0xb4] sm:$0xf0] }
 0x832   :  { %v1389_v17 = vsel %vm373_vm11, %v1385_v46, -inf }
 0x833   :  { %1390 = vmax.xlane.f32.xlu0 %v1389_v17  ;;  %v2712_v17 = vor.u32 %v2944_v45, %v2711_v44  ;;  %v2631_v44 = vld [vmem:[%s3795_s5 + $0x8] sm:$0xf]  ;;  %v2924_v45 = vld [vmem:[%s3795_s5 + $0x14] sm:$0xf0] }
 0x835   :  { %1727 = vmatpush.bf16.msrb.mxu1 %v2712_v17 }
 0x89e   :  { %v1388_v38 = vpop.xlane.xlu2 %1387 }
 0x89f   :  { %v1392_v47 = vsub.f32 %v1384_v43, %v1388_v38  ;;  %v2705_v43 = vld [vmem:[%s3795_s5 + $0xb0] sm:$0xf0]  ;;  %v2942_v38 = vld [vmem:[%s3795_s5 + $0xac] sm:$0xf] }
 0x8a1   :  { %v1394_v48 = vmul.f32 1.442695, %v1392_v47  ;;  %v2713_v47 = vld [vmem:[%s3795_s5 + $0xb8] sm:$0xf0] }
 0x8a3   :  { %3011 = vpow2.f32 %v1394_v48  ;;  %v2716_v48 = vor.u32 %v2942_v38, %v2713_v47  ;;  %v2632_v38 = vor.u32 %v2924_v45, %v2631_v44  ;;  %v2922_v47 = vld [vmem:[%s3795_s5 + $0xc] sm:$0xf] }
 0x8a6   :  { %v1391_v22 = vpop.xlane.xlu0 %1390 }
 0x8a7   :  { %v1393_v41 = vsub.f32 %v1385_v46, %v1391_v22  ;;  %v2687_v22 = vld [vmem:[%s3795_s5 + $0x80] sm:$0xf] }
 0x8a9   :  { %v3012_v49 = vpop.eup %3011  ;;  %v1396_v50 = vmul.f32 1.442695, %v1393_v41  ;;  %v2939_v41 = vld [vmem:[%s3795_s5 + $0x8c] sm:$0xf0] }
 0x8aa   :  { %v1398_v36 = vsel %vm373_vm11, %v3012_v49, 0.0 }
 0x8ab   :  { %3013 = vpow2.f32 %v1396_v50  ;;  %1399 = vadd.xlane.f32.xlu1 %v1398_v36  ;;  %v2688_v50 = vor.u32 %v2939_v41, %v2687_v22  ;;  %v2689_v36 = vld [vmem:[%s3795_s5 + $0x90] sm:$0xf0] }
 0x8b1   :  { %v3014_v51 = vpop.eup %3013 }
 0x8b2   :  { %v1401_v52 = vsel %vm373_vm11, %v3014_v51, 0.0 }
 0x8b3   :  { %1402 = vadd.xlane.f32.xlu2 %v1401_v52  ;;  %v2940_v52 = vld [vmem:[%s3795_s5 + $0x94] sm:$0xf0] }
 0x91e   :  { %v1400_v42 = vpop.xlane.xlu1 %1399 }
 0x91f   :  { %3015 = vrcp.f32 %v1400_v42 }
 0x925   :  { %v3016_v54 = vpop.eup %3015 }
 0x926   :  { %v1403_v53 = vpop.xlane.xlu2 %1402  ;;  %v1406_v56 = vmul.f32 %v3016_v54, %v3012_v49  ;;  %v2937_v49 = vld [vmem:[%s3795_s5 + $0x84] sm:$0xf]  ;;  %v2938_v54 = vld [vmem:[%s3795_s5 + $0x8c] sm:$0xf] }
 0x927   :  { %3017 = vrcp.f32 %v1403_v53  ;;  %v2692_v42 = vor.u32 %v2937_v49, %v2689_v36 }
 0x92d   :  { %v3018_v55 = vpop.eup %3017 }
 0x92e   :  { %v1407_v57 = vmul.f32 %v3018_v55, %v3014_v51  ;;  %v2695_v51 = vld [vmem:[%s3795_s5 + $0x88] sm:$0xf]  ;;  %v2697_v55 = vld [vmem:[%s3795_s5 + $0x98] sm:$0xf0] }
 0x92f   :  { %v2696_v53 = vor.u32 %v2940_v52, %v2695_v51 }
 0x930   :  { %v1408_v58 = vpack.c.bf16 %v1407_v57, %v1406_v56  ;;  %v2700_v56 = vor.u32 %v2938_v54, %v2697_v55  ;;  %v2671_v57 = vld [vmem:[%s3795_s5 + $0x60] sm:$0xf] }
 0x931   :  { %1728 = vmatpush.bf16.msrb.mxu1 %v2696_v53 }
 0x932   :  { %2607 = vmatmul.msk.bf16.vlgmr.msra.gmra.mxu1 %vm373_vm11, %v1408_v58  ;;  %v2935_v58 = vld [vmem:[%s3795_s5 + $0x6c] sm:$0xf0] }
 0x933   :  { %v2672_v60 = vor.u32 %v2935_v58, %v2671_v57 }
 0x9af   :  { %v1422_v61 = vpop.f32.mrf.mxu1 }
 0x9b7   :  { %v1424_v62 = vpop.f32.mrf.mxu1 }
 0x9b8   :  { %v1427_v63 = vpack.c.bf16 %v1424_v62, %v1422_v61  ;;  %v2673_v61 = vld [vmem:[%s3795_s5 + $0x70] sm:$0xf0]  ;;  %v2679_v62 = vld [vmem:[%s3795_s5 + $0x68] sm:$0xf] }
 0x9ba   :  { %2620 = vmatmul.msk.bf16.vlgmr.msra.gmra.mxu2 %vm350_vm7, %v1427_v63  ;;  %v2936_v63 = vld [vmem:[%s3795_s5 + $0x74] sm:$0xf0] }
 0xa3d   :  { %v1457_v0 = vpop.f32.mrf.mxu2 }
 0xa3e   :  { %v1462_v1 = vadd.f32 %v1457_v0, %v1123_v34  ;;  %v2732_v34 = vor.u32 %v2946_v32, %v2729_v33  ;;  %v2676_v0 = vor.u32 %v2933_v59, %v2673_v61  ;;  %v2649_v32 = vld [vmem:[%s3795_s5 + $0x38] sm:$0xf0] }
 0xa3f   :  { %v2652_v33 = vor.u32 %v2926_v31, %v2649_v32  ;;  %v2954_v32 = vld [vmem:[%s3796_s6 + $0x8] sm:$0xff] }
 0xa40   :  { %v3495_v2 = vadd.f32 %v3089_v3, %v1462_v1  ;;  %v2951_v3 = vld [vmem:[%s3795_s5 + $0xec] sm:$0xf0]  ;;  %1740 = vmatpush.bf16.msrb.mxu2 %v2732_v34  ;;  %v2680_v1 = vor.u32 %v2936_v63, %v2679_v62  ;;  %v2623_v34 = vld [vmem:[%s3795_s5] sm:$0xf] }
 0xa41   :  { %v2736_v12 = vor.u32 %v2951_v3, %v2735_v10  ;;  %v2931_v10 = vld [vmem:[%s3795_s5 + $0x4c] sm:$0xf0]  ;;  %v2929_v3 = vld [vmem:[%s3795_s5 + $0x44] sm:$0xf]  ;;  %v2980_v63 = vld [vmem:[%s3794_s4] ss:$0 sm:$0xff] }
 0xa42   :  { %v1467_v4 = vmul.f32 %v3495_v2, %v3495_v2  ;;  %1729 = vmatpush.bf16.msrb.mxu1 %v2680_v1 }
 0xa43   :  { %1697 = vmatpush.bf16.msrb.mxu3 %v2736_v12  ;;  %v2657_v12 = vld [vmem:[%s3795_s5 + $0x50] sm:$0xf0] }
 0xa44   :  { %1469 = vadd.xlane.f32.xlu0 %v1467_v4  ;;  %1741 = vmatpush.bf16.msrb.mxu2 %v2716_v48  ;;  %v2934_v4 = vld [vmem:[%s3795_s5 + $0x6c] sm:$0xf]  ;;  %v2660_v14 = vor.u32 %v2929_v3, %v2657_v12  ;;  %v2633_v48 = vld [vmem:[%s3795_s5 + $0x18] sm:$0xf0]  ;;  %v2959_v12 = vld [vmem:[%s3796_s6 + $0x30] sm:$0xff] }
 0xa45   :  { %v1459_v5 = vpop.f32.mrf.mxu2  ;;  %v2636_v22 = vor.u32 %v2922_v47, %v2633_v48  ;;  %v2960_v3 = vld [vmem:[%s3796_s6 + $0x38] sm:$0xff] }
 0xa46   :  { %v1463_v6 = vadd.f32 %v1459_v5, %v1124_v37  ;;  %v2941_v37 = vld [vmem:[%s3795_s5 + $0xa4] sm:$0xf]  ;;  %v2681_v5 = vld [vmem:[%s3795_s5 + $0x78] sm:$0xf0] }
 0xa47   :  { %1698 = vmatpush.bf16.msrb.mxu3 %v2720_v26  ;;  %v2708_v46 = vor.u32 %v2941_v37, %v2705_v43  ;;  %v2641_v26 = vld [vmem:[%s3795_s5 + $0x30] sm:$0xf0] }
 0xa48   :  { %v3500_v8 = vadd.f32 %v3099_v7, %v1463_v6  ;;  %v2737_v7 = vld [vmem:[%s3795_s5 + $0xf0] sm:$0xf0]  ;;  %1742 = vmatpush.bf16.msrb.mxu2 %v2700_v56  ;;  %v2684_v6 = vor.u32 %v2934_v4, %v2681_v5  ;;  %v2644_v29 = vor.u32 %v2925_v24, %v2641_v26 }
 0xa49   :  { %v2740_v16 = vor.u32 %v2949_v11, %v2737_v7  ;;  %v2663_v7 = vld [vmem:[%s3795_s5 + $0x48] sm:$0xf]  ;;  %v2625_v43 = vld [vmem:[%s3795_s5 + $0x10] sm:$0xf0] }
 0xa4a   :  { %v1468_v9 = vmul.f32 %v3500_v8, %v3500_v8  ;;  %v2628_v17 = vor.u32 %v2921_v35, %v2625_v43 }
 0xa4b   :  { %1711 = vmatpush.bf16.msrb.mxu0 %v2740_v16  ;;  %1699 = vmatpush.bf16.msrb.mxu3 %v2704_v39  ;;  %v2664_v16 = vor.u32 %v2932_v13, %v2663_v7  ;;  %v2624_v39 = vor.u32 %v2923_v15, %v2623_v34  ;;  %v2965_v7 = vld [vmem:[%s3796_s6 + $0x60] sm:$0xff]  ;;  %v2958_v13 = vld [vmem:[%s3796_s6 + $0x28] sm:$0xff] }
 0xa4c   :  { %1471 = vadd.xlane.f32.xlu1 %v1468_v9  ;;  %v2655_v9 = vld [vmem:[%s3795_s5 + $0x40] sm:$0xf]  ;;  %1743 = vmatpush.bf16.msrb.mxu2 %v2684_v6 }
 0xa4d   :  { %v2656_v11 = vor.u32 %v2931_v10, %v2655_v9  ;;  %1730 = vmatpush.bf16.msrb.mxu1 %v2664_v16  ;;  %v2968_v9 = vld [vmem:[%s3796_s6 + $0x78] sm:$0xff]  ;;  %v2967_v10 = vld [vmem:[%s3796_s6 + $0x70] sm:$0xff]  ;;  %v2957_v16 = vld [vmem:[%s3796_s6 + $0x20] sm:$0xff] }
 0xa4e   :  { %v2953_v34 = vld [vmem:[%s3796_s6] sm:$0xff] }
 0xa4f   :  { %1712 = vmatpush.bf16.msrb.mxu0 %v2724_v30  ;;  %1700 = vmatpush.bf16.msrb.mxu3 %v2688_v50  ;;  %v2648_v30 = vor.u32 %v2928_v28, %v2647_v27  ;;  %v2961_v28 = vld [vmem:[%s3796_s6 + $0x40] sm:$0xff] }
 0xa50   :  { %1744 = vmatpush.bf16.msrb.mxu2 %v2668_v20 }
 0xa51   :  { %1731 = vmatpush.bf16.msrb.mxu1 %v2648_v30 }
 0xa53   :  { %1713 = vmatpush.bf16.msrb.mxu0 %v2708_v46  ;;  %1701 = vmatpush.bf16.msrb.mxu3 %v2672_v60 }
 0xa54   :  { %1745 = vmatpush.bf16.msrb.mxu2 %v2652_v33 }
 0xa55   :  { %1732 = vmatpush.bf16.msrb.mxu1 %v2632_v38 }
 0xa57   :  { %1714 = vmatpush.bf16.msrb.mxu0 %v2692_v42  ;;  %1702 = vmatpush.bf16.msrb.mxu3 %v2656_v11  ;;  %v2966_v11 = vld [vmem:[%s3796_s6 + $0x68] sm:$0xff] }
 0xa58   :  { %1746 = vmatpush.bf16.msrb.mxu2 %v2636_v22 }
 0xa5b   :  { %1715 = vmatpush.bf16.msrb.mxu0 %v2676_v0  ;;  %1703 = vmatpush.bf16.msrb.mxu3 %v2640_v25  ;;  %v2955_v25 = vld [vmem:[%s3796_s6 + $0x10] sm:$0xff] }
 0xa5f   :  { %1716 = vmatpush.bf16.msrb.mxu0 %v2660_v14  ;;  %1704 = vmatpush.bf16.msrb.mxu3 %v2624_v39  ;;  %v2964_v14 = vld [vmem:[%s3796_s6 + $0x58] sm:$0xff] }
 0xa63   :  { %1717 = vmatpush.bf16.msrb.mxu0 %v2644_v29  ;;  %1967 = vmatpush.bf16.msra.mxu3 %v2960_v3 }
 0xa67   :  { %1718 = vmatpush.bf16.msrb.mxu0 %v2628_v17  ;;  %1968 = vmatpush.bf16.msra.mxu3 %v2959_v12 }
 0xa6b   :  { %1981 = vmatpush.bf16.msra.mxu0 %v2968_v9  ;;  %1969 = vmatpush.bf16.msra.mxu3 %v2958_v13 }
 0xa6f   :  { %1982 = vmatpush.bf16.msra.mxu0 %v2967_v10  ;;  %1970 = vmatpush.bf16.msra.mxu3 %v2957_v16 }
 0xa73   :  { %1983 = vmatpush.bf16.msra.mxu0 %v2966_v11  ;;  %1971 = vmatpush.bf16.msra.mxu3 %v2956_v21 }
 0xa77   :  { %1984 = vmatpush.bf16.msra.mxu0 %v2965_v7  ;;  %1972 = vmatpush.bf16.msra.mxu3 %v2955_v25 }
 0xa7b   :  { %1985 = vmatpush.bf16.msra.mxu0 %v2964_v14  ;;  %1973 = vmatpush.bf16.msra.mxu3 %v2954_v32 }
 0xa7f   :  { %1986 = vmatpush.bf16.msra.mxu0 %v2963_v19  ;;  %1974 = vmatpush.bf16.msra.mxu3 %v2953_v34 }
 0xa83   :  { %1987 = vmatpush.bf16.msra.mxu0 %v2962_v23 }
 0xa87   :  { %1988 = vmatpush.bf16.msra.mxu0 %v2961_v28 }
 0xab7   :  { %v1470_v37 = vpop.xlane.xlu0 %1469 }
 0xab8   :  { %v1473_v46 = vmul.f32 %v1470_v37, %v3178_v40 }
 0xaba   :  { %v1475_v41 = vadd.f32 1e-06, %v1473_v46 }
 0xabc   :  { %3019 = vrsqrt.f32 %v1475_v41  ;;  %vm1483_vm2 = vweird.f32 %v1475_v41 }
 0xabf   :  { %v1472_v49 = vpop.xlane.xlu1 %1471 }
 0xac0   :  { %v1474_v50 = vmul.f32 %v1472_v49, %v3178_v40 }
 0xac2   :  { %v3020_v36 = vpop.eup %3019  ;;  %v1476_v51 = vadd.f32 1e-06, %v1474_v50 }
 0xac3   :  { %v1478_v52 = vmul.f32 %v3020_v36, %v1475_v41  ;;  %vm1484_vm1 = vweird.f32 %v3020_v36 }
 0xac4   :  { %3021 = vrsqrt.f32 %v1476_v51  ;;  %vm1485_vm3 = vmor %vm1483_vm2, %vm1484_vm1  ;;  %vm1493_vm5 = vweird.f32 %v1476_v51 }
 0xac5   :  { %v1479_v42 = vmul.f32 %v3020_v36, %v1478_v52 }
 0xac7   :  { %v1480_v53 = vmul.f32 0.5, %v1479_v42 }
 0xac9   :  { %v1481_v54 = vsub.f32 1.5, %v1480_v53 }
 0xaca   :  { %v3022_v55 = vpop.eup %3021 }
 0xacb   :  { %v1488_v56 = vmul.f32 %v3022_v55, %v1476_v51  ;;  %v1482_v57 = vmul.f32 %v3020_v36, %v1481_v54  ;;  %vm1494_vm4 = vweird.f32 %v3022_v55 }
 0xacc   :  { %vm1495_vm6 = vmor %vm1493_vm5, %vm1494_vm4 }
 0xacd   :  { %v1489_v58 = vmul.f32 %v3022_v55, %v1488_v56  ;;  %v1486_v60 = vsel %vm1485_vm3, %v3020_v36, %v1482_v57 }
 0xace   :  { %v1497_v40 = vmul.f32 %v1486_v60, %v3495_v2 }
 0xacf   :  { %v1490_v59 = vmul.f32 0.5, %v1489_v58 }
 0xad0   :  { %v1502_v4 = vmul.f32 %v2980_v63, %v1497_v40 }
 0xad1   :  { %v1491_v61 = vsub.f32 1.5, %v1490_v59 }
 0xad3   :  { %v1492_v62 = vmul.f32 %v3022_v55, %v1491_v61 }
 0xad5   :  { %v1496_v0 = vsel %vm1495_vm6, %v3022_v55, %v1492_v62 }
 0xad6   :  { %v1498_v1 = vmul.f32 %v1496_v0, %v3500_v8 }
 0xad8   :  { %v1503_v5 = vmul.f32 %v2980_v63, %v1498_v1 }
 0xada   :  { %v1504_v6 = vpack.c.bf16 %v1503_v5, %v1502_v4 }
 0xadc   :  { %1705 = vmatmul.bf16.vlgmr.msrb.gmra.mxu3 %v1504_v6  ;;  %1719 = vmatmul.bf16.vlgmr.msrb.gmra.mxu0 %v1504_v6 }
 0xadd   :  { %1733 = vmatmul.bf16.vlgmr.msrb.gmra.mxu1 %v1504_v6  ;;  %1747 = vmatmul.bf16.vlgmr.msrb.gmra.mxu2 %v1504_v6 }
 0xb59   :  { %v3730_v18 = vpop.f32.mrf.mxu0 }
 0xb5a   :  { %v2750_v20 = vmul.f32 -1.442695, %v3730_v18  ;;  %v1734_v4 = vpop.f32.mrf.mxu1 }
 0xb5c   :  { %3023 = vpow2.f32 %v2750_v20 }
 0xb5f   :  { %v3742_v24 = vpop.f32.mrf.mxu3 }
 0xb60   :  { %v2749_v26 = vmul.f32 -1.442695, %v3742_v24  ;;  %v1748_v54 = vpop.f32.mrf.mxu2 }
 0xb61   :  { %v3748_v27 = vpop.f32.mrf.mxu0 }
 0xb62   :  { %v3024_v29 = vpop.eup %3023  ;;  %3025 = vpow2.f32 %v2749_v26  ;;  %v2752_v30 = vmul.f32 -1.442695, %v3748_v27 }
 0xb63   :  { %v1766_v31 = vadd.f32 1.0, %v3024_v29 }
 0xb64   :  { %3027 = vpow2.f32 %v2752_v30 }
 0xb65   :  { %3029 = vrcp.f32 %v1766_v31  ;;  %v1795_v49 = vand.u32 2147483648, %v1766_v31  ;;  %vm1789_vm8 = vweird.f32 %v1766_v31  ;;  %v1793_v51 = vand.u32 2147483647, %v1766_v31 }
 0xb67   :  { %v3757_v33 = vpop.f32.mrf.mxu3  ;;  %v1796_v56 = vor.u32 1.1754944e-38, %v1795_v49  ;;  %vm1794_vm11 = vcmp.eq.f32.partialorder %v1793_v51, 8.507059e+37 }
 0xb68   :  { %v3026_v15 = vpop.eup %3025  ;;  %v2751_v35 = vmul.f32 -1.442695, %v3757_v33  ;;  %v1750_v26 = vpop.f32.mrf.mxu2 }
 0xb69   :  { %v1765_v37 = vadd.f32 1.0, %v3026_v15 }
 0xb6a   :  { %v3028_v39 = vpop.eup %3027  ;;  %3031 = vpow2.f32 %v2751_v35  ;;  %v1736_v35 = vpop.f32.mrf.mxu1 }
 0xb6b   :  { %v3030_v43 = vpop.eup %3029  ;;  %3033 = vrcp.f32 %v1765_v37  ;;  %v1768_v45 = vadd.f32 1.0, %v3028_v39  ;;  %v1778_v57 = vand.u32 2147483647, %v1765_v37  ;;  %v1780_v60 = vand.u32 2147483648, %v1765_v37 }
 0xb6c   :  { %v1785_v44 = vmul.f32 %v3030_v43, %v1766_v31  ;;  %vm1790_vm7 = vweird.f32 %v3030_v43  ;;  %vm1774_vm13 = vweird.f32 %v1765_v37 }
 0xb6d   :  { %3035 = vrcp.f32 %v1768_v45  ;;  %vm3763_vm9 = vmor %vm1789_vm8, %vm1790_vm7  ;;  %v1825_v61 = vand.u32 2147483648, %v1768_v45  ;;  %v1823_v63 = vand.u32 2147483647, %v1768_v45  ;;  %vm3773_vm15 = vcmp.eq.f32.partialorder %v1778_v57, 8.507059e+37 }
 0xb6e   :  { %v1786_v46 = vsub.f32 1.0, %v1785_v44  ;;  %vm1819_vm0 = vweird.f32 %v1768_v45  ;;  %v1781_v3 = vor.u32 1.1754944e-38, %v1780_v60 }
 0xb6f   :  { %v1826_v11 = vor.u32 1.1754944e-38, %v1825_v61  ;;  %vm1824_vm2 = vcmp.eq.f32.partialorder %v1823_v63, 8.507059e+37 }
 0xb70   :  { %v3032_v17 = vpop.eup %3031  ;;  %v1787_v38 = vmul.f32 %v3030_v43, %v1786_v46 }
 0xb71   :  { %v3034_v47 = vpop.eup %3033  ;;  %v1767_v48 = vadd.f32 1.0, %v3032_v17 }
 0xb72   :  { %v1770_v22 = vmul.f32 %v3034_v47, %v1765_v37  ;;  %v1788_v41 = vadd.f32 %v3030_v43, %v1787_v38  ;;  %vm1775_vm10 = vweird.f32 %v3034_v47 }
 0xb73   :  { %3037 = vrcp.f32 %v1767_v48  ;;  %v3036_v50 = vpop.eup %3035  ;;  %vm3769_vm14 = vmor %vm1774_vm13, %vm1775_vm10  ;;  %v1810_v14 = vand.u32 2147483648, %v1767_v48  ;;  %v1808_v20 = vand.u32 2147483647, %v1767_v48  ;;  %vm1804_vm4 = vweird.f32 %v1767_v48 }
 0xb74   :  { %v1771_v36 = vsub.f32 1.0, %v1770_v22  ;;  %v1815_v52 = vmul.f32 %v3036_v50, %v1768_v45  ;;  %v1792_v55 = vsel %vm3763_vm9, %v3030_v43, %v1788_v41  ;;  %vm1820_vm12 = vweird.f32 %v3036_v50 }
 0xb75   :  { %v1797_v0 = vsel %vm1794_vm11, %v1796_v56, %v1792_v55  ;;  %vm1821_vm1 = vmor %vm1819_vm0, %vm1820_vm12  ;;  %v1811_v29 = vor.u32 1.1754944e-38, %v1810_v14  ;;  %vm1809_vm6 = vcmp.eq.f32.partialorder %v1808_v20, 8.507059e+37 }
 0xb76   :  { %v1772_v53 = vmul.f32 %v3034_v47, %v1771_v36  ;;  %v1816_v58 = vsub.f32 1.0, %v1815_v52  ;;  %v1830_v7 = vmul.f32 %v1797_v0, %v3730_v18 }
 0xb78   :  { %v1773_v59 = vadd.f32 %v3034_v47, %v1772_v53  ;;  %v1817_v40 = vmul.f32 %v3036_v50, %v1816_v58  ;;  %v1834_v28 = vmul.f32 %v1830_v7, %v1748_v54 }
 0xb79   :  { %v3038_v62 = vpop.eup %3037 }
 0xb7a   :  { %v1800_v1 = vmul.f32 %v3038_v62, %v1767_v48  ;;  %v1818_v9 = vadd.f32 %v3036_v50, %v1817_v40  ;;  %v1777_v10 = vsel %vm3769_vm14, %v3034_v47, %v1773_v59  ;;  %vm1805_vm3 = vweird.f32 %v3038_v62 }
 0xb7b   :  { %v1782_v21 = vsel %vm3773_vm15, %v1781_v3, %v1777_v10  ;;  %vm1806_vm5 = vmor %vm1804_vm4, %vm1805_vm3 }
 0xb7c   :  { %v1801_v12 = vsub.f32 1.0, %v1800_v1  ;;  %v1822_v13 = vsel %vm1821_vm1, %v3036_v50, %v1818_v9  ;;  %v1829_v18 = vmul.f32 %v1782_v21, %v3742_v24 }
 0xb7d   :  { %v1827_v16 = vsel %vm1824_vm2, %v1826_v11, %v1822_v13 }
 0xb7e   :  { %v1802_v19 = vmul.f32 %v3038_v62, %v1801_v12  ;;  %v1832_v23 = vmul.f32 %v1827_v16, %v3748_v27  ;;  %v1833_v37 = vmul.f32 %v1829_v18, %v1734_v4 }
 0xb80   :  { %v1803_v25 = vadd.f32 %v3038_v62, %v1802_v19  ;;  %v1836_v30 = vmul.f32 %v1832_v23, %v1750_v26 }
 0xb82   :  { %v1807_v31 = vsel %vm1806_vm5, %v3038_v62, %v1803_v25  ;;  %v1838_v34 = vpack.c.bf16 %v1836_v30, %v1834_v28 }
 0xb83   :  { %v1812_v32 = vsel %vm1809_vm6, %v1811_v29, %v1807_v31 }
 0xb84   :  { %v1831_v15 = vmul.f32 %v1812_v32, %v3757_v33  ;;  %1989 = vmatmul.bf16.vlgmr.msra.gmra.mxu0 %v1838_v34 }
 0xb86   :  { %v1835_v39 = vmul.f32 %v1831_v15, %v1736_v35 }
 0xb88   :  { %v1837_v27 = vpack.c.bf16 %v1835_v39, %v1833_v37 }
 0xb8a   :  { %1975 = vmatmul.bf16.vlgmr.msra.gmra.mxu3 %v1837_v27 }
 0xc01   :  { %v1990_v43 = vpop.f32.mrf.mxu0 }
 0xc09   :  { %v1992_v46 = vpop.f32.mrf.mxu0 }
 0xc0d   :  { %v1976_v44 = vpop.f32.mrf.mxu3 }
 0xc0e   :  { %v1991_v45 = vadd.f32 %v1990_v43, %v1976_v44 }
 0xc10   :  { %v1995_v24 = vadd.f32 %v1991_v45, %v3495_v2 }
 0xc15   :  { %v1978_v17 = vpop.f32.mrf.mxu3 }
 0xc16   :  { %v1993_v38 = vadd.f32 %v1992_v46, %v1978_v17 }
 0xc18   :  { %v1996_v47 = vadd.f32 %v1993_v38, %v3500_v8 }
 0xc1a   :  { %v2976_v48 = vpack.c.bf16 %v1996_v47, %v1995_v24 }
 0xc1c   :  { %2977 = vst [vmem:[%s3797_s7] sm:$0xff] %v2976_v48  }

</bundles_post_ra>
